<compile_context>
chip_gen: v5e
topology: v5e:2x2
jax: 0.10.0
libtpu: 0.0.40
codegen_flags: <defaults>
</compile_context>

<pallas_src>
import functools

import jax
import jax.numpy as jnp
from jax.experimental import pallas as pl
from jax.experimental.pallas import tpu as pltpu


def _layernorm(x, gamma, beta, eps):
    mu = jnp.mean(x, axis=-1, keepdims=True)
    var = jnp.mean((x - mu) ** 2, axis=-1, keepdims=True)
    return (x - mu) * jax.lax.rsqrt(var + eps) * gamma + beta


def _make_kernel(num_layers, num_heads, eps=1e-5):
    def kernel(x_ref, wqkv_ref, wo_ref, w1_ref, w2_ref, b_ref,
               fcw_ref, fcb_ref, out_ref):
        L, B, H = x_ref.shape
        d = H // num_heads
        G = L * num_heads                      # merged (position, head) batch dim

        x = x_ref[...].astype(jnp.float32).reshape(L * B, H)   # (L*B, H)

        def split_heads(t):                    # (L*B, H) -> (L*heads, B, d)
            return (t.reshape(L, B, num_heads, d)
                     .transpose(0, 2, 1, 3)
                     .reshape(G, B, d))

        for li in range(num_layers):           # static unroll over layers
            wqkv = wqkv_ref[li]                # (H, 3H)  bf16
            wo = wo_ref[li]                    # (H, H)   bf16
            w1 = w1_ref[li]                    # (H, FF)  bf16
            w2 = w2_ref[li]                    # (FF, H)  bf16
            b = b_ref[li]                      # (10, H)  f32 biases + LN params

            # --- multi-head self-attention (over the batch axis, per PyTorch semantics) ---
            qkv = jnp.dot(x.astype(jnp.bfloat16), wqkv,
                          preferred_element_type=jnp.float32)          # (L*B, 3H)
            q = split_heads(qkv[:, 0:H] + b[0])        # q scale already folded in
            k = split_heads(qkv[:, H:2 * H] + b[1])
            v = split_heads(qkv[:, 2 * H:3 * H] + b[2])

            s = jnp.einsum('gqd,gkd->gqk',
                           q.astype(jnp.bfloat16), k.astype(jnp.bfloat16),
                           preferred_element_type=jnp.float32)          # (G, B, B)
            s = s - jnp.max(s, axis=-1, keepdims=True)
            p = jnp.exp(s)
            p = p * pl.reciprocal(jnp.sum(p, axis=-1, keepdims=True), approx=True)
            ctx = jnp.einsum('gqk,gkd->gqd',
                             p.astype(jnp.bfloat16), v.astype(jnp.bfloat16),
                             preferred_element_type=jnp.float32)        # (G, B, d)
            ctx = (ctx.reshape(L, num_heads, B, d)
                      .transpose(0, 2, 1, 3)
                      .reshape(L * B, H))
            attn = jnp.dot(ctx.astype(jnp.bfloat16), wo,
                           preferred_element_type=jnp.float32) + b[3]

            # post-norm encoder layer (norm_first=False default)
            x = _layernorm(x + attn, b[6], b[7], eps)

            # --- feed-forward (dim_feedforward == hidden_size, ReLU) ---
            ff = jnp.maximum(
                jnp.dot(x.astype(jnp.bfloat16), w1,
                        preferred_element_type=jnp.float32) + b[4], 0.0)
            ff = jnp.dot(ff.astype(jnp.bfloat16), w2,
                         preferred_element_type=jnp.float32) + b[5]
            x = _layernorm(x + ff, b[8], b[9], eps)

        # mean over the seq axis (torch dim=1), then fc
        pooled = jnp.mean(x.reshape(L, B, H), axis=0)                   # (B, H)
        out_ref[...] = (jnp.dot(pooled.astype(jnp.bfloat16), fcw_ref[...],
                                preferred_element_type=jnp.float32)
                        + fcb_ref[...]).astype(out_ref.dtype)

    return kernel


def init_params(key, *, input_size, output_size, max_len, num_layers,
                num_heads, hidden_size):
    del num_heads  # only affects forward, not parameter shapes
    keys = jax.random.split(key, 4 + num_layers * 8)

    def rnd(k, shape, scale=0.05):
        return scale * jax.random.normal(k, shape, dtype=jnp.float32)

    params = {
        'token_emb': rnd(keys[0], (input_size, hidden_size), 0.1),
        'pos_emb': rnd(keys[1], (max_len, hidden_size), 0.1),
        'fc_w': rnd(keys[2], (output_size, hidden_size)),
        'fc_b': rnd(keys[3], (output_size,)),
        'layers': [],
    }
    kidx = 4
    ff = hidden_size  # dim_feedforward == hidden_size in the module
    for _ in range(num_layers):
        lk = keys[kidx:kidx + 8]
        kidx += 8
        params['layers'].append({
            'in_proj_w': rnd(lk[0], (3 * hidden_size, hidden_size)),
            'in_proj_b': rnd(lk[1], (3 * hidden_size,)),
            'out_proj_w': rnd(lk[2], (hidden_size, hidden_size)),
            'out_proj_b': rnd(lk[3], (hidden_size,)),
            'lin1_w': rnd(lk[4], (ff, hidden_size)),
            'lin1_b': rnd(lk[5], (ff,)),
            'lin2_w': rnd(lk[6], (hidden_size, ff)),
            'lin2_b': rnd(lk[7], (hidden_size,)),
            'norm1_w': jnp.ones((hidden_size,), jnp.float32),
            'norm1_b': jnp.zeros((hidden_size,), jnp.float32),
            'norm2_w': jnp.ones((hidden_size,), jnp.float32),
            'norm2_b': jnp.zeros((hidden_size,), jnp.float32),
        })
    return params


@functools.partial(jax.jit, static_argnames=('num_layers', 'num_heads'))
def transformer_forward(params, sequence, *, num_layers, num_heads):
    B, L = sequence.shape
    H = params['token_emb'].shape[1]
    O = params['fc_w'].shape[0]
    d = H // num_heads
    scale = 1.0 / (float(d) ** 0.5)

    # Embedding lookups + positional add (glue, plain JAX).
    tok = jnp.take(params['token_emb'], sequence, axis=0)        # (B, L, H)
    pos = params['pos_emb'][:L][None, :, :]                      # (1, L, H)
    x = jnp.transpose(tok + pos, (1, 0, 2)).astype(jnp.float32)  # (L, B, H)

    # Pack parameters: stacked, pre-transposed, Q-scale folded, bf16 MXU operands.
    wqkv_l, wo_l, w1_l, w2_l, b_l = [], [], [], [], []
    for lp in params['layers']:
        inw = lp['in_proj_w']                                    # (3H, H) rows: q,k,v
        inb = lp['in_proj_b']                                    # (3H,)
        inw = jnp.concatenate([inw[:H] * scale, inw[H:]], axis=0)
        inb = jnp.concatenate([inb[:H] * scale, inb[H:]], axis=0)
        wqkv_l.append(inw.T)                                     # (H, 3H)
        wo_l.append(lp['out_proj_w'].T)                          # (H, H)
        w1_l.append(lp['lin1_w'].T)                              # (H, FF)
        w2_l.append(lp['lin2_w'].T)                              # (FF, H)
        b_l.append(jnp.stack([
            inb[0:H], inb[H:2 * H], inb[2 * H:3 * H],            # bq (scaled), bk, bv
            lp['out_proj_b'], lp['lin1_b'], lp['lin2_b'],
            lp['norm1_w'], lp['norm1_b'], lp['norm2_w'], lp['norm2_b'],
        ], axis=0))                                              # (10, H)

    wqkv_all = jnp.stack(wqkv_l).astype(jnp.bfloat16)            # (NL, H, 3H)
    wo_all = jnp.stack(wo_l).astype(jnp.bfloat16)                # (NL, H, H)
    w1_all = jnp.stack(w1_l).astype(jnp.bfloat16)                # (NL, H, FF)
    w2_all = jnp.stack(w2_l).astype(jnp.bfloat16)                # (NL, FF, H)
    b_all = jnp.stack(b_l).astype(jnp.float32)                   # (NL, 10, H)
    fc_w_t = params['fc_w'].T.astype(jnp.bfloat16)               # (H, O)
    fc_b = params['fc_b'][None, :].astype(jnp.float32)           # (1, O)

    inputs = [x, wqkv_all, wo_all, w1_all, w2_all, b_all, fc_w_t, fc_b]
    in_specs = [pl.BlockSpec(a.shape, lambda i, n=a.ndim: (0,) * n) for a in inputs]

    kernel = _make_kernel(num_layers, num_heads)
    return pl.pallas_call(
        kernel,
        out_shape=jax.ShapeDtypeStruct((B, O), jnp.float32),
        grid=(1,),
        in_specs=in_specs,
        out_specs=pl.BlockSpec((B, O), lambda i: (0, 0)),
        compiler_params=pltpu.CompilerParams(
            dimension_semantics=("arbitrary",)),
    )(*inputs)


if __name__ == "__main__":
    INPUT_SIZE = 50     # vocab size
    OUTPUT_SIZE = 10
    MAX_LEN = 16
    NUM_LAYERS = 2
    NUM_HEADS = 4
    HIDDEN = 32
    DROPOUT = 0.0       # inference semantics — dropout is inert
    B, L = 2, 8

    key = jax.random.PRNGKey(0)
    pkey, skey = jax.random.split(key)
    params = init_params(pkey, input_size=INPUT_SIZE, output_size=OUTPUT_SIZE,
                         max_len=MAX_LEN, num_layers=NUM_LAYERS,
                         num_heads=NUM_HEADS, hidden_size=HIDDEN)
    sequence = jax.random.randint(skey, (B, L), 0, INPUT_SIZE, dtype=jnp.int32)

    logits = transformer_forward(params, sequence,
                                 num_layers=NUM_LAYERS, num_heads=NUM_HEADS)
    jax.block_until_ready(logits)
    assert logits.shape == (B, OUTPUT_SIZE)
    assert bool(jnp.all(jnp.isfinite(logits)))
    print("KERNEL_OK")
</pallas_src>

<mosaic_0001>
module attributes {stable_mosaic.version = 11 : i64} {
  func.func @kernel(%arg0: i32, %arg1: memref<8x2x32xf32, #tpu.memory_space<vmem>>, %arg2: memref<2x32x96xbf16, #tpu.memory_space<vmem>>, %arg3: memref<2x32x32xbf16, #tpu.memory_space<vmem>>, %arg4: memref<2x32x32xbf16, #tpu.memory_space<vmem>>, %arg5: memref<2x32x32xbf16, #tpu.memory_space<vmem>>, %arg6: memref<2x10x32xf32, #tpu.memory_space<vmem>>, %arg7: memref<32x10xbf16, #tpu.memory_space<vmem>>, %arg8: memref<1x10xf32, #tpu.memory_space<vmem>>, %arg9: memref<2x10xf32, #tpu.memory_space<vmem>>) attributes {dimension_semantics = [#tpu.dimension_semantics<arbitrary>], iteration_bounds = array<i64: 1>, scalar_prefetch = 0 : i64, scratch_operands = 0 : i64, tpu.core_type = #tpu.core_type<tc>, window_params = [{pipeline_mode = #tpu.pipeline_mode<synchronous>, transform_indices = @transform_0, window_bounds = array<i64: 8, 2, 32>}, {pipeline_mode = #tpu.pipeline_mode<synchronous>, transform_indices = @transform_1, window_bounds = array<i64: 2, 32, 96>}, {pipeline_mode = #tpu.pipeline_mode<synchronous>, transform_indices = @transform_2, window_bounds = array<i64: 2, 32, 32>}, {pipeline_mode = #tpu.pipeline_mode<synchronous>, transform_indices = @transform_3, window_bounds = array<i64: 2, 32, 32>}, {pipeline_mode = #tpu.pipeline_mode<synchronous>, transform_indices = @transform_4, window_bounds = array<i64: 2, 32, 32>}, {pipeline_mode = #tpu.pipeline_mode<synchronous>, transform_indices = @transform_5, window_bounds = array<i64: 2, 10, 32>}, {pipeline_mode = #tpu.pipeline_mode<synchronous>, transform_indices = @transform_6, window_bounds = array<i64: 32, 10>}, {pipeline_mode = #tpu.pipeline_mode<synchronous>, transform_indices = @transform_7, window_bounds = array<i64: 1, 10>}, {pipeline_mode = #tpu.pipeline_mode<synchronous>, transform_indices = @transform_8, window_bounds = array<i64: 2, 10>}]} {
    %c0 = arith.constant 0 : index
    %c0_0 = arith.constant 0 : index
    %c0_1 = arith.constant 0 : index
    %0 = vector.load %arg1[%c0, %c0_0, %c0_1] : memref<8x2x32xf32, #tpu.memory_space<vmem>>, vector<8x2x32xf32>
    %1 = vector.shape_cast %0 : vector<8x2x32xf32> to vector<16x32xf32>
    %c0_2 = arith.constant 0 : index
    %c0_3 = arith.constant 0 : index
    %c0_4 = arith.constant 0 : index
    %2 = vector.load %arg2[%c0_2, %c0_3, %c0_4] : memref<2x32x96xbf16, #tpu.memory_space<vmem>>, vector<1x32x96xbf16>
    %3 = vector.shape_cast %2 : vector<1x32x96xbf16> to vector<32x96xbf16>
    %c0_5 = arith.constant 0 : index
    %c0_6 = arith.constant 0 : index
    %c0_7 = arith.constant 0 : index
    %4 = vector.load %arg3[%c0_5, %c0_6, %c0_7] : memref<2x32x32xbf16, #tpu.memory_space<vmem>>, vector<1x32x32xbf16>
    %5 = vector.shape_cast %4 : vector<1x32x32xbf16> to vector<32x32xbf16>
    %c0_8 = arith.constant 0 : index
    %c0_9 = arith.constant 0 : index
    %c0_10 = arith.constant 0 : index
    %6 = vector.load %arg4[%c0_8, %c0_9, %c0_10] : memref<2x32x32xbf16, #tpu.memory_space<vmem>>, vector<1x32x32xbf16>
    %7 = vector.shape_cast %6 : vector<1x32x32xbf16> to vector<32x32xbf16>
    %c0_11 = arith.constant 0 : index
    %c0_12 = arith.constant 0 : index
    %c0_13 = arith.constant 0 : index
    %8 = vector.load %arg5[%c0_11, %c0_12, %c0_13] : memref<2x32x32xbf16, #tpu.memory_space<vmem>>, vector<1x32x32xbf16>
    %9 = vector.shape_cast %8 : vector<1x32x32xbf16> to vector<32x32xbf16>
    %c0_14 = arith.constant 0 : index
    %c0_15 = arith.constant 0 : index
    %c0_16 = arith.constant 0 : index
    %10 = vector.load %arg6[%c0_14, %c0_15, %c0_16] : memref<2x10x32xf32, #tpu.memory_space<vmem>>, vector<1x10x32xf32>
    %11 = vector.shape_cast %10 : vector<1x10x32xf32> to vector<10x32xf32>
    %12 = arith.truncf %1 : vector<16x32xf32> to vector<16x32xbf16>
    %cst = arith.constant dense<0.000000e+00> : vector<16x96xf32>
    %13 = tpu.matmul %12, %3, %cst {dimension_numbers = #tpu.dot_dimension_numbers<[1], [0], [0], [1], [0, 0, 1, 1], [], []>} : vector<16x32xbf16>, vector<32x96xbf16>, vector<16x96xf32> -> vector<16x96xf32>
    %14 = vector.extract_strided_slice %13 {offsets = [0, 0], sizes = [16, 32], strides = [1, 1]} : vector<16x96xf32> to vector<16x32xf32>
    %15 = vector.extract_strided_slice %11 {offsets = [0, 0], sizes = [1, 32], strides = [1, 1]} : vector<10x32xf32> to vector<1x32xf32>
    %16 = vector.shape_cast %15 : vector<1x32xf32> to vector<32xf32>
    %17 = vector.shape_cast %16 : vector<32xf32> to vector<1x32xf32>
    %18 = vector.broadcast %17 : vector<1x32xf32> to vector<16x32xf32>
    %19 = arith.addf %14, %18 : vector<16x32xf32>
    %20 = vector.shape_cast %19 : vector<16x32xf32> to vector<8x2x4x8xf32>
    %21 = tpu.transpose %20, [0, 2, 1, 3] : vector<8x2x4x8xf32> -> vector<8x4x2x8xf32>
    %22 = vector.shape_cast %21 : vector<8x4x2x8xf32> to vector<32x2x8xf32>
    %23 = vector.extract_strided_slice %13 {offsets = [0, 32], sizes = [16, 32], strides = [1, 1]} : vector<16x96xf32> to vector<16x32xf32>
    %24 = vector.extract_strided_slice %11 {offsets = [1, 0], sizes = [1, 32], strides = [1, 1]} : vector<10x32xf32> to vector<1x32xf32>
    %25 = vector.shape_cast %24 : vector<1x32xf32> to vector<32xf32>
    %26 = vector.shape_cast %25 : vector<32xf32> to vector<1x32xf32>
    %27 = vector.broadcast %26 : vector<1x32xf32> to vector<16x32xf32>
    %28 = arith.addf %23, %27 : vector<16x32xf32>
    %29 = vector.shape_cast %28 : vector<16x32xf32> to vector<8x2x4x8xf32>
    %30 = tpu.transpose %29, [0, 2, 1, 3] : vector<8x2x4x8xf32> -> vector<8x4x2x8xf32>
    %31 = vector.shape_cast %30 : vector<8x4x2x8xf32> to vector<32x2x8xf32>
    %32 = vector.extract_strided_slice %13 {offsets = [0, 64], sizes = [16, 32], strides = [1, 1]} : vector<16x96xf32> to vector<16x32xf32>
    %33 = vector.extract_strided_slice %11 {offsets = [2, 0], sizes = [1, 32], strides = [1, 1]} : vector<10x32xf32> to vector<1x32xf32>
    %34 = vector.shape_cast %33 : vector<1x32xf32> to vector<32xf32>
    %35 = vector.shape_cast %34 : vector<32xf32> to vector<1x32xf32>
    %36 = vector.broadcast %35 : vector<1x32xf32> to vector<16x32xf32>
    %37 = arith.addf %32, %36 : vector<16x32xf32>
    %38 = vector.shape_cast %37 : vector<16x32xf32> to vector<8x2x4x8xf32>
    %39 = tpu.transpose %38, [0, 2, 1, 3] : vector<8x2x4x8xf32> -> vector<8x4x2x8xf32>
    %40 = vector.shape_cast %39 : vector<8x4x2x8xf32> to vector<32x2x8xf32>
    %41 = arith.truncf %22 : vector<32x2x8xf32> to vector<32x2x8xbf16>
    %42 = arith.truncf %31 : vector<32x2x8xf32> to vector<32x2x8xbf16>
    "tpu.trace_start"() <{level = 10 : i32, message = "gqd,gkd->gqk"}> : () -> ()
    %cst_17 = arith.constant dense<0.000000e+00> : vector<32x2x2xf32>
    %43 = tpu.matmul %41, %42, %cst_17 {dimension_numbers = #tpu.dot_dimension_numbers<[2], [2], [1], [1], [0, 0, 0, 1, 1, 1], [0], [0]>} : vector<32x2x8xbf16>, vector<32x2x8xbf16>, vector<32x2x2xf32> -> vector<32x2x2xf32>
    "tpu.trace_stop"() : () -> ()
    %cst_18 = arith.constant dense<0xFF800000> : vector<32x2xf32>
    %44 = vector.multi_reduction <maximumf>, %43, %cst_18 [2] : vector<32x2x2xf32> to vector<32x2xf32>
    %45 = vector.shape_cast %44 : vector<32x2xf32> to vector<32x2x1xf32>
    %46 = vector.broadcast %45 : vector<32x2x1xf32> to vector<32x2x2xf32>
    %47 = arith.subf %43, %46 : vector<32x2x2xf32>
    %48 = math.exp %47 : vector<32x2x2xf32>
    %cst_19 = arith.constant dense<0.000000e+00> : vector<32x2xf32>
    %49 = vector.multi_reduction <add>, %48, %cst_19 [2] : vector<32x2x2xf32> to vector<32x2xf32>
    %50 = vector.shape_cast %49 : vector<32x2xf32> to vector<32x2x1xf32>
    %51 = tpu.reciprocal %50 {approx = true} : vector<32x2x1xf32> -> vector<32x2x1xf32>
    %52 = vector.broadcast %51 : vector<32x2x1xf32> to vector<32x2x2xf32>
    %53 = arith.mulf %48, %52 : vector<32x2x2xf32>
    %54 = arith.truncf %53 : vector<32x2x2xf32> to vector<32x2x2xbf16>
    %55 = arith.truncf %40 : vector<32x2x8xf32> to vector<32x2x8xbf16>
    "tpu.trace_start"() <{level = 10 : i32, message = "gqk,gkd->gqd"}> : () -> ()
    %cst_20 = arith.constant dense<0.000000e+00> : vector<32x2x8xf32>
    %56 = tpu.matmul %54, %55, %cst_20 {dimension_numbers = #tpu.dot_dimension_numbers<[2], [1], [1], [2], [0, 0, 0, 1, 1, 2], [0], [0]>} : vector<32x2x2xbf16>, vector<32x2x8xbf16>, vector<32x2x8xf32> -> vector<32x2x8xf32>
    "tpu.trace_stop"() : () -> ()
    %57 = vector.shape_cast %56 : vector<32x2x8xf32> to vector<8x4x2x8xf32>
    %58 = tpu.transpose %57, [0, 2, 1, 3] : vector<8x4x2x8xf32> -> vector<8x2x4x8xf32>
    %59 = vector.shape_cast %58 : vector<8x2x4x8xf32> to vector<16x32xf32>
    %60 = arith.truncf %59 : vector<16x32xf32> to vector<16x32xbf16>
    %cst_21 = arith.constant dense<0.000000e+00> : vector<16x32xf32>
    %61 = tpu.matmul %60, %5, %cst_21 {dimension_numbers = #tpu.dot_dimension_numbers<[1], [0], [0], [1], [0, 0, 1, 1], [], []>} : vector<16x32xbf16>, vector<32x32xbf16>, vector<16x32xf32> -> vector<16x32xf32>
    %62 = vector.extract_strided_slice %11 {offsets = [3, 0], sizes = [1, 32], strides = [1, 1]} : vector<10x32xf32> to vector<1x32xf32>
    %63 = vector.shape_cast %62 : vector<1x32xf32> to vector<32xf32>
    %64 = vector.shape_cast %63 : vector<32xf32> to vector<1x32xf32>
    %65 = vector.broadcast %64 : vector<1x32xf32> to vector<16x32xf32>
    %66 = arith.addf %61, %65 : vector<16x32xf32>
    %67 = arith.addf %1, %66 : vector<16x32xf32>
    %68 = vector.extract_strided_slice %11 {offsets = [6, 0], sizes = [1, 32], strides = [1, 1]} : vector<10x32xf32> to vector<1x32xf32>
    %69 = vector.shape_cast %68 : vector<1x32xf32> to vector<32xf32>
    %70 = vector.extract_strided_slice %11 {offsets = [7, 0], sizes = [1, 32], strides = [1, 1]} : vector<10x32xf32> to vector<1x32xf32>
    %71 = vector.shape_cast %70 : vector<1x32xf32> to vector<32xf32>
    %cst_22 = arith.constant dense<0.000000e+00> : vector<16xf32>
    %72 = vector.multi_reduction <add>, %67, %cst_22 [1] : vector<16x32xf32> to vector<16xf32>
    %73 = vector.shape_cast %72 : vector<16xf32> to vector<16x1xf32>
    %cst_23 = arith.constant 3.200000e+01 : f32
    %74 = vector.broadcast %cst_23 : f32 to vector<16x1xf32>
    %75 = arith.divf %73, %74 : vector<16x1xf32>
    %76 = vector.broadcast %75 : vector<16x1xf32> to vector<16x32xf32>
    %77 = arith.subf %67, %76 : vector<16x32xf32>
    %78 = arith.mulf %77, %77 : vector<16x32xf32>
    %cst_24 = arith.constant dense<0.000000e+00> : vector<16xf32>
    %79 = vector.multi_reduction <add>, %78, %cst_24 [1] : vector<16x32xf32> to vector<16xf32>
    %80 = vector.shape_cast %79 : vector<16xf32> to vector<16x1xf32>
    %cst_25 = arith.constant 3.200000e+01 : f32
    %81 = vector.broadcast %cst_25 : f32 to vector<16x1xf32>
    %82 = arith.divf %80, %81 : vector<16x1xf32>
    %83 = vector.broadcast %75 : vector<16x1xf32> to vector<16x32xf32>
    %84 = arith.subf %67, %83 : vector<16x32xf32>
    %cst_26 = arith.constant 9.99999974E-6 : f32
    %85 = vector.broadcast %cst_26 : f32 to vector<16x1xf32>
    %86 = arith.addf %82, %85 : vector<16x1xf32>
    %87 = math.rsqrt %86 : vector<16x1xf32>
    %88 = vector.broadcast %87 : vector<16x1xf32> to vector<16x32xf32>
    %89 = arith.mulf %84, %88 : vector<16x32xf32>
    %90 = vector.shape_cast %69 : vector<32xf32> to vector<1x32xf32>
    %91 = vector.broadcast %90 : vector<1x32xf32> to vector<16x32xf32>
    %92 = arith.mulf %89, %91 : vector<16x32xf32>
    %93 = vector.shape_cast %71 : vector<32xf32> to vector<1x32xf32>
    %94 = vector.broadcast %93 : vector<1x32xf32> to vector<16x32xf32>
    %95 = arith.addf %92, %94 : vector<16x32xf32>
    %96 = arith.truncf %95 : vector<16x32xf32> to vector<16x32xbf16>
    %cst_27 = arith.constant dense<0.000000e+00> : vector<16x32xf32>
    %97 = tpu.matmul %96, %7, %cst_27 {dimension_numbers = #tpu.dot_dimension_numbers<[1], [0], [0], [1], [0, 0, 1, 1], [], []>} : vector<16x32xbf16>, vector<32x32xbf16>, vector<16x32xf32> -> vector<16x32xf32>
    %98 = vector.extract_strided_slice %11 {offsets = [4, 0], sizes = [1, 32], strides = [1, 1]} : vector<10x32xf32> to vector<1x32xf32>
    %99 = vector.shape_cast %98 : vector<1x32xf32> to vector<32xf32>
    %100 = vector.shape_cast %99 : vector<32xf32> to vector<1x32xf32>
    %101 = vector.broadcast %100 : vector<1x32xf32> to vector<16x32xf32>
    %102 = arith.addf %97, %101 : vector<16x32xf32>
    %cst_28 = arith.constant 0.000000e+00 : f32
    %103 = vector.broadcast %cst_28 : f32 to vector<16x32xf32>
    %104 = arith.maximumf %102, %103 : vector<16x32xf32>
    %105 = arith.truncf %104 : vector<16x32xf32> to vector<16x32xbf16>
    %cst_29 = arith.constant dense<0.000000e+00> : vector<16x32xf32>
    %106 = tpu.matmul %105, %9, %cst_29 {dimension_numbers = #tpu.dot_dimension_numbers<[1], [0], [0], [1], [0, 0, 1, 1], [], []>} : vector<16x32xbf16>, vector<32x32xbf16>, vector<16x32xf32> -> vector<16x32xf32>
    %107 = vector.extract_strided_slice %11 {offsets = [5, 0], sizes = [1, 32], strides = [1, 1]} : vector<10x32xf32> to vector<1x32xf32>
    %108 = vector.shape_cast %107 : vector<1x32xf32> to vector<32xf32>
    %109 = vector.shape_cast %108 : vector<32xf32> to vector<1x32xf32>
    %110 = vector.broadcast %109 : vector<1x32xf32> to vector<16x32xf32>
    %111 = arith.addf %106, %110 : vector<16x32xf32>
    %112 = arith.addf %95, %111 : vector<16x32xf32>
    %113 = vector.extract_strided_slice %11 {offsets = [8, 0], sizes = [1, 32], strides = [1, 1]} : vector<10x32xf32> to vector<1x32xf32>
    %114 = vector.shape_cast %113 : vector<1x32xf32> to vector<32xf32>
    %115 = vector.extract_strided_slice %11 {offsets = [9, 0], sizes = [1, 32], strides = [1, 1]} : vector<10x32xf32> to vector<1x32xf32>
    %116 = vector.shape_cast %115 : vector<1x32xf32> to vector<32xf32>
    %cst_30 = arith.constant dense<0.000000e+00> : vector<16xf32>
    %117 = vector.multi_reduction <add>, %112, %cst_30 [1] : vector<16x32xf32> to vector<16xf32>
    %118 = vector.shape_cast %117 : vector<16xf32> to vector<16x1xf32>
    %cst_31 = arith.constant 3.200000e+01 : f32
    %119 = vector.broadcast %cst_31 : f32 to vector<16x1xf32>
    %120 = arith.divf %118, %119 : vector<16x1xf32>
    %121 = vector.broadcast %120 : vector<16x1xf32> to vector<16x32xf32>
    %122 = arith.subf %112, %121 : vector<16x32xf32>
    %123 = arith.mulf %122, %122 : vector<16x32xf32>
    %cst_32 = arith.constant dense<0.000000e+00> : vector<16xf32>
    %124 = vector.multi_reduction <add>, %123, %cst_32 [1] : vector<16x32xf32> to vector<16xf32>
    %125 = vector.shape_cast %124 : vector<16xf32> to vector<16x1xf32>
    %cst_33 = arith.constant 3.200000e+01 : f32
    %126 = vector.broadcast %cst_33 : f32 to vector<16x1xf32>
    %127 = arith.divf %125, %126 : vector<16x1xf32>
    %128 = vector.broadcast %120 : vector<16x1xf32> to vector<16x32xf32>
    %129 = arith.subf %112, %128 : vector<16x32xf32>
    %cst_34 = arith.constant 9.99999974E-6 : f32
    %130 = vector.broadcast %cst_34 : f32 to vector<16x1xf32>
    %131 = arith.addf %127, %130 : vector<16x1xf32>
    %132 = math.rsqrt %131 : vector<16x1xf32>
    %133 = vector.broadcast %132 : vector<16x1xf32> to vector<16x32xf32>
    %134 = arith.mulf %129, %133 : vector<16x32xf32>
    %135 = vector.shape_cast %114 : vector<32xf32> to vector<1x32xf32>
    %136 = vector.broadcast %135 : vector<1x32xf32> to vector<16x32xf32>
    %137 = arith.mulf %134, %136 : vector<16x32xf32>
    %138 = vector.shape_cast %116 : vector<32xf32> to vector<1x32xf32>
    %139 = vector.broadcast %138 : vector<1x32xf32> to vector<16x32xf32>
    %140 = arith.addf %137, %139 : vector<16x32xf32>
    %c1 = arith.constant 1 : index
    %c0_35 = arith.constant 0 : index
    %c0_36 = arith.constant 0 : index
    %141 = vector.load %arg2[%c1, %c0_35, %c0_36] : memref<2x32x96xbf16, #tpu.memory_space<vmem>>, vector<1x32x96xbf16>
    %142 = vector.shape_cast %141 : vector<1x32x96xbf16> to vector<32x96xbf16>
    %c1_37 = arith.constant 1 : index
    %c0_38 = arith.constant 0 : index
    %c0_39 = arith.constant 0 : index
    %143 = vector.load %arg3[%c1_37, %c0_38, %c0_39] : memref<2x32x32xbf16, #tpu.memory_space<vmem>>, vector<1x32x32xbf16>
    %144 = vector.shape_cast %143 : vector<1x32x32xbf16> to vector<32x32xbf16>
    %c1_40 = arith.constant 1 : index
    %c0_41 = arith.constant 0 : index
    %c0_42 = arith.constant 0 : index
    %145 = vector.load %arg4[%c1_40, %c0_41, %c0_42] : memref<2x32x32xbf16, #tpu.memory_space<vmem>>, vector<1x32x32xbf16>
    %146 = vector.shape_cast %145 : vector<1x32x32xbf16> to vector<32x32xbf16>
    %c1_43 = arith.constant 1 : index
    %c0_44 = arith.constant 0 : index
    %c0_45 = arith.constant 0 : index
    %147 = vector.load %arg5[%c1_43, %c0_44, %c0_45] : memref<2x32x32xbf16, #tpu.memory_space<vmem>>, vector<1x32x32xbf16>
    %148 = vector.shape_cast %147 : vector<1x32x32xbf16> to vector<32x32xbf16>
    %c1_46 = arith.constant 1 : index
    %c0_47 = arith.constant 0 : index
    %c0_48 = arith.constant 0 : index
    %149 = vector.load %arg6[%c1_46, %c0_47, %c0_48] : memref<2x10x32xf32, #tpu.memory_space<vmem>>, vector<1x10x32xf32>
    %150 = vector.shape_cast %149 : vector<1x10x32xf32> to vector<10x32xf32>
    %151 = arith.truncf %140 : vector<16x32xf32> to vector<16x32xbf16>
    %cst_49 = arith.constant dense<0.000000e+00> : vector<16x96xf32>
    %152 = tpu.matmul %151, %142, %cst_49 {dimension_numbers = #tpu.dot_dimension_numbers<[1], [0], [0], [1], [0, 0, 1, 1], [], []>} : vector<16x32xbf16>, vector<32x96xbf16>, vector<16x96xf32> -> vector<16x96xf32>
    %153 = vector.extract_strided_slice %152 {offsets = [0, 0], sizes = [16, 32], strides = [1, 1]} : vector<16x96xf32> to vector<16x32xf32>
    %154 = vector.extract_strided_slice %150 {offsets = [0, 0], sizes = [1, 32], strides = [1, 1]} : vector<10x32xf32> to vector<1x32xf32>
    %155 = vector.shape_cast %154 : vector<1x32xf32> to vector<32xf32>
    %156 = vector.shape_cast %155 : vector<32xf32> to vector<1x32xf32>
    %157 = vector.broadcast %156 : vector<1x32xf32> to vector<16x32xf32>
    %158 = arith.addf %153, %157 : vector<16x32xf32>
    %159 = vector.shape_cast %158 : vector<16x32xf32> to vector<8x2x4x8xf32>
    %160 = tpu.transpose %159, [0, 2, 1, 3] : vector<8x2x4x8xf32> -> vector<8x4x2x8xf32>
    %161 = vector.shape_cast %160 : vector<8x4x2x8xf32> to vector<32x2x8xf32>
    %162 = vector.extract_strided_slice %152 {offsets = [0, 32], sizes = [16, 32], strides = [1, 1]} : vector<16x96xf32> to vector<16x32xf32>
    %163 = vector.extract_strided_slice %150 {offsets = [1, 0], sizes = [1, 32], strides = [1, 1]} : vector<10x32xf32> to vector<1x32xf32>
    %164 = vector.shape_cast %163 : vector<1x32xf32> to vector<32xf32>
    %165 = vector.shape_cast %164 : vector<32xf32> to vector<1x32xf32>
    %166 = vector.broadcast %165 : vector<1x32xf32> to vector<16x32xf32>
    %167 = arith.addf %162, %166 : vector<16x32xf32>
    %168 = vector.shape_cast %167 : vector<16x32xf32> to vector<8x2x4x8xf32>
    %169 = tpu.transpose %168, [0, 2, 1, 3] : vector<8x2x4x8xf32> -> vector<8x4x2x8xf32>
    %170 = vector.shape_cast %169 : vector<8x4x2x8xf32> to vector<32x2x8xf32>
    %171 = vector.extract_strided_slice %152 {offsets = [0, 64], sizes = [16, 32], strides = [1, 1]} : vector<16x96xf32> to vector<16x32xf32>
    %172 = vector.extract_strided_slice %150 {offsets = [2, 0], sizes = [1, 32], strides = [1, 1]} : vector<10x32xf32> to vector<1x32xf32>
    %173 = vector.shape_cast %172 : vector<1x32xf32> to vector<32xf32>
    %174 = vector.shape_cast %173 : vector<32xf32> to vector<1x32xf32>
    %175 = vector.broadcast %174 : vector<1x32xf32> to vector<16x32xf32>
    %176 = arith.addf %171, %175 : vector<16x32xf32>
    %177 = vector.shape_cast %176 : vector<16x32xf32> to vector<8x2x4x8xf32>
    %178 = tpu.transpose %177, [0, 2, 1, 3] : vector<8x2x4x8xf32> -> vector<8x4x2x8xf32>
    %179 = vector.shape_cast %178 : vector<8x4x2x8xf32> to vector<32x2x8xf32>
    %180 = arith.truncf %161 : vector<32x2x8xf32> to vector<32x2x8xbf16>
    %181 = arith.truncf %170 : vector<32x2x8xf32> to vector<32x2x8xbf16>
    "tpu.trace_start"() <{level = 10 : i32, message = "gqd,gkd->gqk"}> : () -> ()
    %cst_50 = arith.constant dense<0.000000e+00> : vector<32x2x2xf32>
    %182 = tpu.matmul %180, %181, %cst_50 {dimension_numbers = #tpu.dot_dimension_numbers<[2], [2], [1], [1], [0, 0, 0, 1, 1, 1], [0], [0]>} : vector<32x2x8xbf16>, vector<32x2x8xbf16>, vector<32x2x2xf32> -> vector<32x2x2xf32>
    "tpu.trace_stop"() : () -> ()
    %cst_51 = arith.constant dense<0xFF800000> : vector<32x2xf32>
    %183 = vector.multi_reduction <maximumf>, %182, %cst_51 [2] : vector<32x2x2xf32> to vector<32x2xf32>
    %184 = vector.shape_cast %183 : vector<32x2xf32> to vector<32x2x1xf32>
    %185 = vector.broadcast %184 : vector<32x2x1xf32> to vector<32x2x2xf32>
    %186 = arith.subf %182, %185 : vector<32x2x2xf32>
    %187 = math.exp %186 : vector<32x2x2xf32>
    %cst_52 = arith.constant dense<0.000000e+00> : vector<32x2xf32>
    %188 = vector.multi_reduction <add>, %187, %cst_52 [2] : vector<32x2x2xf32> to vector<32x2xf32>
    %189 = vector.shape_cast %188 : vector<32x2xf32> to vector<32x2x1xf32>
    %190 = tpu.reciprocal %189 {approx = true} : vector<32x2x1xf32> -> vector<32x2x1xf32>
    %191 = vector.broadcast %190 : vector<32x2x1xf32> to vector<32x2x2xf32>
    %192 = arith.mulf %187, %191 : vector<32x2x2xf32>
    %193 = arith.truncf %192 : vector<32x2x2xf32> to vector<32x2x2xbf16>
    %194 = arith.truncf %179 : vector<32x2x8xf32> to vector<32x2x8xbf16>
    "tpu.trace_start"() <{level = 10 : i32, message = "gqk,gkd->gqd"}> : () -> ()
    %cst_53 = arith.constant dense<0.000000e+00> : vector<32x2x8xf32>
    %195 = tpu.matmul %193, %194, %cst_53 {dimension_numbers = #tpu.dot_dimension_numbers<[2], [1], [1], [2], [0, 0, 0, 1, 1, 2], [0], [0]>} : vector<32x2x2xbf16>, vector<32x2x8xbf16>, vector<32x2x8xf32> -> vector<32x2x8xf32>
    "tpu.trace_stop"() : () -> ()
    %196 = vector.shape_cast %195 : vector<32x2x8xf32> to vector<8x4x2x8xf32>
    %197 = tpu.transpose %196, [0, 2, 1, 3] : vector<8x4x2x8xf32> -> vector<8x2x4x8xf32>
    %198 = vector.shape_cast %197 : vector<8x2x4x8xf32> to vector<16x32xf32>
    %199 = arith.truncf %198 : vector<16x32xf32> to vector<16x32xbf16>
    %cst_54 = arith.constant dense<0.000000e+00> : vector<16x32xf32>
    %200 = tpu.matmul %199, %144, %cst_54 {dimension_numbers = #tpu.dot_dimension_numbers<[1], [0], [0], [1], [0, 0, 1, 1], [], []>} : vector<16x32xbf16>, vector<32x32xbf16>, vector<16x32xf32> -> vector<16x32xf32>
    %201 = vector.extract_strided_slice %150 {offsets = [3, 0], sizes = [1, 32], strides = [1, 1]} : vector<10x32xf32> to vector<1x32xf32>
    %202 = vector.shape_cast %201 : vector<1x32xf32> to vector<32xf32>
    %203 = vector.shape_cast %202 : vector<32xf32> to vector<1x32xf32>
    %204 = vector.broadcast %203 : vector<1x32xf32> to vector<16x32xf32>
    %205 = arith.addf %200, %204 : vector<16x32xf32>
    %206 = arith.addf %140, %205 : vector<16x32xf32>
    %207 = vector.extract_strided_slice %150 {offsets = [6, 0], sizes = [1, 32], strides = [1, 1]} : vector<10x32xf32> to vector<1x32xf32>
    %208 = vector.shape_cast %207 : vector<1x32xf32> to vector<32xf32>
    %209 = vector.extract_strided_slice %150 {offsets = [7, 0], sizes = [1, 32], strides = [1, 1]} : vector<10x32xf32> to vector<1x32xf32>
    %210 = vector.shape_cast %209 : vector<1x32xf32> to vector<32xf32>
    %cst_55 = arith.constant dense<0.000000e+00> : vector<16xf32>
    %211 = vector.multi_reduction <add>, %206, %cst_55 [1] : vector<16x32xf32> to vector<16xf32>
    %212 = vector.shape_cast %211 : vector<16xf32> to vector<16x1xf32>
    %cst_56 = arith.constant 3.200000e+01 : f32
    %213 = vector.broadcast %cst_56 : f32 to vector<16x1xf32>
    %214 = arith.divf %212, %213 : vector<16x1xf32>
    %215 = vector.broadcast %214 : vector<16x1xf32> to vector<16x32xf32>
    %216 = arith.subf %206, %215 : vector<16x32xf32>
    %217 = arith.mulf %216, %216 : vector<16x32xf32>
    %cst_57 = arith.constant dense<0.000000e+00> : vector<16xf32>
    %218 = vector.multi_reduction <add>, %217, %cst_57 [1] : vector<16x32xf32> to vector<16xf32>
    %219 = vector.shape_cast %218 : vector<16xf32> to vector<16x1xf32>
    %cst_58 = arith.constant 3.200000e+01 : f32
    %220 = vector.broadcast %cst_58 : f32 to vector<16x1xf32>
    %221 = arith.divf %219, %220 : vector<16x1xf32>
    %222 = vector.broadcast %214 : vector<16x1xf32> to vector<16x32xf32>
    %223 = arith.subf %206, %222 : vector<16x32xf32>
    %cst_59 = arith.constant 9.99999974E-6 : f32
    %224 = vector.broadcast %cst_59 : f32 to vector<16x1xf32>
    %225 = arith.addf %221, %224 : vector<16x1xf32>
    %226 = math.rsqrt %225 : vector<16x1xf32>
    %227 = vector.broadcast %226 : vector<16x1xf32> to vector<16x32xf32>
    %228 = arith.mulf %223, %227 : vector<16x32xf32>
    %229 = vector.shape_cast %208 : vector<32xf32> to vector<1x32xf32>
    %230 = vector.broadcast %229 : vector<1x32xf32> to vector<16x32xf32>
    %231 = arith.mulf %228, %230 : vector<16x32xf32>
    %232 = vector.shape_cast %210 : vector<32xf32> to vector<1x32xf32>
    %233 = vector.broadcast %232 : vector<1x32xf32> to vector<16x32xf32>
    %234 = arith.addf %231, %233 : vector<16x32xf32>
    %235 = arith.truncf %234 : vector<16x32xf32> to vector<16x32xbf16>
    %cst_60 = arith.constant dense<0.000000e+00> : vector<16x32xf32>
    %236 = tpu.matmul %235, %146, %cst_60 {dimension_numbers = #tpu.dot_dimension_numbers<[1], [0], [0], [1], [0, 0, 1, 1], [], []>} : vector<16x32xbf16>, vector<32x32xbf16>, vector<16x32xf32> -> vector<16x32xf32>
    %237 = vector.extract_strided_slice %150 {offsets = [4, 0], sizes = [1, 32], strides = [1, 1]} : vector<10x32xf32> to vector<1x32xf32>
    %238 = vector.shape_cast %237 : vector<1x32xf32> to vector<32xf32>
    %239 = vector.shape_cast %238 : vector<32xf32> to vector<1x32xf32>
    %240 = vector.broadcast %239 : vector<1x32xf32> to vector<16x32xf32>
    %241 = arith.addf %236, %240 : vector<16x32xf32>
    %cst_61 = arith.constant 0.000000e+00 : f32
    %242 = vector.broadcast %cst_61 : f32 to vector<16x32xf32>
    %243 = arith.maximumf %241, %242 : vector<16x32xf32>
    %244 = arith.truncf %243 : vector<16x32xf32> to vector<16x32xbf16>
    %cst_62 = arith.constant dense<0.000000e+00> : vector<16x32xf32>
    %245 = tpu.matmul %244, %148, %cst_62 {dimension_numbers = #tpu.dot_dimension_numbers<[1], [0], [0], [1], [0, 0, 1, 1], [], []>} : vector<16x32xbf16>, vector<32x32xbf16>, vector<16x32xf32> -> vector<16x32xf32>
    %246 = vector.extract_strided_slice %150 {offsets = [5, 0], sizes = [1, 32], strides = [1, 1]} : vector<10x32xf32> to vector<1x32xf32>
    %247 = vector.shape_cast %246 : vector<1x32xf32> to vector<32xf32>
    %248 = vector.shape_cast %247 : vector<32xf32> to vector<1x32xf32>
    %249 = vector.broadcast %248 : vector<1x32xf32> to vector<16x32xf32>
    %250 = arith.addf %245, %249 : vector<16x32xf32>
    %251 = arith.addf %234, %250 : vector<16x32xf32>
    %252 = vector.extract_strided_slice %150 {offsets = [8, 0], sizes = [1, 32], strides = [1, 1]} : vector<10x32xf32> to vector<1x32xf32>
    %253 = vector.shape_cast %252 : vector<1x32xf32> to vector<32xf32>
    %254 = vector.extract_strided_slice %150 {offsets = [9, 0], sizes = [1, 32], strides = [1, 1]} : vector<10x32xf32> to vector<1x32xf32>
    %255 = vector.shape_cast %254 : vector<1x32xf32> to vector<32xf32>
    %cst_63 = arith.constant dense<0.000000e+00> : vector<16xf32>
    %256 = vector.multi_reduction <add>, %251, %cst_63 [1] : vector<16x32xf32> to vector<16xf32>
    %257 = vector.shape_cast %256 : vector<16xf32> to vector<16x1xf32>
    %cst_64 = arith.constant 3.200000e+01 : f32
    %258 = vector.broadcast %cst_64 : f32 to vector<16x1xf32>
    %259 = arith.divf %257, %258 : vector<16x1xf32>
    %260 = vector.broadcast %259 : vector<16x1xf32> to vector<16x32xf32>
    %261 = arith.subf %251, %260 : vector<16x32xf32>
    %262 = arith.mulf %261, %261 : vector<16x32xf32>
    %cst_65 = arith.constant dense<0.000000e+00> : vector<16xf32>
    %263 = vector.multi_reduction <add>, %262, %cst_65 [1] : vector<16x32xf32> to vector<16xf32>
    %264 = vector.shape_cast %263 : vector<16xf32> to vector<16x1xf32>
    %cst_66 = arith.constant 3.200000e+01 : f32
    %265 = vector.broadcast %cst_66 : f32 to vector<16x1xf32>
    %266 = arith.divf %264, %265 : vector<16x1xf32>
    %267 = vector.broadcast %259 : vector<16x1xf32> to vector<16x32xf32>
    %268 = arith.subf %251, %267 : vector<16x32xf32>
    %cst_67 = arith.constant 9.99999974E-6 : f32
    %269 = vector.broadcast %cst_67 : f32 to vector<16x1xf32>
    %270 = arith.addf %266, %269 : vector<16x1xf32>
    %271 = math.rsqrt %270 : vector<16x1xf32>
    %272 = vector.broadcast %271 : vector<16x1xf32> to vector<16x32xf32>
    %273 = arith.mulf %268, %272 : vector<16x32xf32>
    %274 = vector.shape_cast %253 : vector<32xf32> to vector<1x32xf32>
    %275 = vector.broadcast %274 : vector<1x32xf32> to vector<16x32xf32>
    %276 = arith.mulf %273, %275 : vector<16x32xf32>
    %277 = vector.shape_cast %255 : vector<32xf32> to vector<1x32xf32>
    %278 = vector.broadcast %277 : vector<1x32xf32> to vector<16x32xf32>
    %279 = arith.addf %276, %278 : vector<16x32xf32>
    %280 = vector.shape_cast %279 : vector<16x32xf32> to vector<8x2x32xf32>
    %cst_68 = arith.constant dense<0.000000e+00> : vector<2x32xf32>
    %281 = vector.multi_reduction <add>, %280, %cst_68 [0] : vector<8x2x32xf32> to vector<2x32xf32>
    %cst_69 = arith.constant 8.000000e+00 : f32
    %282 = vector.broadcast %cst_69 : f32 to vector<2x32xf32>
    %283 = arith.divf %281, %282 : vector<2x32xf32>
    %284 = arith.truncf %283 : vector<2x32xf32> to vector<2x32xbf16>
    %c0_70 = arith.constant 0 : index
    %c0_71 = arith.constant 0 : index
    %285 = vector.load %arg7[%c0_70, %c0_71] : memref<32x10xbf16, #tpu.memory_space<vmem>>, vector<32x10xbf16>
    %cst_72 = arith.constant dense<0.000000e+00> : vector<2x10xf32>
    %286 = tpu.matmul %284, %285, %cst_72 {dimension_numbers = #tpu.dot_dimension_numbers<[1], [0], [0], [1], [0, 0, 1, 1], [], []>} : vector<2x32xbf16>, vector<32x10xbf16>, vector<2x10xf32> -> vector<2x10xf32>
    %c0_73 = arith.constant 0 : index
    %c0_74 = arith.constant 0 : index
    %287 = vector.load %arg8[%c0_73, %c0_74] : memref<1x10xf32, #tpu.memory_space<vmem>>, vector<1x10xf32>
    %288 = vector.broadcast %287 : vector<1x10xf32> to vector<2x10xf32>
    %289 = arith.addf %286, %288 : vector<2x10xf32>
    %c0_75 = arith.constant 0 : index
    %c0_76 = arith.constant 0 : index
    %290 = vector.load %arg9[%c0_75, %c0_76] : memref<2x10xf32, #tpu.memory_space<vmem>>, vector<2x10xf32>
    tpu.vector_store %arg9[%c0_75, %c0_76], %289 {strides = array<i32>} : memref<2x10xf32, #tpu.memory_space<vmem>>, vector<2x10xf32>,
    return
  }
  func.func @transform_0(%arg0: i32) -> (i32, i32, i32) {
    %c0_i32 = arith.constant 0 : i32
    %c0_i32_0 = arith.constant 0 : i32
    %c0_i32_1 = arith.constant 0 : i32
    %c0_i32_2 = arith.constant 0 : i32
    return %c0_i32, %c0_i32_0, %c0_i32_1 : i32, i32, i32
  }
  func.func @transform_1(%arg0: i32) -> (i32, i32, i32) {
    %c0_i32 = arith.constant 0 : i32
    %c0_i32_0 = arith.constant 0 : i32
    %c0_i32_1 = arith.constant 0 : i32
    %c0_i32_2 = arith.constant 0 : i32
    return %c0_i32, %c0_i32_0, %c0_i32_1 : i32, i32, i32
  }
  func.func @transform_2(%arg0: i32) -> (i32, i32, i32) {
    %c0_i32 = arith.constant 0 : i32
    %c0_i32_0 = arith.constant 0 : i32
    %c0_i32_1 = arith.constant 0 : i32
    %c0_i32_2 = arith.constant 0 : i32
    return %c0_i32, %c0_i32_0, %c0_i32_1 : i32, i32, i32
  }
  func.func @transform_3(%arg0: i32) -> (i32, i32, i32) {
    %c0_i32 = arith.constant 0 : i32
    %c0_i32_0 = arith.constant 0 : i32
    %c0_i32_1 = arith.constant 0 : i32
    %c0_i32_2 = arith.constant 0 : i32
    return %c0_i32, %c0_i32_0, %c0_i32_1 : i32, i32, i32
  }
  func.func @transform_4(%arg0: i32) -> (i32, i32, i32) {
    %c0_i32 = arith.constant 0 : i32
    %c0_i32_0 = arith.constant 0 : i32
    %c0_i32_1 = arith.constant 0 : i32
    %c0_i32_2 = arith.constant 0 : i32
    return %c0_i32, %c0_i32_0, %c0_i32_1 : i32, i32, i32
  }
  func.func @transform_5(%arg0: i32) -> (i32, i32, i32) {
    %c0_i32 = arith.constant 0 : i32
    %c0_i32_0 = arith.constant 0 : i32
    %c0_i32_1 = arith.constant 0 : i32
    %c0_i32_2 = arith.constant 0 : i32
    return %c0_i32, %c0_i32_0, %c0_i32_1 : i32, i32, i32
  }
  func.func @transform_6(%arg0: i32) -> (i32, i32) {
    %c0_i32 = arith.constant 0 : i32
    %c0_i32_0 = arith.constant 0 : i32
    %c0_i32_1 = arith.constant 0 : i32
    return %c0_i32, %c0_i32_0 : i32, i32
  }
  func.func @transform_7(%arg0: i32) -> (i32, i32) {
    %c0_i32 = arith.constant 0 : i32
    %c0_i32_0 = arith.constant 0 : i32
    %c0_i32_1 = arith.constant 0 : i32
    return %c0_i32, %c0_i32_0 : i32, i32
  }
  func.func @transform_8(%arg0: i32) -> (i32, i32) {
    %c0_i32 = arith.constant 0 : i32
    %c0_i32_0 = arith.constant 0 : i32
    %c0_i32_1 = arith.constant 0 : i32
    return %c0_i32, %c0_i32_0 : i32, i32
  }
}

</mosaic_0001>

<bundles_post_ra>
// kernel: transformer_forward.1
= control target key start
LH: loop header
LB: loop body
LE: loop exit
PB: predicated region body
PF: predicated region fallthrough
CT: control target
= control target key end

     0   :  { %s10981_s0 = inlined_call_operand.vmem [shape: f32[8,2,32], index: 0, kind: input, shape index: {}]   ;;  %s10982_s1 = inlined_call_operand.vmem [shape: bf16[2,32,96], index: 1, kind: input, shape index: {}]   ;;  %s10983_s2 = inlined_call_operand.vmem [shape: bf16[2,32,32], index: 2, kind: input, shape index: {}]   ;;  %s10984_s3 = inlined_call_operand.vmem [shape: bf16[2,32,32], index: 3, kind: input, shape index: {}]   ;;  %s10985_s4 = inlined_call_operand.vmem [shape: bf16[2,32,32], index: 4, kind: input, shape index: {}]   ;;  %s10986_s5 = inlined_call_operand.vmem [shape: f32[2,10,32], index: 5, kind: input, shape index: {}]   ;;  %s10987_s6 = inlined_call_operand.vmem [shape: bf16[32,10], index: 6, kind: input, shape index: {}]   ;;  %s10988_s7 = inlined_call_operand.vmem [shape: f32[1,10], index: 7, kind: input, shape index: {}]   ;;  %s10989_s8 = inlined_call_operand.hbm [shape: f32[2,10], index: 8, kind: output, shape index: {}]  }
   0x1   :  { %v7814_v0 = vld [vmem:[%s10982_s1 + $0x8] sm:$0xff]  ;;  %v8393_v1 = vld [vmem:[%s10981_s0] sm:$0x3]  ;;  %v8398_v2 = vld [vmem:[%s10981_s0 + $0x2] sm:$0x3] }
   0x2   :  { %107 = vmatpush.bf16.msra.mxu0 %v7814_v0  ;;  %v7813_v3 = vld [vmem:[%s10982_s1] sm:$0xff]  ;;  %v8416_v6 = vld [vmem:[%s10981_s0 + $0x8] sm:$0x3]  ;;  %65 = vst [vmem:[#allocation1] ss:$4 sm:$0xff] %v8393_v1 }
   0x3   :  { %v8406_v4 = vld [vmem:[%s10981_s0 + $0x4] sm:$0x3]  ;;  %v8411_v5 = vld [vmem:[%s10981_s0 + $0x6] sm:$0x3]  ;;  %67 = vst [vmem:[#allocation1 + $0x1] ss:$4 sm:$0xff] %v8398_v2 }
   0x4   :  { %v55_v7 = vld [vmem:[%s10986_s5] sm:$0xff]  ;;  %v8426_v9 = vld [vmem:[%s10981_s0 + $0xa] sm:$0x3]  ;;  %69 = vst [vmem:[#allocation1 + $0x2] ss:$4 sm:$0xff] %v8406_v4 }
   0x5   :  { %v443_v8 = vperm.slane %v55_v7, 1 }
   0x6   :  { %13 = vsyncpa [#allocation3], 0  ;;  %108 = vmatpush.bf16.msra.mxu0 %v7813_v3  ;;  %v8432_v10 = vld [vmem:[%s10981_s0 + $0xc] sm:$0x3]  ;;  %71 = vst [vmem:[#allocation1 + $0x3] ss:$4 sm:$0xff] %v8411_v5 }
   0x7   :  { %s8324_s25 = smov 32   ;;  %v8439_v11 = vld [vmem:[%s10981_s0 + $0xe] sm:$0x3]  ;;  %73 = vst [vmem:[#allocation1 + $0x20] ss:$4 sm:$0xff] %v8416_v6  ;;  %vm97_vm0 = vcmask 261120  }
   0x8   :  { %445 = vrot.lane.b32.xlu0 %v443_v8, %s8324_s25  ;;  %75 = vst [vmem:[#allocation1 + $0x21] ss:$4 sm:$0xff] %v8426_v9  ;;  %s8325_s0 = smov 120   ;;  %s8326_s28 = smov 104   ;;  %v115_v18 = vperm.slane %v55_v7, 0  ;;  %v792_v34 = vperm.slane %v55_v7, 2 }
   0x9   :  { %77 = vst [vmem:[#allocation1 + $0x22] ss:$4 sm:$0xff] %v8432_v10  ;;  %s8327_s29 = smov 112   ;;  %s8328_s30 = smov 96   ;;  %v8330_v39 = vmov 1983009808  }
   0xa   :  { %79 = vst [vmem:[#allocation1 + $0x23] ss:$4 sm:$0xff] %v8439_v11  ;;  %s8329_s9 = smov 64   ;;  %v144_v40 = vunpack.c.l.s4 %v8330_v39  ;;  %vm139_vm1 = vcmask 1047556   ;;  %v8331_v46 = vmov 1934713408  }
   0xb   :  { %v168_v47 = vunpack.c.l.s4 %v8331_v46  ;;  %vm1205_vm2 = vcmask 64512   ;;  %vm1814_vm3 = vcmask 9216   ;;  %vm2235_vm4 = vcmask 1040384   ;;  %s8332_s10 = smov 24   ;;  %s8333_s11 = smov 16  }
   0xc   :  { %v8477_v43 = vunpack.c.0.s8 %v144_v40  ;;  %vm2231_vm5 = vcmask 15360   ;;  %s8334_s12 = smov 8   ;;  %vm3135_vm6 = vcmask 130048   ;;  %vm3138_vm7 = vcmask 195584   ;;  %s8341_s14 = smov [#allocation2]  }
   0xd   :  { %v80_v12 = vld.sshfl [vmem:[#allocation1] sm:$0xff pattern:$0x73625140]  ;;  %v8482_v56 = vunpack.c.0.s8 %v168_v47  ;;  %s7575_s15 = sshll.u32 %s8341_s14, 4  ;;  %s7577_s18 = sshll.u32 %s10989_s8, 4  ;;  %s7576_s15 = int_to_ptr.vmem [resolvable:$true] %s7575_s15  ;;  %s7578_s18 = int_to_ptr.hbm [resolvable:$true] %s7577_s18 }
  0x11   :  { %v81_v13 = vld.sshfl [vmem:[#allocation1 + $0x20] sm:$0xff pattern:$0x73625140] }
  0x12   :  { %v84_v14 = vpack.c.bf16 %v81_v13, %v80_v12 }
  0x14   :  { %7594 = vmatmul.msk.bf16.vlgmr.msra.gmra.mxu0 %vm97_vm0, %v84_v14 }
  0x7a   :  { %v446_v15 = vpop.permute.xlu0 %445 }
  0x91   :  { %v8446_v16 = vpop.f32.mrf.mxu0 }
  0x92   :  { %v448_v17 = vadd.f32 %v446_v15, %v8446_v16  ;;  %v8454_v20 = vadd.f32 %v115_v18, %v8446_v16 }
  0x94   :  { %452 = vrot.lane.b32.xlu1 %v448_v17, %s8325_s0  ;;  %460 = vrot.lane.b32.xlu0 %v448_v17, %s8326_s28 }
  0x99   :  { %v8451_v19 = vpop.f32.mrf.mxu0 }
  0x9a   :  { %v8457_v21 = vadd.f32 %v446_v15, %v8451_v19  ;;  %v8469_v33 = vadd.f32 %v115_v18, %v8451_v19 }
  0x9c   :  { %456 = vrot.lane.b32.xlu1 %v448_v17, %s8327_s29  ;;  %v7849_v22 = vpack.i.bf16 %v8457_v21, %v8454_v20 }
  0x9e   :  { %7850 = vrot.lane.b32.xlu0 %v7849_v22, %s8326_s28 }
  0xa4   :  { %7855 = vrot.lane.b32.xlu1 %v7849_v22, %s8325_s0 }
 0x106   :  { %v453_v23 = vpop.permute.xlu1 %452  ;;  %v461_v24 = vpop.permute.xlu0 %460 }
 0x107   :  { %v7859_v25 = vpack.i.bf16 %v453_v23, %v461_v24 }
 0x109   :  { %7860 = vrot.lane.b32.xlu2 %v7859_v25, %s8328_s30 }
 0x10e   :  { %v457_v26 = vpop.permute.xlu1 %456 }
 0x10f   :  { %v7864_v27 = vpack.i.bf16 %v448_v17, %v457_v26 }
 0x110   :  { %v7851_v28 = vpop.permute.xlu0 %7850 }
 0x111   :  { %7865 = vrot.lane.b32.xlu2 %v7864_v27, %s8328_s30  ;;  %v7853_v30 = vunpack.i.h.bf16 %v7851_v28  ;;  %v7852_v52 = vunpack.i.l.bf16 %v7851_v28 }
 0x113   :  { %v151_v63 = vrot.slane %v7852_v52, 4 }
 0x116   :  { %v7856_v29 = vpop.permute.xlu1 %7855 }
 0x117   :  { %v7858_v31 = vunpack.i.h.bf16 %v7856_v29  ;;  %v7857_v50 = vunpack.i.l.bf16 %v7856_v29 }
 0x119   :  { %7870 = vrot.lane.b32.xlu2 %v7849_v22, %s8327_s29  ;;  %v7874_v32 = vpack.i.bf16 %v7858_v31, %v7853_v30  ;;  %v153_v59 = vrot.slane %v7857_v50, 4  ;;  %v152_v12 = vsel %vm139_vm1, %v151_v63, %v7857_v50 }
 0x11a   :  { %v158_v25 = vperm.slane %v152_v12, %v8477_v43 }
 0x11b   :  { %7875 = vrot.lane.b32.xlu0 %v7874_v32, %s8328_s30  ;;  %v154_v17 = vsel %vm139_vm1, %v7852_v52, %v153_v59  ;;  %v141_v32 = vrot.slane %v8454_v20, 4 }
 0x11c   :  { %v8499_v29 = vperm.slane %v154_v17, %v8477_v43 }
 0x121   :  { %134 = vrot.lane.b32.xlu2 %v8469_v33, %s8326_s28 }
 0x123   :  { %122 = vrot.lane.b32.xlu0 %v8469_v33, %s8325_s0 }
 0x129   :  { %794 = vrot.lane.b32.xlu2 %v792_v34, %s8329_s9 }
 0x163   :  { %v7861_v35 = vpop.permute.xlu2 %7860 }
 0x164   :  { %v7863_v36 = vunpack.i.h.bf16 %v7861_v35  ;;  %v7862_v37 = vunpack.i.l.bf16 %v7861_v35 }
 0x166   :  { %v500_v38 = vrot.slane %v7862_v37, 4  ;;  %v502_v41 = vrot.slane %v7863_v36, 4 }
 0x168   :  { %v501_v42 = vsel %vm139_vm1, %v500_v38, %v7863_v36  ;;  %v503_v45 = vsel %vm139_vm1, %v7862_v37, %v502_v41  ;;  %v163_v38 = vrot.slane %v158_v25, 4 }
 0x169   :  { %v507_v51 = vperm.slane %v501_v42, %v8477_v43  ;;  %v511_v55 = vperm.slane %v503_v45, %v8477_v43 }
 0x16b   :  { %v7866_v44 = vpop.permute.xlu2 %7865  ;;  %v512_v60 = vrot.slane %v507_v51, 4  ;;  %v524_v0 = vrot.slane %v511_v55, 4 }
 0x16c   :  { %v7868_v48 = vunpack.i.h.bf16 %v7866_v44  ;;  %v7867_v49 = vunpack.i.l.bf16 %v7866_v44  ;;  %v175_v44 = vrot.slane %v8499_v29, 4 }
 0x16e   :  { %v490_v53 = vrot.slane %v7868_v48, 4  ;;  %v488_v54 = vrot.slane %v7867_v49, 4 }
 0x170   :  { %v489_v57 = vsel %vm139_vm1, %v488_v54, %v7868_v48  ;;  %v491_v58 = vsel %vm139_vm1, %v7867_v49, %v490_v53 }
 0x171   :  { %v495_v61 = vperm.slane %v489_v57, %v8477_v43  ;;  %v499_v62 = vperm.slane %v491_v58, %v8477_v43 }
 0x173   :  { %v513_v3 = vsel %vm139_vm1, %v512_v60, %v495_v61  ;;  %v514_v7 = vrot.slane %v495_v61, 4  ;;  %v7871_v8 = vpop.permute.xlu2 %7870  ;;  %v525_v18 = vsel %vm139_vm1, %v524_v0, %v499_v62  ;;  %v526_v35 = vrot.slane %v499_v62, 4 }
 0x174   :  { %v7873_v13 = vunpack.i.h.bf16 %v7871_v8  ;;  %v7872_v14 = vunpack.i.l.bf16 %v7871_v8  ;;  %v519_v15 = vperm.slane %v513_v3, %v8482_v56  ;;  %v531_v30 = vperm.slane %v525_v18, %v8482_v56 }
 0x175   :  { %v515_v22 = vsel %vm139_vm1, %v507_v51, %v514_v7  ;;  %v8518_v50 = vsel %vm139_vm1, %v511_v55, %v526_v35 }
 0x176   :  { %v138_v23 = vrot.slane %v7872_v14, 4  ;;  %v7879_v24 = vpack.i.bf16 %v8457_v21, %v7873_v13  ;;  %v587_v26 = vperm.slane %v519_v15, %v8477_v43  ;;  %v588_v27 = vrot.slane %v519_v15, 4 }
 0x177   :  { %v523_v28 = vperm.slane %v515_v22, %v8482_v56  ;;  %v142_v39 = vsel %vm139_vm1, %v7872_v14, %v141_v32  ;;  %v8524_v52 = vperm.slane %v531_v30, %v8477_v43 }
 0x178   :  { %v140_v31 = vsel %vm139_vm1, %v138_v23, %v8454_v20  ;;  %7880 = vrot.lane.b32.xlu1 %v7879_v24, %s8328_s30  ;;  %v589_v34 = vsel %vm139_vm1, 0.0, %v588_v27  ;;  %v596_v37 = vrot.slane %v587_v26, 4  ;;  %v640_v20 = vrot.slane %v531_v30, 4 }
 0x179   :  { %v146_v21 = vperm.slane %v140_v31, %v8477_v43  ;;  %v593_v36 = vperm.slane %v589_v34, %v8477_v43  ;;  %v614_v42 = vrot.slane %v523_v28, 4  ;;  %v613_v45 = vperm.slane %v523_v28, %v8477_v43 }
 0x17a   :  { %v8521_v51 = vperm.slane %v142_v39, %v8477_v43  ;;  %v641_v61 = vsel %vm139_vm1, 0.0, %v640_v20 }
 0x17b   :  { %v165_v40 = vrot.slane %v146_v21, 4  ;;  %v8510_v41 = vpop.permute.xlu2 %134  ;;  %v164_v46 = vsel %vm139_vm1, %v163_v38, %v146_v21  ;;  %v597_v47 = vsel %vm139_vm1, %v593_v36, %v596_v37  ;;  %v594_v48 = vrot.slane %v593_v36, 4 }
 0x17c   :  { %v615_v49 = vsel %vm139_vm1, 0.0, %v614_v42  ;;  %v605_v54 = vperm.slane %v597_v47, %v8482_v56  ;;  %v622_v59 = vrot.slane %v613_v45, 4  ;;  %v170_v60 = vperm.slane %v164_v46, %v8482_v56 }
 0x17d   :  { %v166_v53 = vsel %vm139_vm1, %v158_v25, %v165_v40  ;;  %v595_v57 = vsel %vm139_vm1, %v594_v48, %v587_v26  ;;  %v619_v58 = vperm.slane %v615_v49, %v8477_v43  ;;  %v645_v3 = vperm.slane %v641_v61, %v8477_v43 }
 0x17e   :  { %v601_v55 = vperm.slane %v595_v57, %v8482_v56  ;;  %v1175_v62 = vpack.c.bf16 %v605_v54, %v605_v54  ;;  %v608_v63 = vrot.slane %v605_v54, 4  ;;  %v238_v13 = vperm.slane %v170_v60, %v8477_v43 }
 0x17f   :  { %v620_v0 = vrot.slane %v619_v58, 4  ;;  %v623_v8 = vsel %vm139_vm1, %v619_v58, %v622_v59  ;;  %v239_v34 = vrot.slane %v170_v60, 4  ;;  %v648_v49 = vrot.slane %v8524_v52, 4 }
 0x180   :  { %128 = vrot.lane.b32.xlu1 %v8469_v33, %s8327_s29  ;;  %v1173_v7 = vpack.c.bf16 %v601_v55, %v601_v55  ;;  %v606_v12 = vrot.slane %v601_v55, 4  ;;  %v1248_v14 = vsel %vm1205_vm2, %v1175_v62, 0  ;;  %v631_v15 = vperm.slane %v623_v8, %v8482_v56 }
 0x181   :  { %v609_v18 = vsel %vm139_vm1, 0.0, %v608_v63  ;;  %v621_v22 = vsel %vm139_vm1, %v620_v0, %v613_v45  ;;  %1257 = vmatpush.bf16.xpose.msra.mxu3 %v1248_v14  ;;  %v247_v35 = vrot.slane %v238_v13, 4  ;;  %v240_v40 = vsel %vm139_vm1, 0.0, %v239_v34 }
 0x182   :  { %v1210_v23 = vsel %vm1205_vm2, %v1173_v7, 0  ;;  %v1176_v26 = vpack.c.bf16 %v609_v18, %v609_v18  ;;  %v634_v27 = vrot.slane %v631_v15, 4  ;;  %v1179_v28 = vpack.c.bf16 %v631_v15, %v631_v15 }
 0x183   :  { %v795_v17 = vpop.permute.xlu2 %794  ;;  %1219 = vmatpush.bf16.xpose.msra.mxu1 %v1210_v23  ;;  %v627_v30 = vperm.slane %v621_v22, %v8482_v56  ;;  %v607_v31 = vsel %vm139_vm1, 0.0, %v606_v12  ;;  %v244_v20 = vperm.slane %v240_v40, %v8477_v43  ;;  %v174_v54 = vperm.slane %v166_v53, %v8482_v56 }
 0x184   :  { %v8544_v24 = vadd.f32 %v795_v17, %v8446_v16  ;;  %v8547_v25 = vadd.f32 %v795_v17, %v8451_v19  ;;  %v1267_v32 = vsel %vm1205_vm2, %v1176_v26, 0  ;;  %v1174_v21 = vpack.c.bf16 %v607_v31, %v607_v31 }
 0x185   :  { %v1324_v36 = vsel %vm1205_vm2, %v1179_v28, 0  ;;  %1276 = vmatpush.bf16.xpose.msrb.mxu0 %v1267_v32  ;;  %v1177_v16 = vpack.c.bf16 %v627_v30, %v627_v30  ;;  %v635_v19 = vsel %vm139_vm1, 0.0, %v634_v27  ;;  %v632_v37 = vrot.slane %v627_v30, 4 }
 0x186   :  { %v1229_v38 = vsel %vm1205_vm2, %v1174_v21, 0  ;;  %v1180_v39 = vpack.c.bf16 %v635_v19, %v635_v19  ;;  %v7894_v42 = vpack.i.bf16 %v8547_v25, %v8544_v24  ;;  %v248_v57 = vsel %vm139_vm1, %v244_v20, %v247_v35 }
 0x187   :  { %v1286_v45 = vsel %vm1205_vm2, %v1177_v16, 0  ;;  %1238 = vmatpush.bf16.xpose.msra.mxu2 %v1229_v38  ;;  %v633_v46 = vsel %vm139_vm1, 0.0, %v632_v37  ;;  %v245_v58 = vrot.slane %v244_v20, 4  ;;  %v646_v55 = vrot.slane %v645_v3, 4 }
 0x188   :  { %v1343_v47 = vsel %vm1205_vm2, %v1180_v39, 0  ;;  %v1178_v48 = vpack.c.bf16 %v633_v46, %v633_v46  ;;  %7895 = vrot.lane.b32.xlu2 %v7894_v42, %s8327_s29  ;;  %7890 = vrot.lane.b32.xlu1 %v7894_v42, %s8325_s0  ;;  %v535_v59 = vperm.slane %v8518_v50, %v8482_v56  ;;  %v256_v60 = vperm.slane %v248_v57, %v8482_v56 }
 0x189   :  { %1333 = vmatpush.bf16.xpose.msrb.mxu3 %v1324_v36  ;;  %7885 = vrot.lane.b32.xlu0 %v7894_v42, %s8326_s28  ;;  %v649_v62 = vsel %vm139_vm1, %v645_v3, %v648_v49  ;;  %v176_v53 = vsel %vm139_vm1, %v175_v44, %v8521_v51  ;;  %v246_v0 = vsel %vm139_vm1, %v245_v58, %v238_v13  ;;  %v265_v18 = vrot.slane %v174_v54, 4 }
 0x18a   :  { %v1305_v61 = vsel %vm1205_vm2, %v1178_v48, 0  ;;  %v657_v63 = vperm.slane %v649_v62, %v8482_v56  ;;  %v647_v50 = vsel %vm139_vm1, %v646_v55, %v8524_v52  ;;  %v259_v7 = vrot.slane %v256_v60, 4 }
 0x18b   :  { %1295 = vmatpush.bf16.xpose.msrb.mxu1 %v1286_v45  ;;  %v1143_v8 = vpack.c.bf16 %v256_v60, %v256_v60  ;;  %v252_v12 = vperm.slane %v246_v0, %v8482_v56  ;;  %v653_v14 = vperm.slane %v647_v50, %v8482_v56  ;;  %v264_v17 = vperm.slane %v174_v54, %v8477_v43 }
 0x18c   :  { %v1183_v3 = vpack.c.bf16 %v657_v63, %v657_v63  ;;  %v660_v15 = vrot.slane %v657_v63, 4  ;;  %v260_v22 = vsel %vm139_vm1, 0.0, %v259_v7  ;;  %v665_v28 = vperm.slane %v535_v59, %v8477_v43 }
 0x18d   :  { %1352 = vmatpush.bf16.xpose.msra.mxu0 %v1343_v47  ;;  %7597 = vmatmul.msk.bf16.vlgmr.msra.gmra.mxu3 %vm1205_vm2, %v1143_v8  ;;  %v1141_v44 = vpack.c.bf16 %v252_v12, %v252_v12  ;;  %v1181_v13 = vpack.c.bf16 %v653_v14, %v653_v14  ;;  %v257_v23 = vrot.slane %v252_v12, 4  ;;  %v1144_v26 = vpack.c.bf16 %v260_v22, %v260_v22 }
 0x18e   :  { %v1400_v52 = vsel %vm1205_vm2, %v1183_v3, 0  ;;  %v661_v27 = vsel %vm139_vm1, 0.0, %v660_v15  ;;  %v182_v30 = vperm.slane %v176_v53, %v8482_v56  ;;  %v658_v35 = vrot.slane %v653_v14, 4 }
 0x18f   :  { %1314 = vmatpush.bf16.xpose.msrb.mxu2 %v1305_v61  ;;  %7595 = vmatmul.msk.bf16.vlgmr.msra.gmra.mxu1 %vm1205_vm2, %v1141_v44  ;;  %v1362_v31 = vsel %vm1205_vm2, %v1181_v13, 0  ;;  %v1184_v32 = vpack.c.bf16 %v661_v27, %v661_v27  ;;  %v258_v21 = vsel %vm139_vm1, 0.0, %v257_v23  ;;  %v266_v36 = vsel %vm139_vm1, 0.0, %v265_v18 }
 0x190   :  { %7598 = vmatmul.msk.bf16.vlgmr.msrb.gmra.mxu0 %vm1205_vm2, %v1144_v26  ;;  %v1142_v34 = vpack.c.bf16 %v258_v21, %v258_v21  ;;  %v273_v16 = vrot.slane %v264_v17, 4  ;;  %v270_v37 = vperm.slane %v266_v36, %v8477_v43  ;;  %v659_v38 = vsel %vm139_vm1, 0.0, %v658_v35 }
 0x191   :  { %1409 = vmatpush.bf16.xpose.msra.mxu3 %v1400_v52  ;;  %v1419_v19 = vsel %vm1205_vm2, %v1184_v32, 0  ;;  %v666_v39 = vrot.slane %v535_v59, 4  ;;  %v291_v40 = vrot.slane %v182_v30, 4  ;;  %v1182_v42 = vpack.c.bf16 %v659_v38, %v659_v38 }
 0x192   :  { %7596 = vmatmul.msk.bf16.vlgmr.msra.gmra.mxu2 %vm1205_vm2, %v1142_v34  ;;  %v674_v45 = vrot.slane %v665_v28, 4  ;;  %v274_v20 = vsel %vm139_vm1, %v270_v37, %v273_v16  ;;  %v177_v54 = vrot.slane %v8521_v51, 4  ;;  %v271_v57 = vrot.slane %v270_v37, 4 }
 0x193   :  { %1371 = vmatpush.bf16.xpose.msra.mxu1 %v1362_v31  ;;  %v667_v46 = vsel %vm139_vm1, 0.0, %v666_v39  ;;  %v1381_v47 = vsel %vm1205_vm2, %v1182_v42, 0  ;;  %v282_v48 = vperm.slane %v274_v20, %v8482_v56  ;;  %v292_v58 = vsel %vm139_vm1, 0.0, %v291_v40 }
 0x194   :  { %v671_v49 = vperm.slane %v667_v46, %v8477_v43  ;;  %v290_v61 = vperm.slane %v182_v30, %v8477_v43  ;;  %v272_v53 = vsel %vm139_vm1, %v271_v57, %v264_v17  ;;  %v296_v8 = vperm.slane %v292_v58, %v8477_v43 }
 0x195   :  { %1428 = vmatpush.bf16.xpose.msrb.mxu0 %v1419_v19  ;;  %v285_v55 = vrot.slane %v282_v48, 4  ;;  %v278_v63 = vperm.slane %v272_v53, %v8482_v56  ;;  %v178_v12 = vsel %vm139_vm1, %v8499_v29, %v177_v54  ;;  %v1147_v14 = vpack.c.bf16 %v282_v48, %v282_v48 }
 0x196   :  { %v675_v59 = vsel %vm139_vm1, %v671_v49, %v674_v45  ;;  %v672_v60 = vrot.slane %v671_v49, 4  ;;  %v299_v18 = vrot.slane %v290_v61, 4  ;;  %v186_v30 = vperm.slane %v178_v12, %v8482_v56 }
 0x197   :  { %1390 = vmatpush.bf16.xpose.msra.mxu2 %v1381_v47  ;;  %v683_v62 = vperm.slane %v675_v59, %v8482_v56  ;;  %v286_v3 = vsel %vm139_vm1, 0.0, %v285_v55  ;;  %v283_v15 = vrot.slane %v278_v63, 4  ;;  %v1145_v23 = vpack.c.bf16 %v278_v63, %v278_v63 }
 0x198   :  { %v673_v0 = vsel %vm139_vm1, %v672_v60, %v665_v28  ;;  %v1148_v27 = vpack.c.bf16 %v286_v3, %v286_v3  ;;  %v297_v28 = vrot.slane %v296_v8, 4  ;;  %v300_v35 = vsel %vm139_vm1, %v296_v8, %v299_v18 }
 0x199   :  { %v1187_v50 = vpack.c.bf16 %v683_v62, %v683_v62  ;;  %v679_v51 = vperm.slane %v673_v0, %v8482_v56  ;;  %v686_v7 = vrot.slane %v683_v62, 4  ;;  %v284_v26 = vsel %vm139_vm1, 0.0, %v283_v15 }
 0x19a   :  { %v1146_v34 = vpack.c.bf16 %v284_v26, %v284_v26  ;;  %v298_v16 = vsel %vm139_vm1, %v297_v28, %v290_v61  ;;  %v317_v19 = vrot.slane %v186_v30, 4  ;;  %v308_v37 = vperm.slane %v300_v35, %v8482_v56 }
 0x19b   :  { %v1185_v44 = vpack.c.bf16 %v679_v51, %v679_v51  ;;  %v687_v17 = vsel %vm139_vm1, 0.0, %v686_v7  ;;  %v684_v22 = vrot.slane %v679_v51, 4  ;;  %v1476_v13 = vsel %vm1205_vm2, %v1187_v50, 0 }
 0x19c   :  { %v1188_v52 = vpack.c.bf16 %v687_v17, %v687_v17  ;;  %v304_v38 = vperm.slane %v298_v16, %v8482_v56  ;;  %v311_v39 = vrot.slane %v308_v37, 4  ;;  %v318_v40 = vsel %vm139_vm1, 0.0, %v317_v19 }
 0x19d   :  { %7601 = vmatmul.msk.bf16.vlgmr.msrb.gmra.mxu3 %vm1205_vm2, %v1147_v14  ;;  %v685_v29 = vsel %vm139_vm1, 0.0, %v684_v22  ;;  %v1438_v31 = vsel %vm1205_vm2, %v1185_v44, 0  ;;  %v316_v42 = vperm.slane %v186_v30, %v8477_v43  ;;  %v322_v20 = vperm.slane %v318_v40, %v8477_v43  ;;  %v7876_v14 = vpop.permute.xlu0 %7875 }
 0x19e   :  { %1485 = vmatpush.bf16.xpose.msrb.mxu3 %v1476_v13  ;;  %v1186_v32 = vpack.c.bf16 %v685_v29, %v685_v29  ;;  %v1495_v21 = vsel %vm1205_vm2, %v1188_v52, 0  ;;  %v309_v45 = vrot.slane %v304_v38, 4  ;;  %v1151_v46 = vpack.c.bf16 %v308_v37, %v308_v37 }
 0x19f   :  { %7599 = vmatmul.msk.bf16.vlgmr.msrb.gmra.mxu1 %vm1205_vm2, %v1145_v23  ;;  %v312_v47 = vsel %vm139_vm1, 0.0, %v311_v39  ;;  %v325_v48 = vrot.slane %v316_v42, 4  ;;  %v1149_v49 = vpack.c.bf16 %v304_v38, %v304_v38  ;;  %v323_v58 = vrot.slane %v322_v20, 4 }
 0x1a0   :  { %1447 = vmatpush.bf16.xpose.msrb.mxu1 %v1438_v31  ;;  %7602 = vmatmul.msk.bf16.vlgmr.msra.gmra.mxu0 %vm1205_vm2, %v1148_v27  ;;  %v1457_v36 = vsel %vm1205_vm2, %v1186_v32, 0  ;;  %v310_v54 = vsel %vm139_vm1, 0.0, %v309_v45  ;;  %v1152_v57 = vpack.c.bf16 %v312_v47, %v312_v47  ;;  %v7877_v3 = vunpack.i.l.bf16 %v7876_v14 }
 0x1a1   :  { %1504 = vmatpush.bf16.xpose.msra.mxu0 %v1495_v21  ;;  %v1150_v55 = vpack.c.bf16 %v310_v54, %v310_v54  ;;  %v326_v59 = vsel %vm139_vm1, %v322_v20, %v325_v48  ;;  %v324_v60 = vsel %vm139_vm1, %v323_v58, %v316_v42  ;;  %v7878_v17 = vunpack.i.h.bf16 %v7876_v14 }
 0x1a2   :  { %7600 = vmatmul.msk.bf16.vlgmr.msrb.gmra.mxu2 %vm1205_vm2, %v1146_v34  ;;  %v334_v61 = vperm.slane %v326_v59, %v8482_v56  ;;  %v330_v62 = vperm.slane %v324_v60, %v8482_v56  ;;  %v548_v18 = vrot.slane %v7877_v3, 4  ;;  %v199_v30 = vrot.slane %v8510_v41, 4 }
 0x1a3   :  { %1466 = vmatpush.bf16.xpose.msrb.mxu2 %v1457_v36  ;;  %v550_v52 = vrot.slane %v7878_v17, 4  ;;  %v189_v37 = vrot.slane %v8469_v33, 4 }
 0x1a4   :  { %v337_v53 = vrot.slane %v334_v61, 4  ;;  %v335_v63 = vrot.slane %v330_v62, 4  ;;  %v1155_v0 = vpack.c.bf16 %v334_v61, %v334_v61  ;;  %v1153_v51 = vpack.c.bf16 %v330_v62, %v330_v62 }
 0x1a5   :  { %v549_v13 = vsel %vm139_vm1, %v548_v18, %v7878_v17  ;;  %v123_v28 = vpop.permute.xlu0 %122  ;;  %v551_v21 = vsel %vm139_vm1, %v7877_v3, %v550_v52 }
 0x1a6   :  { %v338_v50 = vsel %vm139_vm1, 0.0, %v337_v53  ;;  %v336_v7 = vsel %vm139_vm1, 0.0, %v335_v63  ;;  %v555_v29 = vperm.slane %v549_v13, %v8477_v43  ;;  %v200_v34 = vsel %vm139_vm1, %v199_v30, %v123_v28 }
 0x1a7   :  { %v1156_v8 = vpack.c.bf16 %v338_v50, %v338_v50  ;;  %v1154_v12 = vpack.c.bf16 %v336_v7, %v336_v7  ;;  %v559_v38 = vperm.slane %v551_v21, %v8477_v43  ;;  %v206_v39 = vperm.slane %v200_v34, %v8477_v43 }
 0x1a8   :  { %v560_v36 = vrot.slane %v555_v29, 4 }
 0x1a9   :  { %v211_v59 = vrot.slane %v206_v39, 4  ;;  %v572_v61 = vrot.slane %v559_v38, 4 }
 0x1ad   :  { %7605 = vmatmul.msk.bf16.vlgmr.msra.gmra.mxu3 %vm1205_vm2, %v1151_v46 }
 0x1af   :  { %7603 = vmatmul.msk.bf16.vlgmr.msra.gmra.mxu1 %vm1205_vm2, %v1149_v49 }
 0x1b0   :  { %7606 = vmatmul.msk.bf16.vlgmr.msrb.gmra.mxu0 %vm1205_vm2, %v1152_v57 }
 0x1b2   :  { %7604 = vmatmul.msk.bf16.vlgmr.msra.gmra.mxu2 %vm1205_vm2, %v1150_v55 }
 0x1bd   :  { %7609 = vmatmul.msk.bf16.vlgmr.msrb.gmra.mxu3 %vm1205_vm2, %v1155_v0 }
 0x1bf   :  { %7607 = vmatmul.msk.bf16.vlgmr.msrb.gmra.mxu1 %vm1205_vm2, %v1153_v51 }
 0x1c0   :  { %7610 = vmatmul.msk.bf16.vlgmr.msra.gmra.mxu0 %vm1205_vm2, %v1156_v8 }
 0x1c2   :  { %7608 = vmatmul.msk.bf16.vlgmr.msrb.gmra.mxu2 %vm1205_vm2, %v1154_v12 }
 0x1e2   :  { %v8652_v15 = vpop.permute.xlu2 %7895 }
 0x1e3   :  { %v7897_v44 = vunpack.i.l.bf16 %v8652_v15 }
 0x1e5   :  { %v7904_v22 = vpack.i.bf16 %v8544_v24, %v7897_v44  ;;  %v201_v24 = vrot.slane %v123_v28, 4 }
 0x1e7   :  { %7905 = vrot.lane.b32.xlu2 %v7904_v22, %s8329_s9  ;;  %v202_v20 = vsel %vm139_vm1, %v8510_v41, %v201_v24 }
 0x1e8   :  { %v8679_v55 = vperm.slane %v202_v20, %v8477_v43 }
 0x1ea   :  { %v7881_v23 = vpop.permute.xlu1 %7880  ;;  %v223_v8 = vrot.slane %v8679_v55, 4 }
 0x1eb   :  { %v7883_v26 = vunpack.i.h.bf16 %v7881_v23  ;;  %v7882_v27 = vunpack.i.l.bf16 %v7881_v23 }
 0x1ed   :  { %v538_v31 = vrot.slane %v7883_v26, 4  ;;  %v536_v32 = vrot.slane %v7882_v27, 4 }
 0x1ef   :  { %v537_v35 = vsel %vm139_vm1, %v536_v32, %v7883_v26  ;;  %v539_v16 = vsel %vm139_vm1, %v7882_v27, %v538_v31 }
 0x1f0   :  { %v543_v19 = vperm.slane %v537_v35, %v8477_v43  ;;  %v547_v46 = vperm.slane %v539_v16, %v8477_v43 }
 0x1f2   :  { %v561_v40 = vsel %vm139_vm1, %v560_v36, %v543_v19  ;;  %v562_v42 = vrot.slane %v543_v19, 4  ;;  %v129_v45 = vpop.permute.xlu1 %128  ;;  %v574_v62 = vrot.slane %v547_v46, 4  ;;  %v573_v12 = vsel %vm139_vm1, %v572_v61, %v547_v46 }
 0x1f3   :  { %v567_v47 = vperm.slane %v561_v40, %v8482_v56  ;;  %v187_v48 = vrot.slane %v129_v45, 4  ;;  %v190_v58 = vsel %vm139_vm1, %v129_v45, %v189_v37  ;;  %v579_v26 = vperm.slane %v573_v12, %v8482_v56 }
 0x1f4   :  { %v563_v49 = vsel %vm139_vm1, %v555_v29, %v562_v42  ;;  %v8683_v53 = vperm.slane %v190_v58, %v8477_v43  ;;  %v575_v18 = vsel %vm139_vm1, %v559_v38, %v574_v62 }
 0x1f5   :  { %v571_v54 = vperm.slane %v563_v49, %v8482_v56  ;;  %v188_v57 = vsel %vm139_vm1, %v187_v48, %v8469_v33  ;;  %v692_v60 = vrot.slane %v567_v47, 4  ;;  %v691_v50 = vperm.slane %v567_v47, %v8477_v43 }
 0x1f6   :  { %v194_v41 = vperm.slane %v188_v57, %v8477_v43  ;;  %v224_v13 = vsel %vm139_vm1, %v223_v8, %v8683_v53  ;;  %v8709_v30 = vperm.slane %v575_v18, %v8482_v56  ;;  %v8729_v45 = vperm.slane %v579_v26, %v8477_v43 }
 0x1f7   :  { %v693_v51 = vsel %vm139_vm1, 0.0, %v692_v60  ;;  %v718_v7 = vrot.slane %v571_v54, 4  ;;  %v717_v3 = vperm.slane %v571_v54, %v8477_v43  ;;  %v700_v52 = vrot.slane %v691_v50, 4 }
 0x1f8   :  { %v212_v63 = vsel %vm139_vm1, %v211_v59, %v194_v41  ;;  %v213_v0 = vrot.slane %v194_v41, 4  ;;  %v697_v23 = vperm.slane %v693_v51, %v8477_v43  ;;  %v8715_v34 = vperm.slane %v224_v13, %v8482_v56 }
 0x1f9   :  { %v218_v33 = vperm.slane %v212_v63, %v8482_v56  ;;  %v719_v28 = vsel %vm139_vm1, 0.0, %v718_v7  ;;  %v726_v21 = vrot.slane %v717_v3, 4  ;;  %v744_v60 = vrot.slane %v579_v26, 4 }
 0x1fa   :  { %v214_v14 = vsel %vm139_vm1, %v206_v39, %v213_v0  ;;  %v8705_v29 = vpop.permute.xlu1 %7890  ;;  %v701_v16 = vsel %vm139_vm1, %v697_v23, %v700_v52  ;;  %v698_v19 = vrot.slane %v697_v23, 4  ;;  %v723_v37 = vperm.slane %v719_v28, %v8477_v43 }
 0x1fb   :  { %v8695_v44 = vperm.slane %v214_v14, %v8482_v56  ;;  %v8698_v17 = vperm.slane %v218_v33, %v8477_v43  ;;  %v343_v22 = vrot.slane %v218_v33, 4  ;;  %v8712_v32 = vpop.permute.xlu0 %7885  ;;  %v7892_v35 = vunpack.i.l.bf16 %v8705_v29 }
 0x1fc   :  { %v7887_v36 = vunpack.i.l.bf16 %v8712_v32  ;;  %v709_v42 = vperm.slane %v701_v16, %v8482_v56  ;;  %v699_v20 = vsel %vm139_vm1, %v698_v19, %v691_v50  ;;  %v727_v46 = vsel %vm139_vm1, %v723_v37, %v726_v21 }
 0x1fd   :  { %v344_v27 = vsel %vm139_vm1, 0.0, %v343_v22  ;;  %v351_v31 = vrot.slane %v8698_v17, 4  ;;  %v8719_v24 = vperm.slane %v8695_v44, %v8477_v43  ;;  %v369_v39 = vrot.slane %v8695_v44, 4 }
 0x1fe   :  { %v348_v38 = vperm.slane %v344_v27, %v8477_v43  ;;  %v7899_v40 = vpack.i.bf16 %v7892_v35, %v7887_v36  ;;  %v724_v47 = vrot.slane %v723_v37, 4  ;;  %v1191_v49 = vpack.c.bf16 %v709_v42, %v709_v42 }
 0x1ff   :  { %v705_v54 = vperm.slane %v699_v20, %v8482_v56  ;;  %v735_v57 = vperm.slane %v727_v46, %v8482_v56  ;;  %v712_v58 = vrot.slane %v709_v42, 4  ;;  %v752_v61 = vrot.slane %v8729_v45, 4 }
 0x200   :  { %v352_v48 = vsel %vm139_vm1, %v348_v38, %v351_v31  ;;  %7900 = vrot.lane.b32.xlu0 %v7899_v40, %s8329_s9  ;;  %v725_v59 = vsel %vm139_vm1, %v724_v47, %v717_v3  ;;  %v1552_v62 = vsel %vm1205_vm2, %v1191_v49, 0  ;;  %v745_v18 = vsel %vm139_vm1, 0.0, %v744_v60 }
 0x201   :  { %v360_v41 = vperm.slane %v352_v48, %v8482_v56  ;;  %v1189_v63 = vpack.c.bf16 %v705_v54, %v705_v54  ;;  %v1195_v0 = vpack.c.bf16 %v735_v57, %v735_v57  ;;  %v713_v50 = vsel %vm139_vm1, 0.0, %v712_v58  ;;  %1561 = vmatpush.bf16.xpose.msra.mxu3 %v1552_v62 }
 0x202   :  { %v1192_v33 = vpack.c.bf16 %v713_v50, %v713_v50  ;;  %v731_v51 = vperm.slane %v725_v59, %v8482_v56  ;;  %v710_v7 = vrot.slane %v705_v54, 4  ;;  %v738_v8 = vrot.slane %v735_v57, 4 }
 0x203   :  { %v1514_v12 = vsel %vm1205_vm2, %v1189_v63, 0  ;;  %v1628_v14 = vsel %vm1205_vm2, %v1195_v0, 0  ;;  %v1159_v3 = vpack.c.bf16 %v360_v41, %v360_v41  ;;  %v749_v28 = vperm.slane %v745_v18, %v8477_v43 }
 0x204   :  { %1523 = vmatpush.bf16.xpose.msra.mxu1 %v1514_v12  ;;  %v1571_v44 = vsel %vm1205_vm2, %v1192_v33, 0  ;;  %v1193_v22 = vpack.c.bf16 %v731_v51, %v731_v51  ;;  %v711_v13 = vsel %vm139_vm1, 0.0, %v710_v7  ;;  %v739_v23 = vsel %vm139_vm1, 0.0, %v738_v8 }
 0x205   :  { %1580 = vmatpush.bf16.xpose.msrb.mxu0 %v1571_v44  ;;  %v1190_v52 = vpack.c.bf16 %v711_v13, %v711_v13  ;;  %v1196_v26 = vpack.c.bf16 %v739_v23, %v739_v23  ;;  %v736_v27 = vrot.slane %v731_v51, 4  ;;  %v349_v21 = vrot.slane %v348_v38, 4 }
 0x206   :  { %v1590_v31 = vsel %vm1205_vm2, %v1193_v22, 0  ;;  %v363_v35 = vrot.slane %v360_v41, 4  ;;  %v753_v37 = vsel %vm139_vm1, %v749_v28, %v752_v61  ;;  %v750_v48 = vrot.slane %v749_v28, 4 }
 0x207   :  { %v1533_v36 = vsel %vm1205_vm2, %v1190_v52, 0  ;;  %v1647_v16 = vsel %vm1205_vm2, %v1196_v26, 0  ;;  %v737_v19 = vsel %vm139_vm1, 0.0, %v736_v27  ;;  %v761_v42 = vperm.slane %v753_v37, %v8482_v56 }
 0x208   :  { %1542 = vmatpush.bf16.xpose.msra.mxu2 %v1533_v36  ;;  %v1194_v40 = vpack.c.bf16 %v737_v19, %v737_v19  ;;  %v350_v20 = vsel %vm139_vm1, %v349_v21, %v8698_v17  ;;  %v364_v38 = vsel %vm139_vm1, 0.0, %v363_v35  ;;  %7613 = vmatmul.msk.bf16.vlgmr.msra.gmra.mxu3 %vm1205_vm2, %v1159_v3  ;;  %v370_v49 = vsel %vm139_vm1, 0.0, %v369_v39 }
 0x209   :  { %1637 = vmatpush.bf16.xpose.msrb.mxu3 %v1628_v14  ;;  %v356_v46 = vperm.slane %v350_v20, %v8482_v56  ;;  %v1160_v47 = vpack.c.bf16 %v364_v38, %v364_v38  ;;  %v1199_v57 = vpack.c.bf16 %v761_v42, %v761_v42  ;;  %v764_v58 = vrot.slane %v761_v42, 4 }
 0x20a   :  { %v1609_v54 = vsel %vm1205_vm2, %v1194_v40, 0  ;;  %v374_v59 = vperm.slane %v370_v49, %v8477_v43  ;;  %v751_v60 = vsel %vm139_vm1, %v750_v48, %v8729_v45  ;;  %v377_v62 = vrot.slane %v8719_v24, 4 }
 0x20b   :  { %v1157_v17 = vpack.c.bf16 %v356_v46, %v356_v46  ;;  %v361_v61 = vrot.slane %v356_v46, 4  ;;  %v1704_v39 = vsel %vm1205_vm2, %v1199_v57, 0  ;;  %v757_v0 = vperm.slane %v751_v60, %v8482_v56 }
 0x20c   :  { %1599 = vmatpush.bf16.xpose.msrb.mxu1 %v1590_v31  ;;  %v8764_v41 = vpop.f32.mrf.mxu1  ;;  %7614 = vmatmul.msk.bf16.vlgmr.msrb.gmra.mxu0 %vm1205_vm2, %v1160_v47  ;;  %v765_v50 = vsel %vm139_vm1, 0.0, %v764_v58  ;;  %v378_v7 = vsel %vm139_vm1, %v374_v59, %v377_v62  ;;  %v769_v8 = vperm.slane %v8709_v30, %v8477_v43  ;;  %v770_v13 = vrot.slane %v8709_v30, 4 }
 0x20d   :  { %1656 = vmatpush.bf16.xpose.msra.mxu0 %v1647_v16  ;;  %v8769_v63 = vpop.f32.mrf.mxu0  ;;  %v1815_v33 = vsel %vm1814_vm3, %v8764_v41, -inf  ;;  %7611 = vmatmul.msk.bf16.vlgmr.msra.gmra.mxu1 %vm1205_vm2, %v1157_v17  ;;  %v1200_v45 = vpack.c.bf16 %v765_v50, %v765_v50  ;;  %v362_v51 = vsel %vm139_vm1, 0.0, %v361_v61  ;;  %v1197_v12 = vpack.c.bf16 %v757_v0, %v757_v0 }
 0x20e   :  { %v1158_v14 = vpack.c.bf16 %v362_v51, %v362_v51  ;;  %v762_v3 = vrot.slane %v757_v0, 4  ;;  %v386_v18 = vperm.slane %v378_v7, %v8482_v56  ;;  %v778_v27 = vrot.slane %v769_v8, 4 }
 0x20f   :  { %v1723_v22 = vsel %vm1205_vm2, %v1200_v45, 0  ;;  %v1666_v23 = vsel %vm1205_vm2, %v1197_v12, 0  ;;  %v395_v28 = vrot.slane %v8715_v34, 4  ;;  %v771_v21 = vsel %vm139_vm1, 0.0, %v770_v13 }
 0x210   :  { %1618 = vmatpush.bf16.xpose.msrb.mxu2 %v1609_v54  ;;  %1816 = vmax.xlane.f32.xlu2 %v1815_v33  ;;  %v8783_v44 = vpop.f32.mrf.mxu3  ;;  %v763_v52 = vsel %vm139_vm1, 0.0, %v762_v3  ;;  %v375_v35 = vrot.slane %v374_v59, 4  ;;  %v775_v30 = vperm.slane %v771_v21, %v8477_v43  ;;  %v389_v36 = vrot.slane %v386_v18, 4 }
 0x211   :  { %1713 = vmatpush.bf16.xpose.msra.mxu3 %v1704_v39  ;;  %7612 = vmatmul.msk.bf16.vlgmr.msra.gmra.mxu2 %vm1205_vm2, %v1158_v14  ;;  %v1821_v26 = vsel %vm1814_vm3, %v8783_v44, -inf  ;;  %v1198_v31 = vpack.c.bf16 %v763_v52, %v763_v52  ;;  %v394_v40 = vperm.slane %v8715_v34, %v8477_v43  ;;  %v396_v48 = vsel %vm139_vm1, 0.0, %v395_v28 }
 0x212   :  { %1822 = vmax.xlane.f32.xlu1 %v1821_v26  ;;  %v376_v37 = vsel %vm139_vm1, %v375_v35, %v8719_v24  ;;  %v779_v38 = vsel %vm139_vm1, %v775_v30, %v778_v27  ;;  %v776_v47 = vrot.slane %v775_v30, 4  ;;  %v1824_v54 = vsel %vm1814_vm3, %v8769_v63, -inf }
 0x213   :  { %v1685_v16 = vsel %vm1205_vm2, %v1198_v31, 0  ;;  %v382_v46 = vperm.slane %v376_v37, %v8482_v56  ;;  %v787_v49 = vperm.slane %v779_v38, %v8482_v56  ;;  %v225_v24 = vrot.slane %v8683_v53, 4 }
 0x214   :  { %1675 = vmatpush.bf16.xpose.msra.mxu1 %v1666_v23  ;;  %v1223_v19 = vpop.f32.mrf.mxu1  ;;  %v1163_v57 = vpack.c.bf16 %v386_v18, %v386_v18  ;;  %v777_v34 = vsel %vm139_vm1, %v776_v47, %v769_v8  ;;  %v390_v58 = vsel %vm139_vm1, 0.0, %v389_v36  ;;  %v400_v39 = vperm.slane %v396_v48, %v8477_v43 }
 0x215   :  { %1732 = vmatpush.bf16.xpose.msrb.mxu0 %v1723_v22  ;;  %v8800_v42 = vpop.f32.mrf.mxu2  ;;  %v1280_v20 = vpop.f32.mrf.mxu0  ;;  %v1203_v17 = vpack.c.bf16 %v787_v49, %v787_v49  ;;  %v783_v60 = vperm.slane %v777_v34, %v8482_v56  ;;  %v790_v61 = vrot.slane %v787_v49, 4  ;;  %v387_v62 = vrot.slane %v382_v46, 4 }
 0x216   :  { %v403_v0 = vrot.slane %v394_v40, 4  ;;  %v226_v45 = vsel %vm139_vm1, %v8679_v55, %v225_v24  ;;  %v1164_v51 = vpack.c.bf16 %v390_v58, %v390_v58  ;;  %v1161_v14 = vpack.c.bf16 %v382_v46, %v382_v46 }
 0x217   :  { %v1780_v50 = vsel %vm1205_vm2, %v1203_v17, 0  ;;  %v1201_v53 = vpack.c.bf16 %v783_v60, %v783_v60  ;;  %v791_v33 = vsel %vm139_vm1, 0.0, %v790_v61  ;;  %v788_v8 = vrot.slane %v783_v60, 4 }
 0x218   :  { %1694 = vmatpush.bf16.xpose.msra.mxu2 %v1685_v16  ;;  %1825 = vmax.xlane.f32.xlu2 %v1824_v54  ;;  %v1261_v59 = vpop.f32.mrf.mxu3  ;;  %v1204_v7 = vpack.c.bf16 %v791_v33, %v791_v33  ;;  %v388_v3 = vsel %vm139_vm1, 0.0, %v387_v62  ;;  %v401_v18 = vrot.slane %v400_v39, 4  ;;  %v404_v55 = vsel %vm139_vm1, %v400_v39, %v403_v0 }
 0x219   :  { %7617 = vmatmul.msk.bf16.vlgmr.msrb.gmra.mxu3 %vm1205_vm2, %v1163_v57  ;;  %v789_v52 = vsel %vm139_vm1, 0.0, %v788_v8  ;;  %v234_v26 = vperm.slane %v226_v45, %v8482_v56  ;;  %v1742_v27 = vsel %vm1205_vm2, %v1201_v53, 0  ;;  %v1162_v21 = vpack.c.bf16 %v388_v3, %v388_v3 }
 0x21a   :  { %1789 = vmatpush.bf16.xpose.msrb.mxu3 %v1780_v50  ;;  %v1799_v23 = vsel %vm1205_vm2, %v1204_v7, 0  ;;  %v1202_v28 = vpack.c.bf16 %v789_v52, %v789_v52  ;;  %v412_v30 = vperm.slane %v404_v55, %v8482_v56  ;;  %v402_v19 = vsel %vm139_vm1, %v401_v18, %v394_v40 }
 0x21b   :  { %v421_v37 = vrot.slane %v234_v26, 4  ;;  %v408_v38 = vperm.slane %v402_v19, %v8482_v56  ;;  %v420_v47 = vperm.slane %v234_v26, %v8477_v43  ;;  %v1818_v17 = vsel %vm1814_vm3, %v8800_v42, -inf }
 0x21c   :  { %v8818_v12 = vpop.f32.mrf.mxu1  ;;  %7618 = vmatmul.msk.bf16.vlgmr.msra.gmra.mxu0 %vm1205_vm2, %v1164_v51  ;;  %v1761_v36 = vsel %vm1205_vm2, %v1202_v28, 0  ;;  %v415_v46 = vrot.slane %v412_v30, 4  ;;  %v1167_v57 = vpack.c.bf16 %v412_v30, %v412_v30 }
 0x21d   :  { %v1242_v22 = vpop.f32.mrf.mxu2  ;;  %v8821_v13 = vpop.f32.mrf.mxu0  ;;  %7615 = vmatmul.msk.bf16.vlgmr.msrb.gmra.mxu1 %vm1205_vm2, %v1161_v14  ;;  %1808 = vmatpush.bf16.xpose.msra.mxu0 %v1799_v23  ;;  %v422_v54 = vsel %vm139_vm1, 0.0, %v421_v37  ;;  %v413_v58 = vrot.slane %v408_v38, 4  ;;  %v429_v59 = vrot.slane %v420_v47, 4  ;;  %v1165_v62 = vpack.c.bf16 %v408_v38, %v408_v38 }
 0x21e   :  { %v1836_v31 = vsel %vm1814_vm3, %v8821_v13, -inf  ;;  %1751 = vmatpush.bf16.xpose.msrb.mxu1 %v1742_v27  ;;  %v416_v34 = vsel %vm139_vm1, 0.0, %v415_v46  ;;  %v426_v40 = vperm.slane %v422_v54, %v8477_v43  ;;  %v1827_v3 = vsel %vm1814_vm3, %v8818_v12, -inf }
 0x21f   :  { %v1168_v60 = vpack.c.bf16 %v416_v34, %v416_v34  ;;  %v414_v39 = vsel %vm139_vm1, 0.0, %v413_v58 }
 0x220   :  { %1837 = vmax.xlane.f32.xlu2 %v1836_v31  ;;  %v8832_v35 = vpop.f32.mrf.mxu3  ;;  %v427_v0 = vrot.slane %v426_v40, 4  ;;  %v430_v45 = vsel %vm139_vm1, %v426_v40, %v429_v59  ;;  %v1166_v51 = vpack.c.bf16 %v414_v39, %v414_v39 }
 0x221   :  { %7616 = vmatmul.msk.bf16.vlgmr.msrb.gmra.mxu2 %vm1205_vm2, %v1162_v21  ;;  %v1833_v16 = vsel %vm1814_vm3, %v8832_v35, -inf  ;;  %v438_v8 = vperm.slane %v430_v45, %v8482_v56 }
 0x222   :  { %1770 = vmatpush.bf16.xpose.msrb.mxu2 %v1761_v36  ;;  %1834 = vmax.xlane.f32.xlu1 %v1833_v16  ;;  %v428_v18 = vsel %vm139_vm1, %v427_v0, %v420_v47 }
 0x223   :  { %v434_v23 = vperm.slane %v428_v18, %v8482_v56  ;;  %v441_v52 = vrot.slane %v438_v8, 4  ;;  %v1171_v31 = vpack.c.bf16 %v438_v8, %v438_v8 }
 0x224   :  { %v1299_v20 = vpop.f32.mrf.mxu1 }
 0x225   :  { %v8842_v48 = vpop.f32.mrf.mxu2  ;;  %v1356_v49 = vpop.f32.mrf.mxu0  ;;  %v442_v21 = vsel %vm139_vm1, 0.0, %v441_v52  ;;  %v439_v30 = vrot.slane %v434_v23, 4  ;;  %v1169_v37 = vpack.c.bf16 %v434_v23, %v434_v23 }
 0x226   :  { %v1830_v36 = vsel %vm1814_vm3, %v8842_v48, -inf  ;;  %v1172_v16 = vpack.c.bf16 %v442_v21, %v442_v21 }
 0x227   :  { %v440_v20 = vsel %vm139_vm1, 0.0, %v439_v30 }
 0x228   :  { %v1337_v24 = vpop.f32.mrf.mxu3  ;;  %v1170_v49 = vpack.c.bf16 %v440_v20, %v440_v20 }
 0x229   :  { %7621 = vmatmul.msk.bf16.vlgmr.msra.gmra.mxu3 %vm1205_vm2, %v1167_v57 }
 0x22a   :  { %1819 = vmax.xlane.f32.xlu0 %v1818_v17 }
 0x22c   :  { %v8850_v61 = vpop.f32.mrf.mxu1  ;;  %7622 = vmatmul.msk.bf16.vlgmr.msrb.gmra.mxu0 %vm1205_vm2, %v1168_v60 }
 0x22d   :  { %v1318_v50 = vpop.f32.mrf.mxu2  ;;  %v8853_v53 = vpop.f32.mrf.mxu0  ;;  %v1839_v33 = vsel %vm1814_vm3, %v8850_v61, -inf  ;;  %7619 = vmatmul.msk.bf16.vlgmr.msra.gmra.mxu1 %vm1205_vm2, %v1165_v62 }
 0x22e   :  { %1840 = vmax.xlane.f32.xlu1 %v1839_v33  ;;  %v1848_v27 = vsel %vm1814_vm3, %v8853_v53, -inf }
 0x230   :  { %v8860_v7 = vpop.f32.mrf.mxu3 }
 0x231   :  { %7620 = vmatmul.msk.bf16.vlgmr.msra.gmra.mxu2 %vm1205_vm2, %v1166_v51  ;;  %v1845_v14 = vsel %vm1814_vm3, %v8860_v7, -inf }
 0x232   :  { %1846 = vmax.xlane.f32.xlu2 %v1845_v14  ;;  %1828 = vmax.xlane.f32.xlu0 %v1827_v3 }
 0x234   :  { %v1375_v22 = vpop.f32.mrf.mxu1 }
 0x235   :  { %v8870_v55 = vpop.f32.mrf.mxu2  ;;  %v1432_v26 = vpop.f32.mrf.mxu0 }
 0x236   :  { %1849 = vmax.xlane.f32.xlu1 %v1848_v27  ;;  %v1842_v47 = vsel %vm1814_vm3, %v8870_v55, -inf }
 0x238   :  { %v1413_v28 = vpop.f32.mrf.mxu3 }
 0x239   :  { %7625 = vmatmul.msk.bf16.vlgmr.msrb.gmra.mxu3 %vm1205_vm2, %v1171_v31 }
 0x23a   :  { %1831 = vmax.xlane.f32.xlu0 %v1830_v36 }
 0x23c   :  { %v8878_v19 = vpop.f32.mrf.mxu1  ;;  %7626 = vmatmul.msk.bf16.vlgmr.msra.gmra.mxu0 %vm1205_vm2, %v1172_v16 }
 0x23d   :  { %v1394_v38 = vpop.f32.mrf.mxu2  ;;  %v8881_v46 = vpop.f32.mrf.mxu0  ;;  %7623 = vmatmul.msk.bf16.vlgmr.msrb.gmra.mxu1 %vm1205_vm2, %v1169_v37  ;;  %v1851_v39 = vsel %vm1814_vm3, %v8878_v19, -inf }
 0x23e   :  { %1843 = vmax.xlane.f32.xlu1 %v1842_v47  ;;  %v1860_v33 = vsel %vm1814_vm3, %v8881_v46, -inf }
 0x240   :  { %v8887_v54 = vpop.f32.mrf.mxu3 }
 0x241   :  { %v7906_v24 = vpop.permute.xlu2 %7905  ;;  %7624 = vmatmul.msk.bf16.vlgmr.msrb.gmra.mxu2 %vm1205_vm2, %v1170_v49  ;;  %v1857_v34 = vsel %vm1814_vm3, %v8887_v54, -inf }
 0x242   :  { %v7908_v57 = vunpack.i.h.bf16 %v7906_v24  ;;  %1858 = vmax.xlane.f32.xlu0 %v1857_v34  ;;  %v7907_v40 = vunpack.i.l.bf16 %v7906_v24 }
 0x244   :  { %v839_v58 = vrot.slane %v7908_v57, 4  ;;  %v1451_v59 = vpop.f32.mrf.mxu1  ;;  %v837_v51 = vrot.slane %v7907_v40, 4 }
 0x245   :  { %v8892_v17 = vpop.f32.mrf.mxu2  ;;  %v1508_v60 = vpop.f32.mrf.mxu0 }
 0x246   :  { %v840_v62 = vsel %vm139_vm1, %v7907_v40, %v839_v58  ;;  %1852 = vmax.xlane.f32.xlu1 %v1851_v39  ;;  %v1854_v45 = vsel %vm1814_vm3, %v8892_v17, -inf  ;;  %v838_v8 = vsel %vm139_vm1, %v837_v51, %v7908_v57 }
 0x247   :  { %v844_v22 = vperm.slane %v838_v8, %v8477_v43  ;;  %v848_v23 = vperm.slane %v840_v62, %v8477_v43 }
 0x248   :  { %v1489_v0 = vpop.f32.mrf.mxu3 }
 0x249   :  { %v863_v31 = vrot.slane %v844_v22, 4  ;;  %v875_v21 = vrot.slane %v848_v23, 4 }
 0x24d   :  { %v1470_v50 = vpop.f32.mrf.mxu2 }
 0x24e   :  { %1861 = vmax.xlane.f32.xlu1 %v1860_v33 }
 0x256   :  { %1855 = vmax.xlane.f32.xlu1 %v1854_v45 }
 0x272   :  { %v7901_v14 = vpop.permute.xlu0 %7900 }
 0x273   :  { %v7903_v3 = vunpack.i.h.bf16 %v7901_v14  ;;  %v7902_v18 = vunpack.i.l.bf16 %v7901_v14 }
 0x275   :  { %v851_v52 = vrot.slane %v7903_v3, 4  ;;  %v849_v26 = vrot.slane %v7902_v18, 4 }
 0x277   :  { %v850_v27 = vsel %vm139_vm1, %v849_v26, %v7903_v3  ;;  %v852_v28 = vsel %vm139_vm1, %v7902_v18, %v851_v52 }
 0x278   :  { %v856_v30 = vperm.slane %v850_v27, %v8477_v43  ;;  %v860_v36 = vperm.slane %v852_v28, %v8477_v43 }
 0x27a   :  { %v861_v16 = vrot.slane %v856_v30, 4  ;;  %v864_v37 = vsel %vm139_vm1, %v856_v30, %v863_v31  ;;  %v873_v20 = vrot.slane %v860_v36, 4  ;;  %v8910_v38 = vsel %vm139_vm1, %v860_v36, %v875_v21 }
 0x27b   :  { %v872_v47 = vperm.slane %v864_v37, %v8482_v56 }
 0x27c   :  { %v862_v49 = vsel %vm139_vm1, %v861_v16, %v844_v22  ;;  %v8915_v24 = vsel %vm139_vm1, %v873_v20, %v848_v23 }
 0x27d   :  { %v868_v57 = vperm.slane %v862_v49, %v8482_v56  ;;  %v962_v34 = vperm.slane %v872_v47, %v8477_v43  ;;  %v963_v58 = vrot.slane %v872_v47, 4 }
 0x27f   :  { %v936_v40 = vperm.slane %v868_v57, %v8477_v43  ;;  %v937_v59 = vrot.slane %v868_v57, 4  ;;  %v971_v60 = vrot.slane %v962_v34, 4  ;;  %v964_v62 = vsel %vm139_vm1, 0.0, %v963_v58 }
 0x280   :  { %v968_v50 = vperm.slane %v964_v62, %v8477_v43 }
 0x281   :  { %v938_v39 = vsel %vm139_vm1, 0.0, %v937_v59  ;;  %v945_v0 = vrot.slane %v936_v40, 4 }
 0x282   :  { %v942_v33 = vperm.slane %v938_v39, %v8477_v43  ;;  %v972_v45 = vsel %vm139_vm1, %v968_v50, %v971_v60  ;;  %v969_v51 = vrot.slane %v968_v50, 4 }
 0x283   :  { %v980_v14 = vperm.slane %v972_v45, %v8482_v56 }
 0x284   :  { %v946_v8 = vsel %vm139_vm1, %v942_v33, %v945_v0  ;;  %v943_v3 = vrot.slane %v942_v33, 4  ;;  %v970_v22 = vsel %vm139_vm1, %v969_v51, %v962_v34 }
 0x285   :  { %v954_v18 = vperm.slane %v946_v8, %v8482_v56  ;;  %v2205_v23 = vpack.c.bf16 %v980_v14, %v980_v14  ;;  %v976_v26 = vperm.slane %v970_v22, %v8482_v56  ;;  %v983_v30 = vrot.slane %v980_v14, 4  ;;  %v1817_v22 = vpop.xlane.xlu2 %1816 }
 0x286   :  { %v944_v52 = vsel %vm139_vm1, %v943_v3, %v936_v40 }
 0x287   :  { %v2201_v27 = vpack.c.bf16 %v954_v18, %v954_v18  ;;  %v950_v28 = vperm.slane %v944_v52, %v8482_v56  ;;  %v957_v31 = vrot.slane %v954_v18, 4  ;;  %v2203_v21 = vpack.c.bf16 %v976_v26, %v976_v26 }
 0x288   :  { %v2351_v49 = vsel %vm2235_vm4, %v2205_v23, 0  ;;  %v984_v34 = vsel %vm139_vm1, 0.0, %v983_v30  ;;  %v981_v50 = vrot.slane %v976_v26, 4  ;;  %v1823_v23 = vpop.xlane.xlu1 %1822 }
 0x289   :  { %v2275_v36 = vsel %vm2235_vm4, %v2201_v27, 0  ;;  %v2199_v16 = vpack.c.bf16 %v950_v28, %v950_v28  ;;  %v958_v37 = vsel %vm139_vm1, 0.0, %v957_v31  ;;  %v955_v20 = vrot.slane %v950_v28, 4  ;;  %v8934_v47 = vpop.f32.mrf.mxu0 }
 0x28a   :  { %2284 = vmatpush.bf16.msra.mxu3 %v2275_v36  ;;  %v2202_v57 = vpack.c.bf16 %v958_v37, %v958_v37  ;;  %v8938_v58 = vpop.f32.mrf.mxu1  ;;  %v2206_v59 = vpack.c.bf16 %v984_v34, %v984_v34  ;;  %v2313_v45 = vsel %vm2235_vm4, %v2203_v21, 0  ;;  %v982_v3 = vsel %vm139_vm1, 0.0, %v981_v50 }
 0x28b   :  { %v2237_v40 = vsel %vm2235_vm4, %v2199_v16, 0  ;;  %v956_v60 = vsel %vm139_vm1, 0.0, %v955_v20  ;;  %v1863_v62 = vsel %vm1814_vm3, %v8938_v58, -inf  ;;  %v8945_v33 = vpop.f32.mrf.mxu3  ;;  %v2204_v18 = vpack.c.bf16 %v982_v3, %v982_v3 }
 0x28c   :  { %2246 = vmatpush.bf16.msra.mxu1 %v2237_v40  ;;  %v2294_v39 = vsel %vm2235_vm4, %v2202_v57, 0  ;;  %v2200_v0 = vpack.c.bf16 %v956_v60, %v956_v60  ;;  %1864 = vmax.xlane.f32.xlu0 %v1863_v62  ;;  %v2370_v51 = vsel %vm2235_vm4, %v2206_v59, 0  ;;  %v1869_v8 = vsel %vm1814_vm3, %v8945_v33, -inf }
 0x28d   :  { %2303 = vmatpush.bf16.msrb.mxu0 %v2294_v39  ;;  %1870 = vmax.xlane.f32.xlu1 %v1869_v8  ;;  %v2332_v52 = vsel %vm2235_vm4, %v2204_v18, 0  ;;  %v1872_v31 = vsel %vm1814_vm3, %v8934_v47, -inf  ;;  %v1911_v21 = vsub.f32 %v8764_v41, %v1817_v22  ;;  %v1826_v37 = vpop.xlane.xlu2 %1825 }
 0x28e   :  { %2360 = vmatpush.bf16.msrb.mxu3 %v2351_v49  ;;  %v2256_v14 = vsel %vm2235_vm4, %v2200_v0, 0  ;;  %v1914_v41 = vsub.f32 %v8769_v63, %v1826_v37 }
 0x28f   :  { %2265 = vmatpush.bf16.msra.mxu2 %v2256_v14  ;;  %v1943_v36 = vmul.f32 1.442695, %v1911_v21  ;;  %v1913_v14 = vsub.f32 %v8783_v44, %v1823_v23 }
 0x290   :  { %2322 = vmatpush.bf16.msrb.mxu1 %v2313_v45  ;;  %v1949_v39 = vmul.f32 1.442695, %v1914_v41 }
 0x291   :  { %2379 = vmatpush.bf16.msra.mxu0 %v2370_v51  ;;  %v1584_v26 = vpop.f32.mrf.mxu0  ;;  %8020 = vpow2.f32 %v1943_v36 }
 0x292   :  { %v1527_v27 = vpop.f32.mrf.mxu1  ;;  %8022 = vpow2.f32 %v1949_v39  ;;  %v1947_v26 = vmul.f32 1.442695, %v1913_v14 }
 0x293   :  { %2341 = vmatpush.bf16.msrb.mxu2 %v2332_v52  ;;  %v1565_v30 = vpop.f32.mrf.mxu3 }
 0x294   :  { %v8954_v28 = vpop.f32.mrf.mxu2  ;;  %1873 = vmax.xlane.f32.xlu0 %v1872_v31  ;;  %8024 = vpow2.f32 %v1947_v26 }
 0x295   :  { %v8959_v16 = vpop.xlane.xlu1 %1834  ;;  %v1866_v40 = vsel %vm1814_vm3, %v8954_v28, -inf  ;;  %v1838_v31 = vpop.xlane.xlu2 %1837 }
 0x297   :  { %v8976_v45 = vpop.eup %8020 }
 0x298   :  { %v2007_v22 = vsel %vm1814_vm3, %v8976_v45, 0.0  ;;  %v8990_v44 = vpop.eup %8022 }
 0x299   :  { %v8961_v20 = vpop.f32.mrf.mxu0  ;;  %v2016_v41 = vsel %vm1814_vm3, %v8990_v44, 0.0 }
 0x29a   :  { %v8963_v49 = vpop.f32.mrf.mxu1  ;;  %v1884_v63 = vsel %vm1814_vm3, %v8961_v20, -inf }
 0x29b   :  { %v1875_v34 = vsel %vm1814_vm3, %v8963_v49, -inf }
 0x29c   :  { %v1546_v57 = vpop.f32.mrf.mxu2  ;;  %1876 = vmax.xlane.f32.xlu2 %v1875_v34  ;;  %1867 = vmax.xlane.f32.xlu0 %v1866_v40  ;;  %v8970_v59 = vpop.f32.mrf.mxu3  ;;  %v1918_v34 = vsub.f32 %v8821_v13, %v1838_v31 }
 0x29d   :  { %v1881_v60 = vsel %vm1814_vm3, %v8970_v59, -inf  ;;  %v1820_v62 = vpop.xlane.xlu0 %1819 }
 0x29e   :  { %1882 = vmax.xlane.f32.xlu1 %v1881_v60  ;;  %v1912_v36 = vsub.f32 %v8800_v42, %v1820_v62  ;;  %v1957_v39 = vmul.f32 1.442695, %v1918_v34 }
 0x2a0   :  { %v1945_v60 = vmul.f32 1.442695, %v1912_v36 }
 0x2a1   :  { %v8974_v0 = vpop.xlane.xlu1 %1840  ;;  %v1660_v50 = vpop.f32.mrf.mxu0 }
 0x2a2   :  { %v1603_v51 = vpop.f32.mrf.mxu1 }
 0x2a4   :  { %v8978_v8 = vpop.f32.mrf.mxu2  ;;  %1885 = vmax.xlane.f32.xlu2 %v1884_v63  ;;  %v1641_v18 = vpop.f32.mrf.mxu3 }
 0x2a5   :  { %v1878_v3 = vsel %vm1814_vm3, %v8978_v8, -inf  ;;  %v1829_v52 = vpop.xlane.xlu0 %1828  ;;  %v9003_v63 = vpop.eup %8024 }
 0x2a6   :  { %1879 = vmax.xlane.f32.xlu0 %v1878_v3  ;;  %2008 = vadd.xlane.f32.xlu1 %v2007_v22  ;;  %v1915_v3 = vsub.f32 %v8818_v12, %v1829_v52  ;;  %v2013_v31 = vsel %vm1814_vm3, %v9003_v63, 0.0 }
 0x2a8   :  { %v1951_v12 = vmul.f32 1.442695, %v1915_v3 }
 0x2a9   :  { %v1850_v27 = vpop.xlane.xlu1 %1849  ;;  %v8988_v30 = vpop.f32.mrf.mxu0 }
 0x2aa   :  { %v1922_v21 = vsub.f32 %v8853_v53, %v1850_v27  ;;  %v8992_v23 = vpop.f32.mrf.mxu1 }
 0x2ac   :  { %v1965_v37 = vmul.f32 1.442695, %v1922_v21  ;;  %v1622_v57 = vpop.f32.mrf.mxu2  ;;  %v8996_v40 = vpop.f32.mrf.mxu3 }
 0x2ad   :  { %v1893_v53 = vsel %vm1814_vm3, %v8996_v40, -inf  ;;  %v1832_v62 = vpop.xlane.xlu0 %1831 }
 0x2ae   :  { %8026 = vpow2.f32 %v1965_v37  ;;  %2017 = vadd.xlane.f32.xlu1 %v2016_v41  ;;  %1894 = vmax.xlane.f32.xlu0 %v1893_v53  ;;  %v1916_v26 = vsub.f32 %v8842_v48, %v1832_v62  ;;  %v1917_v53 = vsub.f32 %v8832_v35, %v8959_v16 }
 0x2af   :  { %8028 = vpow2.f32 %v1945_v60 }
 0x2b0   :  { %8030 = vpow2.f32 %v1957_v39  ;;  %v1953_v52 = vmul.f32 1.442695, %v1916_v26  ;;  %v1919_v39 = vsub.f32 %v8850_v61, %v8974_v0  ;;  %v1955_v35 = vmul.f32 1.442695, %v1917_v53  ;;  %v1847_v61 = vpop.xlane.xlu2 %1846 }
 0x2b1   :  { %v1844_v50 = vpop.xlane.xlu1 %1843  ;;  %v1736_v51 = vpop.f32.mrf.mxu0 }
 0x2b2   :  { %v1920_v42 = vsub.f32 %v8870_v55, %v1844_v50  ;;  %v1679_v13 = vpop.f32.mrf.mxu1  ;;  %v1959_v16 = vmul.f32 1.442695, %v1919_v39 }
 0x2b4   :  { %v9005_v14 = vpop.eup %8026  ;;  %v1961_v18 = vmul.f32 1.442695, %v1920_v42  ;;  %v9008_v22 = vpop.f32.mrf.mxu2 }
 0x2b5   :  { %v1890_v27 = vsel %vm1814_vm3, %v9008_v22, -inf  ;;  %v1717_v55 = vpop.f32.mrf.mxu3  ;;  %v2040_v21 = vsel %vm1814_vm3, %v9005_v14, 0.0  ;;  %v9019_v37 = vpop.eup %8028 }
 0x2b6   :  { %8032 = vpow2.f32 %v1961_v18  ;;  %1891 = vmax.xlane.f32.xlu2 %v1890_v27  ;;  %2014 = vadd.xlane.f32.xlu1 %v2013_v31  ;;  %v9023_v57 = vpop.eup %8030  ;;  %v2010_v50 = vsel %vm1814_vm3, %v9019_v37, 0.0  ;;  %v1921_v55 = vsub.f32 %v8860_v7, %v1847_v61  ;;  %v1859_v53 = vpop.xlane.xlu0 %1858 }
 0x2b7   :  { %2041 = vadd.xlane.f32.xlu0 %v2040_v21  ;;  %8034 = vpow2.f32 %v1951_v12  ;;  %v2028_v62 = vsel %vm1814_vm3, %v9023_v57, 0.0  ;;  %v1925_v7 = vsub.f32 %v8887_v54, %v1859_v53 }
 0x2b8   :  { %8036 = vpow2.f32 %v1953_v52  ;;  %v1963_v52 = vmul.f32 1.442695, %v1921_v55  ;;  %v1896_v55 = vsel %vm1814_vm3, %v8988_v30, -inf }
 0x2b9   :  { %v9017_v36 = vpop.xlane.xlu1 %1852  ;;  %v9021_v48 = vpop.f32.mrf.mxu0  ;;  %8038 = vpow2.f32 %v1955_v35 }
 0x2ba   :  { %v9025_v34 = vpop.f32.mrf.mxu1  ;;  %8040 = vpow2.f32 %v1959_v16 }
 0x2bb   :  { %8042 = vpow2.f32 %v1963_v52 }
 0x2bc   :  { %v9027_v41 = vpop.eup %8032  ;;  %v1698_v60 = vpop.f32.mrf.mxu2 }
 0x2bd   :  { %v9035_v42 = vpop.f32.mrf.mxu3  ;;  %v2034_v51 = vsel %vm1814_vm3, %v9027_v41, 0.0  ;;  %v9041_v3 = vpop.eup %8034 }
 0x2be   :  { %2011 = vadd.xlane.f32.xlu2 %v2010_v50  ;;  %2029 = vadd.xlane.f32.xlu1 %v2028_v62  ;;  %v9043_v18 = vpop.eup %8036  ;;  %v2019_v31 = vsel %vm1814_vm3, %v9041_v3, 0.0 }
 0x2bf   :  { %2035 = vadd.xlane.f32.xlu0 %v2034_v51  ;;  %v2022_v12 = vsel %vm1814_vm3, %v9043_v18, 0.0  ;;  %v9052_v39 = vpop.eup %8038 }
 0x2c0   :  { %v9055_v62 = vpop.eup %8040  ;;  %v2025_v16 = vsel %vm1814_vm3, %v9052_v39, 0.0 }
 0x2c1   :  { %v1862_v13 = vpop.xlane.xlu1 %1861  ;;  %v1812_v0 = vpop.f32.mrf.mxu0  ;;  %v2031_v61 = vsel %vm1814_vm3, %v9055_v62, 0.0 }
 0x2c2   :  { %v1755_v26 = vpop.f32.mrf.mxu1  ;;  %v1971_v0 = vmul.f32 1.442695, %v1925_v7 }
 0x2c3   :  { %v9062_v26 = vpop.eup %8042 }
 0x2c4   :  { %v9045_v27 = vpop.f32.mrf.mxu2 }
 0x2c5   :  { %v1793_v21 = vpop.f32.mrf.mxu3 }
 0x2c6   :  { %2020 = vadd.xlane.f32.xlu2 %v2019_v31  ;;  %2023 = vadd.xlane.f32.xlu1 %v2022_v12  ;;  %v2037_v31 = vsel %vm1814_vm3, %v9062_v26, 0.0  ;;  %v1926_v12 = vsub.f32 %v8881_v46, %v1862_v13  ;;  %v7888_v46 = vunpack.i.h.bf16 %v8712_v32 }
 0x2c8   :  { %v1973_v53 = vmul.f32 1.442695, %v1926_v12  ;;  %v880_v12 = vperm.slane %v8915_v24, %v8482_v56 }
 0x2c9   :  { %v1856_v60 = vpop.xlane.xlu1 %1855 }
 0x2ca   :  { %v1924_v50 = vsub.f32 %v8892_v17, %v1856_v60  ;;  %v7898_v60 = vunpack.i.h.bf16 %v8652_v15 }
 0x2cc   :  { %v1969_v51 = vmul.f32 1.442695, %v1924_v50  ;;  %v1774_v35 = vpop.f32.mrf.mxu2  ;;  %v1887_v50 = vsel %vm1814_vm3, %v8992_v23, -inf  ;;  %v7914_v7 = vpack.i.bf16 %v8547_v25, %v7898_v60  ;;  %v1908_v25 = vsel %vm1814_vm3, %v9021_v48, -inf }
 0x2cd   :  { %v7893_v35 = vunpack.i.h.bf16 %v8705_v29 }
 0x2ce   :  { %8044 = vpow2.f32 %v1969_v51  ;;  %2026 = vadd.xlane.f32.xlu2 %v2025_v16  ;;  %2032 = vadd.xlane.f32.xlu1 %v2031_v61  ;;  %v1902_v16 = vsel %vm1814_vm3, %v9045_v27, -inf }
 0x2cf   :  { %8046 = vpow2.f32 %v1971_v0  ;;  %v7909_v15 = vpack.i.bf16 %v7893_v35, %v7888_v46 }
 0x2d0   :  { %8048 = vpow2.f32 %v1973_v53  ;;  %v989_v53 = vrot.slane %v880_v12, 4 }
 0x2d2   :  { %v990_v46 = vsel %vm139_vm1, 0.0, %v989_v53 }
 0x2d4   :  { %v9064_v17 = vpop.eup %8044 }
 0x2d5   :  { %v2046_v54 = vsel %vm1814_vm3, %v9064_v17, 0.0  ;;  %v9072_v21 = vpop.eup %8046 }
 0x2d6   :  { %2047 = vadd.xlane.f32.xlu0 %v2046_v54  ;;  %1897 = vmax.xlane.f32.xlu2 %v1896_v55  ;;  %v2049_v52 = vsel %vm1814_vm3, %v9072_v21, 0.0  ;;  %v9081_v51 = vpop.eup %8048  ;;  %v1899_v54 = vsel %vm1814_vm3, %v9025_v34, -inf  ;;  %v1923_v55 = vsub.f32 %v8878_v19, %v9017_v36 }
 0x2d7   :  { %2038 = vadd.xlane.f32.xlu1 %v2037_v31  ;;  %v2052_v13 = vsel %vm1814_vm3, %v9081_v51, 0.0 }
 0x2de   :  { %2050 = vadd.xlane.f32.xlu2 %v2049_v52  ;;  %v1967_v52 = vmul.f32 1.442695, %v1923_v55 }
 0x2e6   :  { %1888 = vmax.xlane.f32.xlu2 %v1887_v50 }
 0x2ea   :  { %7915 = vrot.lane.b32.xlu0 %v7914_v7, %s8329_s9 }
 0x2ee   :  { %2053 = vadd.xlane.f32.xlu2 %v2052_v13 }
 0x2f0   :  { %7910 = vrot.lane.b32.xlu1 %v7909_v15, %s8329_s9  ;;  %v1905_v15 = vsel %vm1814_vm3, %v9035_v42, -inf }
 0x2f6   :  { %1903 = vmax.xlane.f32.xlu2 %v1902_v16  ;;  %v994_v16 = vperm.slane %v990_v46, %v8477_v43 }
 0x2fe   :  { %1909 = vmax.xlane.f32.xlu2 %v1908_v25 }
 0x2ff   :  { %v1865_v29 = vpop.xlane.xlu0 %1864 }
 0x300   :  { %v1871_v61 = vpop.xlane.xlu1 %1870  ;;  %v1927_v25 = vsub.f32 %v8938_v58, %v1865_v29 }
 0x301   :  { %v1929_v32 = vsub.f32 %v8945_v33, %v1871_v61 }
 0x303   :  { %v1979_v0 = vmul.f32 1.442695, %v1929_v32 }
 0x305   :  { %8050 = vpow2.f32 %v1979_v0 }
 0x306   :  { %1900 = vmax.xlane.f32.xlu2 %v1899_v54  ;;  %8052 = vpow2.f32 %v1967_v52  ;;  %v1975_v54 = vmul.f32 1.442695, %v1927_v25 }
 0x307   :  { %v1874_v31 = vpop.xlane.xlu0 %1873 }
 0x308   :  { %v1930_v50 = vsub.f32 %v8934_v47, %v1874_v31  ;;  %v988_v47 = vperm.slane %v880_v12, %v8477_v43 }
 0x30a   :  { %v1981_v61 = vmul.f32 1.442695, %v1930_v50 }
 0x30b   :  { %v9100_v60 = vpop.eup %8050 }
 0x30c   :  { %v2061_v33 = vsel %vm1814_vm3, %v9100_v60, 0.0  ;;  %v9113_v0 = vpop.eup %8052 }
 0x30d   :  { %v2043_v52 = vsel %vm1814_vm3, %v9113_v0, 0.0 }
 0x30e   :  { %2062 = vadd.xlane.f32.xlu2 %v2061_v33 }
 0x30f   :  { %v1877_v7 = vpop.xlane.xlu2 %1876  ;;  %v1868_v35 = vpop.xlane.xlu0 %1867 }
 0x310   :  { %v1928_v19 = vsub.f32 %v8954_v28, %v1868_v35  ;;  %v995_v28 = vrot.slane %v994_v16, 4 }
 0x311   :  { %v1883_v36 = vpop.xlane.xlu1 %1882 }
 0x312   :  { %v1977_v13 = vmul.f32 1.442695, %v1928_v19  ;;  %v1933_v24 = vsub.f32 %v8970_v59, %v1883_v36  ;;  %v997_v59 = vrot.slane %v988_v47, 4  ;;  %v996_v12 = vsel %vm139_vm1, %v995_v28, %v988_v47 }
 0x313   :  { %v884_v19 = vperm.slane %v8910_v38, %v8482_v56 }
 0x314   :  { %1906 = vmax.xlane.f32.xlu0 %v1905_v15  ;;  %v1987_v32 = vmul.f32 1.442695, %v1933_v24  ;;  %8054 = vpow2.f32 %v1977_v13  ;;  %v998_v35 = vsel %vm139_vm1, %v994_v16, %v997_v59  ;;  %v9134_v24 = vperm.slane %v996_v12, %v8482_v56 }
 0x315   :  { %v1931_v15 = vsub.f32 %v8963_v49, %v1877_v7  ;;  %v1015_v25 = vrot.slane %v884_v19, 4 }
 0x316   :  { %8056 = vpow2.f32 %v1987_v32  ;;  %v2207_v59 = vpack.c.bf16 %v9134_v24, %v9134_v24 }
 0x317   :  { %8058 = vpow2.f32 %v1981_v61  ;;  %v1886_v55 = vpop.xlane.xlu2 %1885  ;;  %v1983_v7 = vmul.f32 1.442695, %v1931_v15 }
 0x318   :  { %v1934_v33 = vsub.f32 %v8961_v20, %v1886_v55  ;;  %v9137_v20 = vperm.slane %v998_v35, %v8482_v56  ;;  %v9148_v55 = vperm.slane %v884_v19, %v8477_v43  ;;  %v2389_v12 = vsel %vm2235_vm4, %v2207_v59, 0 }
 0x319   :  { %v1880_v31 = vpop.xlane.xlu0 %1879  ;;  %v2009_v29 = vpop.xlane.xlu1 %2008 }
 0x31a   :  { %v1932_v58 = vsub.f32 %v8978_v8, %v1880_v31  ;;  %2044 = vadd.xlane.f32.xlu1 %v2043_v52  ;;  %8060 = vrcp.f32 %v2009_v29  ;;  %v9119_v53 = vpop.eup %8054  ;;  %v1989_v16 = vmul.f32 1.442695, %v1934_v33  ;;  %v1009_v49 = vrot.slane %v9137_v20, 4 }
 0x31b   :  { %8062 = vpow2.f32 %v1975_v54  ;;  %v2058_v8 = vsel %vm1814_vm3, %v9119_v53, 0.0 }
 0x31c   :  { %v1985_v50 = vmul.f32 1.442695, %v1932_v58  ;;  %v9123_v46 = vpop.eup %8056  ;;  %2059 = vadd.xlane.f32.xlu2 %v2058_v8  ;;  %v1016_v58 = vsel %vm139_vm1, 0.0, %v1015_v25  ;;  %v1010_v33 = vsel %vm139_vm1, 0.0, %v1009_v49 }
 0x31d   :  { %v9129_v36 = vpop.eup %8058  ;;  %v2073_v13 = vsel %vm1814_vm3, %v9123_v46, 0.0  ;;  %v1020_v35 = vperm.slane %v1016_v58, %v8477_v43 }
 0x31e   :  { %2074 = vadd.xlane.f32.xlu0 %v2073_v13  ;;  %8064 = vpow2.f32 %v1985_v50  ;;  %v2064_v61 = vsel %vm1814_vm3, %v9129_v36, 0.0 }
 0x320   :  { %v8061_v38 = vpop.eup %8060 }
 0x321   :  { %v9142_v47 = vpop.eup %8062  ;;  %v2135_v32 = vmul.f32 %v8061_v38, %v8976_v45  ;;  %v2018_v28 = vpop.xlane.xlu1 %2017 }
 0x322   :  { %2065 = vadd.xlane.f32.xlu1 %v2064_v61  ;;  %v1895_v54 = vpop.xlane.xlu0 %1894  ;;  %8066 = vrcp.f32 %v2018_v28  ;;  %v2055_v45 = vsel %vm1814_vm3, %v9142_v47, 0.0  ;;  %v2210_v61 = vpack.c.bf16 %v1010_v33, %v1010_v33  ;;  %v1007_v33 = vrot.slane %v9134_v24, 4 }
 0x323   :  { %8068 = vpow2.f32 %v1989_v16  ;;  %v2167_v31 = vpack.c.bf16 %v2135_v32, %v2135_v32  ;;  %v1937_v52 = vsub.f32 %v8996_v40, %v1895_v54  ;;  %v1023_v40 = vrot.slane %v9148_v55, 4 }
 0x324   :  { %v9155_v29 = vpop.eup %8064  ;;  %2056 = vadd.xlane.f32.xlu2 %v2055_v45  ;;  %8070 = vpow2.f32 %v1983_v7  ;;  %v1021_v24 = vrot.slane %v1020_v35, 4 }
 0x325   :  { %7627 = vmatmul.msk.bf16.vlgmr.msra.gmra.mxu1 %vm2231_vm5, %v2167_v31  ;;  %v1995_v50 = vmul.f32 1.442695, %v1937_v52  ;;  %v2070_v13 = vsel %vm1814_vm3, %v9155_v29, 0.0  ;;  %v1024_v54 = vsel %vm139_vm1, %v1020_v35, %v1023_v40 }
 0x326   :  { %2398 = vmatpush.bf16.msra.mxu1 %v2389_v12  ;;  %v1022_v35 = vsel %vm139_vm1, %v1021_v24, %v9148_v55 }
 0x328   :  { %v8067_v19 = vpop.eup %8066 }
 0x329   :  { %v1892_v8 = vpop.xlane.xlu2 %1891  ;;  %v9164_v15 = vpop.eup %8068  ;;  %v2138_v16 = vmul.f32 %v8067_v19, %v8990_v44  ;;  %v2446_v44 = vsel %vm2235_vm4, %v2210_v61, 0 }
 0x32a   :  { %v1936_v38 = vsub.f32 %v9008_v22, %v1892_v8  ;;  %v2015_v25 = vpop.xlane.xlu1 %2014  ;;  %2071 = vadd.xlane.f32.xlu1 %v2070_v13  ;;  %v2076_v59 = vsel %vm1814_vm3, %v9164_v15, 0.0  ;;  %v9171_v49 = vpop.eup %8070  ;;  %v9176_v22 = vperm.slane %v1024_v54, %v8482_v56 }
 0x32b   :  { %8072 = vrcp.f32 %v2015_v25  ;;  %v2170_v32 = vpack.c.bf16 %v2138_v16, %v2138_v16  ;;  %v2067_v52 = vsel %vm1814_vm3, %v9171_v49, 0.0  ;;  %v1008_v16 = vsel %vm139_vm1, 0.0, %v1007_v33 }
 0x32c   :  { %8074 = vpow2.f32 %v1995_v50  ;;  %v1993_v28 = vmul.f32 1.442695, %v1936_v38  ;;  %2077 = vadd.xlane.f32.xlu2 %v2076_v59  ;;  %v2209_v50 = vpack.c.bf16 %v9137_v20, %v9137_v20  ;;  %v1035_v40 = vrot.slane %v9176_v22, 4 }
 0x32d   :  { %7630 = vmatmul.msk.bf16.vlgmr.msrb.gmra.mxu0 %vm2231_vm5, %v2170_v32  ;;  %v2208_v54 = vpack.c.bf16 %v1008_v16, %v1008_v16  ;;  %v1028_v33 = vperm.slane %v1022_v35, %v8482_v56 }
 0x32e   :  { %8076 = vpow2.f32 %v1993_v28  ;;  %2455 = vmatpush.bf16.msrb.mxu0 %v2446_v44  ;;  %v2427_v20 = vsel %vm2235_vm4, %v2209_v50, 0  ;;  %v1036_v38 = vsel %vm139_vm1, 0.0, %v1035_v40 }
 0x32f   :  { %v2211_v40 = vpack.c.bf16 %v1028_v33, %v1028_v33 }
 0x331   :  { %v8073_v7 = vpop.eup %8072  ;;  %v2012_v31 = vpop.xlane.xlu2 %2011  ;;  %v2465_v24 = vsel %vm2235_vm4, %v2211_v40, 0 }
 0x332   :  { %v9180_v45 = vpop.eup %8074  ;;  %v2137_v58 = vmul.f32 %v8073_v7, %v9003_v63  ;;  %8078 = vrcp.f32 %v2012_v31  ;;  %v2030_v12 = vpop.xlane.xlu1 %2029  ;;  %2068 = vadd.xlane.f32.xlu1 %v2067_v52  ;;  %v2214_v7 = vpack.c.bf16 %v1036_v38, %v1036_v38 }
 0x333   :  { %8080 = vrcp.f32 %v2030_v12  ;;  %v2085_v13 = vsel %vm1814_vm3, %v9180_v45, 0.0  ;;  %v2408_v12 = vsel %vm2235_vm4, %v2208_v54, 0 }
 0x334   :  { %v9187_v19 = vpop.eup %8076  ;;  %v2169_v8 = vpack.c.bf16 %v2137_v58, %v2137_v58  ;;  %2086 = vadd.xlane.f32.xlu2 %v2085_v13  ;;  %v2042_v58 = vpop.xlane.xlu0 %2041  ;;  %v1033_v13 = vrot.slane %v1028_v33, 4 }
 0x335   :  { %v2082_v63 = vsel %vm1814_vm3, %v9187_v19, 0.0 }
 0x336   :  { %2083 = vadd.xlane.f32.xlu0 %v2082_v63  ;;  %7629 = vmatmul.msk.bf16.vlgmr.msra.gmra.mxu3 %vm2231_vm5, %v2169_v8  ;;  %v1034_v38 = vsel %vm139_vm1, 0.0, %v1033_v13 }
 0x337   :  { %2436 = vmatpush.bf16.msra.mxu3 %v2427_v20 }
 0x338   :  { %v8079_v25 = vpop.eup %8078 }
 0x339   :  { %v8081_v61 = vpop.eup %8080  ;;  %v2136_v32 = vmul.f32 %v8079_v25, %v9019_v37  ;;  %v2021_v28 = vpop.xlane.xlu2 %2020  ;;  %v2522_v37 = vsel %vm2235_vm4, %v2214_v7, 0 }
 0x33a   :  { %v2142_v59 = vmul.f32 %v8081_v61, %v9023_v57  ;;  %8082 = vrcp.f32 %v2021_v28  ;;  %v2024_v44 = vpop.xlane.xlu1 %2023 }
 0x33b   :  { %v2168_v31 = vpack.c.bf16 %v2136_v32, %v2136_v32  ;;  %8084 = vrcp.f32 %v2024_v44  ;;  %v2213_v44 = vpack.c.bf16 %v9176_v22, %v9176_v22 }
 0x33c   :  { %v2174_v52 = vpack.c.bf16 %v2142_v59, %v2142_v59  ;;  %8086 = vrcp.f32 %v2042_v58  ;;  %v2036_v32 = vpop.xlane.xlu0 %2035  ;;  %v2212_v59 = vpack.c.bf16 %v1034_v38, %v1034_v38 }
 0x33d   :  { %7628 = vmatmul.msk.bf16.vlgmr.msra.gmra.mxu2 %vm2231_vm5, %v2168_v31 }
 0x33e   :  { %2417 = vmatpush.bf16.msra.mxu2 %v2408_v12  ;;  %7634 = vmatmul.msk.bf16.vlgmr.msra.gmra.mxu0 %vm2231_vm5, %v2174_v52 }
 0x33f   :  { %2531 = vmatpush.bf16.msra.mxu0 %v2522_v37 }
 0x340   :  { %v8083_v57 = vpop.eup %8082 }
 0x341   :  { %v2139_v55 = vmul.f32 %v8083_v57, %v9041_v3  ;;  %v2027_v50 = vpop.xlane.xlu2 %2026  ;;  %v8085_v16 = vpop.eup %8084 }
 0x342   :  { %8088 = vrcp.f32 %v2027_v50  ;;  %v2033_v8 = vpop.xlane.xlu1 %2032  ;;  %v8087_v20 = vpop.eup %8086  ;;  %v2140_v25 = vmul.f32 %v8085_v16, %v9043_v18 }
 0x343   :  { %v2171_v63 = vpack.c.bf16 %v2139_v55, %v2139_v55  ;;  %8090 = vrcp.f32 %v2033_v8  ;;  %v2146_v3 = vmul.f32 %v8087_v20, %v9005_v14  ;;  %v2484_v14 = vsel %vm2235_vm4, %v2212_v59, 0 }
 0x344   :  { %v2172_v31 = vpack.c.bf16 %v2140_v25, %v2140_v25  ;;  %8092 = vrcp.f32 %v2036_v32 }
 0x345   :  { %7631 = vmatmul.msk.bf16.vlgmr.msrb.gmra.mxu1 %vm2231_vm5, %v2171_v63  ;;  %v2178_v18 = vpack.c.bf16 %v2146_v3, %v2146_v3 }
 0x346   :  { %2474 = vmatpush.bf16.msrb.mxu1 %v2465_v24 }
 0x348   :  { %v8089_v61 = vpop.eup %8088 }
 0x349   :  { %v2141_v28 = vmul.f32 %v8089_v61, %v9052_v39  ;;  %v1898_v54 = vpop.xlane.xlu2 %1897  ;;  %v8091_v58 = vpop.eup %8090  ;;  %v2503_v39 = vsel %vm2235_vm4, %v2213_v44, 0 }
 0x34a   :  { %v1938_v7 = vsub.f32 %v8988_v30, %v1898_v54  ;;  %v2039_v35 = vpop.xlane.xlu1 %2038  ;;  %v2143_v30 = vmul.f32 %v8091_v58, %v9055_v62  ;;  %v8093_v33 = vpop.eup %8092 }
 0x34b   :  { %v2173_v52 = vpack.c.bf16 %v2141_v28, %v2141_v28  ;;  %8094 = vrcp.f32 %v2039_v35  ;;  %v2048_v50 = vpop.xlane.xlu0 %2047  ;;  %v2144_v8 = vmul.f32 %v8093_v33, %v9027_v41 }
 0x34c   :  { %v1997_v12 = vmul.f32 1.442695, %v1938_v7  ;;  %v2175_v57 = vpack.c.bf16 %v2143_v30, %v2143_v30 }
 0x34d   :  { %7632 = vmatmul.msk.bf16.vlgmr.msrb.gmra.mxu2 %vm2231_vm5, %v2172_v31  ;;  %7633 = vmatmul.msk.bf16.vlgmr.msrb.gmra.mxu3 %vm2231_vm5, %v2173_v52  ;;  %v2176_v16 = vpack.c.bf16 %v2144_v8, %v2144_v8 }
 0x34e   :  { %8096 = vpow2.f32 %v1997_v12  ;;  %2493 = vmatpush.bf16.msrb.mxu2 %v2484_v14  ;;  %2512 = vmatpush.bf16.msrb.mxu3 %v2503_v39 }
 0x34f   :  { %7638 = vmatmul.msk.bf16.vlgmr.msrb.gmra.mxu0 %vm2231_vm5, %v2178_v18  ;;  %8098 = vrcp.f32 %v2048_v50 }
 0x351   :  { %v2051_v22 = vpop.xlane.xlu2 %2050  ;;  %v8095_v37 = vpop.eup %8094 }
 0x352   :  { %v2145_v13 = vmul.f32 %v8095_v37, %v9062_v26  ;;  %8100 = vrcp.f32 %v2051_v22 }
 0x354   :  { %v9222_v55 = vpop.eup %8096  ;;  %v2177_v24 = vpack.c.bf16 %v2145_v13, %v2145_v13 }
 0x355   :  { %7635 = vmatmul.msk.bf16.vlgmr.msra.gmra.mxu1 %vm2231_vm5, %v2175_v57  ;;  %v2088_v40 = vsel %vm1814_vm3, %v9222_v55, 0.0  ;;  %v8099_v32 = vpop.eup %8098 }
 0x356   :  { %2089 = vadd.xlane.f32.xlu1 %v2088_v40  ;;  %v2148_v58 = vmul.f32 %v8099_v32, %v9064_v17 }
 0x358   :  { %v8101_v28 = vpop.eup %8100  ;;  %v2180_v40 = vpack.c.bf16 %v2148_v58, %v2148_v58 }
 0x359   :  { %v1889_v62 = vpop.xlane.xlu2 %1888  ;;  %v2149_v12 = vmul.f32 %v8101_v28, %v9072_v21 }
 0x35a   :  { %v1935_v63 = vsub.f32 %v8992_v23, %v1889_v62 }
 0x35b   :  { %v2181_v17 = vpack.c.bf16 %v2149_v12, %v2149_v12 }
 0x35c   :  { %v1991_v20 = vmul.f32 1.442695, %v1935_v63  ;;  %v7916_v38 = vpop.permute.xlu0 %7915 }
 0x35d   :  { %v7917_v25 = vunpack.i.l.bf16 %v7916_v38  ;;  %7636 = vmatmul.msk.bf16.vlgmr.msra.gmra.mxu2 %vm2231_vm5, %v2176_v16  ;;  %7637 = vmatmul.msk.bf16.vlgmr.msra.gmra.mxu3 %vm2231_vm5, %v2177_v24  ;;  %v7918_v61 = vunpack.i.h.bf16 %v7916_v38 }
 0x35e   :  { %8102 = vpow2.f32 %v1991_v20 }
 0x35f   :  { %v885_v3 = vrot.slane %v7917_v25, 4  ;;  %v887_v18 = vrot.slane %v7918_v61, 4 }
 0x361   :  { %v886_v41 = vsel %vm139_vm1, %v885_v3, %v7918_v61  ;;  %v2054_v26 = vpop.xlane.xlu2 %2053  ;;  %v888_v13 = vsel %vm139_vm1, %v7917_v25, %v887_v18 }
 0x362   :  { %8104 = vrcp.f32 %v2054_v26  ;;  %v7911_v23 = vpop.permute.xlu1 %7910  ;;  %v892_v7 = vperm.slane %v886_v41, %v8477_v43  ;;  %v9258_v25 = vperm.slane %v888_v13, %v8477_v43 }
 0x363   :  { %v7913_v54 = vunpack.i.h.bf16 %v7911_v23  ;;  %v7912_v59 = vunpack.i.l.bf16 %v7911_v23 }
 0x364   :  { %v9233_v44 = vpop.eup %8102  ;;  %v911_v22 = vrot.slane %v892_v7, 4 }
 0x365   :  { %v899_v35 = vrot.slane %v7913_v54, 4  ;;  %v897_v31 = vrot.slane %v7912_v59, 4  ;;  %v2079_v52 = vsel %vm1814_vm3, %v9233_v44, 0.0 }
 0x366   :  { %2080 = vadd.xlane.f32.xlu0 %v2079_v52 }
 0x367   :  { %v898_v14 = vsel %vm139_vm1, %v897_v31, %v7913_v54  ;;  %v900_v39 = vsel %vm139_vm1, %v7912_v59, %v899_v35 }
 0x368   :  { %v8105_v30 = vpop.eup %8104  ;;  %v904_v33 = vperm.slane %v898_v14, %v8477_v43  ;;  %v9244_v37 = vperm.slane %v900_v39, %v8477_v43 }
 0x369   :  { %v2150_v57 = vmul.f32 %v8105_v30, %v9081_v51  ;;  %v1904_v50 = vpop.xlane.xlu2 %1903 }
 0x36a   :  { %v909_v8 = vrot.slane %v904_v33, 4  ;;  %v912_v21 = vsel %vm139_vm1, %v904_v33, %v911_v22  ;;  %v1940_v16 = vsub.f32 %v9045_v27, %v1904_v50  ;;  %v921_v20 = vrot.slane %v9244_v37, 4 }
 0x36b   :  { %v2182_v62 = vpack.c.bf16 %v2150_v57, %v2150_v57  ;;  %v920_v63 = vperm.slane %v912_v21, %v8482_v56 }
 0x36c   :  { %v910_v24 = vsel %vm139_vm1, %v909_v8, %v892_v7  ;;  %v2001_v3 = vmul.f32 1.442695, %v1940_v16  ;;  %v922_v23 = vsel %vm139_vm1, %v921_v20, %v9258_v25 }
 0x36d   :  { %v916_v38 = vperm.slane %v910_v24, %v8482_v56  ;;  %v1066_v51 = vperm.slane %v920_v63, %v8477_v43  ;;  %v1067_v61 = vrot.slane %v920_v63, 4  ;;  %7640 = vmatmul.msk.bf16.vlgmr.msrb.gmra.mxu2 %vm2231_vm5, %v2180_v40  ;;  %7641 = vmatmul.msk.bf16.vlgmr.msrb.gmra.mxu3 %vm2231_vm5, %v2181_v17  ;;  %v928_v12 = vperm.slane %v922_v23, %v8482_v56 }
 0x36e   :  { %7642 = vmatmul.msk.bf16.vlgmr.msra.gmra.mxu0 %vm2231_vm5, %v2182_v62  ;;  %8106 = vpow2.f32 %v2001_v3 }
 0x36f   :  { %v1040_v27 = vperm.slane %v916_v38, %v8477_v43  ;;  %v1041_v41 = vrot.slane %v916_v38, 4  ;;  %v1068_v26 = vsel %vm139_vm1, 0.0, %v1067_v61  ;;  %v1075_v32 = vrot.slane %v1066_v51, 4 }
 0x370   :  { %v1072_v28 = vperm.slane %v1068_v26, %v8477_v43  ;;  %v1093_v24 = vrot.slane %v928_v12, 4 }
 0x371   :  { %v1910_v54 = vpop.xlane.xlu2 %1909  ;;  %v1042_v59 = vsel %vm139_vm1, 0.0, %v1041_v41  ;;  %v1049_v7 = vrot.slane %v1040_v27, 4 }
 0x372   :  { %v1942_v35 = vsub.f32 %v9021_v48, %v1910_v54  ;;  %v1046_v31 = vperm.slane %v1042_v59, %v8477_v43  ;;  %v1073_v52 = vrot.slane %v1072_v28, 4  ;;  %v1076_v58 = vsel %vm139_vm1, %v1072_v28, %v1075_v32 }
 0x373   :  { %v1084_v18 = vperm.slane %v1076_v58, %v8482_v56  ;;  %v1092_v59 = vperm.slane %v928_v12, %v8477_v43 }
 0x374   :  { %v2005_v14 = vmul.f32 1.442695, %v1942_v35  ;;  %v1050_v39 = vsel %vm139_vm1, %v1046_v31, %v1049_v7  ;;  %v1047_v30 = vrot.slane %v1046_v31, 4  ;;  %v1074_v22 = vsel %vm139_vm1, %v1073_v52, %v1066_v51  ;;  %v9278_v40 = vpop.eup %8106 }
 0x375   :  { %v1058_v33 = vperm.slane %v1050_v39, %v8482_v56  ;;  %v2221_v57 = vpack.c.bf16 %v1084_v18, %v1084_v18  ;;  %v1087_v50 = vrot.slane %v1084_v18, 4  ;;  %v9276_v48 = vperm.slane %v1074_v22, %v8482_v56 }
 0x376   :  { %8108 = vpow2.f32 %v2005_v14  ;;  %v1048_v17 = vsel %vm139_vm1, %v1047_v30, %v1040_v27  ;;  %v2094_v8 = vsel %vm1814_vm3, %v9278_v40, 0.0  ;;  %v1094_v52 = vsel %vm139_vm1, 0.0, %v1093_v24 }
 0x377   :  { %v2217_v21 = vpack.c.bf16 %v1058_v33, %v1058_v33  ;;  %v1054_v13 = vperm.slane %v1048_v17, %v8482_v56  ;;  %2095 = vadd.xlane.f32.xlu2 %v2094_v8  ;;  %v1061_v62 = vrot.slane %v1058_v33, 4  ;;  %v1088_v63 = vsel %vm139_vm1, 0.0, %v1087_v50 }
 0x378   :  { %v1085_v16 = vrot.slane %v9276_v48, 4  ;;  %v2655_v51 = vsel %vm2235_vm4, %v2221_v57, 0  ;;  %v2222_v26 = vpack.c.bf16 %v1088_v63, %v1088_v63  ;;  %v923_v39 = vrot.slane %v9258_v25, 4 }
 0x379   :  { %v1901_v20 = vpop.xlane.xlu2 %1900  ;;  %v2579_v38 = vsel %vm2235_vm4, %v2217_v21, 0  ;;  %v2215_v61 = vpack.c.bf16 %v1054_v13, %v1054_v13  ;;  %v1059_v3 = vrot.slane %v1054_v13, 4  ;;  %v1062_v41 = vsel %vm139_vm1, 0.0, %v1061_v62 }
 0x37a   :  { %v1939_v27 = vsub.f32 %v9025_v34, %v1901_v20  ;;  %2588 = vmatpush.bf16.msra.mxu3 %v2579_v38  ;;  %v1086_v32 = vsel %vm139_vm1, 0.0, %v1085_v16  ;;  %v2218_v28 = vpack.c.bf16 %v1062_v41, %v1062_v41  ;;  %v2674_v14 = vsel %vm2235_vm4, %v2222_v26, 0 }
 0x37b   :  { %v2541_v23 = vsel %vm2235_vm4, %v2215_v61, 0  ;;  %v1060_v54 = vsel %vm139_vm1, 0.0, %v1059_v3  ;;  %v2220_v34 = vpack.c.bf16 %v1086_v32, %v1086_v32  ;;  %v1098_v22 = vperm.slane %v1094_v52, %v8477_v43 }
 0x37c   :  { %v9294_v7 = vpop.eup %8108  ;;  %v1999_v35 = vmul.f32 1.442695, %v1939_v27  ;;  %2550 = vmatpush.bf16.msra.mxu1 %v2541_v23  ;;  %v2216_v31 = vpack.c.bf16 %v1060_v54, %v1060_v54  ;;  %v2598_v18 = vsel %vm2235_vm4, %v2218_v28, 0  ;;  %v1101_v33 = vrot.slane %v1092_v59, 4 }
 0x37d   :  { %v2100_v58 = vsel %vm1814_vm3, %v9294_v7, 0.0  ;;  %2607 = vmatpush.bf16.msrb.mxu0 %v2598_v18  ;;  %v2636_v30 = vsel %vm2235_vm4, %v2220_v34, 0  ;;  %v924_v57 = vsel %vm139_vm1, %v9244_v37, %v923_v39  ;;  %v1099_v63 = vrot.slane %v1098_v22, 4 }
 0x37e   :  { %2664 = vmatpush.bf16.msrb.mxu3 %v2655_v51  ;;  %8110 = vpow2.f32 %v1999_v35  ;;  %2101 = vadd.xlane.f32.xlu0 %v2100_v58  ;;  %v2560_v12 = vsel %vm2235_vm4, %v2216_v31, 0  ;;  %v1102_v17 = vsel %vm139_vm1, %v1098_v22, %v1101_v33  ;;  %v932_v21 = vperm.slane %v924_v57, %v8482_v56 }
 0x37f   :  { %2569 = vmatpush.bf16.msra.mxu2 %v2560_v12  ;;  %v1110_v13 = vperm.slane %v1102_v17, %v8482_v56  ;;  %v1100_v3 = vsel %vm139_vm1, %v1099_v63, %v1092_v59 }
 0x380   :  { %v1119_v16 = vrot.slane %v932_v21, 4  ;;  %v1118_v61 = vperm.slane %v932_v21, %v8477_v43 }
 0x381   :  { %2683 = vmatpush.bf16.msra.mxu0 %v2674_v14  ;;  %v2063_v50 = vpop.xlane.xlu2 %2062  ;;  %v2225_v51 = vpack.c.bf16 %v1110_v13, %v1110_v13  ;;  %v2219_v14 = vpack.c.bf16 %v9276_v48, %v9276_v48 }
 0x382   :  { %8112 = vrcp.f32 %v2063_v50  ;;  %v1120_v41 = vsel %vm139_vm1, 0.0, %v1119_v16  ;;  %v1127_v23 = vrot.slane %v1118_v61, 4 }
 0x383   :  { %2645 = vmatpush.bf16.msrb.mxu2 %v2636_v30  ;;  %v2731_v32 = vsel %vm2235_vm4, %v2225_v51, 0  ;;  %v1113_v30 = vrot.slane %v1110_v13, 4 }
 0x384   :  { %v9308_v8 = vpop.eup %8110 }
 0x385   :  { %v2091_v25 = vsel %vm1814_vm3, %v9308_v8, 0.0  ;;  %v1114_v63 = vsel %vm139_vm1, 0.0, %v1113_v30 }
 0x386   :  { %2092 = vadd.xlane.f32.xlu2 %v2091_v25  ;;  %v2226_v51 = vpack.c.bf16 %v1114_v63, %v1114_v63 }
 0x387   :  { %v1907_v62 = vpop.xlane.xlu0 %1906 }
 0x388   :  { %v1941_v24 = vsub.f32 %v9035_v42, %v1907_v62  ;;  %v8113_v37 = vpop.eup %8112  ;;  %v9322_v42 = vperm.slane %v1100_v3, %v8482_v56 }
 0x389   :  { %v2153_v20 = vmul.f32 %v8113_v37, %v9100_v60  ;;  %v1124_v60 = vperm.slane %v1120_v41, %v8477_v43 }
 0x38a   :  { %v2003_v38 = vmul.f32 1.442695, %v1941_v24  ;;  %v1111_v35 = vrot.slane %v9322_v42, 4 }
 0x38b   :  { %v2185_v27 = vpack.c.bf16 %v2153_v20, %v2153_v20  ;;  %v1128_v34 = vsel %vm139_vm1, %v1124_v60, %v1127_v23  ;;  %v1125_v33 = vrot.slane %v1124_v60, 4 }
 0x38c   :  { %8114 = vpow2.f32 %v2003_v38  ;;  %v1112_v12 = vsel %vm139_vm1, 0.0, %v1111_v35  ;;  %v1136_v39 = vperm.slane %v1128_v34, %v8482_v56 }
 0x38d   :  { %v2045_v26 = vpop.xlane.xlu1 %2044  ;;  %7645 = vmatmul.msk.bf16.vlgmr.msra.gmra.mxu3 %vm2231_vm5, %v2185_v27  ;;  %v2224_v25 = vpack.c.bf16 %v1112_v12, %v1112_v12  ;;  %v1126_v16 = vsel %vm139_vm1, %v1125_v33, %v1118_v61 }
 0x38e   :  { %8116 = vrcp.f32 %v2045_v26  ;;  %2740 = vmatpush.bf16.msra.mxu3 %v2731_v32  ;;  %v2229_v62 = vpack.c.bf16 %v1136_v39, %v1136_v39  ;;  %v1132_v3 = vperm.slane %v1126_v16, %v8482_v56  ;;  %v1139_v34 = vrot.slane %v1136_v39, 4 }
 0x38f   :  { %v2060_v28 = vpop.xlane.xlu2 %2059  ;;  %v2712_v20 = vsel %vm2235_vm4, %v2224_v25, 0 }
 0x390   :  { %8118 = vrcp.f32 %v2060_v28  ;;  %v1137_v26 = vrot.slane %v1132_v3, 4 }
 0x391   :  { %v2075_v59 = vpop.xlane.xlu0 %2074 }
 0x392   :  { %v9325_v54 = vpop.eup %8114  ;;  %8120 = vrcp.f32 %v2075_v59  ;;  %v2223_v59 = vpack.c.bf16 %v9322_v42, %v9322_v42 }
 0x393   :  { %v2097_v31 = vsel %vm1814_vm3, %v9325_v54, 0.0 }
 0x394   :  { %v8117_v52 = vpop.eup %8116  ;;  %2098 = vadd.xlane.f32.xlu1 %v2097_v31  ;;  %v1138_v31 = vsel %vm139_vm1, 0.0, %v1137_v26 }
 0x395   :  { %v2147_v58 = vmul.f32 %v8117_v52, %v9113_v0  ;;  %v2066_v18 = vpop.xlane.xlu1 %2065  ;;  %v2617_v0 = vsel %vm2235_vm4, %v2219_v14, 0  ;;  %v2228_v12 = vpack.c.bf16 %v1138_v31, %v1138_v31 }
 0x396   :  { %8122 = vrcp.f32 %v2066_v18  ;;  %v8119_v57 = vpop.eup %8118 }
 0x397   :  { %v2179_v22 = vpack.c.bf16 %v2147_v58, %v2147_v58  ;;  %v2152_v17 = vmul.f32 %v8119_v57, %v9119_v53  ;;  %v2057_v21 = vpop.xlane.xlu2 %2056  ;;  %v2788_v39 = vsel %vm2235_vm4, %v2228_v12, 0 }
 0x398   :  { %v8121_v50 = vpop.eup %8120  ;;  %8124 = vrcp.f32 %v2057_v21 }
 0x399   :  { %7639 = vmatmul.msk.bf16.vlgmr.msrb.gmra.mxu1 %vm2231_vm5, %v2179_v22  ;;  %v2157_v48 = vmul.f32 %v8121_v50, %v9123_v46  ;;  %v2184_v13 = vpack.c.bf16 %v2152_v17, %v2152_v17  ;;  %v2807_v46 = vsel %vm2235_vm4, %v2229_v62, 0 }
 0x39a   :  { %2626 = vmatpush.bf16.msrb.mxu1 %v2617_v0 }
 0x39b   :  { %v2189_v37 = vpack.c.bf16 %v2157_v48, %v2157_v48  ;;  %7644 = vmatmul.msk.bf16.vlgmr.msra.gmra.mxu2 %vm2231_vm5, %v2184_v13  ;;  %v2227_v13 = vpack.c.bf16 %v1132_v3, %v1132_v3 }
 0x39c   :  { %v8123_v24 = vpop.eup %8122  ;;  %2721 = vmatpush.bf16.msra.mxu2 %v2712_v20 }
 0x39d   :  { %v2154_v53 = vmul.f32 %v8123_v24, %v9129_v36  ;;  %v2072_v38 = vpop.xlane.xlu1 %2071  ;;  %7649 = vmatmul.msk.bf16.vlgmr.msrb.gmra.mxu3 %vm2231_vm5, %v2189_v37  ;;  %v2750_v36 = vsel %vm2235_vm4, %v2226_v51, 0 }
 0x39e   :  { %8126 = vrcp.f32 %v2072_v38  ;;  %2816 = vmatpush.bf16.msrb.mxu3 %v2807_v46  ;;  %v8125_v61 = vpop.eup %8124 }
 0x39f   :  { %v2186_v27 = vpack.c.bf16 %v2154_v53, %v2154_v53  ;;  %v2078_v41 = vpop.xlane.xlu2 %2077  ;;  %v2151_v32 = vmul.f32 %v8125_v61, %v9142_v47  ;;  %v2693_v47 = vsel %vm2235_vm4, %v2223_v59, 0 }
 0x3a0   :  { %8128 = vrcp.f32 %v2078_v41 }
 0x3a1   :  { %7646 = vmatmul.msk.bf16.vlgmr.msrb.gmra.mxu0 %vm2231_vm5, %v2186_v27  ;;  %v2183_v52 = vpack.c.bf16 %v2151_v32, %v2151_v32 }
 0x3a2   :  { %2759 = vmatpush.bf16.msrb.mxu0 %v2750_v36  ;;  %v2248_v60 = vpop.f32.mrf.mxu1 }
 0x3a4   :  { %v8127_v23 = vpop.eup %8126 }
 0x3a5   :  { %v2156_v28 = vmul.f32 %v8127_v23, %v9155_v29  ;;  %v2069_v35 = vpop.xlane.xlu1 %2068  ;;  %v1140_v29 = vsel %vm139_vm1, 0.0, %v1139_v34 }
 0x3a6   :  { %v8129_v58 = vpop.eup %8128  ;;  %8130 = vrcp.f32 %v2069_v35  ;;  %v2230_v57 = vpack.c.bf16 %v1140_v29, %v1140_v29 }
 0x3a7   :  { %v2188_v18 = vpack.c.bf16 %v2156_v28, %v2156_v28  ;;  %v2087_v14 = vpop.xlane.xlu2 %2086  ;;  %v2158_v42 = vmul.f32 %v8129_v58, %v9164_v15 }
 0x3a8   :  { %8132 = vrcp.f32 %v2087_v14  ;;  %v2826_v25 = vsel %vm2235_vm4, %v2230_v57, 0 }
 0x3a9   :  { %7643 = vmatmul.msk.bf16.vlgmr.msra.gmra.mxu1 %vm2231_vm5, %v2183_v52  ;;  %v2084_v30 = vpop.xlane.xlu0 %2083  ;;  %v2190_v17 = vpack.c.bf16 %v2158_v42, %v2158_v42 }
 0x3aa   :  { %2702 = vmatpush.bf16.msra.mxu1 %v2693_v47  ;;  %v2250_v22 = vpop.f32.mrf.mxu1  ;;  %v2305_v33 = vpop.f32.mrf.mxu0  ;;  %8134 = vrcp.f32 %v2084_v30 }
 0x3ab   :  { %7648 = vmatmul.msk.bf16.vlgmr.msrb.gmra.mxu2 %vm2231_vm5, %v2188_v18  ;;  %v2847_v51 = vrot.slane %v2305_v33, 4 }
 0x3ac   :  { %2797 = vmatpush.bf16.msrb.mxu2 %v2788_v39  ;;  %v8131_v50 = vpop.eup %8130 }
 0x3ad   :  { %v2155_v15 = vmul.f32 %v8131_v50, %v9171_v49 }
 0x3ae   :  { %v8133_v21 = vpop.eup %8132 }
 0x3af   :  { %v2161_v0 = vmul.f32 %v8133_v21, %v9180_v45  ;;  %v2187_v16 = vpack.c.bf16 %v2155_v15, %v2155_v15  ;;  %v2769_v45 = vsel %vm2235_vm4, %v2227_v13, 0 }
 0x3b0   :  { %v8135_v63 = vpop.eup %8134 }
 0x3b1   :  { %7650 = vmatmul.msk.bf16.vlgmr.msra.gmra.mxu0 %vm2231_vm5, %v2190_v17  ;;  %v2193_v48 = vpack.c.bf16 %v2161_v0, %v2161_v0  ;;  %v2160_v24 = vmul.f32 %v8135_v63, %v9187_v19 }
 0x3b2   :  { %2835 = vmatpush.bf16.msra.mxu0 %v2826_v25  ;;  %v2307_v62 = vpop.f32.mrf.mxu0 }
 0x3b3   :  { %7653 = vmatmul.msk.bf16.vlgmr.msra.gmra.mxu3 %vm2231_vm5, %v2193_v48  ;;  %v2192_v53 = vpack.c.bf16 %v2160_v24, %v2160_v24 }
 0x3b9   :  { %7647 = vmatmul.msk.bf16.vlgmr.msrb.gmra.mxu1 %vm2231_vm5, %v2187_v16  ;;  %v2286_v37 = vpop.f32.mrf.mxu3 }
 0x3ba   :  { %2778 = vmatpush.bf16.msrb.mxu1 %v2769_v45  ;;  %v2841_v20 = vrot.slane %v2286_v37, 4 }
 0x3bb   :  { %v2381_v38 = vpop.f32.mrf.mxu0  ;;  %7652 = vmatmul.msk.bf16.vlgmr.msra.gmra.mxu2 %vm2231_vm5, %v2192_v53 }
 0x3bc   :  { %v2842_v49 = vsel %vm139_vm1, %v2841_v20, %v2248_v60  ;;  %v2867_v35 = vrot.slane %v2381_v38, 4 }
 0x3bd   :  { %v2846_v36 = vperm.slane %v2842_v49, %v8477_v43 }
 0x3c0   :  { %v2267_v46 = vpop.f32.mrf.mxu2 }
 0x3c1   :  { %v2848_v3 = vsel %vm139_vm1, %v2847_v51, %v2267_v46  ;;  %v2288_v61 = vpop.f32.mrf.mxu3 }
 0x3c2   :  { %v2852_v27 = vperm.slane %v2848_v3, %v8477_v43  ;;  %v2324_v19 = vpop.f32.mrf.mxu1 }
 0x3c3   :  { %v2383_v41 = vpop.f32.mrf.mxu0 }
 0x3c4   :  { %v2853_v26 = vrot.slane %v2852_v27, 4 }
 0x3c6   :  { %v2854_v32 = vsel %vm139_vm1, %v2853_v26, %v2846_v36 }
 0x3c7   :  { %v2858_v39 = vperm.slane %v2854_v32, %v8482_v56 }
 0x3c8   :  { %v2269_v23 = vpop.f32.mrf.mxu2 }
 0x3c9   :  { %v2090_v28 = vpop.xlane.xlu1 %2089  ;;  %v2859_v21 = vrot.slane %v2858_v39, 4 }
 0x3ca   :  { %8136 = vrcp.f32 %v2090_v28  ;;  %v2326_v60 = vpop.f32.mrf.mxu1 }
 0x3cb   :  { %v2860_v16 = vsel %vm139_vm1, 0.0, %v2859_v21 }
 0x3cc   :  { %v2457_v59 = vpop.f32.mrf.mxu0 }
 0x3cd   :  { %v2887_v37 = vrot.slane %v2457_v59, 4 }
 0x3d0   :  { %v8137_v31 = vpop.eup %8136  ;;  %v2343_v34 = vpop.f32.mrf.mxu2 }
 0x3d1   :  { %v2362_v52 = vpop.f32.mrf.mxu3  ;;  %v2162_v58 = vmul.f32 %v8137_v31, %v9222_v55  ;;  %v2868_v18 = vsel %vm139_vm1, %v2867_v35, %v2343_v34 }
 0x3d2   :  { %v2861_v14 = vrot.slane %v2362_v52, 4  ;;  %v2872_v47 = vperm.slane %v2868_v18, %v8477_v43  ;;  %v2400_v12 = vpop.f32.mrf.mxu1 }
 0x3d3   :  { %v2194_v30 = vpack.c.bf16 %v2162_v58, %v2162_v58 }
 0x3d4   :  { %v2862_v29 = vsel %vm139_vm1, %v2861_v14, %v2324_v19  ;;  %v2873_v42 = vrot.slane %v2872_v47, 4  ;;  %v2459_v33 = vpop.f32.mrf.mxu0 }
 0x3d5   :  { %v2866_v22 = vperm.slane %v2862_v29, %v8477_v43  ;;  %7654 = vmatmul.msk.bf16.vlgmr.msrb.gmra.mxu0 %vm2231_vm5, %v2194_v30 }
 0x3d7   :  { %v2874_v57 = vsel %vm139_vm1, %v2873_v42, %v2866_v22 }
 0x3d8   :  { %v2878_v55 = vperm.slane %v2874_v57, %v8482_v56  ;;  %v2345_v50 = vpop.f32.mrf.mxu2 }
 0x3d9   :  { %v2364_v17 = vpop.f32.mrf.mxu3  ;;  %v2081_v25 = vpop.xlane.xlu0 %2080 }
 0x3da   :  { %v2879_v0 = vrot.slane %v2878_v55, 4  ;;  %8138 = vrcp.f32 %v2081_v25  ;;  %v2402_v15 = vpop.f32.mrf.mxu1 }
 0x3dc   :  { %v2880_v48 = vsel %vm139_vm1, 0.0, %v2879_v0  ;;  %v3001_v62 = vsel %vm139_vm1, %v2879_v0, %v2858_v39 }
 0x3dd   :  { %v3005_v63 = vperm.slane %v3001_v62, %v8477_v43  ;;  %v3006_v13 = vrot.slane %v2880_v48, 4 }
 0x3df   :  { %v3007_v24 = vsel %vm139_vm1, %v3006_v13, %v2860_v16  ;;  %v3025_v45 = vrot.slane %v3005_v63, 4 }
 0x3e0   :  { %v3011_v53 = vperm.slane %v3007_v24, %v8477_v43  ;;  %v8139_v20 = vpop.eup %8138  ;;  %v2419_v38 = vpop.f32.mrf.mxu2 }
 0x3e1   :  { %v2438_v49 = vpop.f32.mrf.mxu3  ;;  %v2159_v51 = vmul.f32 %v8139_v20, %v9233_v44  ;;  %v2888_v46 = vsel %vm139_vm1, %v2887_v37, %v2419_v38 }
 0x3e2   :  { %v2881_v3 = vrot.slane %v2438_v49, 4  ;;  %v9393_v27 = vsel %vm139_vm1, %v3011_v53, %v3025_v45  ;;  %v2892_v19 = vperm.slane %v2888_v46, %v8477_v43  ;;  %v3023_v61 = vrot.slane %v3011_v53, 4 }
 0x3e3   :  { %v2191_v41 = vpack.c.bf16 %v2159_v51, %v2159_v51 }
 0x3e4   :  { %v2882_v36 = vsel %vm139_vm1, %v2881_v3, %v2400_v12  ;;  %v2893_v26 = vrot.slane %v2892_v19, 4  ;;  %v9399_v23 = vsel %vm139_vm1, %v3023_v61, %v3005_v63 }
 0x3e5   :  { %v2886_v32 = vperm.slane %v2882_v36, %v8477_v43  ;;  %7651 = vmatmul.msk.bf16.vlgmr.msra.gmra.mxu1 %vm2231_vm5, %v2191_v41 }
 0x3e7   :  { %v2894_v44 = vsel %vm139_vm1, %v2893_v26, %v2886_v32 }
 0x3e8   :  { %v2421_v28 = vpop.f32.mrf.mxu2  ;;  %v2898_v16 = vperm.slane %v2894_v44, %v8482_v56  ;;  %v3034_v44 = vperm.slane %v9393_v27, %v8482_v56 }
 0x3e9   :  { %v2440_v60 = vpop.f32.mrf.mxu3 }
 0x3ea   :  { %v2096_v59 = vpop.xlane.xlu2 %2095  ;;  %v2899_v37 = vrot.slane %v2898_v16, 4 }
 0x3eb   :  { %v2533_v35 = vpop.f32.mrf.mxu0  ;;  %8140 = vrcp.f32 %v2096_v59 }
 0x3ec   :  { %v2907_v31 = vrot.slane %v2533_v35, 4  ;;  %v2900_v41 = vsel %vm139_vm1, 0.0, %v2899_v37 }
 0x3f0   :  { %v2495_v34 = vpop.f32.mrf.mxu2 }
 0x3f1   :  { %v2514_v52 = vpop.f32.mrf.mxu3  ;;  %v2908_v58 = vsel %vm139_vm1, %v2907_v31, %v2495_v34  ;;  %v2102_v18 = vpop.xlane.xlu0 %2101 }
 0x3f2   :  { %v8141_v14 = vpop.eup %8140  ;;  %8142 = vrcp.f32 %v2102_v18  ;;  %v2901_v48 = vrot.slane %v2514_v52, 4 }
 0x3f3   :  { %v2164_v47 = vmul.f32 %v8141_v14, %v9278_v40  ;;  %v2535_v12 = vpop.f32.mrf.mxu0  ;;  %v3053_v14 = vrot.slane %v3034_v44, 4 }
 0x3f5   :  { %v2196_v30 = vpack.c.bf16 %v2164_v47, %v2164_v47 }
 0x3f7   :  { %7656 = vmatmul.msk.bf16.vlgmr.msrb.gmra.mxu2 %vm2231_vm5, %v2196_v30 }
 0x3f8   :  { %v8143_v29 = vpop.eup %8142  ;;  %v2497_v42 = vpop.f32.mrf.mxu2 }
 0x3f9   :  { %v2516_v22 = vpop.f32.mrf.mxu3  ;;  %v2166_v33 = vmul.f32 %v8143_v29, %v9294_v7  ;;  %v2093_v39 = vpop.xlane.xlu2 %2092  ;;  %v2912_v7 = vperm.slane %v2908_v58, %v8477_v43 }
 0x3fa   :  { %8144 = vrcp.f32 %v2093_v39 }
 0x3fb   :  { %v2198_v57 = vpack.c.bf16 %v2166_v33, %v2166_v33  ;;  %v2913_v13 = vrot.slane %v2912_v7, 4 }
 0x3fd   :  { %7658 = vmatmul.msk.bf16.vlgmr.msra.gmra.mxu0 %vm2231_vm5, %v2198_v57 }
 0x400   :  { %v8145_v55 = vpop.eup %8144 }
 0x401   :  { %v2163_v50 = vmul.f32 %v8145_v55, %v9308_v8 }
 0x403   :  { %v2195_v17 = vpack.c.bf16 %v2163_v50, %v2163_v50 }
 0x405   :  { %7655 = vmatmul.msk.bf16.vlgmr.msrb.gmra.mxu1 %vm2231_vm5, %v2195_v17 }
 0x407   :  { %v2099_v40 = vpop.xlane.xlu1 %2098 }
 0x408   :  { %8146 = vrcp.f32 %v2099_v40 }
 0x40e   :  { %v8147_v21 = vpop.eup %8146 }
 0x40f   :  { %v2165_v0 = vmul.f32 %v8147_v21, %v9325_v54 }
 0x410   :  { %v2590_v15 = vpop.f32.mrf.mxu3 }
 0x411   :  { %v2197_v25 = vpack.c.bf16 %v2165_v0, %v2165_v0  ;;  %v2921_v35 = vrot.slane %v2590_v15, 4 }
 0x413   :  { %7657 = vmatmul.msk.bf16.vlgmr.msrb.gmra.mxu3 %vm2231_vm5, %v2197_v25 }
 0x416   :  { %v2476_v62 = vpop.f32.mrf.mxu1 }
 0x417   :  { %v2902_v63 = vsel %vm139_vm1, %v2901_v48, %v2476_v62 }
 0x418   :  { %v2906_v8 = vperm.slane %v2902_v63, %v8477_v43  ;;  %v2592_v24 = vpop.f32.mrf.mxu3 }
 0x41a   :  { %v2914_v45 = vsel %vm139_vm1, %v2913_v13, %v2906_v8 }
 0x41b   :  { %v2918_v54 = vperm.slane %v2914_v45, %v8482_v56 }
 0x41d   :  { %v2919_v53 = vrot.slane %v2918_v54, 4 }
 0x41e   :  { %v2478_v20 = vpop.f32.mrf.mxu1  ;;  %v2609_v38 = vpop.f32.mrf.mxu0 }
 0x41f   :  { %v2920_v49 = vsel %vm139_vm1, 0.0, %v2919_v53  ;;  %v3012_v51 = vsel %vm139_vm1, %v2919_v53, %v2898_v16  ;;  %v2927_v46 = vrot.slane %v2609_v38, 4  ;;  %v2571_v61 = vpop.f32.mrf.mxu2 }
 0x420   :  { %v3016_v3 = vperm.slane %v3012_v51, %v8477_v43  ;;  %v3017_v19 = vrot.slane %v2920_v49, 4  ;;  %v2666_v26 = vpop.f32.mrf.mxu3 }
 0x421   :  { %v2928_v36 = vsel %vm139_vm1, %v2927_v46, %v2571_v61  ;;  %v2941_v25 = vrot.slane %v2666_v26, 4 }
 0x422   :  { %v3018_v32 = vsel %vm139_vm1, %v3017_v19, %v2900_v41  ;;  %v3037_v28 = vrot.slane %v3016_v3, 4  ;;  %v2932_v59 = vperm.slane %v2928_v36, %v8477_v43 }
 0x423   :  { %v3022_v60 = vperm.slane %v3018_v32, %v8477_v43 }
 0x424   :  { %v2933_v27 = vrot.slane %v2932_v59, 4 }
 0x425   :  { %v3038_v31 = vsel %vm139_vm1, %v3022_v60, %v3037_v28  ;;  %v3035_v34 = vrot.slane %v3022_v60, 4 }
 0x426   :  { %v2552_v52 = vpop.f32.mrf.mxu1  ;;  %v2611_v58 = vpop.f32.mrf.mxu0  ;;  %v3046_v18 = vperm.slane %v3038_v31, %v8482_v56 }
 0x427   :  { %v2922_v47 = vsel %vm139_vm1, %v2921_v35, %v2552_v52  ;;  %v9432_v12 = vsel %vm139_vm1, %v3035_v34, %v3016_v3  ;;  %v2573_v30 = vpop.f32.mrf.mxu2 }
 0x428   :  { %v2926_v29 = vperm.slane %v2922_v47, %v8477_v43  ;;  %v9436_v42 = vsel %vm139_vm1, %v3046_v18, %v3053_v14  ;;  %v3051_v22 = vrot.slane %v3046_v18, 4  ;;  %v2668_v33 = vpop.f32.mrf.mxu3 }
 0x42a   :  { %v2934_v39 = vsel %vm139_vm1, %v2933_v27, %v2926_v29  ;;  %v9440_v57 = vsel %vm139_vm1, %v3051_v22, %v3034_v44 }
 0x42b   :  { %v2938_v16 = vperm.slane %v2934_v39, %v8482_v56 }
 0x42d   :  { %v2939_v54 = vrot.slane %v2938_v16, 4 }
 0x42e   :  { %v2554_v55 = vpop.f32.mrf.mxu1  ;;  %v2685_v50 = vpop.f32.mrf.mxu0 }
 0x42f   :  { %v2947_v17 = vrot.slane %v2685_v50, 4  ;;  %v2647_v40 = vpop.f32.mrf.mxu2  ;;  %v2940_v19 = vsel %vm139_vm1, 0.0, %v2939_v54 }
 0x431   :  { %v2948_v21 = vsel %vm139_vm1, %v2947_v17, %v2647_v40 }
 0x432   :  { %v2952_v0 = vperm.slane %v2948_v21, %v8477_v43 }
 0x434   :  { %v2953_v62 = vrot.slane %v2952_v0, 4 }
 0x436   :  { %v2628_v15 = vpop.f32.mrf.mxu1  ;;  %v2687_v7 = vpop.f32.mrf.mxu0 }
 0x437   :  { %v2942_v48 = vsel %vm139_vm1, %v2941_v25, %v2628_v15  ;;  %v2649_v63 = vpop.f32.mrf.mxu2  ;;  %v2742_v13 = vpop.f32.mrf.mxu3 }
 0x438   :  { %v2946_v8 = vperm.slane %v2942_v48, %v8477_v43  ;;  %v2961_v52 = vrot.slane %v2742_v13, 4 }
 0x43a   :  { %v2954_v24 = vsel %vm139_vm1, %v2953_v62, %v2946_v8 }
 0x43b   :  { %v2958_v45 = vperm.slane %v2954_v24, %v8482_v56 }
 0x43d   :  { %v2959_v37 = vrot.slane %v2958_v45, 4 }
 0x43e   :  { %v2630_v53 = vpop.f32.mrf.mxu1 }
 0x43f   :  { %v2960_v20 = vsel %vm139_vm1, 0.0, %v2959_v37  ;;  %v3055_v38 = vsel %vm139_vm1, %v2959_v37, %v2938_v16  ;;  %v2723_v46 = vpop.f32.mrf.mxu2  ;;  %v2744_v3 = vpop.f32.mrf.mxu3 }
 0x440   :  { %v3059_v49 = vperm.slane %v3055_v38, %v8477_v43  ;;  %v3060_v51 = vrot.slane %v2960_v20, 4  ;;  %v3030_v3 = vperm.slane %v9399_v23, %v8482_v56 }
 0x442   :  { %v3061_v61 = vsel %vm139_vm1, %v3060_v51, %v2940_v19  ;;  %v3079_v41 = vrot.slane %v3059_v49, 4 }
 0x443   :  { %v3065_v36 = vperm.slane %v3061_v61, %v8477_v43 }
 0x445   :  { %v3080_v26 = vsel %vm139_vm1, %v3065_v36, %v3079_v41  ;;  %v3077_v32 = vrot.slane %v3065_v36, 4 }
 0x447   :  { %v3078_v44 = vsel %vm139_vm1, %v3077_v32, %v3059_v49  ;;  %v2725_v28 = vpop.f32.mrf.mxu2  ;;  %v3088_v49 = vperm.slane %v3080_v26, %v8482_v56 }
 0x448   :  { %v3084_v19 = vperm.slane %v3078_v44, %v8482_v56  ;;  %v3042_v28 = vperm.slane %v9432_v12, %v8482_v56 }
 0x449   :  { %v3107_v32 = vrot.slane %v3088_v49, 4 }
 0x44a   :  { %v3103_v23 = vrot.slane %v3084_v19, 4 }
 0x452   :  { %v2761_v60 = vpop.f32.mrf.mxu0 }
 0x453   :  { %v2967_v59 = vrot.slane %v2761_v60, 4  ;;  %v3049_v60 = vrot.slane %v3030_v3, 4 }
 0x455   :  { %v2968_v35 = vsel %vm139_vm1, %v2967_v59, %v2723_v46 }
 0x456   :  { %v2972_v34 = vperm.slane %v2968_v35, %v8477_v43 }
 0x458   :  { %v2973_v14 = vrot.slane %v2972_v34, 4 }
 0x45a   :  { %v2763_v31 = vpop.f32.mrf.mxu0 }
 0x462   :  { %v2704_v58 = vpop.f32.mrf.mxu1 }
 0x463   :  { %v2962_v18 = vsel %vm139_vm1, %v2961_v52, %v2704_v58  ;;  %v3050_v52 = vsel %vm139_vm1, %v3042_v28, %v3049_v60  ;;  %v8335_v60 = vmov 32.0  }
 0x464   :  { %v2966_v47 = vperm.slane %v2962_v18, %v8477_v43  ;;  %8148 = vrcp.f32 %v8335_v60 }
 0x466   :  { %v2974_v27 = vsel %vm139_vm1, %v2973_v14, %v2966_v47  ;;  %v7815_v14 = vld [vmem:[%s10983_s2] sm:$0xff]  ;;  %v3047_v47 = vrot.slane %v3042_v28, 4 }
 0x467   :  { %v2978_v62 = vperm.slane %v2974_v27, %v8482_v56 }
 0x469   :  { %v2979_v16 = vrot.slane %v2978_v62, 4 }
 0x46a   :  { %v2706_v30 = vpop.f32.mrf.mxu1 }
 0x46b   :  { %v2980_v20 = vsel %vm139_vm1, 0.0, %v2979_v16 }
 0x47a   :  { %v2799_v29 = vpop.f32.mrf.mxu2  ;;  %v2837_v22 = vpop.f32.mrf.mxu0 }
 0x47b   :  { %v2987_v17 = vrot.slane %v2837_v22, 4 }
 0x47d   :  { %v2988_v40 = vsel %vm139_vm1, %v2987_v17, %v2799_v29 }
 0x47e   :  { %v2992_v21 = vperm.slane %v2988_v40, %v8477_v43 }
 0x480   :  { %v2993_v7 = vrot.slane %v2992_v21, 4 }
 0x482   :  { %v2801_v33 = vpop.f32.mrf.mxu2  ;;  %v2780_v39 = vpop.f32.mrf.mxu1 }
 0x483   :  { %v2839_v55 = vpop.f32.mrf.mxu0 }
 0x48a   :  { %v2782_v50 = vpop.f32.mrf.mxu1 }
 0x48b   :  { %v3048_v50 = vsel %vm139_vm1, %v3047_v47, %v3030_v3 }
 0x496   :  { %v2818_v0 = vpop.f32.mrf.mxu3 }
 0x497   :  { %v2981_v25 = vrot.slane %v2818_v0, 4 }
 0x499   :  { %v2982_v15 = vsel %vm139_vm1, %v2981_v25, %v2780_v39 }
 0x49a   :  { %v2986_v48 = vperm.slane %v2982_v15, %v8477_v43 }
 0x49c   :  { %v2994_v63 = vsel %vm139_vm1, %v2993_v7, %v2986_v48 }
 0x49d   :  { %v2998_v13 = vperm.slane %v2994_v63, %v8482_v56 }
 0x49e   :  { %v2820_v8 = vpop.f32.mrf.mxu3 }
 0x49f   :  { %v2999_v24 = vrot.slane %v2998_v13, 4  ;;  %v9512_v13 = vld [vmem:[%s10986_s5] sm:$0xff] }
 0x4a0   :  { %v3142_v8 = vperm.slane %v9512_v13, 3  ;;  %v3401_v60 = vperm.slane %v9512_v13, 6 }
 0x4a1   :  { %v3000_v45 = vsel %vm139_vm1, 0.0, %v2999_v24  ;;  %v3066_v54 = vsel %vm139_vm1, %v2999_v24, %v2978_v62 }
 0x4a2   :  { %v3071_v37 = vrot.slane %v3000_v45, 4  ;;  %v3070_v53 = vperm.slane %v3066_v54, %v8477_v43 }
 0x4a4   :  { %v3072_v38 = vsel %vm139_vm1, %v3071_v37, %v2980_v20  ;;  %v3091_v51 = vrot.slane %v3070_v53, 4 }
 0x4a5   :  { %v3076_v46 = vperm.slane %v3072_v38, %v8477_v43 }
 0x4a7   :  { %v3092_v61 = vsel %vm139_vm1, %v3076_v46, %v3091_v51  ;;  %v3089_v41 = vrot.slane %v3076_v46, 4 }
 0x4a8   :  { %v3100_v36 = vperm.slane %v3092_v61, %v8482_v56 }
 0x4a9   :  { %v3090_v26 = vsel %vm139_vm1, %v3089_v41, %v3070_v53 }
 0x4aa   :  { %v3108_v59 = vsel %vm139_vm1, %v3100_v36, %v3107_v32  ;;  %v3105_v35 = vrot.slane %v3100_v36, 4  ;;  %v3096_v31 = vperm.slane %v3090_v26, %v8482_v56 }
 0x4ab   :  { %v7929_v44 = vpack.i.bf16 %v3108_v59, %v9436_v42  ;;  %v7816_v42 = vld [vmem:[%s10983_s2 + $0x8] sm:$0xff] }
 0x4ac   :  { %v3106_v34 = vsel %vm139_vm1, %v3105_v35, %v3088_v49  ;;  %v3104_v58 = vsel %vm139_vm1, %v3096_v31, %v3103_v23  ;;  %3164 = vmatpush.bf16.msra.mxu1 %v7816_v42  ;;  %v3101_v27 = vrot.slane %v3096_v31, 4  ;;  %v8337_v31 = vmov 842150450  }
 0x4ad   :  { %7930 = vrot.lane.b32.xlu2 %v7929_v44, %s8332_s10  ;;  %v7924_v12 = vpack.i.bf16 %v3106_v34, %v9440_v57  ;;  %v7919_v18 = vpack.i.bf16 %v3104_v58, %v3050_v52  ;;  %v3243_v23 = vunpack.c.l.s4 %v8337_v31  ;;  %v8338_v44 = vmov 1414812756  }
 0x4ae   :  { %v3102_v17 = vsel %vm139_vm1, %v3101_v27, %v3084_v19  ;;  %v3247_v34 = vunpack.c.l.s4 %v8338_v44  ;;  %v8339_v52 = vmov 1987475062   ;;  %v3403_v31 = vrot.slane %v3401_v60, 2 }
 0x4af   :  { %7925 = vrot.lane.b32.xlu0 %v7924_v12, %s8333_s11  ;;  %7920 = vrot.lane.b32.xlu1 %v7919_v18, %s8334_s12  ;;  %v3251_v58 = vunpack.c.l.s4 %v8339_v52  ;;  %v9529_v42 = vunpack.c.0.s8 %v3243_v23  ;;  %v3404_v23 = vrot.slane %v3401_v60, 4  ;;  %v3405_v44 = vrot.slane %v3401_v60, 6 }
 0x4b0   :  { %3165 = vmatpush.bf16.msra.mxu1 %v7815_v14  ;;  %v9531_v14 = vunpack.c.0.s8 %v3247_v34 }
 0x4b1   :  { %10999 = vst [vmem:[#allocation6_spill] sm:$0xff] %v9529_v42  ;;  %v9533_v47 = vunpack.c.0.s8 %v3251_v58 }
 0x4b2   :  { %11000 = vst [vmem:[#allocation7_spill] sm:$0xff] %v9531_v14 }
 0x4b3   :  { %11001 = vst [vmem:[#allocation8_spill] sm:$0xff] %v9533_v47 }
 0x507   :  { %v7931_v57 = vpop.permute.xlu2 %7930 }
 0x508   :  { %v7933_v40 = vunpack.i.h.bf16 %v7931_v57  ;;  %v7932_v21 = vunpack.i.l.bf16 %v7931_v57 }
 0x521   :  { %v7926_v30 = vpop.permute.xlu0 %7925  ;;  %v7921_v29 = vpop.permute.xlu1 %7920 }
 0x522   :  { %v7928_v22 = vunpack.i.h.bf16 %v7926_v30  ;;  %v7927_v33 = vunpack.i.l.bf16 %v7926_v30  ;;  %v7923_v39 = vunpack.i.h.bf16 %v7921_v29  ;;  %v7922_v55 = vunpack.i.l.bf16 %v7921_v29 }
 0x524   :  { %v3133_v0 = vsel %vm1205_vm2, %v3048_v50, %v7922_v55  ;;  %v3134_v25 = vsel %vm1205_vm2, %v3102_v17, %v7923_v39 }
 0x525   :  { %v3136_v15 = vsel %vm3135_vm6, %v3133_v0, %v7927_v33  ;;  %v3137_v7 = vsel %vm3135_vm6, %v3134_v25, %v7928_v22 }
 0x526   :  { %v3139_v48 = vsel %vm3138_vm7, %v3136_v15, %v7932_v21  ;;  %v3140_v62 = vsel %vm3138_vm7, %v3137_v7, %v7933_v40 }
 0x527   :  { %v3141_v63 = vpack.c.bf16 %v3140_v62, %v3139_v48 }
 0x529   :  { %7667 = vmatmul.msk.bf16.vlgmr.msra.gmra.mxu1 %vm97_vm0, %v3141_v63 }
 0x5a6   :  { %v3167_v16 = vpop.f32.mrf.mxu1 }
 0x5a7   :  { %v3168_v24 = vadd.f32 %v3167_v16, %v3142_v8 }
 0x5a9   :  { %v3174_v45 = vrot.slane %v3168_v24, 2  ;;  %v3175_v54 = vrot.slane %v3168_v24, 4  ;;  %v3176_v37 = vrot.slane %v3168_v24, 6  ;;  %v3186_v53 = vadd.f32 %v3168_v24, %v8393_v1 }
 0x5ab   :  { %v3187_v20 = vadd.f32 %v3174_v45, %v8398_v2  ;;  %v3188_v38 = vadd.f32 %v3175_v54, %v8406_v4  ;;  %v3189_v49 = vadd.f32 %v3176_v37, %v8411_v5  ;;  %3202 = vst [vmem:[#allocation1] ss:$4 sm:$0xff] %v3186_v53 }
 0x5ad   :  { %3204 = vst [vmem:[#allocation1 + $0x1] ss:$4 sm:$0xff] %v3187_v20 }
 0x5ae   :  { %3206 = vst [vmem:[#allocation1 + $0x2] ss:$4 sm:$0xff] %v3188_v38  ;;  %v3169_v51 = vpop.f32.mrf.mxu1 }
 0x5af   :  { %3208 = vst [vmem:[#allocation1 + $0x3] ss:$4 sm:$0xff] %v3189_v49  ;;  %v3170_v46 = vadd.f32 %v3169_v51, %v3142_v8 }
 0x5b1   :  { %v3177_v3 = vrot.slane %v3170_v46, 2  ;;  %v3178_v19 = vrot.slane %v3170_v46, 4  ;;  %v3179_v61 = vrot.slane %v3170_v46, 6  ;;  %v3190_v41 = vadd.f32 %v3170_v46, %v8416_v6  ;;  %v8149_v6 = vpop.eup %8148 }
 0x5b2   :  { %vm3232_vm8 = vweird.f32 %v8149_v6 }
 0x5b3   :  { %v3191_v36 = vadd.f32 %v3177_v3, %v8426_v9  ;;  %v3192_v1 = vadd.f32 %v3178_v19, %v8432_v10  ;;  %v3193_v2 = vadd.f32 %v3179_v61, %v8439_v11  ;;  %3210 = vst [vmem:[#allocation1 + $0x20] ss:$4 sm:$0xff] %v3190_v41  ;;  %v3228_v9 = vmul.f32 32.0, %v8149_v6 }
 0x5b4   :  { %v8336_v11 = vmov 269488144  }
 0x5b5   :  { %3212 = vst [vmem:[#allocation1 + $0x21] ss:$4 sm:$0xff] %v3191_v36  ;;  %v3229_v26 = vsub.f32 1.0, %v3228_v9  ;;  %v3239_v35 = vunpack.c.l.s4 %v8336_v11 }
 0x5b6   :  { %v3217_v4 = vld.sshfl [vmem:[#allocation1] sm:$0xff pattern:$0x73625140]  ;;  %3214 = vst [vmem:[#allocation1 + $0x22] ss:$4 sm:$0xff] %v3192_v1 }
 0x5b7   :  { %3216 = vst [vmem:[#allocation1 + $0x23] ss:$4 sm:$0xff] %v3193_v2  ;;  %v3221_v5 = vsel %vm97_vm0, %v3217_v4, 0.0  ;;  %v3230_v10 = vmul.f32 %v8149_v6, %v3229_v26  ;;  %v9527_v18 = vunpack.c.0.s8 %v3239_v35 }
 0x5b8   :  { %3222 = vadd.xlane.f32.xlu0 %v3221_v5 }
 0x5b9   :  { %v3231_v59 = vadd.f32 %v8149_v6, %v3230_v10  ;;  %10998 = vst [vmem:[#allocation5_spill] sm:$0xff] %v9527_v18  ;;  %v7817_v10 = vld [vmem:[%s10984_s3] sm:$0xff] }
 0x5bb   :  { %v9525_v12 = vsel %vm3232_vm8, %v8149_v6, %v3231_v59  ;;  %v7818_v6 = vld [vmem:[%s10984_s3 + $0x8] sm:$0xff]  ;;  %v3417_v59 = vperm.slane %v9512_v13, 7 }
 0x5bc   :  { %3483 = vmatpush.bf16.msra.mxu2 %v7818_v6 }
 0x5be   :  { %v3218_v32 = vld.sshfl [vmem:[#allocation1 + $0x20] sm:$0xff pattern:$0x73625140] }
 0x5bf   :  { %v3224_v28 = vsel %vm97_vm0, %v3218_v32, 0.0 }
 0x5c0   :  { %3225 = vadd.xlane.f32.xlu1 %v3224_v28  ;;  %3484 = vmatpush.bf16.msra.mxu2 %v7817_v10 }
 0x62b   :  { %v3223_v27 = vpop.xlane.xlu0 %3222 }
 0x62c   :  { %v3234_v57 = vmul.f32 %v9525_v12, %v3223_v27 }
 0x62e   :  { %v3241_v30 = vperm.slane %v3234_v57, %v9527_v18  ;;  %v3245_v29 = vperm.slane %v3234_v57, %v9529_v42  ;;  %v3249_v22 = vperm.slane %v3234_v57, %v9531_v14  ;;  %v3253_v33 = vperm.slane %v3234_v57, %v9533_v47 }
 0x630   :  { %v9540_v39 = vsub.f32 %v3186_v53, %v3241_v30  ;;  %v9542_v55 = vsub.f32 %v3187_v20, %v3245_v29  ;;  %v9544_v50 = vsub.f32 %v3188_v38, %v3249_v22  ;;  %v9546_v17 = vsub.f32 %v3189_v49, %v3253_v33 }
 0x631   :  { %v3419_v29 = vrot.slane %v3417_v59, 2  ;;  %v3420_v22 = vrot.slane %v3417_v59, 4 }
 0x632   :  { %v3286_v40 = vmul.f32 %v9540_v39, %v9540_v39  ;;  %v3287_v21 = vmul.f32 %v9542_v55, %v9542_v55  ;;  %v3288_v0 = vmul.f32 %v9544_v50, %v9544_v50  ;;  %v3289_v25 = vmul.f32 %v9546_v17, %v9546_v17 }
 0x633   :  { %v3226_v15 = vpop.xlane.xlu1 %3225 }
 0x634   :  { %3302 = vst [vmem:[#allocation1] ss:$4 sm:$0xff] %v3286_v40  ;;  %v3235_v7 = vmul.f32 %v9525_v12, %v3226_v15  ;;  %v3421_v15 = vrot.slane %v3417_v59, 6 }
 0x635   :  { %3304 = vst [vmem:[#allocation1 + $0x1] ss:$4 sm:$0xff] %v3287_v21 }
 0x636   :  { %3306 = vst [vmem:[#allocation1 + $0x2] ss:$4 sm:$0xff] %v3288_v0  ;;  %v3257_v48 = vperm.slane %v3235_v7, %v9527_v18  ;;  %v3261_v62 = vperm.slane %v3235_v7, %v9529_v42  ;;  %v3265_v63 = vperm.slane %v3235_v7, %v9531_v14  ;;  %v3269_v8 = vperm.slane %v3235_v7, %v9533_v47 }
 0x637   :  { %3308 = vst [vmem:[#allocation1 + $0x3] ss:$4 sm:$0xff] %v3289_v25 }
 0x638   :  { %v9561_v16 = vsub.f32 %v3190_v41, %v3257_v48  ;;  %v9563_v24 = vsub.f32 %v3191_v36, %v3261_v62  ;;  %v9565_v45 = vsub.f32 %v3192_v1, %v3265_v63  ;;  %v9567_v54 = vsub.f32 %v3193_v2, %v3269_v8 }
 0x63a   :  { %v3290_v37 = vmul.f32 %v9561_v16, %v9561_v16  ;;  %v3291_v53 = vmul.f32 %v9563_v24, %v9563_v24  ;;  %v3292_v20 = vmul.f32 %v9565_v45, %v9565_v45  ;;  %v3293_v38 = vmul.f32 %v9567_v54, %v9567_v54 }
 0x63c   :  { %3310 = vst [vmem:[#allocation1 + $0x20] ss:$4 sm:$0xff] %v3290_v37 }
 0x63d   :  { %3312 = vst [vmem:[#allocation1 + $0x21] ss:$4 sm:$0xff] %v3291_v53 }
 0x63e   :  { %v3317_v49 = vld.sshfl [vmem:[#allocation1] sm:$0xff pattern:$0x73625140]  ;;  %3314 = vst [vmem:[#allocation1 + $0x22] ss:$4 sm:$0xff] %v3292_v20 }
 0x63f   :  { %3316 = vst [vmem:[#allocation1 + $0x23] ss:$4 sm:$0xff] %v3293_v38  ;;  %v3321_v51 = vsel %vm97_vm0, %v3317_v49, 0.0 }
 0x640   :  { %3322 = vadd.xlane.f32.xlu2 %v3321_v51 }
 0x646   :  { %v3318_v46 = vld.sshfl [vmem:[#allocation1 + $0x20] sm:$0xff pattern:$0x73625140] }
 0x647   :  { %v3324_v3 = vsel %vm97_vm0, %v3318_v46, 0.0 }
 0x648   :  { %3325 = vadd.xlane.f32.xlu0 %v3324_v3 }
 0x6b3   :  { %v3323_v19 = vpop.xlane.xlu2 %3322 }
 0x6b4   :  { %v3327_v61 = vmul.f32 %v3323_v19, %v9525_v12 }
 0x6b6   :  { %v3329_v41 = vadd.f32 1e-05, %v3327_v61 }
 0x6b8   :  { %8150 = vrsqrt.f32 %v3329_v41  ;;  %vm3337_vm10 = vweird.f32 %v3329_v41 }
 0x6bb   :  { %v3326_v36 = vpop.xlane.xlu0 %3325 }
 0x6bc   :  { %v3328_v1 = vmul.f32 %v3326_v36, %v9525_v12 }
 0x6be   :  { %v8151_v2 = vpop.eup %8150  ;;  %v3330_v4 = vadd.f32 1e-05, %v3328_v1 }
 0x6bf   :  { %v3332_v5 = vmul.f32 %v8151_v2, %v3329_v41  ;;  %vm3338_vm9 = vweird.f32 %v8151_v2 }
 0x6c0   :  { %8152 = vrsqrt.f32 %v3330_v4  ;;  %vm3339_vm11 = vmor %vm3337_vm10, %vm3338_vm9  ;;  %vm3347_vm13 = vweird.f32 %v3330_v4 }
 0x6c1   :  { %v3333_v32 = vmul.f32 %v8151_v2, %v3332_v5 }
 0x6c3   :  { %v3334_v28 = vmul.f32 0.5, %v3333_v32 }
 0x6c5   :  { %v3335_v9 = vsub.f32 1.5, %v3334_v28 }
 0x6c6   :  { %v8153_v26 = vpop.eup %8152 }
 0x6c7   :  { %v3336_v11 = vmul.f32 %v8151_v2, %v3335_v9  ;;  %v3342_v35 = vmul.f32 %v8153_v26, %v3330_v4  ;;  %vm3348_vm12 = vweird.f32 %v8153_v26  ;;  %v3461_v9 = vperm.slane %v9512_v13, 4 }
 0x6c8   :  { %vm3349_vm14 = vmor %vm3347_vm13, %vm3348_vm12 }
 0x6c9   :  { %v3340_v34 = vsel %vm3339_vm11, %v8151_v2, %v3336_v11  ;;  %v3343_v52 = vmul.f32 %v8153_v26, %v3342_v35 }
 0x6ca   :  { %v3356_v58 = vperm.slane %v3340_v34, %v9527_v18  ;;  %v3360_v27 = vperm.slane %v3340_v34, %v9529_v42  ;;  %v3364_v57 = vperm.slane %v3340_v34, %v9531_v14  ;;  %v3368_v30 = vperm.slane %v3340_v34, %v9533_v47 }
 0x6cb   :  { %v3344_v33 = vmul.f32 0.5, %v3343_v52 }
 0x6cc   :  { %v3393_v40 = vmul.f32 %v3356_v58, %v9540_v39  ;;  %v3394_v21 = vmul.f32 %v3360_v27, %v9542_v55  ;;  %v3395_v0 = vmul.f32 %v3364_v57, %v9544_v50  ;;  %v3396_v25 = vmul.f32 %v3368_v30, %v9546_v17 }
 0x6cd   :  { %v3345_v7 = vsub.f32 1.5, %v3344_v33 }
 0x6ce   :  { %v3409_v48 = vmul.f32 %v3401_v60, %v3393_v40  ;;  %v3410_v62 = vmul.f32 %v3403_v31, %v3394_v21  ;;  %v3411_v63 = vmul.f32 %v3404_v23, %v3395_v0  ;;  %v3412_v8 = vmul.f32 %v3405_v44, %v3396_v25 }
 0x6cf   :  { %v3346_v37 = vmul.f32 %v8153_v26, %v3345_v7 }
 0x6d0   :  { %v3425_v53 = vadd.f32 %v3417_v59, %v3409_v48  ;;  %v3426_v20 = vadd.f32 %v3419_v29, %v3410_v62  ;;  %v3427_v38 = vadd.f32 %v3420_v22, %v3411_v63  ;;  %v3428_v39 = vadd.f32 %v3421_v15, %v3412_v8 }
 0x6d1   :  { %v3350_v49 = vsel %vm3349_vm14, %v8153_v26, %v3346_v37 }
 0x6d2   :  { %3441 = vst [vmem:[#allocation1] ss:$4 sm:$0xff] %v3425_v53  ;;  %v3372_v55 = vperm.slane %v3350_v49, %v9527_v18  ;;  %v3376_v50 = vperm.slane %v3350_v49, %v9529_v42  ;;  %v3380_v17 = vperm.slane %v3350_v49, %v9531_v14  ;;  %v3384_v51 = vperm.slane %v3350_v49, %v9533_v47 }
 0x6d3   :  { %3443 = vst [vmem:[#allocation1 + $0x1] ss:$4 sm:$0xff] %v3426_v20 }
 0x6d4   :  { %3445 = vst [vmem:[#allocation1 + $0x2] ss:$4 sm:$0xff] %v3427_v38  ;;  %v3397_v46 = vmul.f32 %v3372_v55, %v9561_v16  ;;  %v3398_v3 = vmul.f32 %v3376_v50, %v9563_v24  ;;  %v3399_v19 = vmul.f32 %v3380_v17, %v9565_v45  ;;  %v3400_v61 = vmul.f32 %v3384_v51, %v9567_v54  ;;  %v7820_v45 = vld [vmem:[%s10985_s4 + $0x8] sm:$0xff]  ;;  %v7819_v54 = vld [vmem:[%s10985_s4] sm:$0xff] }
 0x6d5   :  { %3447 = vst [vmem:[#allocation1 + $0x3] ss:$4 sm:$0xff] %v3428_v39  ;;  %3516 = vmatpush.bf16.msra.mxu3 %v7820_v45 }
 0x6d6   :  { %v3413_v41 = vmul.f32 %v3401_v60, %v3397_v46  ;;  %v3414_v36 = vmul.f32 %v3403_v31, %v3398_v3  ;;  %v3415_v1 = vmul.f32 %v3404_v23, %v3399_v19  ;;  %v3416_v2 = vmul.f32 %v3405_v44, %v3400_v61 }
 0x6d7   :  { %v3494_v23 = vperm.slane %v9512_v13, 5 }
 0x6d8   :  { %v3429_v4 = vadd.f32 %v3417_v59, %v3413_v41  ;;  %v3430_v5 = vadd.f32 %v3419_v29, %v3414_v36  ;;  %v3431_v32 = vadd.f32 %v3420_v22, %v3415_v1  ;;  %v3432_v28 = vadd.f32 %v3421_v15, %v3416_v2 }
 0x6d9   :  { %3517 = vmatpush.bf16.msra.mxu3 %v7819_v54 }
 0x6da   :  { %3449 = vst [vmem:[#allocation1 + $0x20] ss:$4 sm:$0xff] %v3429_v4 }
 0x6db   :  { %3451 = vst [vmem:[#allocation1 + $0x21] ss:$4 sm:$0xff] %v3430_v5 }
 0x6dc   :  { %3453 = vst [vmem:[#allocation1 + $0x22] ss:$4 sm:$0xff] %v3431_v32  ;;  %v3456_v16 = vld.sshfl [vmem:[#allocation1] sm:$0xff pattern:$0x73625140] }
 0x6dd   :  { %3455 = vst [vmem:[#allocation1 + $0x23] ss:$4 sm:$0xff] %v3432_v28 }
 0x6e4   :  { %v3457_v6 = vld.sshfl [vmem:[#allocation1 + $0x20] sm:$0xff pattern:$0x73625140] }
 0x6e5   :  { %v3460_v24 = vpack.c.bf16 %v3457_v6, %v3456_v16 }
 0x6e7   :  { %7676 = vmatmul.msk.bf16.vlgmr.msra.gmra.mxu2 %vm97_vm0, %v3460_v24 }
 0x76a   :  { %v3486_v60 = vpop.f32.mrf.mxu2 }
 0x76b   :  { %v3487_v26 = vadd.f32 %v3486_v60, %v3461_v9 }
 0x76d   :  { %v3491_v11 = vmax.f32 %v3487_v26, 0.0 }
 0x772   :  { %v3488_v10 = vpop.f32.mrf.mxu2 }
 0x773   :  { %v3489_v59 = vadd.f32 %v3488_v10, %v3461_v9 }
 0x775   :  { %v3492_v35 = vmax.f32 %v3489_v59, 0.0 }
 0x777   :  { %v3493_v31 = vpack.c.bf16 %v3492_v35, %v3491_v11 }
 0x779   :  { %7685 = vmatmul.msk.bf16.vlgmr.msra.gmra.mxu3 %vm97_vm0, %v3493_v31 }
 0x7fc   :  { %v3519_v44 = vpop.f32.mrf.mxu3 }
 0x7fd   :  { %v3520_v34 = vadd.f32 %v3519_v44, %v3494_v23 }
 0x7ff   :  { %v3526_v52 = vrot.slane %v3520_v34, 2  ;;  %v3527_v58 = vrot.slane %v3520_v34, 4  ;;  %v3528_v27 = vrot.slane %v3520_v34, 6  ;;  %v3538_v57 = vadd.f32 %v3520_v34, %v3425_v53 }
 0x801   :  { %v3539_v30 = vadd.f32 %v3526_v52, %v3426_v20  ;;  %v3540_v29 = vadd.f32 %v3527_v58, %v3427_v38  ;;  %v3541_v22 = vadd.f32 %v3528_v27, %v3428_v39  ;;  %3554 = vst [vmem:[#allocation1] ss:$4 sm:$0xff] %v3538_v57 }
 0x803   :  { %3556 = vst [vmem:[#allocation1 + $0x1] ss:$4 sm:$0xff] %v3539_v30 }
 0x804   :  { %3558 = vst [vmem:[#allocation1 + $0x2] ss:$4 sm:$0xff] %v3540_v29  ;;  %v3521_v33 = vpop.f32.mrf.mxu3 }
 0x805   :  { %3560 = vst [vmem:[#allocation1 + $0x3] ss:$4 sm:$0xff] %v3541_v22  ;;  %v3522_v40 = vadd.f32 %v3521_v33, %v3494_v23  ;;  %v7822_v33 = vld [vmem:[%s10982_s1 + $0x18] sm:$0xff] }
 0x806   :  { %3850 = vmatpush.bf16.msrb.mxu0 %v7822_v33 }
 0x807   :  { %v3529_v21 = vrot.slane %v3522_v40, 2  ;;  %v3530_v0 = vrot.slane %v3522_v40, 4  ;;  %v3531_v25 = vrot.slane %v3522_v40, 6  ;;  %v3542_v15 = vadd.f32 %v3522_v40, %v3429_v4 }
 0x809   :  { %v3543_v13 = vadd.f32 %v3529_v21, %v3430_v5  ;;  %v3544_v7 = vadd.f32 %v3530_v0, %v3431_v32  ;;  %v3545_v48 = vadd.f32 %v3531_v25, %v3432_v28  ;;  %3562 = vst [vmem:[#allocation1 + $0x20] ss:$4 sm:$0xff] %v3542_v15  ;;  %v7821_v0 = vld [vmem:[%s10982_s1 + $0x10] sm:$0xff] }
 0x80a   :  { %3851 = vmatpush.bf16.msrb.mxu0 %v7821_v0 }
 0x80b   :  { %3564 = vst [vmem:[#allocation1 + $0x21] ss:$4 sm:$0xff] %v3543_v13 }
 0x80c   :  { %v3569_v62 = vld.sshfl [vmem:[#allocation1] sm:$0xff pattern:$0x73625140]  ;;  %3566 = vst [vmem:[#allocation1 + $0x22] ss:$4 sm:$0xff] %v3544_v7 }
 0x80d   :  { %3568 = vst [vmem:[#allocation1 + $0x23] ss:$4 sm:$0xff] %v3545_v48  ;;  %v3573_v63 = vsel %vm97_vm0, %v3569_v62, 0.0 }
 0x80e   :  { %3574 = vadd.xlane.f32.xlu1 %v3573_v63 }
 0x814   :  { %v3570_v8 = vld.sshfl [vmem:[#allocation1 + $0x20] sm:$0xff pattern:$0x73625140] }
 0x815   :  { %v3576_v37 = vsel %vm97_vm0, %v3570_v8, 0.0 }
 0x816   :  { %3577 = vadd.xlane.f32.xlu2 %v3576_v37 }
 0x881   :  { %v3575_v53 = vpop.xlane.xlu1 %3574 }
 0x882   :  { %v3579_v20 = vmul.f32 %v3575_v53, %v9525_v12 }
 0x884   :  { %v3586_v38 = vperm.slane %v3579_v20, %v9527_v18  ;;  %v3590_v39 = vperm.slane %v3579_v20, %v9529_v42  ;;  %v3594_v49 = vperm.slane %v3579_v20, %v9531_v14  ;;  %v3598_v55 = vperm.slane %v3579_v20, %v9533_v47 }
 0x886   :  { %v9622_v50 = vsub.f32 %v3538_v57, %v3586_v38  ;;  %v9624_v17 = vsub.f32 %v3539_v30, %v3590_v39  ;;  %v9626_v51 = vsub.f32 %v3540_v29, %v3594_v49  ;;  %v9628_v46 = vsub.f32 %v3541_v22, %v3598_v55  ;;  %v56_v57 = vld [vmem:[%s10986_s5 + $0x8] sm:$0x3] }
 0x887   :  { %v9666_v22 = vperm.slane %v56_v57, 0  ;;  %v3762_v25 = vperm.slane %v56_v57, 1 }
 0x888   :  { %v3631_v3 = vmul.f32 %v9622_v50, %v9622_v50  ;;  %v3632_v19 = vmul.f32 %v9624_v17, %v9624_v17  ;;  %v3633_v61 = vmul.f32 %v9626_v51, %v9626_v51  ;;  %v3634_v41 = vmul.f32 %v9628_v46, %v9628_v46 }
 0x889   :  { %v3578_v36 = vpop.xlane.xlu2 %3577  ;;  %v3749_v63 = vrot.slane %v9666_v22, 4  ;;  %v3750_v8 = vrot.slane %v9666_v22, 6  ;;  %v3764_v55 = vrot.slane %v3762_v25, 2 }
 0x88a   :  { %3647 = vst [vmem:[#allocation1] ss:$4 sm:$0xff] %v3631_v3  ;;  %v3580_v1 = vmul.f32 %v3578_v36, %v9525_v12  ;;  %v3765_v3 = vrot.slane %v3762_v25, 4 }
 0x88b   :  { %3649 = vst [vmem:[#allocation1 + $0x1] ss:$4 sm:$0xff] %v3632_v19 }
 0x88c   :  { %3651 = vst [vmem:[#allocation1 + $0x2] ss:$4 sm:$0xff] %v3633_v61  ;;  %v3602_v2 = vperm.slane %v3580_v1, %v9527_v18  ;;  %v3606_v4 = vperm.slane %v3580_v1, %v9529_v42  ;;  %v3610_v5 = vperm.slane %v3580_v1, %v9531_v14  ;;  %v3614_v32 = vperm.slane %v3580_v1, %v9533_v47 }
 0x88d   :  { %3653 = vst [vmem:[#allocation1 + $0x3] ss:$4 sm:$0xff] %v3634_v41 }
 0x88e   :  { %v9643_v28 = vsub.f32 %v3542_v15, %v3602_v2  ;;  %v9645_v16 = vsub.f32 %v3543_v13, %v3606_v4  ;;  %v9647_v6 = vsub.f32 %v3544_v7, %v3610_v5  ;;  %v9649_v24 = vsub.f32 %v3545_v48, %v3614_v32  ;;  %v9677_v7 = vld [vmem:[%s10986_s5 + $0x10] sm:$0xff] }
 0x88f   :  { %v3748_v48 = vrot.slane %v9666_v22, 2  ;;  %v4185_v62 = vperm.slane %v9677_v7, 1  ;;  %v3766_v2 = vrot.slane %v3762_v25, 6 }
 0x890   :  { %v3635_v45 = vmul.f32 %v9643_v28, %v9643_v28  ;;  %v3636_v54 = vmul.f32 %v9645_v16, %v9645_v16  ;;  %v3637_v60 = vmul.f32 %v9647_v6, %v9647_v6  ;;  %v3638_v9 = vmul.f32 %v9649_v24, %v9649_v24 }
 0x891   :  { %4187 = vrot.lane.b32.xlu2 %v4185_v62, %s8324_s25 }
 0x892   :  { %3655 = vst [vmem:[#allocation1 + $0x20] ss:$4 sm:$0xff] %v3635_v45 }
 0x893   :  { %3657 = vst [vmem:[#allocation1 + $0x21] ss:$4 sm:$0xff] %v3636_v54 }
 0x894   :  { %v3662_v26 = vld.sshfl [vmem:[#allocation1] sm:$0xff pattern:$0x73625140]  ;;  %3659 = vst [vmem:[#allocation1 + $0x22] ss:$4 sm:$0xff] %v3637_v60 }
 0x895   :  { %3661 = vst [vmem:[#allocation1 + $0x23] ss:$4 sm:$0xff] %v3638_v9  ;;  %v3666_v10 = vsel %vm97_vm0, %v3662_v26, 0.0 }
 0x896   :  { %3667 = vadd.xlane.f32.xlu0 %v3666_v10 }
 0x89c   :  { %v3663_v59 = vld.sshfl [vmem:[#allocation1 + $0x20] sm:$0xff pattern:$0x73625140] }
 0x89d   :  { %v3669_v11 = vsel %vm97_vm0, %v3663_v59, 0.0 }
 0x89e   :  { %3670 = vadd.xlane.f32.xlu1 %v3669_v11 }
 0x909   :  { %v3668_v35 = vpop.xlane.xlu0 %3667 }
 0x90a   :  { %v3672_v31 = vmul.f32 %v3668_v35, %v9525_v12 }
 0x90c   :  { %v3674_v23 = vadd.f32 1e-05, %v3672_v31 }
 0x90e   :  { %8154 = vrsqrt.f32 %v3674_v23  ;;  %vm3682_vm8 = vweird.f32 %v3674_v23 }
 0x911   :  { %v3671_v44 = vpop.xlane.xlu1 %3670 }
 0x912   :  { %v3673_v34 = vmul.f32 %v3671_v44, %v9525_v12 }
 0x914   :  { %v8155_v52 = vpop.eup %8154  ;;  %v3675_v58 = vadd.f32 1e-05, %v3673_v34 }
 0x915   :  { %v3677_v27 = vmul.f32 %v8155_v52, %v3674_v23  ;;  %vm3683_vm15 = vweird.f32 %v8155_v52 }
 0x916   :  { %8156 = vrsqrt.f32 %v3675_v58  ;;  %vm3684_vm9 = vmor %vm3682_vm8, %vm3683_vm15  ;;  %vm3692_vm11 = vweird.f32 %v3675_v58  ;;  %vm7507_vm8 = vcmask 254976  }
 0x917   :  { %v3678_v30 = vmul.f32 %v8155_v52, %v3677_v27 }
 0x919   :  { %v3679_v29 = vmul.f32 0.5, %v3678_v30 }
 0x91b   :  { %v3680_v40 = vsub.f32 1.5, %v3679_v29 }
 0x91c   :  { %v8157_v21 = vpop.eup %8156 }
 0x91d   :  { %v3681_v15 = vmul.f32 %v8155_v52, %v3680_v40  ;;  %v3687_v13 = vmul.f32 %v8157_v21, %v3675_v58  ;;  %vm3693_vm10 = vweird.f32 %v8157_v21 }
 0x91e   :  { %vm3694_vm12 = vmor %vm3692_vm11, %vm3693_vm10 }
 0x91f   :  { %v3685_v37 = vsel %vm3684_vm9, %v8155_v52, %v3681_v15  ;;  %v3688_v53 = vmul.f32 %v8157_v21, %v3687_v13 }
 0x920   :  { %v3701_v20 = vperm.slane %v3685_v37, %v9527_v18  ;;  %v3705_v38 = vperm.slane %v3685_v37, %v9529_v42  ;;  %v3709_v39 = vperm.slane %v3685_v37, %v9531_v14  ;;  %v3713_v49 = vperm.slane %v3685_v37, %v9533_v47 }
 0x921   :  { %v3689_v19 = vmul.f32 0.5, %v3688_v53 }
 0x922   :  { %v3738_v61 = vmul.f32 %v3701_v20, %v9622_v50  ;;  %v3739_v41 = vmul.f32 %v3705_v38, %v9624_v17  ;;  %v3740_v36 = vmul.f32 %v3709_v39, %v9626_v51  ;;  %v3741_v1 = vmul.f32 %v3713_v49, %v9628_v46 }
 0x923   :  { %v3690_v4 = vsub.f32 1.5, %v3689_v19  ;;  %v4534_v20 = vperm.slane %v9677_v7, 2 }
 0x924   :  { %v3754_v5 = vmul.f32 %v9666_v22, %v3738_v61  ;;  %v3755_v32 = vmul.f32 %v3748_v48, %v3739_v41  ;;  %v3756_v45 = vmul.f32 %v3749_v63, %v3740_v36  ;;  %v3757_v54 = vmul.f32 %v3750_v8, %v3741_v1 }
 0x925   :  { %v3691_v60 = vmul.f32 %v8157_v21, %v3690_v4 }
 0x926   :  { %v9693_v9 = vadd.f32 %v3762_v25, %v3754_v5  ;;  %v9695_v26 = vadd.f32 %v3764_v55, %v3755_v32  ;;  %v9697_v50 = vadd.f32 %v3765_v3, %v3756_v45  ;;  %v9699_v17 = vadd.f32 %v3766_v2, %v3757_v54 }
 0x927   :  { %v3695_v51 = vsel %vm3694_vm12, %v8157_v21, %v3691_v60  ;;  %v3858_v21 = vperm.slane %v9677_v7, 0  ;;  %vm7568_vm12 = vcmask 74752  }
 0x928   :  { %3809 = vst [vmem:[#allocation1] ss:$4 sm:$0xff] %v9693_v9  ;;  %v3717_v46 = vperm.slane %v3695_v51, %v9527_v18  ;;  %v3721_v10 = vperm.slane %v3695_v51, %v9529_v42  ;;  %v3725_v59 = vperm.slane %v3695_v51, %v9531_v14  ;;  %v3729_v11 = vperm.slane %v3695_v51, %v9533_v47 }
 0x929   :  { %3811 = vst [vmem:[#allocation1 + $0x1] ss:$4 sm:$0xff] %v9695_v26 }
 0x92a   :  { %3813 = vst [vmem:[#allocation1 + $0x2] ss:$4 sm:$0xff] %v9697_v50  ;;  %v3742_v35 = vmul.f32 %v3717_v46, %v9643_v28  ;;  %v3743_v31 = vmul.f32 %v3721_v10, %v9645_v16  ;;  %v3744_v23 = vmul.f32 %v3725_v59, %v9647_v6  ;;  %v3745_v44 = vmul.f32 %v3729_v11, %v9649_v24 }
 0x92b   :  { %3815 = vst [vmem:[#allocation1 + $0x3] ss:$4 sm:$0xff] %v9699_v17 }
 0x92c   :  { %v3758_v34 = vmul.f32 %v9666_v22, %v3742_v35  ;;  %v3759_v52 = vmul.f32 %v3748_v48, %v3743_v31  ;;  %v3760_v58 = vmul.f32 %v3749_v63, %v3744_v23  ;;  %v3761_v27 = vmul.f32 %v3750_v8, %v3745_v44  ;;  %v4188_v22 = vpop.permute.xlu2 %4187 }
 0x92e   :  { %v9714_v57 = vadd.f32 %v3762_v25, %v3758_v34  ;;  %v9716_v30 = vadd.f32 %v3764_v55, %v3759_v52  ;;  %v9718_v29 = vadd.f32 %v3765_v3, %v3760_v58  ;;  %v9720_v28 = vadd.f32 %v3766_v2, %v3761_v27 }
 0x930   :  { %3817 = vst [vmem:[#allocation1 + $0x20] ss:$4 sm:$0xff] %v9714_v57 }
 0x931   :  { %3819 = vst [vmem:[#allocation1 + $0x21] ss:$4 sm:$0xff] %v9716_v30 }
 0x932   :  { %3821 = vst [vmem:[#allocation1 + $0x22] ss:$4 sm:$0xff] %v9718_v29  ;;  %v3824_v16 = vld.sshfl [vmem:[#allocation1] sm:$0xff pattern:$0x73625140] }
 0x933   :  { %3823 = vst [vmem:[#allocation1 + $0x23] ss:$4 sm:$0xff] %v9720_v28 }
 0x93a   :  { %v3825_v6 = vld.sshfl [vmem:[#allocation1 + $0x20] sm:$0xff pattern:$0x73625140] }
 0x93b   :  { %v3828_v24 = vpack.c.bf16 %v3825_v6, %v3824_v16 }
 0x93d   :  { %7712 = vmatmul.msk.bf16.vlgmr.msrb.gmra.mxu0 %vm97_vm0, %v3828_v24 }
 0x9ba   :  { %v9727_v33 = vpop.f32.mrf.mxu0 }
 0x9bb   :  { %v4190_v40 = vadd.f32 %v4188_v22, %v9727_v33  ;;  %v9736_v25 = vadd.f32 %v3858_v21, %v9727_v33 }
 0x9bd   :  { %4194 = vrot.lane.b32.xlu1 %v4190_v40, %s8325_s0  ;;  %4202 = vrot.lane.b32.xlu0 %v4190_v40, %s8326_s28 }
 0x9c2   :  { %v9733_v0 = vpop.f32.mrf.mxu0 }
 0x9c3   :  { %v4191_v15 = vadd.f32 %v4188_v22, %v9733_v0  ;;  %v9747_v53 = vadd.f32 %v3858_v21, %v9733_v0 }
 0x9c5   :  { %4198 = vrot.lane.b32.xlu0 %v4190_v40, %s8327_s29  ;;  %v7939_v13 = vpack.i.bf16 %v4191_v15, %v9736_v25 }
 0x9c7   :  { %7940 = vrot.lane.b32.xlu1 %v7939_v13, %s8326_s28 }
 0xa2f   :  { %v4195_v48 = vpop.permute.xlu1 %4194  ;;  %v4203_v62 = vpop.permute.xlu0 %4202 }
 0xa30   :  { %v7934_v63 = vpack.i.bf16 %v4195_v48, %v4203_v62  ;;  %v3883_v62 = vrot.slane %v9736_v25, 4 }
 0xa32   :  { %7935 = vrot.lane.b32.xlu2 %v7934_v63, %s8328_s30 }
 0xa37   :  { %v4199_v8 = vpop.permute.xlu0 %4198 }
 0xa38   :  { %v7949_v37 = vpack.i.bf16 %v4190_v40, %v4199_v8 }
 0xa39   :  { %v7941_v39 = vpop.permute.xlu1 %7940 }
 0xa3a   :  { %7950 = vrot.lane.b32.xlu0 %v7949_v37, %s8328_s30  ;;  %7945 = vrot.lane.b32.xlu2 %v7939_v13, %s8325_s0  ;;  %v7943_v55 = vunpack.i.h.bf16 %v7941_v39  ;;  %v7942_v32 = vunpack.i.l.bf16 %v7941_v39 }
 0xa3c   :  { %v3893_v59 = vrot.slane %v7942_v32, 4 }
 0xa42   :  { %7955 = vrot.lane.b32.xlu0 %v7939_v13, %s8327_s29 }
 0xa4a   :  { %3877 = vrot.lane.b32.xlu0 %v9747_v53, %s8326_s28 }
 0xa52   :  { %4536 = vrot.lane.b32.xlu0 %v4534_v20, %s8329_s9 }
 0xa8c   :  { %v7936_v38 = vpop.permute.xlu2 %7935 }
 0xa8d   :  { %v7937_v61 = vunpack.i.l.bf16 %v7936_v38  ;;  %v7938_v36 = vunpack.i.h.bf16 %v7936_v38 }
 0xa8f   :  { %v4242_v41 = vrot.slane %v7937_v61, 4  ;;  %v4244_v7 = vrot.slane %v7938_v36, 4 }
 0xa91   :  { %v4243_v1 = vsel %vm139_vm1, %v4242_v41, %v7938_v36  ;;  %v4245_v46 = vsel %vm139_vm1, %v7937_v61, %v4244_v7 }
 0xa92   :  { %v4249_v45 = vperm.slane %v4243_v1, %v8477_v43  ;;  %v4253_v44 = vperm.slane %v4245_v46, %v8477_v43 }
 0xa94   :  { %v7946_v49 = vpop.permute.xlu2 %7945  ;;  %v4254_v11 = vrot.slane %v4249_v45, 4  ;;  %v4266_v63 = vrot.slane %v4253_v44, 4 }
 0xa95   :  { %v7948_v3 = vunpack.i.h.bf16 %v7946_v49  ;;  %v7947_v54 = vunpack.i.l.bf16 %v7946_v49 }
 0xa97   :  { %v7959_v19 = vpack.i.bf16 %v7948_v3, %v7943_v55  ;;  %v3895_v35 = vrot.slane %v7947_v54, 4  ;;  %v3894_v34 = vsel %vm139_vm1, %v3893_v59, %v7947_v54 }
 0xa98   :  { %v3900_v21 = vperm.slane %v3894_v34, %v8477_v43 }
 0xa99   :  { %7960 = vrot.lane.b32.xlu1 %v7959_v19, %s8328_s30  ;;  %v3896_v22 = vsel %vm139_vm1, %v7942_v32, %v3895_v35 }
 0xa9a   :  { %v9773_v38 = vperm.slane %v3896_v22, %v8477_v43  ;;  %v3905_v41 = vrot.slane %v3900_v21, 4 }
 0xaa1   :  { %3865 = vrot.lane.b32.xlu1 %v9747_v53, %s8325_s0 }
 0xaac   :  { %v7951_v2 = vpop.permute.xlu0 %7950 }
 0xaad   :  { %v7953_v4 = vunpack.i.h.bf16 %v7951_v2  ;;  %v7952_v5 = vunpack.i.l.bf16 %v7951_v2 }
 0xaaf   :  { %v4232_v60 = vrot.slane %v7953_v4, 4  ;;  %v4230_v51 = vrot.slane %v7952_v5, 4 }
 0xab1   :  { %v4231_v10 = vsel %vm139_vm1, %v4230_v51, %v7953_v4  ;;  %v4233_v23 = vsel %vm139_vm1, %v7952_v5, %v4232_v60  ;;  %v3917_v51 = vrot.slane %v9773_v38, 4 }
 0xab2   :  { %v4237_v31 = vperm.slane %v4231_v10, %v8477_v43  ;;  %v4241_v40 = vperm.slane %v4233_v23, %v8477_v43 }
 0xab4   :  { %v4255_v52 = vsel %vm139_vm1, %v4254_v11, %v4237_v31  ;;  %v4256_v58 = vrot.slane %v4237_v31, 4  ;;  %v7956_v27 = vpop.permute.xlu0 %7955  ;;  %v4267_v55 = vsel %vm139_vm1, %v4266_v63, %v4241_v40  ;;  %v4268_v36 = vrot.slane %v4241_v40, 4 }
 0xab5   :  { %v4261_v16 = vperm.slane %v4255_v52, %v8482_v56  ;;  %v7958_v6 = vunpack.i.h.bf16 %v7956_v27  ;;  %v7957_v24 = vunpack.i.l.bf16 %v7956_v27  ;;  %v4273_v4 = vperm.slane %v4267_v55, %v8482_v56 }
 0xab6   :  { %v4257_v8 = vsel %vm139_vm1, %v4249_v45, %v4256_v58  ;;  %v4269_v46 = vsel %vm139_vm1, %v4253_v44, %v4268_v36 }
 0xab7   :  { %v4329_v13 = vperm.slane %v4261_v16, %v8477_v43  ;;  %v4330_v48 = vrot.slane %v4261_v16, 4  ;;  %v7964_v37 = vpack.i.bf16 %v4191_v15, %v7958_v6  ;;  %v3881_v20 = vrot.slane %v7957_v24, 4 }
 0xab8   :  { %v3884_v19 = vsel %vm139_vm1, %v7957_v24, %v3883_v62  ;;  %v4265_v15 = vperm.slane %v4257_v8, %v8482_v56  ;;  %v9801_v34 = vperm.slane %v4273_v4, %v8477_v43  ;;  %v4382_v52 = vrot.slane %v4273_v4, 4 }
 0xab9   :  { %v4331_v39 = vsel %vm139_vm1, 0.0, %v4330_v48  ;;  %v4338_v49 = vrot.slane %v4329_v13, 4  ;;  %v3882_v3 = vsel %vm139_vm1, %v3881_v20, %v9736_v25  ;;  %7965 = vrot.lane.b32.xlu2 %v7964_v37, %s8328_s30  ;;  %v9789_v25 = vperm.slane %v3884_v19, %v8477_v43 }
 0xaba   :  { %v4335_v61 = vperm.slane %v4331_v39, %v8477_v43  ;;  %v3888_v1 = vperm.slane %v3882_v3, %v8477_v43  ;;  %v4355_v59 = vperm.slane %v4265_v15, %v8477_v43  ;;  %v4356_v27 = vrot.slane %v4265_v15, 4 }
 0xabb   :  { %v3918_v58 = vsel %vm139_vm1, %v3917_v51, %v9789_v25  ;;  %v9813_v22 = vperm.slane %v4269_v46, %v8482_v56  ;;  %v4390_v39 = vrot.slane %v9801_v34, 4 }
 0xabc   :  { %v9784_v2 = vpop.permute.xlu0 %3877  ;;  %v4339_v7 = vsel %vm139_vm1, %v4335_v61, %v4338_v49  ;;  %v3906_v5 = vsel %vm139_vm1, %v3905_v41, %v3888_v1  ;;  %v3907_v32 = vrot.slane %v3888_v1, 4  ;;  %v4336_v60 = vrot.slane %v4335_v61, 4 }
 0xabd   :  { %v3912_v45 = vperm.slane %v3906_v5, %v8482_v56  ;;  %v4347_v54 = vperm.slane %v4339_v7, %v8482_v56  ;;  %v4364_v63 = vrot.slane %v4355_v59, 4  ;;  %v9819_v37 = vperm.slane %v3918_v58, %v8482_v56 }
 0xabe   :  { %v3908_v10 = vsel %vm139_vm1, %v3900_v21, %v3907_v32  ;;  %v4337_v24 = vsel %vm139_vm1, %v4336_v60, %v4329_v13  ;;  %v4383_v13 = vsel %vm139_vm1, 0.0, %v4382_v52  ;;  %v4357_v55 = vsel %vm139_vm1, 0.0, %v4356_v27 }
 0xabf   :  { %v3916_v11 = vperm.slane %v3908_v10, %v8482_v56  ;;  %v3980_v35 = vperm.slane %v3912_v45, %v8477_v43  ;;  %v3981_v31 = vrot.slane %v3912_v45, 4  ;;  %v4917_v23 = vpack.c.bf16 %v4347_v54, %v4347_v54 }
 0xac0   :  { %v4343_v20 = vperm.slane %v4337_v24, %v8482_v56  ;;  %v4361_v36 = vperm.slane %v4357_v55, %v8477_v43  ;;  %v4350_v1 = vrot.slane %v4347_v54, 4 }
 0xac1   :  { %v3982_v44 = vsel %vm139_vm1, 0.0, %v3981_v31  ;;  %v9807_v16 = vperm.slane %v3916_v11, %v8477_v43  ;;  %v4007_v6 = vrot.slane %v3916_v11, 4  ;;  %3871 = vrot.lane.b32.xlu2 %v9747_v53, %s8327_s29  ;;  %v3989_v21 = vrot.slane %v3980_v35, 4 }
 0xac2   :  { %v3986_v40 = vperm.slane %v3982_v44, %v8477_v43  ;;  %v4989_v62 = vsel %vm1205_vm2, %v4917_v23, 0  ;;  %v4915_v15 = vpack.c.bf16 %v4343_v20, %v4343_v20  ;;  %v4348_v7 = vrot.slane %v4343_v20, 4 }
 0xac3   :  { %v4008_v48 = vsel %vm139_vm1, 0.0, %v4007_v6  ;;  %4998 = vmatpush.bf16.xpose.msrb.mxu3 %v4989_v62  ;;  %v4015_v49 = vrot.slane %v9807_v16, 4  ;;  %v4365_v32 = vsel %vm139_vm1, %v4361_v36, %v4364_v63  ;;  %v4351_v51 = vsel %vm139_vm1, 0.0, %v4350_v1 }
 0xac4   :  { %v4537_v8 = vpop.permute.xlu0 %4536  ;;  %v3987_v61 = vrot.slane %v3986_v40, 4  ;;  %v9833_v41 = vperm.slane %v4008_v48, %v8477_v43  ;;  %v3990_v4 = vsel %vm139_vm1, %v3986_v40, %v3989_v21  ;;  %v4373_v60 = vperm.slane %v4365_v32, %v8482_v56 }
 0xac5   :  { %v9827_v3 = vadd.f32 %v4537_v8, %v9727_v33  ;;  %v9830_v19 = vadd.f32 %v4537_v8, %v9733_v0  ;;  %v4951_v33 = vsel %vm1205_vm2, %v4915_v15, 0  ;;  %v4362_v0 = vrot.slane %v4361_v36, 4 }
 0xac6   :  { %v3998_v45 = vperm.slane %v3990_v4, %v8482_v56  ;;  %4960 = vmatpush.bf16.xpose.msrb.mxu1 %v4951_v33  ;;  %v4349_v54 = vsel %vm139_vm1, 0.0, %v4348_v7  ;;  %v4918_v46 = vpack.c.bf16 %v4351_v51, %v4351_v51  ;;  %v4921_v23 = vpack.c.bf16 %v4373_v60, %v4373_v60 }
 0xac7   :  { %v7979_v5 = vpack.i.bf16 %v9830_v19, %v9827_v3  ;;  %v4363_v10 = vsel %vm139_vm1, %v4362_v0, %v4355_v59  ;;  %v4916_v11 = vpack.c.bf16 %v4349_v54, %v4349_v54  ;;  %v4376_v58 = vrot.slane %v4373_v60, 4 }
 0xac8   :  { %v4885_v31 = vpack.c.bf16 %v3998_v45, %v3998_v45  ;;  %v4369_v52 = vperm.slane %v4363_v10, %v8482_v56  ;;  %v5008_v27 = vsel %vm1205_vm2, %v4918_v46, 0  ;;  %v4387_v6 = vperm.slane %v4383_v13, %v8477_v43 }
 0xac9   :  { %7980 = vrot.lane.b32.xlu0 %v7979_v5, %s8327_s29  ;;  %7975 = vrot.lane.b32.xlu2 %v7979_v5, %s8325_s0  ;;  %v4970_v44 = vsel %vm1205_vm2, %v4916_v11, 0  ;;  %v3988_v24 = vsel %vm139_vm1, %v3987_v61, %v3980_v35  ;;  %v5065_v59 = vsel %vm1205_vm2, %v4921_v23, 0  ;;  %v4377_v21 = vsel %vm139_vm1, 0.0, %v4376_v58 }
 0xaca   :  { %7715 = vmatmul.msk.bf16.vlgmr.msrb.gmra.mxu3 %vm1205_vm2, %v4885_v31  ;;  %5017 = vmatpush.bf16.xpose.msra.mxu0 %v5008_v27  ;;  %v4919_v40 = vpack.c.bf16 %v4369_v52, %v4369_v52  ;;  %v4374_v48 = vrot.slane %v4369_v52, 4  ;;  %v4922_v62 = vpack.c.bf16 %v4377_v21, %v4377_v21  ;;  %v4391_v63 = vsel %vm139_vm1, %v4387_v6, %v4390_v39 }
 0xacb   :  { %4979 = vmatpush.bf16.xpose.msrb.mxu2 %v4970_v44  ;;  %5074 = vmatpush.bf16.xpose.msra.mxu3 %v5065_v59  ;;  %v3994_v8 = vperm.slane %v3988_v24, %v8482_v56  ;;  %v4001_v20 = vrot.slane %v3998_v45, 4  ;;  %v4399_v55 = vperm.slane %v4391_v63, %v8482_v56  ;;  %v4388_v61 = vrot.slane %v4387_v6, 4 }
 0xacc   :  { %7970 = vrot.lane.b32.xlu1 %v7979_v5, %s8326_s28  ;;  %v5027_v13 = vsel %vm1205_vm2, %v4919_v40, 0  ;;  %v4375_v35 = vsel %vm139_vm1, 0.0, %v4374_v48  ;;  %v5084_v15 = vsel %vm1205_vm2, %v4922_v62, 0  ;;  %v4016_v60 = vsel %vm139_vm1, %v9833_v41, %v4015_v49 }
 0xacd   :  { %v4920_v36 = vpack.c.bf16 %v4375_v35, %v4375_v35  ;;  %v4883_v1 = vpack.c.bf16 %v3994_v8, %v3994_v8  ;;  %v4002_v7 = vsel %vm139_vm1, 0.0, %v4001_v20  ;;  %v4925_v4 = vpack.c.bf16 %v4399_v55, %v4399_v55 }
 0xace   :  { %5036 = vmatpush.bf16.xpose.msra.mxu1 %v5027_v13  ;;  %v4886_v39 = vpack.c.bf16 %v4002_v7, %v4002_v7  ;;  %v4389_v5 = vsel %vm139_vm1, %v4388_v61, %v9801_v34  ;;  %v4402_v33 = vrot.slane %v4399_v55, 4  ;;  %v3999_v45 = vrot.slane %v3994_v8, 4 }
 0xacf   :  { %v5046_v32 = vsel %vm1205_vm2, %v4920_v36, 0  ;;  %7713 = vmatmul.msk.bf16.vlgmr.msrb.gmra.mxu1 %vm1205_vm2, %v4883_v1  ;;  %v4395_v0 = vperm.slane %v4389_v5, %v8482_v56  ;;  %v4013_v51 = vrot.slane %v9833_v41, 4  ;;  %v5141_v54 = vsel %vm1205_vm2, %v4925_v4, 0 }
 0xad0   :  { %v4403_v34 = vsel %vm139_vm1, 0.0, %v4402_v33  ;;  %v4407_v46 = vperm.slane %v9813_v22, %v8477_v43  ;;  %v4000_v31 = vsel %vm139_vm1, 0.0, %v3999_v45  ;;  %v4024_v49 = vperm.slane %v4016_v60, %v8482_v56 }
 0xad1   :  { %7716 = vmatmul.msk.bf16.vlgmr.msra.gmra.mxu0 %vm1205_vm2, %v4886_v39  ;;  %v4923_v10 = vpack.c.bf16 %v4395_v0, %v4395_v0  ;;  %v4926_v11 = vpack.c.bf16 %v4403_v34, %v4403_v34  ;;  %v4400_v23 = vrot.slane %v4395_v0, 4  ;;  %v4884_v52 = vpack.c.bf16 %v4000_v31, %v4000_v31 }
 0xad2   :  { %5093 = vmatpush.bf16.xpose.msrb.mxu0 %v5084_v15  ;;  %v4408_v41 = vrot.slane %v9813_v22, 4  ;;  %v4416_v6 = vrot.slane %v4407_v46, 4  ;;  %v4033_v24 = vrot.slane %v9819_v37, 4  ;;  %v4014_v21 = vsel %vm139_vm1, %v4013_v51, %v9807_v16 }
 0xad3   :  { %5055 = vmatpush.bf16.xpose.msra.mxu2 %v5046_v32  ;;  %5150 = vmatpush.bf16.xpose.msrb.mxu3 %v5141_v54  ;;  %v5103_v58 = vsel %vm1205_vm2, %v4923_v10, 0  ;;  %v5160_v27 = vsel %vm1205_vm2, %v4926_v11, 0  ;;  %v4401_v44 = vsel %vm139_vm1, 0.0, %v4400_v23  ;;  %v4032_v48 = vperm.slane %v9819_v37, %v8477_v43 }
 0xad4   :  { %v4924_v59 = vpack.c.bf16 %v4401_v44, %v4401_v44  ;;  %v4409_v40 = vsel %vm139_vm1, 0.0, %v4408_v41  ;;  %7714 = vmatmul.msk.bf16.vlgmr.msrb.gmra.mxu2 %vm1205_vm2, %v4884_v52  ;;  %v4889_v63 = vpack.c.bf16 %v4024_v49, %v4024_v49  ;;  %v4020_v20 = vperm.slane %v4014_v21, %v8482_v56 }
 0xad5   :  { %v4413_v22 = vperm.slane %v4409_v40, %v8477_v43  ;;  %v4027_v35 = vrot.slane %v4024_v49, 4  ;;  %v4034_v55 = vsel %vm139_vm1, 0.0, %v4033_v24  ;;  %v3919_v37 = vrot.slane %v9789_v25, 4 }
 0xad6   :  { %5112 = vmatpush.bf16.xpose.msrb.mxu1 %v5103_v58  ;;  %v5122_v62 = vsel %vm1205_vm2, %v4924_v59, 0  ;;  %v4038_v7 = vperm.slane %v4034_v55, %v8477_v43  ;;  %v4041_v4 = vrot.slane %v4032_v48, 4  ;;  %v4025_v5 = vrot.slane %v4020_v20, 4 }
 0xad7   :  { %v4417_v8 = vsel %vm139_vm1, %v4413_v22, %v4416_v6  ;;  %v4414_v13 = vrot.slane %v4413_v22, 4  ;;  %v4028_v39 = vsel %vm139_vm1, 0.0, %v4027_v35  ;;  %v4887_v60 = vpack.c.bf16 %v4020_v20, %v4020_v20 }
 0xad8   :  { %v4425_v16 = vperm.slane %v4417_v8, %v8482_v56  ;;  %v3920_v25 = vsel %vm139_vm1, %v9773_v38, %v3919_v37  ;;  %v4026_v10 = vsel %vm139_vm1, 0.0, %v4025_v5  ;;  %v4042_v11 = vsel %vm139_vm1, %v4038_v7, %v4041_v4 }
 0xad9   :  { %v4415_v61 = vsel %vm139_vm1, %v4414_v13, %v4407_v46  ;;  %v4890_v46 = vpack.c.bf16 %v4028_v39, %v4028_v39  ;;  %v3928_v31 = vperm.slane %v3920_v25, %v8482_v56  ;;  %v4039_v23 = vrot.slane %v4038_v7, 4 }
 0xada   :  { %5169 = vmatpush.bf16.xpose.msra.mxu0 %v5160_v27  ;;  %7719 = vmatmul.msk.bf16.vlgmr.msra.gmra.mxu3 %vm1205_vm2, %v4889_v63  ;;  %v4929_v15 = vpack.c.bf16 %v4425_v16, %v4425_v16  ;;  %v4421_v36 = vperm.slane %v4415_v61, %v8482_v56  ;;  %v4428_v1 = vrot.slane %v4425_v16, 4  ;;  %v4888_v49 = vpack.c.bf16 %v4026_v10, %v4026_v10 }
 0xadb   :  { %5131 = vmatpush.bf16.xpose.msrb.mxu2 %v5122_v62  ;;  %v4050_v41 = vperm.slane %v4042_v11, %v8482_v56  ;;  %v4040_v58 = vsel %vm139_vm1, %v4039_v23, %v4032_v48  ;;  %v4059_v27 = vrot.slane %v3928_v31, 4  ;;  %v4058_v24 = vperm.slane %v3928_v31, %v8477_v43 }
 0xadc   :  { %v5217_v33 = vsel %vm1205_vm2, %v4929_v15, 0  ;;  %v4927_v32 = vpack.c.bf16 %v4421_v36, %v4421_v36  ;;  %v4429_v0 = vsel %vm139_vm1, 0.0, %v4428_v1  ;;  %v4426_v45 = vrot.slane %v4421_v36, 4 }
 0xadd   :  { %5226 = vmatpush.bf16.xpose.msra.mxu3 %v5217_v33  ;;  %v4930_v51 = vpack.c.bf16 %v4429_v0, %v4429_v0  ;;  %v4893_v6 = vpack.c.bf16 %v4050_v41, %v4050_v41  ;;  %v4046_v59 = vperm.slane %v4040_v58, %v8482_v56  ;;  %v4053_v40 = vrot.slane %v4050_v41, 4 }
 0xade   :  { %v4427_v54 = vsel %vm139_vm1, 0.0, %v4426_v45  ;;  %v5179_v34 = vsel %vm1205_vm2, %v4927_v32, 0  ;;  %v4060_v21 = vsel %vm139_vm1, 0.0, %v4059_v27  ;;  %v4067_v62 = vrot.slane %v4058_v24, 4 }
 0xadf   :  { %7717 = vmatmul.msk.bf16.vlgmr.msra.gmra.mxu1 %vm1205_vm2, %v4887_v60  ;;  %v5236_v52 = vsel %vm1205_vm2, %v4930_v51, 0  ;;  %v4928_v38 = vpack.c.bf16 %v4427_v54, %v4427_v54  ;;  %v4064_v22 = vperm.slane %v4060_v21, %v8477_v43  ;;  %v4054_v48 = vsel %vm139_vm1, 0.0, %v4053_v40 }
 0xae0   :  { %5188 = vmatpush.bf16.xpose.msra.mxu1 %v5179_v34  ;;  %v4051_v63 = vrot.slane %v4046_v59, 4  ;;  %v4891_v8 = vpack.c.bf16 %v4046_v59, %v4046_v59  ;;  %v4894_v20 = vpack.c.bf16 %v4054_v48, %v4054_v48  ;;  %v3941_v23 = vrot.slane %v9784_v2, 4 }
 0xae1   :  { %7720 = vmatmul.msk.bf16.vlgmr.msrb.gmra.mxu0 %vm1205_vm2, %v4890_v46  ;;  %v5198_v44 = vsel %vm1205_vm2, %v4928_v38, 0  ;;  %v4068_v35 = vsel %vm139_vm1, %v4064_v22, %v4067_v62  ;;  %v4065_v55 = vrot.slane %v4064_v22, 4 }
 0xae2   :  { %5245 = vmatpush.bf16.xpose.msrb.mxu0 %v5236_v52  ;;  %v4052_v13 = vsel %vm139_vm1, 0.0, %v4051_v63  ;;  %v4076_v61 = vperm.slane %v4068_v35, %v8482_v56 }
 0xae3   :  { %v4892_v16 = vpack.c.bf16 %v4052_v13, %v4052_v13  ;;  %v4066_v37 = vsel %vm139_vm1, %v4065_v55, %v4058_v24 }
 0xae4   :  { %7718 = vmatmul.msk.bf16.vlgmr.msra.gmra.mxu2 %vm1205_vm2, %v4888_v49  ;;  %v4897_v15 = vpack.c.bf16 %v4076_v61, %v4076_v61  ;;  %v4072_v36 = vperm.slane %v4066_v37, %v8482_v56  ;;  %v4079_v1 = vrot.slane %v4076_v61, 4 }
 0xae5   :  { %5207 = vmatpush.bf16.xpose.msra.mxu2 %v5198_v44 }
 0xae6   :  { %v4080_v7 = vsel %vm139_vm1, 0.0, %v4079_v1  ;;  %v4077_v4 = vrot.slane %v4072_v36, 4  ;;  %v4895_v39 = vpack.c.bf16 %v4072_v36, %v4072_v36 }
 0xae7   :  { %v4898_v5 = vpack.c.bf16 %v4080_v7, %v4080_v7 }
 0xae8   :  { %v4078_v33 = vsel %vm139_vm1, 0.0, %v4077_v4 }
 0xae9   :  { %v4896_v32 = vpack.c.bf16 %v4078_v33, %v4078_v33 }
 0xaea   :  { %7723 = vmatmul.msk.bf16.vlgmr.msrb.gmra.mxu3 %vm1205_vm2, %v4893_v6 }
 0xaef   :  { %7721 = vmatmul.msk.bf16.vlgmr.msrb.gmra.mxu1 %vm1205_vm2, %v4891_v8  ;;  %v3931_v8 = vrot.slane %v9747_v53, 4 }
 0xaf1   :  { %7724 = vmatmul.msk.bf16.vlgmr.msra.gmra.mxu0 %vm1205_vm2, %v4894_v20 }
 0xaf4   :  { %7722 = vmatmul.msk.bf16.vlgmr.msrb.gmra.mxu2 %vm1205_vm2, %v4892_v16 }
 0xafa   :  { %7727 = vmatmul.msk.bf16.vlgmr.msra.gmra.mxu3 %vm1205_vm2, %v4897_v15 }
 0xaff   :  { %7725 = vmatmul.msk.bf16.vlgmr.msra.gmra.mxu1 %vm1205_vm2, %v4895_v39 }
 0xb01   :  { %7728 = vmatmul.msk.bf16.vlgmr.msrb.gmra.mxu0 %vm1205_vm2, %v4898_v5 }
 0xb04   :  { %7726 = vmatmul.msk.bf16.vlgmr.msra.gmra.mxu2 %vm1205_vm2, %v4896_v32 }
 0xb0b   :  { %v7961_v0 = vpop.permute.xlu1 %7960 }
 0xb0c   :  { %v7962_v45 = vunpack.i.l.bf16 %v7961_v0  ;;  %v7963_v51 = vunpack.i.h.bf16 %v7961_v0 }
 0xb0e   :  { %v4290_v60 = vrot.slane %v7962_v45, 4  ;;  %v4292_v52 = vrot.slane %v7963_v51, 4 }
 0xb10   :  { %v4291_v25 = vsel %vm139_vm1, %v4290_v60, %v7963_v51  ;;  %v4293_v59 = vsel %vm139_vm1, %v7962_v45, %v4292_v52 }
 0xb11   :  { %v4297_v46 = vperm.slane %v4291_v25, %v8477_v43  ;;  %v4301_v20 = vperm.slane %v4293_v59, %v8477_v43 }
 0xb13   :  { %v7966_v54 = vpop.permute.xlu2 %7965  ;;  %v3866_v31 = vpop.permute.xlu1 %3865  ;;  %v4302_v49 = vrot.slane %v4297_v46, 4  ;;  %v4314_v5 = vrot.slane %v4301_v20, 4 }
 0xb14   :  { %v7967_v34 = vunpack.i.l.bf16 %v7966_v54  ;;  %v7968_v10 = vunpack.i.h.bf16 %v7966_v54  ;;  %v3942_v27 = vsel %vm139_vm1, %v3941_v23, %v3866_v31  ;;  %v3943_v6 = vrot.slane %v3866_v31, 4 }
 0xb15   :  { %v3948_v21 = vperm.slane %v3942_v27, %v8477_v43 }
 0xb16   :  { %v4278_v11 = vrot.slane %v7967_v34, 4  ;;  %v4280_v41 = vrot.slane %v7968_v10, 4  ;;  %v3944_v35 = vsel %vm139_vm1, %v9784_v2, %v3943_v6 }
 0xb17   :  { %v3953_v61 = vrot.slane %v3948_v21, 4  ;;  %v9963_v7 = vperm.slane %v3944_v35, %v8477_v43 }
 0xb18   :  { %v4279_v38 = vsel %vm139_vm1, %v4278_v11, %v7968_v10  ;;  %v4281_v62 = vsel %vm139_vm1, %v7967_v34, %v4280_v41 }
 0xb19   :  { %v4285_v58 = vperm.slane %v4279_v38, %v8477_v43  ;;  %v4289_v16 = vperm.slane %v4281_v62, %v8477_v43  ;;  %v3965_v10 = vrot.slane %v9963_v7, 4 }
 0xb1b   :  { %v4303_v44 = vsel %vm139_vm1, %v4302_v49, %v4285_v58  ;;  %v3872_v24 = vpop.permute.xlu2 %3871  ;;  %v4304_v13 = vrot.slane %v4285_v58, 4  ;;  %v4316_v32 = vrot.slane %v4289_v16, 4  ;;  %v4315_v60 = vsel %vm139_vm1, %v4314_v5, %v4289_v16 }
 0xb1c   :  { %v4309_v40 = vperm.slane %v4303_v44, %v8482_v56  ;;  %v3929_v22 = vrot.slane %v3872_v24, 4  ;;  %v3932_v4 = vsel %vm139_vm1, %v3872_v24, %v3931_v8  ;;  %v4321_v38 = vperm.slane %v4315_v60, %v8482_v56 }
 0xb1d   :  { %v9973_v51 = vperm.slane %v3932_v4, %v8477_v43  ;;  %v4317_v52 = vsel %vm139_vm1, %v4301_v20, %v4316_v32 }
 0xb1e   :  { %v4433_v48 = vperm.slane %v4309_v40, %v8477_v43  ;;  %v4434_v63 = vrot.slane %v4309_v40, 4  ;;  %v3930_v55 = vsel %vm139_vm1, %v3929_v22, %v9747_v53  ;;  %v4305_v53 = vsel %vm139_vm1, %v4297_v46, %v4304_v13 }
 0xb1f   :  { %v3936_v37 = vperm.slane %v3930_v55, %v8477_v43  ;;  %v4313_v34 = vperm.slane %v4305_v53, %v8482_v56  ;;  %v3966_v58 = vsel %vm139_vm1, %v3965_v10, %v9973_v51  ;;  %v9992_v40 = vperm.slane %v4317_v52, %v8482_v56 }
 0xb20   :  { %v4435_v15 = vsel %vm139_vm1, 0.0, %v4434_v63  ;;  %v4442_v1 = vrot.slane %v4433_v48, 4  ;;  %v9995_v62 = vperm.slane %v4321_v38, %v8477_v43  ;;  %v4486_v63 = vrot.slane %v4321_v38, 4 }
 0xb21   :  { %v4439_v36 = vperm.slane %v4435_v15, %v8477_v43  ;;  %v3954_v2 = vsel %vm139_vm1, %v3953_v61, %v3936_v37  ;;  %v3955_v39 = vrot.slane %v3936_v37, 4  ;;  %v4459_v24 = vperm.slane %v4313_v34, %v8477_v43 }
 0xb22   :  { %v3960_v33 = vperm.slane %v3954_v2, %v8482_v56  ;;  %v4460_v59 = vrot.slane %v4313_v34, 4  ;;  %v9998_v8 = vperm.slane %v3966_v58, %v8482_v56  ;;  %v4487_v53 = vsel %vm139_vm1, 0.0, %v4486_v63 }
 0xb23   :  { %v3956_v0 = vsel %vm139_vm1, %v3948_v21, %v3955_v39  ;;  %v4443_v45 = vsel %vm139_vm1, %v4439_v36, %v4442_v1  ;;  %v4440_v41 = vrot.slane %v4439_v36, 4  ;;  %v4468_v15 = vrot.slane %v4459_v24, 4 }
 0xb24   :  { %v3964_v25 = vperm.slane %v3956_v0, %v8482_v56  ;;  %v4085_v54 = vrot.slane %v3960_v33, 4  ;;  %v4084_v46 = vperm.slane %v3960_v33, %v8477_v43  ;;  %v4451_v23 = vperm.slane %v4443_v45, %v8482_v56 }
 0xb25   :  { %v4441_v20 = vsel %vm139_vm1, %v4440_v41, %v4433_v48  ;;  %v4461_v37 = vsel %vm139_vm1, 0.0, %v4460_v59  ;;  %v4494_v33 = vrot.slane %v9995_v62, 4  ;;  %v4491_v10 = vperm.slane %v4487_v53, %v8477_v43 }
 0xb26   :  { %v4086_v11 = vsel %vm139_vm1, 0.0, %v4085_v54  ;;  %v4111_v31 = vrot.slane %v3964_v25, 4  ;;  %v9987_v27 = vperm.slane %v3964_v25, %v8477_v43  ;;  %v4093_v21 = vrot.slane %v4084_v46, 4 }
 0xb27   :  { %v4090_v49 = vperm.slane %v4086_v11, %v8477_v43  ;;  %v4933_v22 = vpack.c.bf16 %v4451_v23, %v4451_v23  ;;  %v4447_v16 = vperm.slane %v4441_v20, %v8482_v56  ;;  %v4454_v36 = vrot.slane %v4451_v23, 4 }
 0xb28   :  { %v4112_v6 = vsel %vm139_vm1, 0.0, %v4111_v31  ;;  %v4119_v35 = vrot.slane %v9987_v27, 4  ;;  %v4465_v4 = vperm.slane %v4461_v37, %v8477_v43  ;;  %v4495_v41 = vsel %vm139_vm1, %v4491_v10, %v4494_v33 }
 0xb29   :  { %v4091_v44 = vrot.slane %v4090_v49, 4  ;;  %v10002_v13 = vperm.slane %v4112_v6, %v8477_v43  ;;  %v5293_v55 = vsel %vm1205_vm2, %v4933_v22, 0  ;;  %v4931_v1 = vpack.c.bf16 %v4447_v16, %v4447_v16 }
 0xb2a   :  { %5302 = vmatpush.bf16.xpose.msrb.mxu3 %v5293_v55  ;;  %v4452_v48 = vrot.slane %v4447_v16, 4  ;;  %v4094_v2 = vsel %vm139_vm1, %v4090_v49, %v4093_v21  ;;  %v4455_v39 = vsel %vm139_vm1, 0.0, %v4454_v36  ;;  %v4469_v0 = vsel %vm139_vm1, %v4465_v4, %v4468_v15 }
 0xb2b   :  { %v4092_v61 = vsel %vm139_vm1, %v4091_v44, %v4084_v46  ;;  %v4102_v5 = vperm.slane %v4094_v2, %v8482_v56  ;;  %v5255_v32 = vsel %vm1205_vm2, %v4931_v1, 0  ;;  %v4934_v45 = vpack.c.bf16 %v4455_v39, %v4455_v39 }
 0xb2c   :  { %v4466_v60 = vrot.slane %v4465_v4, 4  ;;  %5264 = vmatpush.bf16.xpose.msrb.mxu1 %v5255_v32  ;;  %v4477_v25 = vperm.slane %v4469_v0, %v8482_v56  ;;  %v4453_v54 = vsel %vm139_vm1, 0.0, %v4452_v48  ;;  %v4098_v23 = vperm.slane %v4092_v61, %v8482_v56 }
 0xb2d   :  { %v4901_v34 = vpack.c.bf16 %v4102_v5, %v4102_v5  ;;  %v5312_v46 = vsel %vm1205_vm2, %v4934_v45, 0  ;;  %v4932_v31 = vpack.c.bf16 %v4453_v54, %v4453_v54  ;;  %v4503_v44 = vperm.slane %v4495_v41, %v8482_v56 }
 0xb2e   :  { %v4467_v11 = vsel %vm139_vm1, %v4466_v60, %v4459_v24  ;;  %v4937_v52 = vpack.c.bf16 %v4477_v25, %v4477_v25  ;;  %5321 = vmatpush.bf16.xpose.msra.mxu0 %v5312_v46  ;;  %v4480_v49 = vrot.slane %v4477_v25, 4  ;;  %v4899_v6 = vpack.c.bf16 %v4098_v23, %v4098_v23 }
 0xb2f   :  { %v4473_v38 = vperm.slane %v4467_v11, %v8482_v56  ;;  %v5274_v58 = vsel %vm1205_vm2, %v4932_v31, 0  ;;  %v4105_v59 = vrot.slane %v4102_v5, 4  ;;  %v4941_v55 = vpack.c.bf16 %v4503_v44, %v4503_v44 }
 0xb30   :  { %v5369_v24 = vsel %vm1205_vm2, %v4937_v52, 0  ;;  %5283 = vmatpush.bf16.xpose.msrb.mxu2 %v5274_v58  ;;  %v4481_v22 = vsel %vm139_vm1, 0.0, %v4480_v49  ;;  %v4492_v61 = vrot.slane %v4491_v10, 4  ;;  %v4506_v1 = vrot.slane %v4503_v44, 4 }
 0xb31   :  { %7731 = vmatmul.msk.bf16.vlgmr.msrb.gmra.mxu3 %vm1205_vm2, %v4901_v34  ;;  %v4935_v21 = vpack.c.bf16 %v4473_v38, %v4473_v38  ;;  %v4478_v63 = vrot.slane %v4473_v38, 4  ;;  %v4938_v20 = vpack.c.bf16 %v4481_v22, %v4481_v22  ;;  %v4106_v16 = vsel %vm139_vm1, 0.0, %v4105_v59 }
 0xb32   :  { %5378 = vmatpush.bf16.xpose.msra.mxu3 %v5369_v24  ;;  %v4902_v36 = vpack.c.bf16 %v4106_v16, %v4106_v16  ;;  %v5445_v2 = vsel %vm1205_vm2, %v4941_v55, 0  ;;  %v4493_v39 = vsel %vm139_vm1, %v4492_v61, %v9995_v62  ;;  %v4507_v53 = vsel %vm139_vm1, 0.0, %v4506_v1 }
 0xb33   :  { %v5331_v37 = vsel %vm1205_vm2, %v4935_v21, 0  ;;  %v4479_v15 = vsel %vm139_vm1, 0.0, %v4478_v63  ;;  %v5388_v4 = vsel %vm1205_vm2, %v4938_v20, 0  ;;  %v4499_v5 = vperm.slane %v4493_v39, %v8482_v56  ;;  %7729 = vmatmul.msk.bf16.vlgmr.msrb.gmra.mxu1 %vm1205_vm2, %v4899_v6 }
 0xb34   :  { %5340 = vmatpush.bf16.xpose.msra.mxu1 %v5331_v37  ;;  %v4936_v48 = vpack.c.bf16 %v4479_v15, %v4479_v15  ;;  %v4103_v33 = vrot.slane %v4098_v23, 4  ;;  %v4120_v32 = vsel %vm139_vm1, %v10002_v13, %v4119_v35  ;;  %v4117_v0 = vrot.slane %v10002_v13, 4  ;;  %v10052_v35 = vpop.permute.xlu2 %7975 }
 0xb35   :  { %7732 = vmatmul.msk.bf16.vlgmr.msra.gmra.mxu0 %vm1205_vm2, %v4902_v36  ;;  %v4942_v62 = vpack.c.bf16 %v4507_v53, %v4507_v53  ;;  %v4511_v25 = vperm.slane %v9992_v40, %v8477_v43  ;;  %v4939_v54 = vpack.c.bf16 %v4499_v5, %v4499_v5  ;;  %v4504_v10 = vrot.slane %v4499_v5, 4 }
 0xb36   :  { %5397 = vmatpush.bf16.xpose.msrb.mxu0 %v5388_v4  ;;  %v5350_v45 = vsel %vm1205_vm2, %v4936_v48, 0  ;;  %v4104_v34 = vsel %vm139_vm1, 0.0, %v4103_v33  ;;  %v4128_v31 = vperm.slane %v4120_v32, %v8482_v56  ;;  %v4137_v23 = vrot.slane %v9998_v8, 4 }
 0xb37   :  { %v5464_v13 = vsel %vm1205_vm2, %v4942_v62, 0  ;;  %v4900_v46 = vpack.c.bf16 %v4104_v34, %v4104_v34  ;;  %v5407_v52 = vsel %vm1205_vm2, %v4939_v54, 0  ;;  %v4505_v38 = vsel %vm139_vm1, 0.0, %v4504_v10 }
 0xb38   :  { %5359 = vmatpush.bf16.xpose.msra.mxu2 %v5350_v45  ;;  %v4512_v49 = vrot.slane %v9992_v40, 4  ;;  %v4940_v41 = vpack.c.bf16 %v4505_v38, %v4505_v38  ;;  %v4520_v44 = vrot.slane %v4511_v25, 4  ;;  %v4118_v6 = vsel %vm139_vm1, %v4117_v0, %v9987_v27 }
 0xb39   :  { %7730 = vmatmul.msk.bf16.vlgmr.msrb.gmra.mxu2 %vm1205_vm2, %v4900_v46  ;;  %v7977_v59 = vunpack.i.l.bf16 %v10052_v35  ;;  %v4131_v20 = vrot.slane %v4128_v31, 4  ;;  %v4138_v27 = vsel %vm139_vm1, 0.0, %v4137_v23  ;;  %v4124_v55 = vperm.slane %v4118_v6, %v8482_v56 }
 0xb3a   :  { %5454 = vmatpush.bf16.xpose.msrb.mxu3 %v5445_v2  ;;  %v4513_v21 = vsel %vm139_vm1, 0.0, %v4512_v49  ;;  %v5426_v22 = vsel %vm1205_vm2, %v4940_v41, 0  ;;  %v4905_v61 = vpack.c.bf16 %v4128_v31, %v4128_v31  ;;  %v3967_v1 = vrot.slane %v9973_v51, 4 }
 0xb3b   :  { %v10047_v60 = vpop.permute.xlu0 %7980  ;;  %v4517_v63 = vperm.slane %v4513_v21, %v8477_v43  ;;  %v4142_v4 = vperm.slane %v4138_v27, %v8477_v43  ;;  %v4132_v48 = vsel %vm139_vm1, 0.0, %v4131_v20  ;;  %v4129_v53 = vrot.slane %v4124_v55, 4 }
 0xb3c   :  { %v7982_v11 = vunpack.i.l.bf16 %v10047_v60  ;;  %5416 = vmatpush.bf16.xpose.msrb.mxu1 %v5407_v52  ;;  %v3968_v62 = vsel %vm139_vm1, %v9963_v7, %v3967_v1  ;;  %v4903_v54 = vpack.c.bf16 %v4124_v55, %v4124_v55 }
 0xb3d   :  { %v4521_v37 = vsel %vm139_vm1, %v4517_v63, %v4520_v44  ;;  %v4518_v15 = vrot.slane %v4517_v63, 4  ;;  %v4143_v10 = vrot.slane %v4142_v4, 4  ;;  %v3976_v52 = vperm.slane %v3968_v62, %v8482_v56 }
 0xb3e   :  { %5473 = vmatpush.bf16.xpose.msra.mxu0 %v5464_v13  ;;  %v7989_v58 = vpack.i.bf16 %v9827_v3, %v7982_v11  ;;  %v10066_v24 = vpop.permute.xlu1 %7970  ;;  %v4136_v3 = vperm.slane %v9998_v8, %v8477_v43  ;;  %v4529_v36 = vperm.slane %v4521_v37, %v8482_v56  ;;  %v4130_v13 = vsel %vm139_vm1, 0.0, %v4129_v53 }
 0xb3f   :  { %v7972_v40 = vunpack.i.l.bf16 %v10066_v24  ;;  %v4519_v8 = vsel %vm139_vm1, %v4518_v15, %v4511_v25  ;;  %v4906_v25 = vpack.c.bf16 %v4132_v48, %v4132_v48  ;;  %v4904_v38 = vpack.c.bf16 %v4130_v13, %v4130_v13 }
 0xb40   :  { %7990 = vrot.lane.b32.xlu1 %v7989_v58, %s8329_s9  ;;  %5435 = vmatpush.bf16.xpose.msrb.mxu2 %v5426_v22  ;;  %v4945_v2 = vpack.c.bf16 %v4529_v36, %v4529_v36  ;;  %v4525_v39 = vperm.slane %v4519_v8, %v8482_v56  ;;  %v4532_v5 = vrot.slane %v4529_v36, 4  ;;  %v4145_v33 = vrot.slane %v4136_v3, 4 }
 0xb41   :  { %v7984_v16 = vpack.i.bf16 %v7977_v59, %v7972_v40  ;;  %7735 = vmatmul.msk.bf16.vlgmr.msra.gmra.mxu3 %vm1205_vm2, %v4905_v61  ;;  %v4144_v41 = vsel %vm139_vm1, %v4143_v10, %v4136_v3  ;;  %v4163_v59 = vrot.slane %v3976_v52, 4  ;;  %v4162_v20 = vperm.slane %v3976_v52, %v8477_v43 }
 0xb42   :  { %v5521_v32 = vsel %vm1205_vm2, %v4945_v2, 0  ;;  %v4943_v0 = vpack.c.bf16 %v4525_v39, %v4525_v39  ;;  %v4533_v51 = vsel %vm139_vm1, 0.0, %v4532_v5  ;;  %v4530_v45 = vrot.slane %v4525_v39, 4 }
 0xb43   :  { %7985 = vrot.lane.b32.xlu2 %v7984_v16, %s8329_s9  ;;  %5530 = vmatpush.bf16.xpose.msra.mxu3 %v5521_v32  ;;  %v4946_v34 = vpack.c.bf16 %v4533_v51, %v4533_v51  ;;  %v4146_v11 = vsel %vm139_vm1, %v4142_v4, %v4145_v33  ;;  %v4150_v22 = vperm.slane %v4144_v41, %v8482_v56  ;;  %v4164_v27 = vsel %vm139_vm1, 0.0, %v4163_v59 }
 0xb44   :  { %v4531_v46 = vsel %vm139_vm1, 0.0, %v4530_v45  ;;  %7733 = vmatmul.msk.bf16.vlgmr.msra.gmra.mxu1 %vm1205_vm2, %v4903_v54  ;;  %v5483_v31 = vsel %vm1205_vm2, %v4943_v0, 0  ;;  %v4154_v49 = vperm.slane %v4146_v11, %v8482_v56  ;;  %v4168_v61 = vperm.slane %v4164_v27, %v8477_v43 }
 0xb45   :  { %7736 = vmatmul.msk.bf16.vlgmr.msrb.gmra.mxu0 %vm1205_vm2, %v4906_v25  ;;  %v5540_v23 = vsel %vm1205_vm2, %v4946_v34, 0  ;;  %v4944_v7 = vpack.c.bf16 %v4531_v46, %v4531_v46  ;;  %5492 = vmatpush.bf16.xpose.msra.mxu1 %v5483_v31  ;;  %v4155_v55 = vrot.slane %v4150_v22, 4  ;;  %v4171_v37 = vrot.slane %v4162_v20, 4 }
 0xb46   :  { %5549 = vmatpush.bf16.xpose.msrb.mxu0 %v5540_v23  ;;  %v4157_v63 = vrot.slane %v4154_v49, 4  ;;  %v4909_v3 = vpack.c.bf16 %v4154_v49, %v4154_v49  ;;  %v4907_v4 = vpack.c.bf16 %v4150_v22, %v4150_v22  ;;  %v4169_v2 = vrot.slane %v4168_v61, 4 }
 0xb47   :  { %v5502_v58 = vsel %vm1205_vm2, %v4944_v7, 0  ;;  %v4156_v48 = vsel %vm139_vm1, 0.0, %v4155_v55  ;;  %v4172_v39 = vsel %vm139_vm1, %v4168_v61, %v4171_v37 }
 0xb48   :  { %v4158_v16 = vsel %vm139_vm1, 0.0, %v4157_v63  ;;  %v4908_v53 = vpack.c.bf16 %v4156_v48, %v4156_v48  ;;  %v4180_v33 = vperm.slane %v4172_v39, %v8482_v56  ;;  %v4170_v32 = vsel %vm139_vm1, %v4169_v2, %v4162_v20 }
 0xb49   :  { %7734 = vmatmul.msk.bf16.vlgmr.msra.gmra.mxu2 %vm1205_vm2, %v4904_v38  ;;  %v4910_v8 = vpack.c.bf16 %v4158_v16, %v4158_v16  ;;  %v4176_v54 = vperm.slane %v4170_v32, %v8482_v56 }
 0xb4a   :  { %5511 = vmatpush.bf16.xpose.msra.mxu2 %v5502_v58  ;;  %v4183_v25 = vrot.slane %v4180_v33, 4  ;;  %v4913_v10 = vpack.c.bf16 %v4180_v33, %v4180_v33 }
 0xb4b   :  { %v4181_v46 = vrot.slane %v4176_v54, 4  ;;  %v4911_v7 = vpack.c.bf16 %v4176_v54, %v4176_v54 }
 0xb4c   :  { %v10102_v44 = vpop.f32.mrf.mxu1  ;;  %v4184_v13 = vsel %vm139_vm1, 0.0, %v4183_v25 }
 0xb4d   :  { %v10104_v6 = vpop.f32.mrf.mxu3  ;;  %v4914_v52 = vpack.c.bf16 %v4184_v13, %v4184_v13  ;;  %v4182_v38 = vsel %vm139_vm1, 0.0, %v4181_v46  ;;  %v5555_v41 = vsel %vm1814_vm3, %v10102_v44, -inf }
 0xb4e   :  { %v10106_v21 = vpop.f32.mrf.mxu0  ;;  %v4912_v58 = vpack.c.bf16 %v4182_v38, %v4182_v38  ;;  %v5561_v59 = vsel %vm1814_vm3, %v10104_v6, -inf }
 0xb4f   :  { %v5564_v40 = vsel %vm1814_vm3, %v10106_v21, -inf }
 0xb50   :  { %5565 = vmax.xlane.f32.xlu0 %v5564_v40 }
 0xb51   :  { %7739 = vmatmul.msk.bf16.vlgmr.msrb.gmra.mxu3 %vm1205_vm2, %v4909_v3 }
 0xb54   :  { %v4964_v15 = vpop.f32.mrf.mxu1  ;;  %7737 = vmatmul.msk.bf16.vlgmr.msrb.gmra.mxu1 %vm1205_vm2, %v4907_v4 }
 0xb55   :  { %v5002_v36 = vpop.f32.mrf.mxu3  ;;  %7740 = vmatmul.msk.bf16.vlgmr.msra.gmra.mxu0 %vm1205_vm2, %v4910_v8 }
 0xb56   :  { %v5021_v1 = vpop.f32.mrf.mxu0 }
 0xb57   :  { %v10118_v5 = vpop.f32.mrf.mxu2 }
 0xb58   :  { %v5558_v27 = vsel %vm1814_vm3, %v10118_v5, -inf }
 0xb59   :  { %7738 = vmatmul.msk.bf16.vlgmr.msrb.gmra.mxu2 %vm1205_vm2, %v4908_v53 }
 0xb5c   :  { %v10125_v0 = vpop.f32.mrf.mxu1 }
 0xb5d   :  { %v10127_v51 = vpop.f32.mrf.mxu3  ;;  %v5567_v55 = vsel %vm1814_vm3, %v10125_v0, -inf }
 0xb5e   :  { %v5573_v45 = vsel %vm1814_vm3, %v10127_v51, -inf  ;;  %v10131_v62 = vpop.f32.mrf.mxu0 }
 0xb5f   :  { %5574 = vmax.xlane.f32.xlu0 %v5573_v45  ;;  %v4983_v34 = vpop.f32.mrf.mxu2  ;;  %v5576_v1 = vsel %vm1814_vm3, %v10131_v62, -inf }
 0xb61   :  { %7743 = vmatmul.msk.bf16.vlgmr.msra.gmra.mxu3 %vm1205_vm2, %v4913_v10 }
 0xb64   :  { %v5040_v11 = vpop.f32.mrf.mxu1  ;;  %7741 = vmatmul.msk.bf16.vlgmr.msra.gmra.mxu1 %vm1205_vm2, %v4911_v7 }
 0xb65   :  { %v5078_v31 = vpop.f32.mrf.mxu3  ;;  %7744 = vmatmul.msk.bf16.vlgmr.msrb.gmra.mxu0 %vm1205_vm2, %v4914_v52 }
 0xb66   :  { %v5097_v23 = vpop.f32.mrf.mxu0 }
 0xb67   :  { %v10137_v49 = vpop.f32.mrf.mxu2 }
 0xb68   :  { %v5570_v4 = vsel %vm1814_vm3, %v10137_v49, -inf }
 0xb69   :  { %7742 = vmatmul.msk.bf16.vlgmr.msra.gmra.mxu2 %vm1205_vm2, %v4912_v58 }
 0xb6a   :  { %5556 = vmax.xlane.f32.xlu1 %v5555_v41 }
 0xb6c   :  { %5562 = vmax.xlane.f32.xlu2 %v5561_v59  ;;  %v10146_v22 = vpop.f32.mrf.mxu1 }
 0xb6d   :  { %v10148_v40 = vpop.f32.mrf.mxu3  ;;  %v5579_v63 = vsel %vm1814_vm3, %v10146_v22, -inf }
 0xb6e   :  { %v10152_v20 = vpop.f32.mrf.mxu0  ;;  %5580 = vmax.xlane.f32.xlu0 %v5579_v63  ;;  %v5585_v33 = vsel %vm1814_vm3, %v10148_v40, -inf }
 0xb6f   :  { %v5059_v3 = vpop.f32.mrf.mxu2  ;;  %v5588_v37 = vsel %vm1814_vm3, %v10152_v20, -inf }
 0xb72   :  { %5559 = vmax.xlane.f32.xlu1 %v5558_v27 }
 0xb74   :  { %5568 = vmax.xlane.f32.xlu2 %v5567_v55  ;;  %v5116_v16 = vpop.f32.mrf.mxu1 }
 0xb75   :  { %v5154_v61 = vpop.f32.mrf.mxu3 }
 0xb76   :  { %v5173_v15 = vpop.f32.mrf.mxu0  ;;  %5589 = vmax.xlane.f32.xlu0 %v5588_v37 }
 0xb77   :  { %v10160_v36 = vpop.f32.mrf.mxu2 }
 0xb78   :  { %v5582_v2 = vsel %vm1814_vm3, %v10160_v36, -inf }
 0xb7a   :  { %5577 = vmax.xlane.f32.xlu1 %v5576_v1 }
 0xb7c   :  { %5571 = vmax.xlane.f32.xlu2 %v5570_v4  ;;  %v10166_v8 = vpop.f32.mrf.mxu1 }
 0xb7d   :  { %v10168_v48 = vpop.f32.mrf.mxu3  ;;  %v5591_v25 = vsel %vm1814_vm3, %v10166_v8, -inf }
 0xb7e   :  { %v10172_v39 = vpop.f32.mrf.mxu0  ;;  %5583 = vmax.xlane.f32.xlu0 %v5582_v2  ;;  %v5597_v32 = vsel %vm1814_vm3, %v10168_v48, -inf }
 0xb7f   :  { %v5135_v53 = vpop.f32.mrf.mxu2  ;;  %v5600_v13 = vsel %vm1814_vm3, %v10172_v39, -inf }
 0xb82   :  { %5586 = vmax.xlane.f32.xlu1 %v5585_v33 }
 0xb84   :  { %5598 = vmax.xlane.f32.xlu2 %v5597_v32  ;;  %v5192_v45 = vpop.f32.mrf.mxu1 }
 0xb85   :  { %v5230_v54 = vpop.f32.mrf.mxu3 }
 0xb86   :  { %v5249_v34 = vpop.f32.mrf.mxu0  ;;  %5592 = vmax.xlane.f32.xlu0 %v5591_v25 }
 0xb87   :  { %v10180_v10 = vpop.f32.mrf.mxu2 }
 0xb88   :  { %v5594_v11 = vsel %vm1814_vm3, %v10180_v10, -inf }
 0xb8e   :  { %5601 = vmax.xlane.f32.xlu0 %v5600_v13 }
 0xb8f   :  { %v5211_v46 = vpop.f32.mrf.mxu2 }
 0xb96   :  { %5595 = vmax.xlane.f32.xlu0 %v5594_v11 }
 0xb9d   :  { %v7986_v31 = vpop.permute.xlu2 %7985 }
 0xb9e   :  { %v7988_v23 = vunpack.i.h.bf16 %v7986_v31  ;;  %v7987_v52 = vunpack.i.l.bf16 %v7986_v31 }
 0xba0   :  { %v4593_v7 = vrot.slane %v7988_v23, 4  ;;  %v4591_v41 = vrot.slane %v7987_v52, 4 }
 0xba2   :  { %v4594_v38 = vsel %vm139_vm1, %v7987_v52, %v4593_v7  ;;  %v4592_v58 = vsel %vm139_vm1, %v4591_v41, %v7988_v23 }
 0xba3   :  { %v4598_v63 = vperm.slane %v4592_v58, %v8477_v43  ;;  %v4602_v55 = vperm.slane %v4594_v38, %v8477_v43 }
 0xba5   :  { %v4603_v37 = vrot.slane %v4598_v63, 4  ;;  %v4615_v53 = vrot.slane %v4602_v55, 4 }
 0xbb0   :  { %v10190_v15 = vpop.f32.mrf.mxu1 }
 0xbb1   :  { %v5603_v33 = vsel %vm1814_vm3, %v10190_v15, -inf }
 0xbb2   :  { %v7991_v59 = vpop.permute.xlu1 %7990  ;;  %v10192_v1 = vpop.f32.mrf.mxu0  ;;  %5604 = vmax.xlane.f32.xlu2 %v5603_v33 }
 0xbb3   :  { %v7993_v3 = vunpack.i.h.bf16 %v7991_v59  ;;  %v7992_v27 = vunpack.i.l.bf16 %v7991_v59 }
 0xbb4   :  { %v10200_v54 = vpop.f32.mrf.mxu3 }
 0xbb5   :  { %v4581_v16 = vrot.slane %v7993_v3, 4  ;;  %v4579_v61 = vrot.slane %v7992_v27, 4  ;;  %v5609_v25 = vsel %vm1814_vm3, %v10200_v54, -inf }
 0xbb6   :  { %5610 = vmax.xlane.f32.xlu0 %v5609_v25 }
 0xbb7   :  { %v4580_v4 = vsel %vm139_vm1, %v4579_v61, %v7993_v3  ;;  %v4582_v2 = vsel %vm139_vm1, %v7992_v27, %v4581_v16  ;;  %v5612_v61 = vsel %vm1814_vm3, %v10192_v1, -inf }
 0xbb8   :  { %v4586_v32 = vperm.slane %v4580_v4, %v8477_v43  ;;  %v4590_v45 = vperm.slane %v4582_v2, %v8477_v43  ;;  %v5268_v58 = vpop.f32.mrf.mxu1 }
 0xbba   :  { %v4604_v34 = vsel %vm139_vm1, %v4603_v37, %v4586_v32  ;;  %v4605_v13 = vrot.slane %v4586_v32, 4  ;;  %v10206_v46 = vsel %vm139_vm1, %v4615_v53, %v4590_v45  ;;  %v4617_v11 = vrot.slane %v4590_v45, 4  ;;  %v5325_v59 = vpop.f32.mrf.mxu0  ;;  %5613 = vmax.xlane.f32.xlu2 %v5612_v61 }
 0xbbb   :  { %v4610_v31 = vperm.slane %v4604_v34, %v8482_v56 }
 0xbbc   :  { %v4606_v23 = vsel %vm139_vm1, %v4598_v63, %v4605_v13  ;;  %v10211_v7 = vsel %vm139_vm1, %v4602_v55, %v4617_v11  ;;  %v5306_v37 = vpop.f32.mrf.mxu3  ;;  %v10220_v4 = vpop.f32.mrf.mxu2 }
 0xbbd   :  { %v4614_v52 = vperm.slane %v4606_v23, %v8482_v56  ;;  %v4678_v38 = vperm.slane %v4610_v31, %v8477_v43  ;;  %v4679_v41 = vrot.slane %v4610_v31, 4 }
 0xbbf   :  { %v4680_v3 = vsel %vm139_vm1, 0.0, %v4679_v41  ;;  %v4687_v27 = vrot.slane %v4678_v38, 4  ;;  %v4704_v16 = vperm.slane %v4614_v52, %v8477_v43  ;;  %v4705_v55 = vrot.slane %v4614_v52, 4 }
 0xbc0   :  { %v4684_v63 = vperm.slane %v4680_v3, %v8477_v43 }
 0xbc1   :  { %v4713_v2 = vrot.slane %v4704_v16, 4  ;;  %v4706_v32 = vsel %vm139_vm1, 0.0, %v4705_v55  ;;  %v10230_v58 = vpop.f32.mrf.mxu1 }
 0xbc2   :  { %v4688_v53 = vsel %vm139_vm1, %v4684_v63, %v4687_v27  ;;  %v4685_v33 = vrot.slane %v4684_v63, 4  ;;  %v4710_v25 = vperm.slane %v4706_v32, %v8477_v43  ;;  %v10232_v59 = vpop.f32.mrf.mxu0  ;;  %v5606_v63 = vsel %vm1814_vm3, %v10220_v4, -inf }
 0xbc3   :  { %v4696_v45 = vperm.slane %v4688_v53, %v8482_v56  ;;  %5607 = vmax.xlane.f32.xlu2 %v5606_v63 }
 0xbc4   :  { %v4686_v34 = vsel %vm139_vm1, %v4685_v33, %v4678_v38  ;;  %v4714_v31 = vsel %vm139_vm1, %v4710_v25, %v4713_v2  ;;  %v4711_v41 = vrot.slane %v4710_v25, 4  ;;  %v5615_v38 = vsel %vm1814_vm3, %v10230_v58, -inf  ;;  %v10240_v55 = vpop.f32.mrf.mxu3  ;;  %v5287_v53 = vpop.f32.mrf.mxu2 }
 0xbc5   :  { %v5941_v13 = vpack.c.bf16 %v4696_v45, %v4696_v45  ;;  %v4692_v11 = vperm.slane %v4686_v34, %v8482_v56  ;;  %v4699_v23 = vrot.slane %v4696_v45, 4  ;;  %v4722_v52 = vperm.slane %v4714_v31, %v8482_v56  ;;  %5616 = vmax.xlane.f32.xlu0 %v5615_v38 }
 0xbc6   :  { %v5621_v33 = vsel %vm1814_vm3, %v10240_v55, -inf  ;;  %v4712_v25 = vsel %vm139_vm1, %v4711_v41, %v4704_v16 }
 0xbc7   :  { %v6013_v3 = vsel %vm2235_vm4, %v5941_v13, 0  ;;  %v5939_v27 = vpack.c.bf16 %v4692_v11, %v4692_v11  ;;  %v4700_v61 = vsel %vm139_vm1, 0.0, %v4699_v23  ;;  %v4697_v37 = vrot.slane %v4692_v11, 4  ;;  %5622 = vmax.xlane.f32.xlu1 %v5621_v33 }
 0xbc8   :  { %6022 = vmatpush.bf16.msrb.mxu3 %v6013_v3  ;;  %v5945_v2 = vpack.c.bf16 %v4722_v52, %v4722_v52  ;;  %v5942_v45 = vpack.c.bf16 %v4700_v61, %v4700_v61  ;;  %v4718_v13 = vperm.slane %v4712_v25, %v8482_v56  ;;  %v4725_v3 = vrot.slane %v4722_v52, 4 }
 0xbc9   :  { %v5975_v32 = vsel %vm2235_vm4, %v5939_v27, 0  ;;  %v4698_v11 = vsel %vm139_vm1, 0.0, %v4697_v37  ;;  %v5344_v53 = vpop.f32.mrf.mxu1  ;;  %v5624_v52 = vsel %vm1814_vm3, %v10232_v59, -inf }
 0xbca   :  { %5984 = vmatpush.bf16.msrb.mxu1 %v5975_v32  ;;  %v6089_v34 = vsel %vm2235_vm4, %v5945_v2, 0  ;;  %v6032_v31 = vsel %vm2235_vm4, %v5942_v45, 0  ;;  %v5940_v23 = vpack.c.bf16 %v4698_v11, %v4698_v11  ;;  %v5943_v38 = vpack.c.bf16 %v4718_v13, %v4718_v13  ;;  %v5401_v37 = vpop.f32.mrf.mxu0  ;;  %v5566_v11 = vpop.xlane.xlu0 %5565 }
 0xbcb   :  { %6041 = vmatpush.bf16.msra.mxu0 %v6032_v31  ;;  %v4723_v63 = vrot.slane %v4718_v13, 4  ;;  %v4726_v16 = vsel %vm139_vm1, 0.0, %v4725_v3 }
 0xbcc   :  { %6098 = vmatpush.bf16.msra.mxu3 %v6089_v34  ;;  %v5994_v27 = vsel %vm2235_vm4, %v5940_v23, 0  ;;  %v6051_v41 = vsel %vm2235_vm4, %v5943_v38, 0  ;;  %v5946_v61 = vpack.c.bf16 %v4726_v16, %v4726_v16  ;;  %v5382_v32 = vpop.f32.mrf.mxu3  ;;  %v10257_v25 = vpop.f32.mrf.mxu2 }
 0xbcd   :  { %6003 = vmatpush.bf16.msrb.mxu2 %v5994_v27  ;;  %v4724_v2 = vsel %vm139_vm1, 0.0, %v4723_v63  ;;  %5625 = vmax.xlane.f32.xlu0 %v5624_v52  ;;  %v5618_v13 = vsel %vm1814_vm3, %v10257_v25, -inf }
 0xbce   :  { %6060 = vmatpush.bf16.msra.mxu1 %v6051_v41  ;;  %v5944_v33 = vpack.c.bf16 %v4724_v2, %v4724_v2  ;;  %v6108_v45 = vsel %vm2235_vm4, %v5946_v61, 0  ;;  %5619 = vmax.xlane.f32.xlu2 %v5618_v13 }
 0xbcf   :  { %6117 = vmatpush.bf16.msrb.mxu0 %v6108_v45 }
 0xbd0   :  { %v6070_v34 = vsel %vm2235_vm4, %v5944_v33, 0  ;;  %v5654_v33 = vsub.f32 %v10106_v21, %v5566_v11 }
 0xbd1   :  { %6079 = vmatpush.bf16.msra.mxu2 %v6070_v34  ;;  %v10262_v31 = vpop.f32.mrf.mxu1 }
 0xbd2   :  { %v10264_v23 = vpop.f32.mrf.mxu0  ;;  %v10270_v27 = vpop.xlane.xlu0 %5574  ;;  %v5689_v13 = vmul.f32 1.442695, %v5654_v33 }
 0xbd4   :  { %v10266_v3 = vpop.f32.mrf.mxu3  ;;  %v5363_v38 = vpop.f32.mrf.mxu2 }
 0xbd5   :  { %v5633_v63 = vsel %vm1814_vm3, %v10266_v3, -inf }
 0xbd6   :  { %5634 = vmax.xlane.f32.xlu2 %v5633_v63 }
 0xbd9   :  { %v5420_v41 = vpop.f32.mrf.mxu1 }
 0xbda   :  { %v5477_v61 = vpop.f32.mrf.mxu0 }
 0xbdc   :  { %v5458_v53 = vpop.f32.mrf.mxu3  ;;  %v10274_v52 = vpop.f32.mrf.mxu2 }
 0xbdd   :  { %v5557_v16 = vpop.xlane.xlu1 %5556  ;;  %v5630_v45 = vsel %vm1814_vm3, %v10274_v52, -inf }
 0xbde   :  { %v5651_v2 = vsub.f32 %v10102_v44, %v5557_v16  ;;  %5631 = vmax.xlane.f32.xlu0 %v5630_v45 }
 0xbdf   :  { %v5563_v37 = vpop.xlane.xlu2 %5562 }
 0xbe0   :  { %v5683_v32 = vmul.f32 1.442695, %v5651_v2  ;;  %v5653_v61 = vsub.f32 %v10104_v6, %v5563_v37 }
 0xbe1   :  { %v10278_v34 = vpop.xlane.xlu0 %5580  ;;  %v10280_v63 = vpop.f32.mrf.mxu1 }
 0xbe2   :  { %8158 = vpow2.f32 %v5683_v32  ;;  %v10282_v41 = vpop.f32.mrf.mxu0  ;;  %v5687_v47 = vmul.f32 1.442695, %v5653_v61 }
 0xbe3   :  { %8160 = vpow2.f32 %v5689_v13 }
 0xbe4   :  { %v10285_v16 = vpop.f32.mrf.mxu3  ;;  %v5439_v2 = vpop.f32.mrf.mxu2 }
 0xbe5   :  { %v5560_v38 = vpop.xlane.xlu1 %5559 }
 0xbe6   :  { %v5652_v44 = vsub.f32 %v10118_v5, %v5560_v38 }
 0xbe7   :  { %v5569_v21 = vpop.xlane.xlu2 %5568 }
 0xbe8   :  { %v10287_v11 = vpop.eup %8158  ;;  %v5685_v53 = vmul.f32 1.442695, %v5652_v44  ;;  %v5655_v42 = vsub.f32 %v10125_v0, %v5569_v21 }
 0xbe9   :  { %v5747_v33 = vsel %vm1814_vm3, %v10287_v11, 0.0  ;;  %v5590_v32 = vpop.xlane.xlu0 %5589  ;;  %v10293_v14 = vpop.eup %8160 }
 0xbea   :  { %8162 = vpow2.f32 %v5685_v53  ;;  %5748 = vadd.xlane.f32.xlu0 %v5747_v33  ;;  %v5662_v45 = vsub.f32 %v10152_v20, %v5590_v32  ;;  %v5496_v13 = vpop.f32.mrf.mxu1  ;;  %v5553_v18 = vpop.f32.mrf.mxu0  ;;  %v5756_v0 = vsel %vm1814_vm3, %v10293_v14, 0.0 }
 0xbeb   :  { %v5691_v18 = vmul.f32 1.442695, %v5655_v42 }
 0xbec   :  { %v5705_v5 = vmul.f32 1.442695, %v5662_v45  ;;  %v5534_v37 = vpop.f32.mrf.mxu3  ;;  %v10299_v53 = vpop.f32.mrf.mxu2 }
 0xbed   :  { %v5578_v38 = vpop.xlane.xlu1 %5577 }
 0xbee   :  { %v5658_v6 = vsub.f32 %v10131_v62, %v5578_v38  ;;  %8164 = vpow2.f32 %v5705_v5  ;;  %v5657_v38 = vsub.f32 %v10127_v51, %v10270_v27 }
 0xbef   :  { %v5572_v44 = vpop.xlane.xlu2 %5571  ;;  %8166 = vpow2.f32 %v5687_v47 }
 0xbf0   :  { %v10297_v2 = vpop.eup %8162  ;;  %v5656_v20 = vsub.f32 %v10137_v49, %v5572_v44  ;;  %v5697_v61 = vmul.f32 1.442695, %v5658_v6 }
 0xbf1   :  { %v5750_v33 = vsel %vm1814_vm3, %v10297_v2, 0.0  ;;  %v5584_v21 = vpop.xlane.xlu0 %5583 }
 0xbf2   :  { %8168 = vpow2.f32 %v5697_v61  ;;  %5751 = vadd.xlane.f32.xlu1 %v5750_v33  ;;  %5757 = vadd.xlane.f32.xlu0 %v5756_v0  ;;  %v5660_v62 = vsub.f32 %v10160_v36, %v5584_v21  ;;  %v5693_v32 = vmul.f32 1.442695, %v5656_v20  ;;  %v5659_v36 = vsub.f32 %v10146_v22, %v10278_v34 }
 0xbf3   :  { %8170 = vpow2.f32 %v5691_v18  ;;  %v5695_v20 = vmul.f32 1.442695, %v5657_v38 }
 0xbf4   :  { %v10307_v47 = vpop.eup %8164  ;;  %v5701_v45 = vmul.f32 1.442695, %v5660_v62  ;;  %v5515_v13 = vpop.f32.mrf.mxu2  ;;  %v5699_v27 = vmul.f32 1.442695, %v5659_v36 }
 0xbf5   :  { %v10309_v5 = vpop.eup %8166  ;;  %v5780_v49 = vsel %vm1814_vm3, %v10307_v47, 0.0  ;;  %v5587_v33 = vpop.xlane.xlu1 %5586 }
 0xbf6   :  { %8172 = vpow2.f32 %v5701_v45  ;;  %5781 = vadd.xlane.f32.xlu2 %v5780_v49  ;;  %v5753_v37 = vsel %vm1814_vm3, %v10309_v5, 0.0  ;;  %v5661_v34 = vsub.f32 %v10148_v40, %v5587_v33 }
 0xbf7   :  { %8174 = vpow2.f32 %v5693_v32  ;;  %v5599_v49 = vpop.xlane.xlu2 %5598 }
 0xbf8   :  { %v10315_v42 = vpop.eup %8168  ;;  %8176 = vpow2.f32 %v5695_v20  ;;  %v5703_v32 = vmul.f32 1.442695, %v5661_v34  ;;  %v5665_v36 = vsub.f32 %v10168_v48, %v5599_v49 }
 0xbf9   :  { %v5768_v6 = vsel %vm1814_vm3, %v10315_v42, 0.0  ;;  %v5593_v44 = vpop.xlane.xlu0 %5592  ;;  %v10323_v51 = vpop.eup %8170  ;;  %8178 = vpow2.f32 %v5699_v27 }
 0xbfa   :  { %5769 = vadd.xlane.f32.xlu1 %v5768_v6  ;;  %5754 = vadd.xlane.f32.xlu0 %v5753_v37  ;;  %v5759_v21 = vsel %vm1814_vm3, %v10323_v51, 0.0  ;;  %8180 = vpow2.f32 %v5703_v32  ;;  %v5711_v20 = vmul.f32 1.442695, %v5665_v36  ;;  %v5627_v36 = vsel %vm1814_vm3, %v10262_v31, -inf }
 0xbfc   :  { %v10325_v61 = vpop.eup %8172 }
 0xbfd   :  { %v10327_v0 = vpop.eup %8174  ;;  %v5774_v22 = vsel %vm1814_vm3, %v10325_v61, 0.0 }
 0xbfe   :  { %5775 = vadd.xlane.f32.xlu2 %v5774_v22  ;;  %v5762_v18 = vsel %vm1814_vm3, %v10327_v0, 0.0  ;;  %v10338_v45 = vpop.eup %8176  ;;  %v5636_v22 = vsel %vm1814_vm3, %v10264_v23, -inf }
 0xbff   :  { %v10340_v38 = vpop.eup %8178  ;;  %v5765_v13 = vsel %vm1814_vm3, %v10338_v45, 0.0 }
 0xc00   :  { %v5771_v40 = vsel %vm1814_vm3, %v10340_v38, 0.0  ;;  %v10348_v33 = vpop.eup %8180 }
 0xc01   :  { %v10336_v62 = vpop.xlane.xlu0 %5601  ;;  %v5777_v48 = vsel %vm1814_vm3, %v10348_v33, 0.0 }
 0xc02   :  { %5763 = vadd.xlane.f32.xlu1 %v5762_v18  ;;  %5760 = vadd.xlane.f32.xlu0 %v5759_v21  ;;  %v5663_v21 = vsub.f32 %v10166_v8, %v5593_v44 }
 0xc04   :  { %v5707_v49 = vmul.f32 1.442695, %v5663_v21 }
 0xc09   :  { %v5596_v6 = vpop.xlane.xlu0 %5595 }
 0xc0a   :  { %5772 = vadd.xlane.f32.xlu1 %v5771_v40  ;;  %5766 = vadd.xlane.f32.xlu0 %v5765_v13  ;;  %v5664_v37 = vsub.f32 %v10180_v10, %v5596_v6  ;;  %v7973_v40 = vunpack.i.h.bf16 %v10066_v24  ;;  %v7978_v6 = vunpack.i.h.bf16 %v10052_v35  ;;  %v5642_v35 = vsel %vm1814_vm3, %v10299_v53, -inf }
 0xc0c   :  { %v5709_v27 = vmul.f32 1.442695, %v5664_v37  ;;  %v7983_v37 = vunpack.i.h.bf16 %v10047_v60 }
 0xc0e   :  { %8182 = vpow2.f32 %v5709_v27  ;;  %v7999_v27 = vpack.i.bf16 %v9830_v19, %v7983_v37 }
 0xc0f   :  { %8184 = vpow2.f32 %v5711_v20  ;;  %v7994_v20 = vpack.i.bf16 %v7978_v6, %v7973_v40  ;;  %v5666_v40 = vsub.f32 %v10172_v39, %v10336_v62 }
 0xc10   :  { %8186 = vpow2.f32 %v5707_v49 }
 0xc12   :  { %5778 = vadd.xlane.f32.xlu1 %v5777_v48  ;;  %5637 = vmax.xlane.f32.xlu0 %v5636_v22 }
 0xc14   :  { %v10354_v34 = vpop.eup %8182 }
 0xc15   :  { %v10356_v18 = vpop.eup %8184  ;;  %v5786_v10 = vsel %vm1814_vm3, %v10354_v34, 0.0 }
 0xc16   :  { %5787 = vadd.xlane.f32.xlu2 %v5786_v10  ;;  %v5789_v32 = vsel %vm1814_vm3, %v10356_v18, 0.0  ;;  %v10366_v13 = vpop.eup %8186  ;;  %v5648_v10 = vsel %vm1814_vm3, %v10282_v41, -inf }
 0xc17   :  { %v5783_v8 = vsel %vm1814_vm3, %v10366_v13, 0.0 }
 0xc1a   :  { %5790 = vadd.xlane.f32.xlu0 %v5789_v32 }
 0xc22   :  { %5628 = vmax.xlane.f32.xlu0 %v5627_v36 }
 0xc25   :  { %v5605_v44 = vpop.xlane.xlu2 %5604 }
 0xc29   :  { %v5611_v48 = vpop.xlane.xlu0 %5610 }
 0xc2a   :  { %5784 = vadd.xlane.f32.xlu0 %v5783_v8  ;;  %v5669_v24 = vsub.f32 %v10200_v54, %v5611_v48  ;;  %v4622_v48 = vperm.slane %v10206_v46, %v8482_v56  ;;  %v5667_v46 = vsub.f32 %v10190_v15, %v5605_v44 }
 0xc2b   :  { %7995 = vrot.lane.b32.xlu1 %v7994_v20, %s8329_s9 }
 0xc2c   :  { %v5719_v22 = vmul.f32 1.442695, %v5669_v24  ;;  %v4730_v15 = vperm.slane %v4622_v48, %v8477_v43 }
 0xc2d   :  { %v5614_v60 = vpop.xlane.xlu2 %5613 }
 0xc2e   :  { %8000 = vrot.lane.b32.xlu2 %v7999_v27, %s8329_s9  ;;  %8188 = vpow2.f32 %v5719_v22  ;;  %v5670_v36 = vsub.f32 %v10192_v1, %v5614_v60  ;;  %v5713_v27 = vmul.f32 1.442695, %v5666_v40  ;;  %v4731_v22 = vrot.slane %v4622_v48, 4 }
 0xc2f   :  { %v4626_v48 = vperm.slane %v10211_v7, %v8482_v56 }
 0xc30   :  { %v5721_v37 = vmul.f32 1.442695, %v5670_v36 }
 0xc32   :  { %5643 = vmax.xlane.f32.xlu0 %v5642_v35 }
 0xc34   :  { %v10381_v19 = vpop.eup %8188 }
 0xc35   :  { %v5801_v54 = vsel %vm1814_vm3, %v10381_v19, 0.0 }
 0xc36   :  { %v5608_v21 = vpop.xlane.xlu2 %5607 }
 0xc37   :  { %v5668_v32 = vsub.f32 %v10220_v4, %v5608_v21 }
 0xc38   :  { %v5617_v6 = vpop.xlane.xlu0 %5616 }
 0xc39   :  { %v5717_v49 = vmul.f32 1.442695, %v5668_v32 }
 0xc3a   :  { %5649 = vmax.xlane.f32.xlu0 %v5648_v10  ;;  %v5623_v24 = vpop.xlane.xlu1 %5622  ;;  %v5671_v10 = vsub.f32 %v10230_v58, %v5617_v6 }
 0xc3b   :  { %8190 = vpow2.f32 %v5717_v49  ;;  %v5673_v60 = vsub.f32 %v10240_v55, %v5623_v24  ;;  %v4732_v49 = vsel %vm139_vm1, 0.0, %v4731_v22 }
 0xc3c   :  { %8192 = vpow2.f32 %v5721_v37  ;;  %v5723_v36 = vmul.f32 1.442695, %v5671_v10  ;;  %v4736_v6 = vperm.slane %v4732_v49, %v8477_v43  ;;  %v5715_v37 = vmul.f32 1.442695, %v5667_v46 }
 0xc3d   :  { %8194 = vpow2.f32 %v5713_v27  ;;  %v5727_v32 = vmul.f32 1.442695, %v5673_v60  ;;  %v4757_v49 = vrot.slane %v4626_v48, 4 }
 0xc40   :  { %v5626_v39 = vpop.xlane.xlu0 %5625 }
 0xc41   :  { %v5620_v20 = vpop.xlane.xlu2 %5619  ;;  %v10388_v8 = vpop.eup %8190 }
 0xc42   :  { %5802 = vadd.xlane.f32.xlu0 %v5801_v54  ;;  %v5672_v4 = vsub.f32 %v10257_v25, %v5620_v20  ;;  %v5798_v1 = vsel %vm1814_vm3, %v10388_v8, 0.0  ;;  %v10395_v62 = vpop.eup %8192  ;;  %v5645_v20 = vsel %vm1814_vm3, %v10285_v16, -inf }
 0xc43   :  { %v10399_v25 = vpop.eup %8194  ;;  %v5804_v21 = vsel %vm1814_vm3, %v10395_v62, 0.0 }
 0xc44   :  { %v5725_v35 = vmul.f32 1.442695, %v5672_v4  ;;  %v5792_v54 = vsel %vm1814_vm3, %v10399_v25, 0.0  ;;  %v4737_v4 = vrot.slane %v4736_v6, 4 }
 0xc46   :  { %8196 = vpow2.f32 %v5725_v35  ;;  %v5639_v35 = vsel %vm1814_vm3, %v10280_v63, -inf  ;;  %v4738_v10 = vsel %vm139_vm1, %v4737_v4, %v4730_v15  ;;  %v4758_v4 = vsel %vm139_vm1, 0.0, %v4757_v49 }
 0xc47   :  { %8198 = vpow2.f32 %v5727_v32 }
 0xc48   :  { %8200 = vpow2.f32 %v5723_v36  ;;  %v4744_v36 = vperm.slane %v4738_v10, %v8482_v56  ;;  %v4762_v10 = vperm.slane %v4758_v4, %v8477_v43 }
 0xc49   :  { %8202 = vpow2.f32 %v5715_v37  ;;  %v5635_v32 = vpop.xlane.xlu2 %5634 }
 0xc4a   :  { %5799 = vadd.xlane.f32.xlu0 %v5798_v1  ;;  %v5674_v1 = vsub.f32 %v10232_v59, %v5626_v39 }
 0xc4c   :  { %v10407_v40 = vpop.eup %8196 }
 0xc4d   :  { %v5810_v27 = vsel %vm1814_vm3, %v10407_v40, 0.0  ;;  %v10417_v24 = vpop.eup %8198 }
 0xc4e   :  { %v10423_v22 = vpop.eup %8200  ;;  %v5813_v59 = vsel %vm1814_vm3, %v10417_v24, 0.0 }
 0xc4f   :  { %v10429_v46 = vpop.eup %8202  ;;  %v5807_v7 = vsel %vm1814_vm3, %v10423_v22, 0.0 }
 0xc50   :  { %v5795_v37 = vsel %vm1814_vm3, %v10429_v46, 0.0 }
 0xc51   :  { %v5632_v55 = vpop.xlane.xlu0 %5631 }
 0xc52   :  { %5805 = vadd.xlane.f32.xlu0 %v5804_v21  ;;  %v5676_v58 = vsub.f32 %v10274_v52, %v5632_v55  ;;  %v4739_v52 = vrot.slane %v4730_v15, 4  ;;  %v5729_v21 = vmul.f32 1.442695, %v5674_v1  ;;  %v4749_v1 = vrot.slane %v4744_v36, 4 }
 0xc54   :  { %v5733_v44 = vmul.f32 1.442695, %v5676_v58  ;;  %v4740_v39 = vsel %vm139_vm1, %v4736_v6, %v4739_v52  ;;  %v5677_v58 = vsub.f32 %v10266_v3, %v5635_v32 }
 0xc55   :  { %5793 = vadd.xlane.f32.xlu1 %v5792_v54  ;;  %v10435_v54 = vperm.slane %v4740_v39, %v8482_v56  ;;  %v4750_v39 = vsel %vm139_vm1, 0.0, %v4749_v1 }
 0xc56   :  { %8204 = vpow2.f32 %v5733_v44 }
 0xc57   :  { %5646 = vmax.xlane.f32.xlu2 %v5645_v20  ;;  %v4751_v52 = vrot.slane %v10435_v54, 4 }
 0xc59   :  { %v4752_v32 = vsel %vm139_vm1, 0.0, %v4751_v52 }
 0xc5a   :  { %5811 = vadd.xlane.f32.xlu0 %v5810_v27  ;;  %v5947_v27 = vpack.c.bf16 %v4744_v36, %v4744_v36  ;;  %v4763_v36 = vrot.slane %v4762_v10, 4 }
 0xc5c   :  { %v10437_v55 = vpop.eup %8204 }
 0xc5d   :  { %5640 = vmax.xlane.f32.xlu1 %v5639_v35  ;;  %v5749_v60 = vpop.xlane.xlu0 %5748  ;;  %v5735_v35 = vmul.f32 1.442695, %v5677_v58  ;;  %v5822_v3 = vsel %vm1814_vm3, %v10437_v55, 0.0 }
 0xc5e   :  { %8206 = vrcp.f32 %v5749_v60 }
 0xc5f   :  { %5814 = vadd.xlane.f32.xlu2 %v5813_v59  ;;  %8208 = vpow2.f32 %v5729_v21  ;;  %v6127_v21 = vsel %vm2235_vm4, %v5947_v27, 0  ;;  %v4756_v59 = vperm.slane %v4626_v48, %v8477_v43  ;;  %v5950_v27 = vpack.c.bf16 %v4752_v32, %v4752_v32 }
 0xc61   :  { %v4764_v52 = vsel %vm139_vm1, %v4763_v36, %v4756_v59  ;;  %v5949_v36 = vpack.c.bf16 %v10435_v54, %v10435_v54 }
 0xc62   :  { %5808 = vadd.xlane.f32.xlu0 %v5807_v7 }
 0xc64   :  { %v8207_v6 = vpop.eup %8206 }
 0xc65   :  { %v5875_v20 = vmul.f32 %v8207_v6, %v10287_v11  ;;  %v5752_v15 = vpop.xlane.xlu1 %5751  ;;  %5796 = vadd.xlane.f32.xlu1 %v5795_v37  ;;  %v5758_v44 = vpop.xlane.xlu0 %5757 }
 0xc66   :  { %8210 = vrcp.f32 %v5752_v15  ;;  %v10448_v11 = vpop.eup %8208  ;;  %v5948_v15 = vpack.c.bf16 %v4750_v39, %v4750_v39 }
 0xc67   :  { %v5907_v60 = vpack.c.bf16 %v5875_v20, %v5875_v20  ;;  %8212 = vrcp.f32 %v5758_v44  ;;  %5823 = vadd.xlane.f32.xlu2 %v5822_v3  ;;  %v5816_v7 = vsel %vm1814_vm3, %v10448_v11, 0.0  ;;  %v4765_v44 = vrot.slane %v4756_v59, 4 }
 0xc68   :  { %8214 = vpow2.f32 %v5735_v35  ;;  %v6184_v3 = vsel %vm2235_vm4, %v5950_v27, 0 }
 0xc69   :  { %7745 = vmatmul.msk.bf16.vlgmr.msrb.gmra.mxu1 %vm2231_vm5, %v5907_v60  ;;  %v6146_v60 = vsel %vm2235_vm4, %v5948_v15, 0  ;;  %v6165_v15 = vsel %vm2235_vm4, %v5949_v36, 0 }
 0xc6a   :  { %6136 = vmatpush.bf16.msrb.mxu1 %v6127_v21  ;;  %v5782_v21 = vpop.xlane.xlu2 %5781 }
 0xc6c   :  { %v8211_v49 = vpop.eup %8210 }
 0xc6d   :  { %v8213_v58 = vpop.eup %8212  ;;  %v5876_v6 = vmul.f32 %v8211_v49, %v10297_v2  ;;  %v5770_v37 = vpop.xlane.xlu1 %5769  ;;  %5817 = vadd.xlane.f32.xlu1 %v5816_v7  ;;  %v4766_v2 = vsel %vm139_vm1, %v4762_v10, %v4765_v44 }
 0xc6e   :  { %v5755_v20 = vpop.xlane.xlu0 %5754  ;;  %v5878_v48 = vmul.f32 %v8213_v58, %v10293_v14  ;;  %v10460_v35 = vpop.eup %8214  ;;  %v4770_v14 = vperm.slane %v4764_v52, %v8482_v56  ;;  %v4774_v39 = vperm.slane %v4766_v2, %v8482_v56 }
 0xc6f   :  { %v5908_v4 = vpack.c.bf16 %v5876_v6, %v5876_v6  ;;  %8216 = vrcp.f32 %v5755_v20  ;;  %v5825_v59 = vsel %vm1814_vm3, %v10460_v35, 0.0 }
 0xc70   :  { %v5910_v1 = vpack.c.bf16 %v5878_v48, %v5878_v48  ;;  %8218 = vrcp.f32 %v5770_v37  ;;  %v4775_v58 = vrot.slane %v4770_v14, 4  ;;  %v4777_v37 = vrot.slane %v4774_v39, 4 }
 0xc71   :  { %7746 = vmatmul.msk.bf16.vlgmr.msrb.gmra.mxu2 %vm2231_vm5, %v5908_v4  ;;  %v5951_v2 = vpack.c.bf16 %v4770_v14, %v4770_v14 }
 0xc72   :  { %7748 = vmatmul.msk.bf16.vlgmr.msra.gmra.mxu0 %vm2231_vm5, %v5910_v1  ;;  %6155 = vmatpush.bf16.msrb.mxu2 %v6146_v60  ;;  %v4776_v44 = vsel %vm139_vm1, 0.0, %v4775_v58 }
 0xc73   :  { %6193 = vmatpush.bf16.msra.mxu0 %v6184_v3  ;;  %v5952_v3 = vpack.c.bf16 %v4776_v44, %v4776_v44 }
 0xc75   :  { %v8217_v32 = vpop.eup %8216  ;;  %v5764_v49 = vpop.xlane.xlu1 %5763  ;;  %5826 = vadd.xlane.f32.xlu1 %v5825_v59 }
 0xc76   :  { %v5761_v7 = vpop.xlane.xlu0 %5760  ;;  %v5877_v10 = vmul.f32 %v8217_v32, %v10309_v5  ;;  %8220 = vrcp.f32 %v5764_v49  ;;  %v8219_v20 = vpop.eup %8218  ;;  %v4778_v5 = vsel %vm139_vm1, 0.0, %v4777_v37 }
 0xc77   :  { %8222 = vrcp.f32 %v5761_v7  ;;  %v5882_v27 = vmul.f32 %v8219_v20, %v10315_v42  ;;  %v5776_v59 = vpop.xlane.xlu2 %5775  ;;  %v5954_v49 = vpack.c.bf16 %v4778_v5, %v4778_v5  ;;  %v6203_v42 = vsel %vm2235_vm4, %v5951_v2, 0 }
 0xc78   :  { %v5909_v6 = vpack.c.bf16 %v5877_v10, %v5877_v10 }
 0xc79   :  { %v5914_v7 = vpack.c.bf16 %v5882_v27, %v5882_v27 }
 0xc7a   :  { %7747 = vmatmul.msk.bf16.vlgmr.msrb.gmra.mxu3 %vm2231_vm5, %v5909_v6  ;;  %v5953_v6 = vpack.c.bf16 %v4774_v39, %v4774_v39 }
 0xc7b   :  { %6174 = vmatpush.bf16.msrb.mxu3 %v6165_v15 }
 0xc7c   :  { %v8221_v48 = vpop.eup %8220 }
 0xc7d   :  { %v8223_v4 = vpop.eup %8222  ;;  %v5880_v54 = vmul.f32 %v8221_v48, %v10327_v0  ;;  %v5773_v60 = vpop.xlane.xlu1 %5772  ;;  %v6260_v0 = vsel %vm2235_vm4, %v5954_v49, 0 }
 0xc7e   :  { %v5767_v1 = vpop.xlane.xlu0 %5766  ;;  %v5879_v52 = vmul.f32 %v8223_v4, %v10323_v51  ;;  %v6222_v51 = vsel %vm2235_vm4, %v5952_v3, 0  ;;  %v6241_v4 = vsel %vm2235_vm4, %v5953_v6, 0 }
 0xc7f   :  { %v5912_v32 = vpack.c.bf16 %v5880_v54, %v5880_v54  ;;  %8224 = vrcp.f32 %v5767_v1 }
 0xc80   :  { %v5911_v10 = vpack.c.bf16 %v5879_v52, %v5879_v52  ;;  %8226 = vrcp.f32 %v5782_v21 }
 0xc81   :  { %7750 = vmatmul.msk.bf16.vlgmr.msra.gmra.mxu2 %vm2231_vm5, %v5912_v32  ;;  %8228 = vrcp.f32 %v5776_v59 }
 0xc82   :  { %7749 = vmatmul.msk.bf16.vlgmr.msra.gmra.mxu1 %vm2231_vm5, %v5911_v10  ;;  %7752 = vmatmul.msk.bf16.vlgmr.msrb.gmra.mxu0 %vm2231_vm5, %v5914_v7  ;;  %8230 = vrcp.f32 %v5773_v60 }
 0xc83   :  { %6212 = vmatpush.bf16.msra.mxu1 %v6203_v42  ;;  %6231 = vmatpush.bf16.msra.mxu2 %v6222_v51 }
 0xc84   :  { %6269 = vmatpush.bf16.msrb.mxu0 %v6260_v0 }
 0xc85   :  { %v8225_v14 = vpop.eup %8224  ;;  %v5779_v44 = vpop.xlane.xlu1 %5778 }
 0xc86   :  { %v5638_v36 = vpop.xlane.xlu0 %5637  ;;  %v5881_v21 = vmul.f32 %v8225_v14, %v10338_v45  ;;  %v8227_v37 = vpop.eup %8226 }
 0xc87   :  { %v5678_v58 = vsub.f32 %v10264_v23, %v5638_v36  ;;  %v8229_v20 = vpop.eup %8228  ;;  %v5886_v45 = vmul.f32 %v8227_v37, %v10307_v47 }
 0xc88   :  { %v5913_v15 = vpack.c.bf16 %v5881_v21, %v5881_v21  ;;  %v8231_v27 = vpop.eup %8230  ;;  %v5884_v54 = vmul.f32 %v8229_v20, %v10325_v61 }
 0xc89   :  { %v5737_v48 = vmul.f32 1.442695, %v5678_v58  ;;  %v5788_v5 = vpop.xlane.xlu2 %5787  ;;  %v5883_v23 = vmul.f32 %v8231_v27, %v10340_v38  ;;  %v5918_v60 = vpack.c.bf16 %v5886_v45, %v5886_v45 }
 0xc8a   :  { %7751 = vmatmul.msk.bf16.vlgmr.msra.gmra.mxu3 %vm2231_vm5, %v5913_v15  ;;  %v5916_v1 = vpack.c.bf16 %v5884_v54, %v5884_v54 }
 0xc8b   :  { %8232 = vpow2.f32 %v5737_v48  ;;  %6250 = vmatpush.bf16.msra.mxu3 %v6241_v4  ;;  %v5915_v2 = vpack.c.bf16 %v5883_v23, %v5883_v23 }
 0xc8c   :  { %8234 = vrcp.f32 %v5779_v44 }
 0xc8d   :  { %8236 = vrcp.f32 %v5788_v5 }
 0xc8e   :  { %v5791_v39 = vpop.xlane.xlu0 %5790 }
 0xc8f   :  { %8238 = vrcp.f32 %v5791_v39 }
 0xc91   :  { %v10494_v52 = vpop.eup %8232  ;;  %7754 = vmatmul.msk.bf16.vlgmr.msrb.gmra.mxu2 %vm2231_vm5, %v5916_v1  ;;  %v8001_v61 = vpop.permute.xlu2 %8000 }
 0xc92   :  { %v8235_v3 = vpop.eup %8234  ;;  %v5828_v59 = vsel %vm1814_vm3, %v10494_v52, 0.0  ;;  %7753 = vmatmul.msk.bf16.vlgmr.msrb.gmra.mxu1 %vm2231_vm5, %v5915_v2  ;;  %7756 = vmatmul.msk.bf16.vlgmr.msra.gmra.mxu0 %vm2231_vm5, %v5918_v60  ;;  %v8002_v38 = vunpack.i.l.bf16 %v8001_v61  ;;  %v8003_v0 = vunpack.i.h.bf16 %v8001_v61 }
 0xc93   :  { %5829 = vadd.xlane.f32.xlu0 %v5828_v59  ;;  %v5885_v47 = vmul.f32 %v8235_v3, %v10348_v33  ;;  %v8237_v7 = vpop.eup %8236 }
 0xc94   :  { %v4627_v42 = vrot.slane %v8002_v38, 4  ;;  %v5888_v14 = vmul.f32 %v8237_v7, %v10354_v34  ;;  %v4629_v33 = vrot.slane %v8003_v0, 4 }
 0xc95   :  { %v5917_v10 = vpack.c.bf16 %v5885_v47, %v5885_v47 }
 0xc96   :  { %v5629_v32 = vpop.xlane.xlu0 %5628  ;;  %v4628_v36 = vsel %vm139_vm1, %v4627_v42, %v8003_v0  ;;  %v5920_v20 = vpack.c.bf16 %v5888_v14, %v5888_v14  ;;  %v4630_v5 = vsel %vm139_vm1, %v8002_v38, %v4629_v33 }
 0xc97   :  { %v5675_v49 = vsub.f32 %v10262_v31, %v5629_v32  ;;  %v8239_v31 = vpop.eup %8238  ;;  %v4634_v15 = vperm.slane %v4628_v36, %v8477_v43  ;;  %v4638_v2 = vperm.slane %v4630_v5, %v8477_v43 }
 0xc98   :  { %v5889_v23 = vmul.f32 %v8239_v31, %v10356_v18 }
 0xc99   :  { %v5731_v51 = vmul.f32 1.442695, %v5675_v49  ;;  %v4653_v45 = vrot.slane %v4634_v15, 4 }
 0xc9a   :  { %7755 = vmatmul.msk.bf16.vlgmr.msrb.gmra.mxu3 %vm2231_vm5, %v5917_v10  ;;  %v5921_v7 = vpack.c.bf16 %v5889_v23, %v5889_v23 }
 0xc9b   :  { %8240 = vpow2.f32 %v5731_v51 }
 0xc9d   :  { %v7996_v21 = vpop.permute.xlu1 %7995 }
 0xc9e   :  { %v5785_v58 = vpop.xlane.xlu0 %5784  ;;  %v7998_v6 = vunpack.i.h.bf16 %v7996_v21  ;;  %v7997_v37 = vunpack.i.l.bf16 %v7996_v21 }
 0xc9f   :  { %8242 = vrcp.f32 %v5785_v58 }
 0xca0   :  { %v4641_v48 = vrot.slane %v7998_v6, 4  ;;  %v4639_v27 = vrot.slane %v7997_v37, 4 }
 0xca1   :  { %v10507_v44 = vpop.eup %8240  ;;  %7758 = vmatmul.msk.bf16.vlgmr.msra.gmra.mxu2 %vm2231_vm5, %v5920_v20 }
 0xca2   :  { %v5819_v34 = vsel %vm1814_vm3, %v10507_v44, 0.0  ;;  %v4640_v4 = vsel %vm139_vm1, %v4639_v27, %v7998_v6  ;;  %v4642_v54 = vsel %vm139_vm1, %v7997_v37, %v4641_v48 }
 0xca3   :  { %5820 = vadd.xlane.f32.xlu2 %v5819_v34  ;;  %v4646_v39 = vperm.slane %v4640_v4, %v8477_v43  ;;  %v4650_v1 = vperm.slane %v4642_v54, %v8477_v43 }
 0xca5   :  { %v8243_v60 = vpop.eup %8242  ;;  %v4651_v3 = vrot.slane %v4646_v39, 4  ;;  %v4654_v59 = vsel %vm139_vm1, %v4646_v39, %v4653_v45  ;;  %v4663_v61 = vrot.slane %v4650_v1, 4 }
 0xca6   :  { %v5644_v47 = vpop.xlane.xlu0 %5643  ;;  %v4662_v38 = vperm.slane %v4654_v59, %v8482_v56  ;;  %v5887_v32 = vmul.f32 %v8243_v60, %v10366_v13 }
 0xca7   :  { %v5680_v49 = vsub.f32 %v10299_v53, %v5644_v47  ;;  %v4652_v18 = vsel %vm139_vm1, %v4651_v3, %v4634_v15  ;;  %v4664_v10 = vsel %vm139_vm1, %v4663_v61, %v4638_v2  ;;  %v4665_v15 = vrot.slane %v4638_v2, 4 }
 0xca8   :  { %v4658_v42 = vperm.slane %v4652_v18, %v8482_v56  ;;  %v4670_v51 = vperm.slane %v4664_v10, %v8482_v56  ;;  %v4808_v0 = vperm.slane %v4662_v38, %v8477_v43  ;;  %v4809_v14 = vrot.slane %v4662_v38, 4 }
 0xca9   :  { %v5919_v36 = vpack.c.bf16 %v5887_v32, %v5887_v32  ;;  %v5741_v21 = vmul.f32 1.442695, %v5680_v49  ;;  %v4666_v38 = vsel %vm139_vm1, %v4650_v1, %v4665_v15 }
 0xcaa   :  { %7759 = vmatmul.msk.bf16.vlgmr.msra.gmra.mxu3 %vm2231_vm5, %v5921_v7  ;;  %v4782_v13 = vperm.slane %v4658_v42, %v8477_v43  ;;  %v4783_v58 = vrot.slane %v4658_v42, 4  ;;  %v4810_v53 = vsel %vm139_vm1, 0.0, %v4809_v14  ;;  %v4817_v33 = vrot.slane %v4808_v0, 4 }
 0xcab   :  { %8244 = vpow2.f32 %v5741_v21  ;;  %7757 = vmatmul.msk.bf16.vlgmr.msra.gmra.mxu1 %vm2231_vm5, %v5919_v36  ;;  %v4814_v6 = vperm.slane %v4810_v53, %v8477_v43  ;;  %v4835_v20 = vrot.slane %v4670_v51, 4  ;;  %v4834_v45 = vperm.slane %v4670_v51, %v8477_v43 }
 0xcac   :  { %v4784_v37 = vsel %vm139_vm1, 0.0, %v4783_v58  ;;  %v4791_v31 = vrot.slane %v4782_v13, 4  ;;  %v4674_v36 = vperm.slane %v4666_v38, %v8482_v56 }
 0xcad   :  { %v4788_v27 = vperm.slane %v4784_v37, %v8477_v43  ;;  %v4818_v34 = vsel %vm139_vm1, %v4814_v6, %v4817_v33  ;;  %v4815_v5 = vrot.slane %v4814_v6, 4  ;;  %v4836_v23 = vsel %vm139_vm1, 0.0, %v4835_v20 }
 0xcae   :  { %v5650_v48 = vpop.xlane.xlu0 %5649  ;;  %v10538_v54 = vperm.slane %v4818_v34, %v8482_v56  ;;  %v4840_v3 = vperm.slane %v4836_v23, %v8477_v43  ;;  %v4843_v10 = vrot.slane %v4834_v45, 4 }
 0xcaf   :  { %v5682_v4 = vsub.f32 %v10282_v41, %v5650_v48  ;;  %v4792_v39 = vsel %vm139_vm1, %v4788_v27, %v4791_v31  ;;  %v4789_v60 = vrot.slane %v4788_v27, 4  ;;  %v4816_v2 = vsel %vm139_vm1, %v4815_v5, %v4808_v0 }
 0xcb0   :  { %v4800_v61 = vperm.slane %v4792_v39, %v8482_v56  ;;  %v4822_v47 = vperm.slane %v4816_v2, %v8482_v56  ;;  %v5961_v32 = vpack.c.bf16 %v10538_v54, %v10538_v54  ;;  %v4841_v14 = vrot.slane %v4840_v3, 4 }
 0xcb1   :  { %v5745_v59 = vmul.f32 1.442695, %v5682_v4  ;;  %v10547_v41 = vpop.eup %8244  ;;  %v4790_v49 = vsel %vm139_vm1, %v4789_v60, %v4782_v13  ;;  %v4844_v20 = vsel %vm139_vm1, %v4840_v3, %v4843_v10  ;;  %v4861_v4 = vrot.slane %v4674_v36, 4 }
 0xcb2   :  { %v5834_v7 = vsel %vm1814_vm3, %v10547_v41, 0.0  ;;  %v5957_v18 = vpack.c.bf16 %v4800_v61, %v4800_v61  ;;  %v4796_v42 = vperm.slane %v4790_v49, %v8482_v56  ;;  %v4803_v51 = vrot.slane %v4800_v61, 4 }
 0xcb3   :  { %8246 = vpow2.f32 %v5745_v59  ;;  %5835 = vadd.xlane.f32.xlu1 %v5834_v7  ;;  %v4827_v0 = vrot.slane %v4822_v47, 4  ;;  %v5959_v21 = vpack.c.bf16 %v4822_v47, %v4822_v47  ;;  %v6393_v13 = vsel %vm2235_vm4, %v5961_v32, 0 }
 0xcb4   :  { %v6317_v1 = vsel %vm2235_vm4, %v5957_v18, 0  ;;  %v5955_v53 = vpack.c.bf16 %v4796_v42, %v4796_v42  ;;  %v4804_v33 = vsel %vm139_vm1, 0.0, %v4803_v51  ;;  %v4801_v6 = vrot.slane %v4796_v42, 4 }
 0xcb5   :  { %6326 = vmatpush.bf16.msrb.mxu3 %v6317_v1  ;;  %v5958_v37 = vpack.c.bf16 %v4804_v33, %v4804_v33  ;;  %v4828_v31 = vsel %vm139_vm1, 0.0, %v4827_v0  ;;  %v4842_v34 = vsel %vm139_vm1, %v4841_v14, %v4834_v45  ;;  %v6355_v39 = vsel %vm2235_vm4, %v5959_v21, 0 }
 0xcb6   :  { %v5803_v58 = vpop.xlane.xlu0 %5802  ;;  %v6279_v15 = vsel %vm2235_vm4, %v5955_v53, 0  ;;  %v4802_v48 = vsel %vm139_vm1, 0.0, %v4801_v6  ;;  %v5960_v27 = vpack.c.bf16 %v4828_v31, %v4828_v31  ;;  %v10572_v3 = vperm.slane %v4844_v20, %v8482_v56 }
 0xcb7   :  { %8248 = vrcp.f32 %v5803_v58  ;;  %6288 = vmatpush.bf16.msrb.mxu1 %v6279_v15  ;;  %v6336_v23 = vsel %vm2235_vm4, %v5958_v37, 0  ;;  %v5956_v60 = vpack.c.bf16 %v4802_v48, %v4802_v48  ;;  %v10576_v45 = vperm.slane %v4842_v34, %v8482_v56 }
 0xcb8   :  { %6345 = vmatpush.bf16.msra.mxu0 %v6336_v23  ;;  %v6374_v61 = vsel %vm2235_vm4, %v5960_v27, 0  ;;  %v4862_v38 = vsel %vm139_vm1, 0.0, %v4861_v4  ;;  %v5965_v7 = vpack.c.bf16 %v10572_v3, %v10572_v3  ;;  %v4829_v31 = vrot.slane %v10538_v54, 4 }
 0xcb9   :  { %6402 = vmatpush.bf16.msra.mxu3 %v6393_v13  ;;  %v10565_v5 = vpop.eup %8246  ;;  %v6298_v59 = vsel %vm2235_vm4, %v5956_v60, 0  ;;  %v4853_v18 = vrot.slane %v10576_v45, 4  ;;  %v4866_v42 = vperm.slane %v4862_v38, %v8477_v43 }
 0xcba   :  { %v5840_v2 = vsel %vm1814_vm3, %v10565_v5, 0.0  ;;  %6307 = vmatpush.bf16.msrb.mxu2 %v6298_v59  ;;  %v6469_v51 = vsel %vm2235_vm4, %v5965_v7, 0  ;;  %v4830_v48 = vsel %vm139_vm1, 0.0, %v4829_v31 }
 0xcbb   :  { %6364 = vmatpush.bf16.msra.mxu1 %v6355_v39  ;;  %5841 = vadd.xlane.f32.xlu2 %v5840_v2  ;;  %v4854_v0 = vsel %vm139_vm1, 0.0, %v4853_v18  ;;  %v4867_v14 = vrot.slane %v4866_v42, 4  ;;  %v5962_v54 = vpack.c.bf16 %v4830_v48, %v4830_v48 }
 0xcbc   :  { %v5964_v13 = vpack.c.bf16 %v4854_v0, %v4854_v0 }
 0xcbd   :  { %v8249_v47 = vpop.eup %8248 }
 0xcbe   :  { %6383 = vmatpush.bf16.msra.mxu2 %v6374_v61  ;;  %v5893_v32 = vmul.f32 %v8249_v47, %v10381_v19  ;;  %v5800_v49 = vpop.xlane.xlu0 %5799  ;;  %v4860_v19 = vperm.slane %v4674_v36, %v8477_v43  ;;  %v6450_v37 = vsel %vm2235_vm4, %v5964_v13, 0 }
 0xcbf   :  { %8250 = vrcp.f32 %v5800_v49 }
 0xcc0   :  { %v5925_v10 = vpack.c.bf16 %v5893_v32, %v5893_v32  ;;  %v4868_v33 = vsel %vm139_vm1, %v4867_v14, %v4860_v19  ;;  %v4869_v60 = vrot.slane %v4860_v19, 4  ;;  %v6412_v32 = vsel %vm2235_vm4, %v5962_v54, 0 }
 0xcc1   :  { %v10595_v20 = vperm.slane %v4868_v33, %v8482_v56 }
 0xcc2   :  { %7763 = vmatmul.msk.bf16.vlgmr.msrb.gmra.mxu3 %vm2231_vm5, %v5925_v10  ;;  %v4870_v49 = vsel %vm139_vm1, %v4866_v42, %v4869_v60 }
 0xcc3   :  { %6478 = vmatpush.bf16.msrb.mxu3 %v6469_v51  ;;  %v4879_v34 = vrot.slane %v10595_v20, 4  ;;  %v4878_v51 = vperm.slane %v4870_v49, %v8482_v56 }
 0xcc5   :  { %v8251_v1 = vpop.eup %8250  ;;  %v4880_v61 = vsel %vm139_vm1, 0.0, %v4879_v34  ;;  %v5969_v13 = vpack.c.bf16 %v4878_v51, %v4878_v51 }
 0xcc6   :  { %v5892_v21 = vmul.f32 %v8251_v1, %v10388_v8  ;;  %v5806_v58 = vpop.xlane.xlu0 %5805  ;;  %v5968_v7 = vpack.c.bf16 %v4880_v61, %v4880_v61 }
 0xcc8   :  { %v5924_v53 = vpack.c.bf16 %v5892_v21, %v5892_v21  ;;  %v5794_v6 = vpop.xlane.xlu1 %5793  ;;  %v6526_v42 = vsel %vm2235_vm4, %v5968_v7, 0 }
 0xcc9   :  { %8252 = vrcp.f32 %v5794_v6 }
 0xcca   :  { %7762 = vmatmul.msk.bf16.vlgmr.msrb.gmra.mxu2 %vm2231_vm5, %v5924_v53  ;;  %v5647_v36 = vpop.xlane.xlu2 %5646 }
 0xccb   :  { %6459 = vmatpush.bf16.msrb.mxu2 %v6450_v37  ;;  %v5681_v8 = vsub.f32 %v10285_v16, %v5647_v36 }
 0xccd   :  { %v5743_v27 = vmul.f32 1.442695, %v5681_v8  ;;  %v5963_v8 = vpack.c.bf16 %v10576_v45, %v10576_v45 }
 0xcce   :  { %v5812_v15 = vpop.xlane.xlu0 %5811 }
 0xccf   :  { %8254 = vrcp.f32 %v5812_v15  ;;  %v8253_v4 = vpop.eup %8252 }
 0xcd0   :  { %8256 = vpow2.f32 %v5743_v27  ;;  %v5890_v23 = vmul.f32 %v8253_v4, %v10399_v25  ;;  %v5641_v39 = vpop.xlane.xlu1 %5640 }
 0xcd1   :  { %v5679_v2 = vsub.f32 %v10280_v63, %v5641_v39  ;;  %8258 = vrcp.f32 %v5806_v58 }
 0xcd2   :  { %v5922_v59 = vpack.c.bf16 %v5890_v23, %v5890_v23  ;;  %v5815_v16 = vpop.xlane.xlu2 %5814 }
 0xcd3   :  { %v5739_v47 = vmul.f32 1.442695, %v5679_v2  ;;  %8260 = vrcp.f32 %v5815_v16 }
 0xcd4   :  { %7760 = vmatmul.msk.bf16.vlgmr.msrb.gmra.mxu0 %vm2231_vm5, %v5922_v59 }
 0xcd5   :  { %v8255_v38 = vpop.eup %8254  ;;  %8262 = vpow2.f32 %v5739_v47  ;;  %6421 = vmatpush.bf16.msrb.mxu0 %v6412_v32 }
 0xcd6   :  { %v5896_v25 = vmul.f32 %v8255_v38, %v10407_v40  ;;  %v10607_v63 = vpop.eup %8256  ;;  %v4855_v40 = vrot.slane %v10572_v3, 4  ;;  %v6545_v3 = vsel %vm2235_vm4, %v5969_v13, 0  ;;  %v5809_v48 = vpop.xlane.xlu0 %5808 }
 0xcd7   :  { %v5837_v10 = vsel %vm1814_vm3, %v10607_v63, 0.0  ;;  %v8259_v14 = vpop.eup %8258 }
 0xcd8   :  { %v5928_v18 = vpack.c.bf16 %v5896_v25, %v5896_v25  ;;  %5838 = vadd.xlane.f32.xlu0 %v5837_v10  ;;  %v5797_v0 = vpop.xlane.xlu1 %5796  ;;  %v4856_v6 = vsel %vm139_vm1, 0.0, %v4855_v40  ;;  %v5894_v37 = vmul.f32 %v8259_v14, %v10395_v62  ;;  %v6431_v62 = vsel %vm2235_vm4, %v5963_v8, 0 }
 0xcd9   :  { %8264 = vrcp.f32 %v5797_v0  ;;  %v8261_v1 = vpop.eup %8260  ;;  %v5966_v15 = vpack.c.bf16 %v4856_v6, %v4856_v6  ;;  %v5967_v25 = vpack.c.bf16 %v10595_v20, %v10595_v20 }
 0xcda   :  { %7766 = vmatmul.msk.bf16.vlgmr.msra.gmra.mxu2 %vm2231_vm5, %v5928_v18  ;;  %v5897_v21 = vmul.f32 %v8261_v1, %v10417_v24  ;;  %v5824_v58 = vpop.xlane.xlu2 %5823  ;;  %v5926_v34 = vpack.c.bf16 %v5894_v37, %v5894_v37 }
 0xcdb   :  { %6535 = vmatpush.bf16.msra.mxu2 %v6526_v42  ;;  %v10615_v19 = vpop.eup %8262  ;;  %8266 = vrcp.f32 %v5824_v58 }
 0xcdc   :  { %v5831_v53 = vsel %vm1814_vm3, %v10615_v19, 0.0  ;;  %v5929_v33 = vpack.c.bf16 %v5897_v21, %v5897_v21  ;;  %8268 = vrcp.f32 %v5809_v48 }
 0xcdd   :  { %5832 = vadd.xlane.f32.xlu1 %v5831_v53 }
 0xcde   :  { %7767 = vmatmul.msk.bf16.vlgmr.msra.gmra.mxu3 %vm2231_vm5, %v5929_v33 }
 0xcdf   :  { %v8265_v31 = vpop.eup %8264  ;;  %6554 = vmatpush.bf16.msra.mxu3 %v6545_v3 }
 0xce0   :  { %v5891_v36 = vmul.f32 %v8265_v31, %v10429_v46  ;;  %v5818_v24 = vpop.xlane.xlu1 %5817  ;;  %v6488_v46 = vsel %vm2235_vm4, %v5966_v15, 0 }
 0xce1   :  { %v8267_v27 = vpop.eup %8266  ;;  %8270 = vrcp.f32 %v5818_v24 }
 0xce2   :  { %v5923_v4 = vpack.c.bf16 %v5891_v36, %v5891_v36  ;;  %v5900_v23 = vmul.f32 %v8267_v27, %v10437_v55  ;;  %v8269_v60 = vpop.eup %8268  ;;  %v4881_v55 = vrot.slane %v4878_v51, 4 }
 0xce3   :  { %v5895_v59 = vmul.f32 %v8269_v60, %v10423_v22  ;;  %v6507_v22 = vsel %vm2235_vm4, %v5967_v25, 0 }
 0xce4   :  { %7761 = vmatmul.msk.bf16.vlgmr.msrb.gmra.mxu1 %vm2231_vm5, %v5923_v4  ;;  %7764 = vmatmul.msk.bf16.vlgmr.msra.gmra.mxu0 %vm2231_vm5, %v5926_v34  ;;  %v5932_v39 = vpack.c.bf16 %v5900_v23, %v5900_v23  ;;  %v4882_v47 = vsel %vm139_vm1, 0.0, %v4881_v55 }
 0xce5   :  { %6440 = vmatpush.bf16.msrb.mxu1 %v6431_v62  ;;  %6497 = vmatpush.bf16.msra.mxu0 %v6488_v46  ;;  %v5970_v7 = vpack.c.bf16 %v4882_v47, %v4882_v47  ;;  %v5927_v18 = vpack.c.bf16 %v5895_v59, %v5895_v59 }
 0xce6   :  { %v5986_v45 = vpop.f32.mrf.mxu1 }
 0xce7   :  { %v8271_v2 = vpop.eup %8270 }
 0xce8   :  { %v5827_v54 = vpop.xlane.xlu1 %5826  ;;  %v5898_v61 = vmul.f32 %v8271_v2, %v10448_v11 }
 0xce9   :  { %8272 = vrcp.f32 %v5827_v54 }
 0xcea   :  { %7770 = vmatmul.msk.bf16.vlgmr.msrb.gmra.mxu2 %vm2231_vm5, %v5932_v39  ;;  %v5930_v10 = vpack.c.bf16 %v5898_v61, %v5898_v61 }
 0xcee   :  { %v5988_v16 = vpop.f32.mrf.mxu1 }
 0xcef   :  { %v8273_v38 = vpop.eup %8272  ;;  %v6043_v32 = vpop.f32.mrf.mxu0 }
 0xcf0   :  { %v5901_v49 = vmul.f32 %v8273_v38, %v10460_v35  ;;  %v6585_v51 = vrot.slane %v6043_v32, 4  ;;  %v6564_v35 = vsel %vm2235_vm4, %v5970_v7, 0 }
 0xcf2   :  { %v5933_v0 = vpack.c.bf16 %v5901_v49, %v5901_v49 }
 0xcf4   :  { %v6005_v14 = vpop.f32.mrf.mxu2  ;;  %7765 = vmatmul.msk.bf16.vlgmr.msra.gmra.mxu1 %vm2231_vm5, %v5927_v18  ;;  %7768 = vmatmul.msk.bf16.vlgmr.msrb.gmra.mxu0 %vm2231_vm5, %v5930_v10 }
 0xcf5   :  { %v6586_v11 = vsel %vm139_vm1, %v6585_v51, %v6005_v14  ;;  %7771 = vmatmul.msk.bf16.vlgmr.msrb.gmra.mxu3 %vm2231_vm5, %v5933_v0  ;;  %6516 = vmatpush.bf16.msra.mxu1 %v6507_v22 }
 0xcf6   :  { %6573 = vmatpush.bf16.msrb.mxu0 %v6564_v35  ;;  %v6590_v40 = vperm.slane %v6586_v11, %v8477_v43 }
 0xcf7   :  { %v6045_v20 = vpop.f32.mrf.mxu0 }
 0xcf8   :  { %v6591_v33 = vrot.slane %v6590_v40, 4 }
 0xcfc   :  { %v6007_v42 = vpop.f32.mrf.mxu2 }
 0xcfd   :  { %v6024_v1 = vpop.f32.mrf.mxu3 }
 0xcfe   :  { %v6579_v21 = vrot.slane %v6024_v1, 4 }
 0xcff   :  { %v6062_v58 = vpop.f32.mrf.mxu1  ;;  %v6119_v13 = vpop.f32.mrf.mxu0 }
 0xd00   :  { %v6580_v53 = vsel %vm139_vm1, %v6579_v21, %v5986_v45  ;;  %v6605_v31 = vrot.slane %v6119_v13, 4 }
 0xd01   :  { %v6584_v6 = vperm.slane %v6580_v53, %v8477_v43 }
 0xd03   :  { %v6592_v37 = vsel %vm139_vm1, %v6591_v33, %v6584_v6 }
 0xd04   :  { %v6081_v3 = vpop.f32.mrf.mxu2  ;;  %v6596_v59 = vperm.slane %v6592_v37, %v8482_v56 }
 0xd05   :  { %v6026_v36 = vpop.f32.mrf.mxu3  ;;  %v6606_v24 = vsel %vm139_vm1, %v6605_v31, %v6081_v3 }
 0xd06   :  { %v5830_v8 = vpop.xlane.xlu0 %5829  ;;  %v6610_v4 = vperm.slane %v6606_v24, %v8477_v43  ;;  %v6597_v25 = vrot.slane %v6596_v59, 4 }
 0xd07   :  { %8274 = vrcp.f32 %v5830_v8  ;;  %v6064_v15 = vpop.f32.mrf.mxu1  ;;  %v6121_v48 = vpop.f32.mrf.mxu0 }
 0xd08   :  { %v6611_v55 = vrot.slane %v6610_v4, 4  ;;  %v6598_v11 = vsel %vm139_vm1, 0.0, %v6597_v25 }
 0xd0c   :  { %v6083_v27 = vpop.f32.mrf.mxu2 }
 0xd0d   :  { %v8275_v34 = vpop.eup %8274  ;;  %v6100_v23 = vpop.f32.mrf.mxu3 }
 0xd0e   :  { %v5902_v62 = vmul.f32 %v8275_v34, %v10494_v52  ;;  %v6599_v46 = vrot.slane %v6100_v23, 4 }
 0xd0f   :  { %v6138_v45 = vpop.f32.mrf.mxu1  ;;  %v6195_v39 = vpop.f32.mrf.mxu0 }
 0xd10   :  { %v5934_v54 = vpack.c.bf16 %v5902_v62, %v5902_v62  ;;  %v6600_v60 = vsel %vm139_vm1, %v6599_v46, %v6062_v58  ;;  %v6625_v16 = vrot.slane %v6195_v39, 4 }
 0xd11   :  { %v6604_v2 = vperm.slane %v6600_v60, %v8477_v43 }
 0xd12   :  { %7772 = vmatmul.msk.bf16.vlgmr.msra.gmra.mxu0 %vm2231_vm5, %v5934_v54 }
 0xd13   :  { %v6612_v61 = vsel %vm139_vm1, %v6611_v55, %v6604_v2 }
 0xd14   :  { %v6616_v47 = vperm.slane %v6612_v61, %v8482_v56  ;;  %v6157_v38 = vpop.f32.mrf.mxu2 }
 0xd15   :  { %v6102_v52 = vpop.f32.mrf.mxu3  ;;  %v6626_v32 = vsel %vm139_vm1, %v6625_v16, %v6157_v38 }
 0xd16   :  { %v5821_v49 = vpop.xlane.xlu2 %5820  ;;  %v6617_v7 = vrot.slane %v6616_v47, 4  ;;  %v6630_v21 = vperm.slane %v6626_v32, %v8477_v43 }
 0xd17   :  { %8276 = vrcp.f32 %v5821_v49  ;;  %v6140_v18 = vpop.f32.mrf.mxu1  ;;  %v6197_v10 = vpop.f32.mrf.mxu0 }
 0xd18   :  { %v6618_v0 = vsel %vm139_vm1, 0.0, %v6617_v7  ;;  %v6739_v51 = vsel %vm139_vm1, %v6617_v7, %v6596_v59  ;;  %v6631_v36 = vrot.slane %v6630_v21, 4 }
 0xd19   :  { %v6743_v14 = vperm.slane %v6739_v51, %v8477_v43  ;;  %v6744_v22 = vrot.slane %v6618_v0, 4 }
 0xd1b   :  { %v6745_v35 = vsel %vm139_vm1, %v6744_v22, %v6598_v11  ;;  %v6763_v20 = vrot.slane %v6743_v14, 4 }
 0xd1c   :  { %v6749_v40 = vperm.slane %v6745_v35, %v8477_v43  ;;  %v6159_v1 = vpop.f32.mrf.mxu2 }
 0xd1d   :  { %v8277_v42 = vpop.eup %8276  ;;  %v6176_v13 = vpop.f32.mrf.mxu3 }
 0xd1e   :  { %v5899_v58 = vmul.f32 %v8277_v42, %v10507_v44  ;;  %v6619_v53 = vrot.slane %v6176_v13, 4  ;;  %v10668_v33 = vsel %vm139_vm1, %v6749_v40, %v6763_v20  ;;  %v6761_v6 = vrot.slane %v6749_v40, 4 }
 0xd20   :  { %v5931_v37 = vpack.c.bf16 %v5899_v58, %v5899_v58  ;;  %v6620_v31 = vsel %vm139_vm1, %v6619_v53, %v6138_v45  ;;  %v10672_v3 = vsel %vm139_vm1, %v6761_v6, %v6743_v14 }
 0xd21   :  { %v6624_v24 = vperm.slane %v6620_v31, %v8477_v43 }
 0xd22   :  { %7769 = vmatmul.msk.bf16.vlgmr.msrb.gmra.mxu1 %vm2231_vm5, %v5931_v37 }
 0xd23   :  { %v6632_v8 = vsel %vm139_vm1, %v6631_v36, %v6624_v24 }
 0xd24   :  { %v6233_v44 = vpop.f32.mrf.mxu2  ;;  %v6636_v11 = vperm.slane %v6632_v8, %v8482_v56 }
 0xd25   :  { %v6178_v15 = vpop.f32.mrf.mxu3 }
 0xd26   :  { %v5836_v48 = vpop.xlane.xlu1 %5835  ;;  %v6637_v1 = vrot.slane %v6636_v11, 4 }
 0xd27   :  { %8278 = vrcp.f32 %v5836_v48 }
 0xd28   :  { %v6214_v27 = vpop.f32.mrf.mxu1 }
 0xd2c   :  { %v6235_v34 = vpop.f32.mrf.mxu2 }
 0xd2d   :  { %v8279_v4 = vpop.eup %8278  ;;  %v6252_v23 = vpop.f32.mrf.mxu3 }
 0xd2e   :  { %v5842_v62 = vpop.xlane.xlu2 %5841  ;;  %v5904_v46 = vmul.f32 %v8279_v4, %v10547_v41  ;;  %v6639_v45 = vrot.slane %v6252_v23, 4 }
 0xd2f   :  { %8280 = vrcp.f32 %v5842_v62 }
 0xd30   :  { %v5936_v39 = vpack.c.bf16 %v5904_v46, %v5904_v46  ;;  %v6640_v54 = vsel %vm139_vm1, %v6639_v45, %v6214_v27  ;;  %v6216_v60 = vpop.f32.mrf.mxu1 }
 0xd31   :  { %v6644_v14 = vperm.slane %v6640_v54, %v8477_v43 }
 0xd32   :  { %7774 = vmatmul.msk.bf16.vlgmr.msra.gmra.mxu2 %vm2231_vm5, %v5936_v39 }
 0xd35   :  { %v8281_v55 = vpop.eup %8280  ;;  %v6254_v59 = vpop.f32.mrf.mxu3 }
 0xd36   :  { %v5906_v2 = vmul.f32 %v8281_v55, %v10565_v5 }
 0xd38   :  { %v5938_v61 = vpack.c.bf16 %v5906_v2, %v5906_v2 }
 0xd3a   :  { %7776 = vmatmul.msk.bf16.vlgmr.msrb.gmra.mxu0 %vm2231_vm5, %v5938_v61 }
 0xd45   :  { %v6328_v16 = vpop.f32.mrf.mxu3 }
 0xd46   :  { %v6659_v31 = vrot.slane %v6328_v16, 4 }
 0xd4b   :  { %v5839_v47 = vpop.xlane.xlu0 %5838 }
 0xd4c   :  { %8282 = vrcp.f32 %v5839_v47 }
 0xd4d   :  { %v6309_v38 = vpop.f32.mrf.mxu2  ;;  %v6330_v41 = vpop.f32.mrf.mxu3 }
 0xd50   :  { %v5833_v52 = vpop.xlane.xlu1 %5832 }
 0xd51   :  { %8284 = vrcp.f32 %v5833_v52  ;;  %v6271_v32 = vpop.f32.mrf.mxu0 }
 0xd52   :  { %v8283_v49 = vpop.eup %8282  ;;  %v6645_v25 = vrot.slane %v6271_v32, 4 }
 0xd53   :  { %v5905_v7 = vmul.f32 %v8283_v49, %v10607_v63 }
 0xd54   :  { %v6646_v18 = vsel %vm139_vm1, %v6645_v25, %v6233_v44  ;;  %v6772_v44 = vperm.slane %v10668_v33, %v8482_v56 }
 0xd55   :  { %v6311_v10 = vpop.f32.mrf.mxu2  ;;  %v5937_v5 = vpack.c.bf16 %v5905_v7, %v5905_v7  ;;  %v6650_v0 = vperm.slane %v6646_v18, %v8477_v43 }
 0xd56   :  { %v6791_v60 = vrot.slane %v6772_v44, 4 }
 0xd57   :  { %v8285_v51 = vpop.eup %8284  ;;  %v6651_v22 = vrot.slane %v6650_v0, 4  ;;  %7775 = vmatmul.msk.bf16.vlgmr.msra.gmra.mxu3 %vm2231_vm5, %v5937_v5 }
 0xd58   :  { %v5903_v35 = vmul.f32 %v8285_v51, %v10615_v19  ;;  %v6638_v19 = vsel %vm139_vm1, 0.0, %v6637_v1 }
 0xd59   :  { %v6652_v20 = vsel %vm139_vm1, %v6651_v22, %v6644_v14  ;;  %v6273_v42 = vpop.f32.mrf.mxu0 }
 0xd5a   :  { %v5935_v63 = vpack.c.bf16 %v5903_v35, %v5903_v35  ;;  %v6656_v40 = vperm.slane %v6652_v20, %v8482_v56 }
 0xd5c   :  { %v6657_v21 = vrot.slane %v6656_v40, 4  ;;  %7773 = vmatmul.msk.bf16.vlgmr.msra.gmra.mxu1 %vm2231_vm5, %v5935_v63 }
 0xd5d   :  { %v6385_v58 = vpop.f32.mrf.mxu2 }
 0xd5e   :  { %v6658_v13 = vsel %vm139_vm1, 0.0, %v6657_v21  ;;  %v6750_v53 = vsel %vm139_vm1, %v6657_v21, %v6636_v11 }
 0xd5f   :  { %v6754_v6 = vperm.slane %v6750_v53, %v8477_v43  ;;  %v6755_v37 = vrot.slane %v6658_v13, 4 }
 0xd61   :  { %v6756_v36 = vsel %vm139_vm1, %v6755_v37, %v6638_v19  ;;  %v6290_v24 = vpop.f32.mrf.mxu1  ;;  %v6347_v8 = vpop.f32.mrf.mxu0  ;;  %v6775_v15 = vrot.slane %v6754_v6, 4 }
 0xd62   :  { %v6404_v48 = vpop.f32.mrf.mxu3  ;;  %v6660_v27 = vsel %vm139_vm1, %v6659_v31, %v6290_v24  ;;  %v6665_v34 = vrot.slane %v6347_v8, 4  ;;  %v6760_v4 = vperm.slane %v6756_v36, %v8477_v43 }
 0xd63   :  { %v6664_v55 = vperm.slane %v6660_v27, %v8477_v43  ;;  %v6679_v49 = vrot.slane %v6404_v48, 4 }
 0xd64   :  { %v6666_v23 = vsel %vm139_vm1, %v6665_v34, %v6309_v38  ;;  %v6776_v46 = vsel %vm139_vm1, %v6760_v4, %v6775_v15  ;;  %v6773_v45 = vrot.slane %v6760_v4, 4 }
 0xd65   :  { %v6387_v62 = vpop.f32.mrf.mxu2  ;;  %v6670_v39 = vperm.slane %v6666_v23, %v8477_v43  ;;  %v6784_v54 = vperm.slane %v6776_v46, %v8482_v56 }
 0xd66   :  { %v10706_v33 = vsel %vm139_vm1, %v6773_v45, %v6754_v6 }
 0xd67   :  { %v6671_v2 = vrot.slane %v6670_v39, 4  ;;  %v10710_v59 = vsel %vm139_vm1, %v6784_v54, %v6791_v60  ;;  %v6789_v61 = vrot.slane %v6784_v54, 4 }
 0xd69   :  { %v6672_v16 = vsel %vm139_vm1, %v6671_v2, %v6664_v55  ;;  %v6292_v47 = vpop.f32.mrf.mxu1  ;;  %v6349_v38 = vpop.f32.mrf.mxu0  ;;  %v10714_v41 = vsel %vm139_vm1, %v6789_v61, %v6772_v44 }
 0xd6a   :  { %v6406_v52 = vpop.f32.mrf.mxu3  ;;  %v6676_v11 = vperm.slane %v6672_v16, %v8482_v56 }
 0xd6c   :  { %v6677_v1 = vrot.slane %v6676_v11, 4 }
 0xd6d   :  { %v6461_v32 = vpop.f32.mrf.mxu2 }
 0xd6e   :  { %v6678_v37 = vsel %vm139_vm1, 0.0, %v6677_v1 }
 0xd71   :  { %v6366_v25 = vpop.f32.mrf.mxu1  ;;  %v6423_v7 = vpop.f32.mrf.mxu0 }
 0xd72   :  { %v6680_v18 = vsel %vm139_vm1, %v6679_v49, %v6366_v25  ;;  %v6685_v10 = vrot.slane %v6423_v7, 4 }
 0xd73   :  { %v6684_v14 = vperm.slane %v6680_v18, %v8477_v43 }
 0xd74   :  { %v6686_v5 = vsel %vm139_vm1, %v6685_v10, %v6385_v58 }
 0xd75   :  { %v6463_v0 = vpop.f32.mrf.mxu2  ;;  %v6690_v51 = vperm.slane %v6686_v5, %v8477_v43 }
 0xd77   :  { %v6691_v22 = vrot.slane %v6690_v51, 4 }
 0xd78   :  { %v6480_v35 = vpop.f32.mrf.mxu3 }
 0xd79   :  { %v6692_v20 = vsel %vm139_vm1, %v6691_v22, %v6684_v14  ;;  %v6368_v42 = vpop.f32.mrf.mxu1  ;;  %v6425_v63 = vpop.f32.mrf.mxu0  ;;  %v6699_v62 = vrot.slane %v6480_v35, 4 }
 0xd7a   :  { %v6696_v40 = vperm.slane %v6692_v20, %v8482_v56 }
 0xd7c   :  { %v6697_v21 = vrot.slane %v6696_v40, 4 }
 0xd7e   :  { %v6698_v13 = vsel %vm139_vm1, 0.0, %v6697_v21  ;;  %v6793_v58 = vsel %vm139_vm1, %v6697_v21, %v6676_v11 }
 0xd7f   :  { %v6797_v53 = vperm.slane %v6793_v58, %v8477_v43  ;;  %v6798_v6 = vrot.slane %v6698_v13, 4 }
 0xd80   :  { %v6482_v19 = vpop.f32.mrf.mxu3 }
 0xd81   :  { %v6799_v31 = vsel %vm139_vm1, %v6798_v6, %v6678_v37  ;;  %v6817_v36 = vrot.slane %v6797_v53, 4  ;;  %v6768_v37 = vperm.slane %v10672_v3, %v8482_v56 }
 0xd82   :  { %v6803_v24 = vperm.slane %v6799_v31, %v8477_v43 }
 0xd84   :  { %v6818_v8 = vsel %vm139_vm1, %v6803_v24, %v6817_v36  ;;  %v6815_v44 = vrot.slane %v6803_v24, 4 }
 0xd86   :  { %v6816_v15 = vsel %vm139_vm1, %v6815_v44, %v6797_v53  ;;  %v6826_v53 = vperm.slane %v6818_v8, %v8482_v56 }
 0xd87   :  { %v6822_v19 = vperm.slane %v6816_v15, %v8482_v56 }
 0xd88   :  { %v6845_v44 = vrot.slane %v6826_v53, 4 }
 0xd89   :  { %v6841_v3 = vrot.slane %v6822_v19, 4 }
 0xd8f   :  { %v6499_v48 = vpop.f32.mrf.mxu0 }
 0xd90   :  { %v6705_v27 = vrot.slane %v6499_v48, 4  ;;  %v6780_v48 = vperm.slane %v10706_v33, %v8482_v56 }
 0xd92   :  { %v6706_v34 = vsel %vm139_vm1, %v6705_v27, %v6461_v32  ;;  %v6787_v27 = vrot.slane %v6768_v37, 4 }
 0xd93   :  { %v6710_v23 = vperm.slane %v6706_v34, %v8477_v43 }
 0xd95   :  { %v6711_v39 = vrot.slane %v6710_v23, 4 }
 0xd97   :  { %v6501_v4 = vpop.f32.mrf.mxu0 }
 0xd9f   :  { %v6442_v46 = vpop.f32.mrf.mxu1 }
 0xda0   :  { %v6700_v45 = vsel %vm139_vm1, %v6699_v62, %v6442_v46  ;;  %v6788_v62 = vsel %vm139_vm1, %v6780_v48, %v6787_v27 }
 0xda1   :  { %v6704_v54 = vperm.slane %v6700_v45, %v8477_v43 }
 0xda3   :  { %v6712_v60 = vsel %vm139_vm1, %v6711_v39, %v6704_v54  ;;  %v6785_v39 = vrot.slane %v6780_v48, 4 }
 0xda4   :  { %v6716_v0 = vperm.slane %v6712_v60, %v8482_v56 }
 0xda6   :  { %v6717_v35 = vrot.slane %v6716_v0, 4 }
 0xda7   :  { %v6444_v55 = vpop.f32.mrf.mxu1 }
 0xda8   :  { %v6718_v21 = vsel %vm139_vm1, 0.0, %v6717_v35 }
 0xdb5   :  { %v6537_v2 = vpop.f32.mrf.mxu2 }
 0xdb7   :  { %v6575_v61 = vpop.f32.mrf.mxu0 }
 0xdb8   :  { %v6725_v38 = vrot.slane %v6575_v61, 4 }
 0xdba   :  { %v6726_v52 = vsel %vm139_vm1, %v6725_v38, %v6537_v2  ;;  %v6786_v38 = vsel %vm139_vm1, %v6785_v39, %v6768_v37 }
 0xdbb   :  { %v6730_v49 = vperm.slane %v6726_v52, %v8477_v43 }
 0xdbd   :  { %v6539_v16 = vpop.f32.mrf.mxu2  ;;  %v6731_v10 = vrot.slane %v6730_v49, 4 }
 0xdbf   :  { %v6577_v47 = vpop.f32.mrf.mxu0 }
 0xdd9   :  { %v6518_v32 = vpop.f32.mrf.mxu1 }
 0xdda   :  { %v6556_v25 = vpop.f32.mrf.mxu3 }
 0xddb   :  { %v6719_v7 = vrot.slane %v6556_v25, 4 }
 0xddd   :  { %v6720_v18 = vsel %vm139_vm1, %v6719_v7, %v6518_v32 }
 0xdde   :  { %v6724_v5 = vperm.slane %v6720_v18, %v8477_v43 }
 0xde0   :  { %v6732_v51 = vsel %vm139_vm1, %v6731_v10, %v6724_v5 }
 0xde1   :  { %v6736_v14 = vperm.slane %v6732_v51, %v8482_v56  ;;  %v6520_v22 = vpop.f32.mrf.mxu1 }
 0xde2   :  { %v6558_v11 = vpop.f32.mrf.mxu3 }
 0xde3   :  { %v6737_v20 = vrot.slane %v6736_v14, 4  ;;  %v10786_v14 = vld [vmem:[%s10986_s5 + $0x10] sm:$0xff] }
 0xde4   :  { %v6878_v22 = vperm.slane %v10786_v14, 3 }
 0xde5   :  { %v6738_v42 = vsel %vm139_vm1, 0.0, %v6737_v20  ;;  %v6804_v63 = vsel %vm139_vm1, %v6737_v20, %v6716_v0 }
 0xde6   :  { %v6808_v40 = vperm.slane %v6804_v63, %v8477_v43  ;;  %v6809_v1 = vrot.slane %v6738_v42, 4 }
 0xde8   :  { %v6810_v13 = vsel %vm139_vm1, %v6809_v1, %v6718_v21  ;;  %v6829_v58 = vrot.slane %v6808_v40, 4 }
 0xde9   :  { %v6814_v6 = vperm.slane %v6810_v13, %v8477_v43 }
 0xdeb   :  { %v6830_v31 = vsel %vm139_vm1, %v6814_v6, %v6829_v58  ;;  %v6827_v36 = vrot.slane %v6814_v6, 4 }
 0xdec   :  { %v6838_v24 = vperm.slane %v6830_v31, %v8482_v56 }
 0xded   :  { %v6828_v34 = vsel %vm139_vm1, %v6827_v36, %v6808_v40 }
 0xdee   :  { %v6846_v8 = vsel %vm139_vm1, %v6838_v24, %v6845_v44  ;;  %v6843_v43 = vrot.slane %v6838_v24, 4  ;;  %v6834_v4 = vperm.slane %v6828_v34, %v8482_v56  ;;  %v7824_v56 = vld [vmem:[%s10983_s2 + $0x18] sm:$0xff] }
 0xdef   :  { %v8014_v15 = vpack.i.bf16 %v6846_v8, %v10710_v59  ;;  %6900 = vmatpush.bf16.msrb.mxu1 %v7824_v56  ;;  %v7823_v59 = vld [vmem:[%s10983_s2 + $0x10] sm:$0xff] }
 0xdf0   :  { %v6844_v23 = vsel %vm139_vm1, %v6843_v43, %v6826_v53  ;;  %v6842_v46 = vsel %vm139_vm1, %v6834_v4, %v6841_v3  ;;  %v6839_v54 = vrot.slane %v6834_v4, 4  ;;  %v11005_v43 = vld [vmem:[#allocation8_spill] sm:$0xff] }
 0xdf1   :  { %8015 = vrot.lane.b32.xlu1 %v8014_v15, %s8332_s10  ;;  %v8009_v33 = vpack.i.bf16 %v6844_v23, %v10714_v41  ;;  %v8004_v45 = vpack.i.bf16 %v6842_v46, %v6788_v62 }
 0xdf2   :  { %v6840_v52 = vsel %vm139_vm1, %v6839_v54, %v6822_v19 }
 0xdf3   :  { %8010 = vrot.lane.b32.xlu2 %v8009_v33, %s8333_s11  ;;  %8005 = vrot.lane.b32.xlu0 %v8004_v45, %s8334_s12 }
 0xdf4   :  { %6901 = vmatpush.bf16.msrb.mxu1 %v7823_v59 }
 0xe4d   :  { %v8011_v60 = vpop.permute.xlu2 %8010 }
 0xe4e   :  { %v8013_v16 = vunpack.i.h.bf16 %v8011_v60  ;;  %v8012_v47 = vunpack.i.l.bf16 %v8011_v60 }
 0xe63   :  { %v8016_v55 = vpop.permute.xlu1 %8015 }
 0xe64   :  { %v8018_v32 = vunpack.i.h.bf16 %v8016_v55  ;;  %v8017_v49 = vunpack.i.l.bf16 %v8016_v55 }
 0xe65   :  { %v8006_v41 = vpop.permute.xlu0 %8005 }
 0xe66   :  { %v8008_v2 = vunpack.i.h.bf16 %v8006_v41  ;;  %v8007_v61 = vunpack.i.l.bf16 %v8006_v41 }
 0xe68   :  { %v6871_v25 = vsel %vm1205_vm2, %v6786_v38, %v8007_v61  ;;  %v6872_v7 = vsel %vm1205_vm2, %v6840_v52, %v8008_v2 }
 0xe69   :  { %v6873_v18 = vsel %vm3135_vm6, %v6871_v25, %v8012_v47  ;;  %v6874_v10 = vsel %vm3135_vm6, %v6872_v7, %v8013_v16 }
 0xe6a   :  { %v6875_v5 = vsel %vm3138_vm7, %v6873_v18, %v8017_v49  ;;  %v6876_v0 = vsel %vm3138_vm7, %v6874_v10, %v8018_v32 }
 0xe6b   :  { %v6877_v51 = vpack.c.bf16 %v6876_v0, %v6875_v5 }
 0xe6d   :  { %7785 = vmatmul.msk.bf16.vlgmr.msrb.gmra.mxu1 %vm97_vm0, %v6877_v51 }
 0xeea   :  { %v6903_v11 = vpop.f32.mrf.mxu1 }
 0xeeb   :  { %v6904_v35 = vadd.f32 %v6903_v11, %v6878_v22 }
 0xeed   :  { %v6910_v20 = vrot.slane %v6904_v35, 2  ;;  %v6911_v42 = vrot.slane %v6904_v35, 4  ;;  %v6912_v63 = vrot.slane %v6904_v35, 6  ;;  %v6922_v40 = vadd.f32 %v6904_v35, %v9693_v9  ;;  %v7826_v35 = vld [vmem:[%s10984_s3 + $0x18] sm:$0xff] }
 0xeee   :  { %7212 = vmatpush.bf16.msrb.mxu2 %v7826_v35 }
 0xeef   :  { %v6923_v1 = vadd.f32 %v6910_v20, %v9695_v26  ;;  %v6924_v21 = vadd.f32 %v6911_v42, %v9697_v50  ;;  %v6925_v13 = vadd.f32 %v6912_v63, %v9699_v17  ;;  %6938 = vst [vmem:[#allocation1] ss:$4 sm:$0xff] %v6922_v40 }
 0xef1   :  { %6940 = vst [vmem:[#allocation1 + $0x1] ss:$4 sm:$0xff] %v6923_v1 }
 0xef2   :  { %6942 = vst [vmem:[#allocation1 + $0x2] ss:$4 sm:$0xff] %v6924_v21  ;;  %v6905_v58 = vpop.f32.mrf.mxu1 }
 0xef3   :  { %6944 = vst [vmem:[#allocation1 + $0x3] ss:$4 sm:$0xff] %v6925_v13  ;;  %v6906_v53 = vadd.f32 %v6905_v58, %v6878_v22 }
 0xef5   :  { %v6913_v6 = vrot.slane %v6906_v53, 2  ;;  %v6914_v37 = vrot.slane %v6906_v53, 4  ;;  %v6915_v19 = vrot.slane %v6906_v53, 6  ;;  %v6926_v31 = vadd.f32 %v6906_v53, %v9714_v57 }
 0xef7   :  { %v6927_v36 = vadd.f32 %v6913_v6, %v9716_v30  ;;  %v6928_v9 = vadd.f32 %v6914_v37, %v9718_v29  ;;  %v6929_v26 = vadd.f32 %v6915_v19, %v9720_v28  ;;  %6946 = vst [vmem:[#allocation1 + $0x20] ss:$4 sm:$0xff] %v6926_v31  ;;  %v11002_v30 = vld [vmem:[#allocation5_spill] sm:$0xff]  ;;  %v11003_v29 = vld [vmem:[#allocation6_spill] sm:$0xff]  ;;  %v11004_v28 = vld [vmem:[#allocation7_spill] sm:$0xff]  ;;  %v7146_v6 = vperm.slane %v10786_v14, 7 }
 0xef9   :  { %6948 = vst [vmem:[#allocation1 + $0x21] ss:$4 sm:$0xff] %v6927_v36 }
 0xefa   :  { %6950 = vst [vmem:[#allocation1 + $0x22] ss:$4 sm:$0xff] %v6928_v9  ;;  %v6953_v50 = vld.sshfl [vmem:[#allocation1] sm:$0xff pattern:$0x73625140] }
 0xefb   :  { %6952 = vst [vmem:[#allocation1 + $0x23] ss:$4 sm:$0xff] %v6929_v26  ;;  %v6957_v17 = vsel %vm97_vm0, %v6953_v50, 0.0 }
 0xefc   :  { %6958 = vadd.xlane.f32.xlu0 %v6957_v17 }
 0xf02   :  { %v6954_v24 = vld.sshfl [vmem:[#allocation1 + $0x20] sm:$0xff pattern:$0x73625140] }
 0xf03   :  { %v6960_v44 = vsel %vm97_vm0, %v6954_v24, 0.0 }
 0xf04   :  { %6961 = vadd.xlane.f32.xlu2 %v6960_v44 }
 0xf6f   :  { %v6959_v48 = vpop.xlane.xlu0 %6958 }
 0xf70   :  { %v6963_v57 = vmul.f32 %v6959_v48, %v9525_v12 }
 0xf72   :  { %v6970_v27 = vperm.slane %v6963_v57, %v11002_v30  ;;  %v6974_v34 = vperm.slane %v6963_v57, %v11003_v29  ;;  %v6978_v8 = vperm.slane %v6963_v57, %v11004_v28  ;;  %v6982_v4 = vperm.slane %v6963_v57, %v11005_v43 }
 0xf73   :  { %v7148_v57 = vrot.slane %v7146_v6, 2 }
 0xf74   :  { %v10804_v3 = vsub.f32 %v6922_v40, %v6970_v27  ;;  %v10806_v15 = vsub.f32 %v6923_v1, %v6974_v34  ;;  %v10808_v23 = vsub.f32 %v6924_v21, %v6978_v8  ;;  %v10810_v62 = vsub.f32 %v6925_v13, %v6982_v4  ;;  %v7825_v40 = vld [vmem:[%s10984_s3 + $0x10] sm:$0xff] }
 0xf75   :  { %7213 = vmatpush.bf16.msrb.mxu2 %v7825_v40  ;;  %v7130_v13 = vperm.slane %v10786_v14, 6  ;;  %v7149_v27 = vrot.slane %v7146_v6, 4 }
 0xf76   :  { %v7015_v46 = vmul.f32 %v10804_v3, %v10804_v3  ;;  %v7016_v33 = vmul.f32 %v10806_v15, %v10806_v15  ;;  %v7017_v45 = vmul.f32 %v10808_v23, %v10808_v23  ;;  %v7018_v56 = vmul.f32 %v10810_v62, %v10810_v62 }
 0xf77   :  { %v6962_v59 = vpop.xlane.xlu2 %6961 }
 0xf78   :  { %7031 = vst [vmem:[#allocation1] ss:$4 sm:$0xff] %v7015_v46  ;;  %v6964_v39 = vmul.f32 %v6962_v59, %v9525_v12 }
 0xf79   :  { %7033 = vst [vmem:[#allocation1 + $0x1] ss:$4 sm:$0xff] %v7016_v33 }
 0xf7a   :  { %7035 = vst [vmem:[#allocation1 + $0x2] ss:$4 sm:$0xff] %v7017_v45  ;;  %v6986_v54 = vperm.slane %v6964_v39, %v11002_v30  ;;  %v6990_v60 = vperm.slane %v6964_v39, %v11003_v29  ;;  %v6994_v55 = vperm.slane %v6964_v39, %v11004_v28  ;;  %v6998_v41 = vperm.slane %v6964_v39, %v11005_v43 }
 0xf7b   :  { %7037 = vst [vmem:[#allocation1 + $0x3] ss:$4 sm:$0xff] %v7018_v56  ;;  %v7150_v45 = vrot.slane %v7146_v6, 6 }
 0xf7c   :  { %v10825_v2 = vsub.f32 %v6926_v31, %v6986_v54  ;;  %v10827_v61 = vsub.f32 %v6927_v36, %v6990_v60  ;;  %v10829_v16 = vsub.f32 %v6928_v9, %v6994_v55  ;;  %v10831_v47 = vsub.f32 %v6929_v26, %v6998_v41 }
 0xf7d   :  { %v7132_v31 = vrot.slane %v7130_v13, 2  ;;  %v7133_v36 = vrot.slane %v7130_v13, 4  ;;  %v7134_v9 = vrot.slane %v7130_v13, 6 }
 0xf7e   :  { %v7019_v38 = vmul.f32 %v10825_v2, %v10825_v2  ;;  %v7020_v52 = vmul.f32 %v10827_v61, %v10827_v61  ;;  %v7021_v32 = vmul.f32 %v10829_v16, %v10829_v16  ;;  %v7022_v49 = vmul.f32 %v10831_v47, %v10831_v47 }
 0xf80   :  { %7039 = vst [vmem:[#allocation1 + $0x20] ss:$4 sm:$0xff] %v7019_v38 }
 0xf81   :  { %7041 = vst [vmem:[#allocation1 + $0x21] ss:$4 sm:$0xff] %v7020_v52 }
 0xf82   :  { %7043 = vst [vmem:[#allocation1 + $0x22] ss:$4 sm:$0xff] %v7021_v32  ;;  %v7046_v25 = vld.sshfl [vmem:[#allocation1] sm:$0xff pattern:$0x73625140] }
 0xf83   :  { %7045 = vst [vmem:[#allocation1 + $0x23] ss:$4 sm:$0xff] %v7022_v49  ;;  %v7050_v7 = vsel %vm97_vm0, %v7046_v25, 0.0 }
 0xf84   :  { %7051 = vadd.xlane.f32.xlu1 %v7050_v7 }
 0xf8a   :  { %v7047_v18 = vld.sshfl [vmem:[#allocation1 + $0x20] sm:$0xff pattern:$0x73625140] }
 0xf8b   :  { %v7053_v10 = vsel %vm97_vm0, %v7047_v18, 0.0 }
 0xf8c   :  { %7054 = vadd.xlane.f32.xlu0 %v7053_v10 }
 0xff7   :  { %v7052_v5 = vpop.xlane.xlu1 %7051 }
 0xff8   :  { %v7056_v0 = vmul.f32 %v7052_v5, %v9525_v12 }
 0xffa   :  { %v7058_v51 = vadd.f32 1e-05, %v7056_v0 }
 0xffc   :  { %8286 = vrsqrt.f32 %v7058_v51  ;;  %vm7066_vm2 = vweird.f32 %v7058_v51 }
 0xfff   :  { %v7055_v22 = vpop.xlane.xlu0 %7054 }
0x1000   :  { %v7057_v11 = vmul.f32 %v7055_v22, %v9525_v12 }
0x1002   :  { %v8287_v20 = vpop.eup %8286  ;;  %v7059_v42 = vadd.f32 1e-05, %v7057_v11 }
0x1003   :  { %v7061_v63 = vmul.f32 %v8287_v20, %v7058_v51  ;;  %vm7067_vm1 = vweird.f32 %v8287_v20 }
0x1004   :  { %8288 = vrsqrt.f32 %v7059_v42  ;;  %vm7068_vm3 = vmor %vm7066_vm2, %vm7067_vm1  ;;  %vm7076_vm5 = vweird.f32 %v7059_v42 }
0x1005   :  { %v7062_v1 = vmul.f32 %v8287_v20, %v7061_v63 }
0x1007   :  { %v7063_v21 = vmul.f32 0.5, %v7062_v1  ;;  %v7190_v1 = vperm.slane %v10786_v14, 4 }
0x1009   :  { %v7064_v58 = vsub.f32 1.5, %v7063_v21 }
0x100a   :  { %v8289_v53 = vpop.eup %8288 }
0x100b   :  { %v7065_v37 = vmul.f32 %v8287_v20, %v7064_v58  ;;  %v7071_v19 = vmul.f32 %v8289_v53, %v7059_v42  ;;  %vm7077_vm4 = vweird.f32 %v8289_v53 }
0x100c   :  { %vm7078_vm6 = vmor %vm7076_vm5, %vm7077_vm4 }
0x100d   :  { %v7069_v26 = vsel %vm7068_vm3, %v8287_v20, %v7065_v37  ;;  %v7072_v50 = vmul.f32 %v8289_v53, %v7071_v19  ;;  %v7223_v19 = vperm.slane %v10786_v14, 5 }
0x100e   :  { %v7085_v17 = vperm.slane %v7069_v26, %v11002_v30  ;;  %v7089_v24 = vperm.slane %v7069_v26, %v11003_v29  ;;  %v7093_v44 = vperm.slane %v7069_v26, %v11004_v28  ;;  %v7097_v48 = vperm.slane %v7069_v26, %v11005_v43 }
0x100f   :  { %v7073_v34 = vmul.f32 0.5, %v7072_v50 }
0x1010   :  { %v7122_v8 = vmul.f32 %v7085_v17, %v10804_v3  ;;  %v7123_v4 = vmul.f32 %v7089_v24, %v10806_v15  ;;  %v7124_v46 = vmul.f32 %v7093_v44, %v10808_v23  ;;  %v7125_v33 = vmul.f32 %v7097_v48, %v10810_v62 }
0x1011   :  { %v7074_v56 = vsub.f32 1.5, %v7073_v34 }
0x1012   :  { %v7138_v59 = vmul.f32 %v7130_v13, %v7122_v8  ;;  %v7139_v39 = vmul.f32 %v7132_v31, %v7123_v4  ;;  %v7140_v54 = vmul.f32 %v7133_v36, %v7124_v46  ;;  %v7141_v60 = vmul.f32 %v7134_v9, %v7125_v33 }
0x1013   :  { %v7075_v55 = vmul.f32 %v8289_v53, %v7074_v56 }
0x1014   :  { %v7154_v41 = vadd.f32 %v7146_v6, %v7138_v59  ;;  %v7155_v38 = vadd.f32 %v7148_v57, %v7139_v39  ;;  %v7156_v52 = vadd.f32 %v7149_v27, %v7140_v54  ;;  %v7157_v3 = vadd.f32 %v7150_v45, %v7141_v60 }
0x1015   :  { %v7079_v32 = vsel %vm7078_vm6, %v8289_v53, %v7075_v55 }
0x1016   :  { %7170 = vst [vmem:[#allocation1] ss:$4 sm:$0xff] %v7154_v41  ;;  %v7101_v15 = vperm.slane %v7079_v32, %v11002_v30  ;;  %v7105_v23 = vperm.slane %v7079_v32, %v11003_v29  ;;  %v7109_v62 = vperm.slane %v7079_v32, %v11004_v28  ;;  %v7113_v49 = vperm.slane %v7079_v32, %v11005_v43 }
0x1017   :  { %7172 = vst [vmem:[#allocation1 + $0x1] ss:$4 sm:$0xff] %v7155_v38 }
0x1018   :  { %7174 = vst [vmem:[#allocation1 + $0x2] ss:$4 sm:$0xff] %v7156_v52  ;;  %v7126_v25 = vmul.f32 %v7101_v15, %v10825_v2  ;;  %v7127_v7 = vmul.f32 %v7105_v23, %v10827_v61  ;;  %v7128_v18 = vmul.f32 %v7109_v62, %v10829_v16  ;;  %v7129_v10 = vmul.f32 %v7113_v49, %v10831_v47  ;;  %v7828_v16 = vld [vmem:[%s10985_s4 + $0x18] sm:$0xff]  ;;  %v7827_v47 = vld [vmem:[%s10985_s4 + $0x10] sm:$0xff] }
0x1019   :  { %7176 = vst [vmem:[#allocation1 + $0x3] ss:$4 sm:$0xff] %v7157_v3  ;;  %7245 = vmatpush.bf16.msrb.mxu3 %v7828_v16 }
0x101a   :  { %v7142_v5 = vmul.f32 %v7130_v13, %v7126_v25  ;;  %v7143_v0 = vmul.f32 %v7132_v31, %v7127_v7  ;;  %v7144_v51 = vmul.f32 %v7133_v36, %v7128_v18  ;;  %v7145_v22 = vmul.f32 %v7134_v9, %v7129_v10 }
0x101c   :  { %v7158_v11 = vadd.f32 %v7146_v6, %v7142_v5  ;;  %v7159_v35 = vadd.f32 %v7148_v57, %v7143_v0  ;;  %v7160_v20 = vadd.f32 %v7149_v27, %v7144_v51  ;;  %v7161_v42 = vadd.f32 %v7150_v45, %v7145_v22 }
0x101d   :  { %7246 = vmatpush.bf16.msrb.mxu3 %v7827_v47 }
0x101e   :  { %7178 = vst [vmem:[#allocation1 + $0x20] ss:$4 sm:$0xff] %v7158_v11 }
0x101f   :  { %7180 = vst [vmem:[#allocation1 + $0x21] ss:$4 sm:$0xff] %v7159_v35 }
0x1020   :  { %7182 = vst [vmem:[#allocation1 + $0x22] ss:$4 sm:$0xff] %v7160_v20  ;;  %v7185_v2 = vld.sshfl [vmem:[#allocation1] sm:$0xff pattern:$0x73625140] }
0x1021   :  { %7184 = vst [vmem:[#allocation1 + $0x23] ss:$4 sm:$0xff] %v7161_v42 }
0x1028   :  { %v7186_v63 = vld.sshfl [vmem:[#allocation1 + $0x20] sm:$0xff pattern:$0x73625140] }
0x1029   :  { %v7189_v61 = vpack.c.bf16 %v7186_v63, %v7185_v2 }
0x102b   :  { %7794 = vmatmul.msk.bf16.vlgmr.msrb.gmra.mxu2 %vm97_vm0, %v7189_v61 }
0x10ae   :  { %v7215_v40 = vpop.f32.mrf.mxu2 }
0x10af   :  { %v7216_v21 = vadd.f32 %v7215_v40, %v7190_v1 }
0x10b1   :  { %v7220_v53 = vmax.f32 %v7216_v21, 0.0 }
0x10b6   :  { %v7217_v13 = vpop.f32.mrf.mxu2 }
0x10b7   :  { %v7218_v58 = vadd.f32 %v7217_v13, %v7190_v1 }
0x10b9   :  { %v7221_v6 = vmax.f32 %v7218_v58, 0.0 }
0x10bb   :  { %v7222_v37 = vpack.c.bf16 %v7221_v6, %v7220_v53 }
0x10bd   :  { %7803 = vmatmul.msk.bf16.vlgmr.msrb.gmra.mxu3 %vm97_vm0, %v7222_v37 }
0x1140   :  { %v7248_v31 = vpop.f32.mrf.mxu3 }
0x1141   :  { %v7249_v36 = vadd.f32 %v7248_v31, %v7223_v19 }
0x1143   :  { %v7255_v9 = vrot.slane %v7249_v36, 2  ;;  %v7256_v26 = vrot.slane %v7249_v36, 4  ;;  %v7257_v50 = vrot.slane %v7249_v36, 6  ;;  %v7267_v17 = vadd.f32 %v7249_v36, %v7154_v41 }
0x1145   :  { %v7268_v24 = vadd.f32 %v7255_v9, %v7155_v38  ;;  %v7269_v44 = vadd.f32 %v7256_v26, %v7156_v52  ;;  %v7270_v48 = vadd.f32 %v7257_v50, %v7157_v3  ;;  %7283 = vst [vmem:[#allocation1] ss:$4 sm:$0xff] %v7267_v17  ;;  %v7830_v26 = vld [vmem:[%s10987_s6 + $0x8] sm:$0xff] }
0x1146   :  { %7561 = vmatpush.bf16.msra.mxu0 %v7830_v26 }
0x1147   :  { %7285 = vst [vmem:[#allocation1 + $0x1] ss:$4 sm:$0xff] %v7268_v24 }
0x1148   :  { %7287 = vst [vmem:[#allocation1 + $0x2] ss:$4 sm:$0xff] %v7269_v44  ;;  %v7250_v57 = vpop.f32.mrf.mxu3 }
0x1149   :  { %7289 = vst [vmem:[#allocation1 + $0x3] ss:$4 sm:$0xff] %v7270_v48  ;;  %v7251_v27 = vadd.f32 %v7250_v57, %v7223_v19 }
0x114b   :  { %v7258_v34 = vrot.slane %v7251_v27, 2  ;;  %v7259_v8 = vrot.slane %v7251_v27, 4  ;;  %v7260_v4 = vrot.slane %v7251_v27, 6  ;;  %v7271_v46 = vadd.f32 %v7251_v27, %v7158_v11 }
0x114d   :  { %v7272_v14 = vadd.f32 %v7258_v34, %v7159_v35  ;;  %v7273_v33 = vadd.f32 %v7259_v8, %v7160_v20  ;;  %v7274_v45 = vadd.f32 %v7260_v4, %v7161_v42  ;;  %7291 = vst [vmem:[#allocation1 + $0x20] ss:$4 sm:$0xff] %v7271_v46  ;;  %v8340_v4 = vmov 8.0  }
0x114f   :  { %7293 = vst [vmem:[#allocation1 + $0x21] ss:$4 sm:$0xff] %v7272_v14 }
0x1150   :  { %7295 = vst [vmem:[#allocation1 + $0x22] ss:$4 sm:$0xff] %v7273_v33  ;;  %v7298_v56 = vld.sshfl [vmem:[#allocation1] sm:$0xff pattern:$0x73625140] }
0x1151   :  { %7297 = vst [vmem:[#allocation1 + $0x23] ss:$4 sm:$0xff] %v7274_v45  ;;  %v7302_v59 = vsel %vm97_vm0, %v7298_v56, 0.0 }
0x1152   :  { %7303 = vadd.xlane.f32.xlu2 %v7302_v59 }
0x1158   :  { %v7299_v39 = vld.sshfl [vmem:[#allocation1 + $0x20] sm:$0xff pattern:$0x73625140] }
0x1159   :  { %v7305_v54 = vsel %vm97_vm0, %v7299_v39, 0.0 }
0x115a   :  { %7306 = vadd.xlane.f32.xlu0 %v7305_v54 }
0x11c5   :  { %v7304_v60 = vpop.xlane.xlu2 %7303 }
0x11c6   :  { %v7308_v55 = vmul.f32 %v7304_v60, %v9525_v12 }
0x11c8   :  { %v7315_v41 = vperm.slane %v7308_v55, %v11002_v30  ;;  %v7319_v38 = vperm.slane %v7308_v55, %v11003_v29  ;;  %v7323_v52 = vperm.slane %v7308_v55, %v11004_v28  ;;  %v7327_v3 = vperm.slane %v7308_v55, %v11005_v43 }
0x11ca   :  { %v10886_v32 = vsub.f32 %v7267_v17, %v7315_v41  ;;  %v10888_v15 = vsub.f32 %v7268_v24, %v7319_v38  ;;  %v10890_v23 = vsub.f32 %v7269_v44, %v7323_v52  ;;  %v10892_v62 = vsub.f32 %v7270_v48, %v7327_v3  ;;  %v7703_v17 = vld [vmem:[%s10986_s5 + $0x18] sm:$0x3]  ;;  %v7829_v24 = vld [vmem:[%s10987_s6] sm:$0xff] }
0x11cb   :  { %v10938_v27 = vperm.slane %v7703_v17, 1  ;;  %7562 = vmatpush.bf16.msra.mxu0 %v7829_v24 }
0x11cc   :  { %v7360_v49 = vmul.f32 %v10886_v32, %v10886_v32  ;;  %v7361_v25 = vmul.f32 %v10888_v15, %v10888_v15  ;;  %v7362_v7 = vmul.f32 %v10890_v23, %v10890_v23  ;;  %v7363_v18 = vmul.f32 %v10892_v62, %v10892_v62 }
0x11cd   :  { %v7307_v10 = vpop.xlane.xlu0 %7306  ;;  %v7493_v55 = vrot.slane %v10938_v27, 2 }
0x11ce   :  { %7376 = vst [vmem:[#allocation1] ss:$4 sm:$0xff] %v7360_v49  ;;  %v7309_v5 = vmul.f32 %v7307_v10, %v9525_v12 }
0x11cf   :  { %7378 = vst [vmem:[#allocation1 + $0x1] ss:$4 sm:$0xff] %v7361_v25 }
0x11d0   :  { %7380 = vst [vmem:[#allocation1 + $0x2] ss:$4 sm:$0xff] %v7362_v7  ;;  %v7331_v0 = vperm.slane %v7309_v5, %v11002_v30  ;;  %v7335_v51 = vperm.slane %v7309_v5, %v11003_v29  ;;  %v7339_v22 = vperm.slane %v7309_v5, %v11004_v28  ;;  %v7343_v11 = vperm.slane %v7309_v5, %v11005_v43 }
0x11d1   :  { %7382 = vst [vmem:[#allocation1 + $0x3] ss:$4 sm:$0xff] %v7363_v18  ;;  %v7494_v7 = vrot.slane %v10938_v27, 4 }
0x11d2   :  { %v10907_v35 = vsub.f32 %v7271_v46, %v7331_v0  ;;  %v10909_v20 = vsub.f32 %v7272_v14, %v7335_v51  ;;  %v10911_v42 = vsub.f32 %v7273_v33, %v7339_v22  ;;  %v10913_v2 = vsub.f32 %v7274_v45, %v7343_v11 }
0x11d3   :  { %v7495_v51 = vrot.slane %v10938_v27, 6 }
0x11d4   :  { %v7364_v63 = vmul.f32 %v10907_v35, %v10907_v35  ;;  %v7365_v61 = vmul.f32 %v10909_v20, %v10909_v20  ;;  %v7366_v16 = vmul.f32 %v10911_v42, %v10911_v42  ;;  %v7367_v47 = vmul.f32 %v10913_v2, %v10913_v2 }
0x11d6   :  { %7384 = vst [vmem:[#allocation1 + $0x20] ss:$4 sm:$0xff] %v7364_v63 }
0x11d7   :  { %7386 = vst [vmem:[#allocation1 + $0x21] ss:$4 sm:$0xff] %v7365_v61 }
0x11d8   :  { %7388 = vst [vmem:[#allocation1 + $0x22] ss:$4 sm:$0xff] %v7366_v16  ;;  %v7391_v40 = vld.sshfl [vmem:[#allocation1] sm:$0xff pattern:$0x73625140] }
0x11d9   :  { %7390 = vst [vmem:[#allocation1 + $0x23] ss:$4 sm:$0xff] %v7367_v47  ;;  %v7395_v1 = vsel %vm97_vm0, %v7391_v40, 0.0 }
0x11da   :  { %7396 = vadd.xlane.f32.xlu1 %v7395_v1 }
0x11e0   :  { %v7392_v21 = vld.sshfl [vmem:[#allocation1 + $0x20] sm:$0xff pattern:$0x73625140] }
0x11e1   :  { %v7398_v13 = vsel %vm97_vm0, %v7392_v21, 0.0 }
0x11e2   :  { %7399 = vadd.xlane.f32.xlu2 %v7398_v13 }
0x124d   :  { %v7397_v58 = vpop.xlane.xlu1 %7396 }
0x124e   :  { %v7401_v53 = vmul.f32 %v7397_v58, %v9525_v12 }
0x1250   :  { %v7403_v6 = vadd.f32 1e-05, %v7401_v53 }
0x1252   :  { %8290 = vrsqrt.f32 %v7403_v6  ;;  %vm7411_vm13 = vweird.f32 %v7403_v6 }
0x1255   :  { %v7400_v37 = vpop.xlane.xlu2 %7399 }
0x1256   :  { %v7402_v19 = vmul.f32 %v7400_v37, %v9525_v12  ;;  %v10936_v12 = vperm.slane %v7703_v17, 0 }
0x1258   :  { %v8291_v31 = vpop.eup %8290  ;;  %v7404_v36 = vadd.f32 1e-05, %v7402_v19  ;;  %v7477_v46 = vrot.slane %v10936_v12, 2  ;;  %v7478_v14 = vrot.slane %v10936_v12, 4  ;;  %v7479_v60 = vrot.slane %v10936_v12, 6 }
0x1259   :  { %v7406_v9 = vmul.f32 %v8291_v31, %v7403_v6  ;;  %vm7412_vm7 = vweird.f32 %v8291_v31 }
0x125a   :  { %8292 = vrsqrt.f32 %v7404_v36  ;;  %vm7413_vm14 = vmor %vm7411_vm13, %vm7412_vm7  ;;  %vm7421_vm9 = vweird.f32 %v7404_v36 }
0x125b   :  { %v7407_v50 = vmul.f32 %v8291_v31, %v7406_v9  ;;  %8294 = vrcp.f32 %v8340_v4 }
0x125d   :  { %v7408_v44 = vmul.f32 0.5, %v7407_v50 }
0x125f   :  { %v7409_v48 = vsub.f32 1.5, %v7408_v44 }
0x1260   :  { %v8293_v57 = vpop.eup %8292 }
0x1261   :  { %v7410_v34 = vmul.f32 %v8291_v31, %v7409_v48  ;;  %v7416_v8 = vmul.f32 %v8293_v57, %v7404_v36  ;;  %v8295_v25 = vpop.eup %8294  ;;  %vm7422_vm15 = vweird.f32 %v8293_v57 }
0x1262   :  { %vm7423_vm10 = vmor %vm7421_vm9, %vm7422_vm15  ;;  %vm7528_vm11 = vweird.f32 %v8295_v25 }
0x1263   :  { %v7414_v33 = vsel %vm7413_vm14, %v8291_v31, %v7410_v34  ;;  %v7417_v45 = vmul.f32 %v8293_v57, %v7416_v8 }
0x1264   :  { %v7430_v56 = vperm.slane %v7414_v33, %v11002_v30  ;;  %v7434_v59 = vperm.slane %v7414_v33, %v11003_v29  ;;  %v7438_v39 = vperm.slane %v7414_v33, %v11004_v28  ;;  %v7442_v54 = vperm.slane %v7414_v33, %v11005_v43 }
0x1265   :  { %v7418_v41 = vmul.f32 0.5, %v7417_v45  ;;  %v8019_v45 = vld [vmem:[%s10988_s7] ss:$0 sm:$0xff] }
0x1266   :  { %v7467_v38 = vmul.f32 %v7430_v56, %v10886_v32  ;;  %v7468_v52 = vmul.f32 %v7434_v59, %v10888_v15  ;;  %v7469_v3 = vmul.f32 %v7438_v39, %v10890_v23  ;;  %v7470_v49 = vmul.f32 %v7442_v54, %v10892_v62 }
0x1267   :  { %v7419_v18 = vsub.f32 1.5, %v7418_v41  ;;  %v7524_v62 = vmul.f32 8.0, %v8295_v25 }
0x1268   :  { %v7483_v10 = vmul.f32 %v10936_v12, %v7467_v38  ;;  %v7484_v5 = vmul.f32 %v7477_v46, %v7468_v52  ;;  %v7485_v0 = vmul.f32 %v7478_v14, %v7469_v3  ;;  %v7486_v32 = vmul.f32 %v7479_v60, %v7470_v49 }
0x1269   :  { %v7420_v22 = vmul.f32 %v8293_v57, %v7419_v18  ;;  %v7525_v53 = vsub.f32 1.0, %v7524_v62 }
0x126a   :  { %v7499_v15 = vadd.f32 %v10938_v27, %v7483_v10  ;;  %v7500_v23 = vadd.f32 %v7493_v55, %v7484_v5  ;;  %v7501_v11 = vadd.f32 %v7494_v7, %v7485_v0  ;;  %v7502_v13 = vadd.f32 %v7495_v51, %v7486_v32 }
0x126b   :  { %v7424_v63 = vsel %vm7423_vm10, %v8293_v57, %v7420_v22 }
0x126c   :  { %v7508_v61 = vsel %vm7507_vm8, %v7499_v15, 0.0  ;;  %v7509_v16 = vsel %vm7507_vm8, %v7500_v23, 0.0  ;;  %v7446_v40 = vperm.slane %v7424_v63, %v11002_v30  ;;  %v7450_v1 = vperm.slane %v7424_v63, %v11003_v29 }
0x126d   :  { %v7510_v47 = vadd.f32 %v7509_v16, %v7508_v61  ;;  %v7454_v21 = vperm.slane %v7424_v63, %v11004_v28  ;;  %v7458_v58 = vperm.slane %v7424_v63, %v11005_v43  ;;  %v7511_v6 = vsel %vm7507_vm8, %v7501_v11, 0.0 }
0x126e   :  { %v7471_v37 = vmul.f32 %v7446_v40, %v10907_v35  ;;  %v7472_v19 = vmul.f32 %v7450_v1, %v10909_v20  ;;  %v7526_v28 = vmul.f32 %v8295_v25, %v7525_v53  ;;  %v7513_v50 = vsel %vm7507_vm8, %v7502_v13, 0.0 }
0x126f   :  { %v7473_v31 = vmul.f32 %v7454_v21, %v10911_v42  ;;  %v7512_v36 = vadd.f32 %v7511_v6, %v7510_v47  ;;  %v7474_v9 = vmul.f32 %v7458_v58, %v10913_v2 }
0x1270   :  { %v7487_v30 = vmul.f32 %v10936_v12, %v7471_v37  ;;  %v7488_v29 = vmul.f32 %v7477_v46, %v7472_v19  ;;  %v7527_v2 = vadd.f32 %v8295_v25, %v7526_v28 }
0x1271   :  { %v7489_v26 = vmul.f32 %v7478_v14, %v7473_v31  ;;  %v7490_v43 = vmul.f32 %v7479_v60, %v7474_v9  ;;  %v7514_v44 = vadd.f32 %v7513_v50, %v7512_v36 }
0x1272   :  { %v7503_v17 = vadd.f32 %v10938_v27, %v7487_v30  ;;  %v7504_v24 = vadd.f32 %v7493_v55, %v7488_v29  ;;  %v7529_v46 = vsel %vm7528_vm11, %v8295_v25, %v7527_v2 }
0x1273   :  { %v7505_v35 = vadd.f32 %v7494_v7, %v7489_v26  ;;  %v7506_v42 = vadd.f32 %v7495_v51, %v7490_v43 }
0x1274   :  { %v7515_v20 = vsel %vm7507_vm8, %v7503_v17, 0.0  ;;  %v7517_v57 = vsel %vm7507_vm8, %v7504_v24, 0.0 }
0x1275   :  { %v7516_v48 = vadd.f32 %v7515_v20, %v7514_v44  ;;  %v7519_v12 = vsel %vm7507_vm8, %v7505_v35, 0.0  ;;  %v7521_v4 = vsel %vm7507_vm8, %v7506_v42, 0.0 }
0x1277   :  { %v7518_v34 = vadd.f32 %v7517_v57, %v7516_v48 }
0x1279   :  { %v7520_v8 = vadd.f32 %v7519_v12, %v7518_v34 }
0x127b   :  { %v7522_v14 = vadd.f32 %v7521_v4, %v7520_v8 }
0x127d   :  { %v7530_v27 = vmul.f32 %v7529_v46, %v7522_v14 }
0x127f   :  { %v7531_v33 = vpack.c.bf16 %v7530_v27, %v7530_v27 }
0x1281   :  { %7812 = vmatmul.msk.bf16.vlgmr.msra.gmra.mxu0 %vm97_vm0, %v7531_v33 }
0x12fe   :  { %v7564_v56 = vpop.f32.mrf.mxu0 }
0x12ff   :  { %v7565_v59 = vadd.f32 %v8019_v45, %v7564_v56 }
0x1301   :  { %7569 = vst.msk [vmem:[#allocation2] sm:$0x3] %vm7568_vm12, %v7565_v59 }
0x1302   :  { %7580 = dma.vmem_to_hbm [thread:$0]  %s7576_s15, 32, %s7578_s18, [#allocation3]  }
0x1306   :  { %v7566_v39 = vpop.f32.mrf.mxu0 }
0x1307   :  { %8322 = dma.done.wait [#allocation3], 32  }
0x1308   :  { %8323 = vsyncadd [#allocation3], 4294967264 }
0x1309   :  { %7585 = vsyncpa [#allocation3], 1 }

</bundles_post_ra>
